<compile_context>
chip_gen: v7x
topology: tpu7x:2x2x1
jax: 0.10.0
libtpu: 0.0.40
codegen_flags: <defaults>
</compile_context>

<pallas_src>
import functools

import jax
import jax.numpy as jnp
from jax.experimental import pallas as pl
from jax.experimental.pallas import tpu as pltpu

EPS = 1e-5                       # torch.nn.InstanceNorm2d default eps
_VMEM_LIMIT = 32 * 1024 * 1024   # explicit scoped-VMEM budget (v5e/v6e/v7x safe)


# ------------------------------ geometry ----------------------------------- #

def _geom(h, w):
    """Flat-slab geometry for a 3x3 / pad=1 conv on an (h, w) image."""
    row = w + 2                    # padded row stride
    out_len = h * row              # conv output rows (2 junk cols per image row)
    slab_len = (h + 2) * row + 2   # padded slab (+2 slack rows for tap slices)
    dst_off = row + 1              # where valid output lands in the next slab
    return row, out_len, slab_len, dst_off


# ----------------------------- kernel helpers ------------------------------- #

def _conv_taps(slab_ref, w_ref, offsets, out_len):
    """3x3 'valid' conv on a flat slab ref (slab_len, Cin): 9 shifted sublane
    slices, each a (out_len, Cin) @ (Cin, Cout) bf16 matmul accumulated f32."""
    cout = w_ref.shape[-1]
    acc = jnp.zeros((out_len, cout), jnp.float32)
    for t, off in enumerate(offsets):
        acc = acc + jnp.dot(slab_ref[pl.ds(off, out_len), :], w_ref[t],
                            preferred_element_type=jnp.float32)
    return acc


def _masked_inorm_relu(acc, mask, gamma, beta, inv_hw):
    """InstanceNorm2d(affine, biased var) + ReLU over valid rows, all in f32."""
    mean = jnp.sum(acc * mask, axis=0, keepdims=True) * inv_hw
    cen = acc - mean
    var = jnp.sum(cen * cen * mask, axis=0, keepdims=True) * inv_hw
    y = cen * jax.lax.rsqrt(var + EPS) * gamma + beta
    return jnp.maximum(y, 0.0)


# ------------------------------ fused kernel -------------------------------- #

def up_fused_kernel(x_ref, e_ref, wup_ref, bup_ref, w1a_ref, w1b_ref, w2_ref,
                    g_ref, bt_ref, m_ref, o_ref, y1_s, y2_s, *,
                    offsets, out_len, dst_off, inv_hw):
    mask = m_ref[...]
    gamma = g_ref[...]
    beta = bt_ref[...]

    # Scratch slabs double as the next stage's zero-padded input layout.
    # Re-zero every step (cheap VMEM stores) so pad rows are always 0 even if
    # the "parallel" batch axis is split across TensorCores.
    y1_s[...] = jnp.zeros(y1_s.shape, y1_s.dtype)
    y2_s[...] = jnp.zeros(y2_s.shape, y2_s.dtype)

    # stage 1: Conv2d(in, in//2, 3, pad=1, bias=True) on the upsampled slab
    acc = _conv_taps(x_ref, wup_ref, offsets, out_len)
    y1 = (acc + bup_ref[...]) * mask                  # zero junk cols -> pad
    y1_s[pl.ds(dst_off, out_len), :] = y1.astype(y1_s.dtype)

    # stage 2: conv1(cat[up(x), crop(enc)]) + InstanceNorm + ReLU
    #          (concat never materialized: w1 split along input channels)
    acc = _conv_taps(y1_s, w1a_ref, offsets, out_len)
    acc = acc + _conv_taps(e_ref, w1b_ref, offsets, out_len)
    y2 = _masked_inorm_relu(acc, mask, gamma, beta, inv_hw)
    y2_s[pl.ds(dst_off, out_len), :] = (y2 * mask).astype(y2_s.dtype)

    # stage 3: conv2 + InstanceNorm + ReLU
    acc = _conv_taps(y2_s, w2_ref, offsets, out_len)
    y3 = _masked_inorm_relu(acc, mask, gamma, beta, inv_hw)
    o_ref[...] = y3.astype(o_ref.dtype)


# ------------------------------- JAX glue ----------------------------------- #

def _batched_spec(shape):
    nd = len(shape)
    return pl.BlockSpec((None,) + tuple(shape[1:]),
                        lambda b, nd=nd: (b,) + (0,) * (nd - 1))


def _shared_spec(shape):
    nd = len(shape)
    return pl.BlockSpec(tuple(shape), lambda b, nd=nd: (0,) * nd)


def _interp_matrix_padded(n_in, n_out):
    """x2 bilinear (align_corners=True) interp matrix with the 3x3-conv zero
    padding baked in as zero first/last rows: shape (n_out + 2, n_in)."""
    idx = jnp.arange(n_out, dtype=jnp.float32)
    src = idx * (n_in - 1) / (n_out - 1)
    lo = jnp.clip(jnp.floor(src).astype(jnp.int32), 0, n_in - 2)
    frac = src - lo.astype(jnp.float32)
    rows = jnp.arange(n_out) + 1
    a = jnp.zeros((n_out + 2, n_in), jnp.float32)
    a = a.at[rows, lo].add(1.0 - frac)
    a = a.at[rows, lo + 1].add(frac)
    return a


def _upsample_pad(x_nhwc):
    """(N,H,W,C) -> (N,2H+2,2W+2,C): bilinear x2 upsample with the conv zero
    padding fused into the interp matrices (single XLA pass)."""
    _, h, w, _ = x_nhwc.shape
    ah = _interp_matrix_padded(h, 2 * h)
    aw = _interp_matrix_padded(w, 2 * w)
    hi = jax.lax.Precision.HIGHEST
    y = jnp.einsum("ph,nhwc->npwc", ah, x_nhwc, precision=hi)
    return jnp.einsum("qw,npwc->npqc", aw, y, precision=hi)


def _to_slab(x_pad_nhwc, slab_len, dtype):
    """(N,H+2,W+2,C) padded image -> flat slab (N, slab_len, C) in `dtype`."""
    n, hp2, wp2, c = x_pad_nhwc.shape
    flat = x_pad_nhwc.reshape(n, hp2 * wp2, c)
    flat = jnp.pad(flat, ((0, 0), (0, slab_len - hp2 * wp2), (0, 0)))
    return flat.astype(dtype)


def _center_crop(e_nhwc, h, w):
    top = int(round((e_nhwc.shape[1] - h) / 2.0))
    left = int(round((e_nhwc.shape[2] - w) / 2.0))
    return e_nhwc[:, top:top + h, left:left + w, :]


# ------------------------------- Up.forward --------------------------------- #

def up_forward(x_nchw, enc_nchw, p, *, compute_dtype=jnp.bfloat16):
    n, c_in, h, w = x_nchw.shape
    hp, wp = 2 * h, 2 * w
    half = c_in // 2
    c_out = p["w1"].shape[-1]
    row, out_len, slab_len, dst_off = _geom(hp, wp)
    offsets = tuple(ky * row + kx for ky in range(3) for kx in range(3))
    inv_hw = 1.0 / float(hp * wp)

    x = jnp.transpose(x_nchw, (0, 2, 3, 1)).astype(jnp.float32)       # NHWC
    enc = jnp.transpose(enc_nchw, (0, 2, 3, 1)).astype(jnp.float32)   # NHWC

    # up path: bilinear x2 (+ fused zero pad) -> bf16 flat slab (one HBM pass)
    x_slab = _to_slab(_upsample_pad(x), slab_len, compute_dtype)

    # skip path: center-crop, re-pad for the conv, flatten
    enc = _center_crop(enc, hp, wp)
    enc_slab = _to_slab(jnp.pad(enc, ((0, 0), (1, 1), (1, 1), (0, 0))),
                        slab_len, compute_dtype)

    # 0/1 mask of the valid (non-junk) rows of each flat conv output
    mask = ((jnp.arange(out_len) % row) < wp).astype(jnp.float32)
    mask = mask.reshape(out_len, 1)

    w_up = p["w_up"].reshape(9, c_in, half).astype(compute_dtype)
    w1 = p["w1"].reshape(9, c_in, c_out)
    w1a = w1[:, :half, :].astype(compute_dtype)   # taps hitting up(x)
    w1b = w1[:, half:, :].astype(compute_dtype)   # taps hitting crop(enc)
    w2 = p["w2"].reshape(9, c_out, c_out).astype(compute_dtype)
    b_up = p["b_up"].astype(jnp.float32)
    gamma = p["gamma"].astype(jnp.float32)
    beta = p["beta"].astype(jnp.float32)

    kernel = functools.partial(up_fused_kernel, offsets=offsets,
                               out_len=out_len, dst_off=dst_off, inv_hw=inv_hw)

    batched = [x_slab, enc_slab]
    shared = [w_up, b_up, w1a, w1b, w2, gamma, beta, mask]
    in_specs = [_batched_spec(a.shape) for a in batched] + \
               [_shared_spec(a.shape) for a in shared]

    y3 = pl.pallas_call(
        kernel,
        out_shape=jax.ShapeDtypeStruct((n, out_len, c_out), jnp.float32),
        grid=(n,),
        in_specs=in_specs,
        out_specs=pl.BlockSpec((None, out_len, c_out), lambda b: (b, 0, 0)),
        scratch_shapes=[pltpu.VMEM((slab_len, half), compute_dtype),
                        pltpu.VMEM((slab_len, c_out), compute_dtype)],
        compiler_params=pltpu.CompilerParams(
            dimension_semantics=("parallel",),
            vmem_limit_bytes=_VMEM_LIMIT),
    )(*batched, *shared)

    out = y3.reshape(n, hp, row, c_out)[:, :, :wp, :]
    return jnp.transpose(out, (0, 3, 1, 2))                           # NCHW


# ------------------------ pure-JAX reference (check) ------------------------ #

def _q(x, dtype):
    """Round-trip through the kernel's storage dtype (math stays in f32)."""
    return x.astype(dtype).astype(jnp.float32)


def up_forward_ref(x_nchw, enc_nchw, p, *, compute_dtype=jnp.bfloat16):
    """lax.conv reference mirroring the kernel path's bf16 storage points."""
    x = jnp.transpose(x_nchw, (0, 2, 3, 1)).astype(jnp.float32)
    enc = jnp.transpose(enc_nchw, (0, 2, 3, 1)).astype(jnp.float32)
    hp, wp = 2 * x.shape[1], 2 * x.shape[2]

    def conv(z, wgt, pad):
        return jax.lax.conv_general_dilated(
            _q(z, compute_dtype), _q(wgt, compute_dtype), (1, 1), pad,
            dimension_numbers=("NHWC", "HWIO", "NHWC"),
            preferred_element_type=jnp.float32)

    def inorm_relu(z):
        m = jnp.mean(z, axis=(1, 2), keepdims=True)
        v = jnp.mean((z - m) ** 2, axis=(1, 2), keepdims=True)
        y = (z - m) * jax.lax.rsqrt(v + EPS) * p["gamma"].reshape(1, 1, 1, -1) \
            + p["beta"].reshape(1, 1, 1, -1)
        return jnp.maximum(y, 0.0)

    xp = _upsample_pad(x)                                  # already zero-padded
    y = conv(xp, p["w_up"], ((0, 0), (0, 0))) + p["b_up"].reshape(1, 1, 1, -1)
    enc = _center_crop(enc, hp, wp)
    z = jnp.concatenate([y, enc], axis=-1)
    z = inorm_relu(conv(z, p["w1"], ((1, 1), (1, 1))))
    z = inorm_relu(conv(z, p["w2"], ((1, 1), (1, 1))))
    return jnp.transpose(z, (0, 3, 1, 2))


# ---------------------------------- main ------------------------------------ #

def init_params(key, in_ch, out_ch):
    k = jax.random.split(key, 6)
    half = in_ch // 2
    s = 0.1
    return {
        # up path conv: in_ch -> in_ch//2, 3x3, bias=True  (HWIO layout)
        "w_up": s * jax.random.normal(k[0], (3, 3, in_ch, half), jnp.float32),
        "b_up": s * jax.random.normal(k[1], (1, half), jnp.float32),
        # convBlock convs: in_ch -> out_ch -> out_ch, 3x3, bias=False
        "w1": s * jax.random.normal(k[2], (3, 3, in_ch, out_ch), jnp.float32),
        "w2": s * jax.random.normal(k[3], (3, 3, out_ch, out_ch), jnp.float32),
        # shared InstanceNorm2d affine params (applied after conv1 AND conv2)
        "gamma": 1.0 + s * jax.random.normal(k[4], (1, out_ch), jnp.float32),
        "beta": s * jax.random.normal(k[5], (1, out_ch), jnp.float32),
    }


if __name__ == "__main__":
    key = jax.random.PRNGKey(0)
    kx, ke, kp = jax.random.split(key, 3)

    N, in_ch, out_ch = 2, 64, 64
    H = W = 8                                   # decoder feature, upsamples to 16
    x = jax.random.normal(kx, (N, in_ch, H, W), jnp.float32)            # NCHW
    enc = jax.random.normal(ke, (N, in_ch // 2, 2 * H + 2, 2 * W + 2),
                            jnp.float32)                                # NCHW
    params = init_params(kp, in_ch, out_ch)

    fwd = jax.jit(functools.partial(up_forward, p=params))
    out = jax.block_until_ready(fwd(x, enc))
    assert out.shape == (N, out_ch, 2 * H, 2 * W), out.shape

    ref_fn = jax.jit(functools.partial(up_forward_ref, p=params))
    ref = jax.block_until_ready(ref_fn(x, enc))

    # tolerance covers bf16 activation/weight storage (math accumulates in f32)
    err = float(jnp.max(jnp.abs(out - ref)))
    assert jnp.allclose(out, ref, rtol=1e-2, atol=1e-2), err

    print("KERNEL_OK")
</pallas_src>

<mosaic_0001>
module attributes {stable_mosaic.version = 11 : i64} {
  func.func private @main(%arg0: i32) attributes {dimension_semantics = [#tpu.dimension_semantics<core_parallel>], iteration_bounds = array<i64: 2>, tpu.core_type = #tpu.core_type<sc_scalar_subcore>, window_params = []} {
    return
  }
}

module attributes {stable_mosaic.version = 11 : i64} {
  func.func private @main(%arg0: i32) attributes {dimension_semantics = [#tpu.dimension_semantics<core_parallel>], iteration_bounds = array<i64: 2>, tpu.core_type = #tpu.core_type<sc_scalar_subcore>, window_params = []} {
    return
  }
}

module attributes {stable_mosaic.version = 11 : i64} {
  func.func @up_fused_kernel(%arg0: i32, %arg1: memref<1x326x64xbf16, #tpu.memory_space<vmem>>, %arg2: memref<1x326x32xbf16, #tpu.memory_space<vmem>>, %arg3: memref<9x64x32xbf16, #tpu.memory_space<vmem>>, %arg4: memref<1x32xf32, #tpu.memory_space<vmem>>, %arg5: memref<9x32x64xbf16, #tpu.memory_space<vmem>>, %arg6: memref<9x32x64xbf16, #tpu.memory_space<vmem>>, %arg7: memref<9x64x64xbf16, #tpu.memory_space<vmem>>, %arg8: memref<1x64xf32, #tpu.memory_space<vmem>>, %arg9: memref<1x64xf32, #tpu.memory_space<vmem>>, %arg10: memref<288x1xf32, #tpu.memory_space<vmem>>, %arg11: memref<1x288x64xf32, #tpu.memory_space<vmem>>, %arg12: memref<326x32xbf16, #tpu.memory_space<vmem>>, %arg13: memref<326x64xbf16, #tpu.memory_space<vmem>>) attributes {dimension_semantics = [#tpu.dimension_semantics<parallel>], iteration_bounds = array<i64: 2>, scalar_prefetch = 0 : i64, scratch_operands = 2 : i64, tpu.core_type = #tpu.core_type<tc>, window_params = [{transform_indices = @transform_0, window_bounds = array<i64: 1, 326, 64>}, {transform_indices = @transform_1, window_bounds = array<i64: 1, 326, 32>}, {pipeline_mode = #tpu.pipeline_mode<synchronous>, transform_indices = @transform_2, window_bounds = array<i64: 9, 64, 32>}, {pipeline_mode = #tpu.pipeline_mode<synchronous>, transform_indices = @transform_3, window_bounds = array<i64: 1, 32>}, {pipeline_mode = #tpu.pipeline_mode<synchronous>, transform_indices = @transform_4, window_bounds = array<i64: 9, 32, 64>}, {pipeline_mode = #tpu.pipeline_mode<synchronous>, transform_indices = @transform_5, window_bounds = array<i64: 9, 32, 64>}, {pipeline_mode = #tpu.pipeline_mode<synchronous>, transform_indices = @transform_6, window_bounds = array<i64: 9, 64, 64>}, {pipeline_mode = #tpu.pipeline_mode<synchronous>, transform_indices = @transform_7, window_bounds = array<i64: 1, 64>}, {pipeline_mode = #tpu.pipeline_mode<synchronous>, transform_indices = @transform_8, window_bounds = array<i64: 1, 64>}, {pipeline_mode = #tpu.pipeline_mode<synchronous>, transform_indices = @transform_9, window_bounds = array<i64: 288, 1>}, {transform_indices = @transform_10, window_bounds = array<i64: 1, 288, 64>}]} {
    %c0 = arith.constant 0 : index
    %c0_0 = arith.constant 0 : index
    %0 = vector.load %arg10[%c0, %c0_0] : memref<288x1xf32, #tpu.memory_space<vmem>>, vector<288x1xf32>
    %c0_1 = arith.constant 0 : index
    %c0_2 = arith.constant 0 : index
    %1 = vector.load %arg8[%c0_1, %c0_2] : memref<1x64xf32, #tpu.memory_space<vmem>>, vector<1x64xf32>
    %c0_3 = arith.constant 0 : index
    %c0_4 = arith.constant 0 : index
    %2 = vector.load %arg9[%c0_3, %c0_4] : memref<1x64xf32, #tpu.memory_space<vmem>>, vector<1x64xf32>
    %cst = arith.constant 0.000000e+00 : bf16
    %3 = vector.broadcast %cst : bf16 to vector<326x32xbf16>
    %c0_5 = arith.constant 0 : index
    %c0_6 = arith.constant 0 : index
    %4 = vector.load %arg12[%c0_5, %c0_6] : memref<326x32xbf16, #tpu.memory_space<vmem>>, vector<326x32xbf16>
    tpu.vector_store %arg12[%c0_5, %c0_6], %3 {strides = array<i32>} : memref<326x32xbf16, #tpu.memory_space<vmem>>, vector<326x32xbf16>,
    %cst_7 = arith.constant 0.000000e+00 : bf16
    %5 = vector.broadcast %cst_7 : bf16 to vector<326x64xbf16>
    %c0_8 = arith.constant 0 : index
    %c0_9 = arith.constant 0 : index
    %6 = vector.load %arg13[%c0_8, %c0_9] : memref<326x64xbf16, #tpu.memory_space<vmem>>, vector<326x64xbf16>
    tpu.vector_store %arg13[%c0_8, %c0_9], %5 {strides = array<i32>} : memref<326x64xbf16, #tpu.memory_space<vmem>>, vector<326x64xbf16>,
    %cst_10 = arith.constant 0.000000e+00 : f32
    %7 = vector.broadcast %cst_10 : f32 to vector<288x32xf32>
    %c0_11 = arith.constant 0 : index
    %c0_12 = arith.constant 0 : index
    %c0_13 = arith.constant 0 : index
    %8 = vector.load %arg1[%c0_11, %c0_12, %c0_13] : memref<1x326x64xbf16, #tpu.memory_space<vmem>>, vector<1x288x64xbf16>
    %9 = vector.shape_cast %8 : vector<1x288x64xbf16> to vector<288x64xbf16>
    %c0_14 = arith.constant 0 : index
    %c0_15 = arith.constant 0 : index
    %c0_16 = arith.constant 0 : index
    %10 = vector.load %arg3[%c0_14, %c0_15, %c0_16] : memref<9x64x32xbf16, #tpu.memory_space<vmem>>, vector<1x64x32xbf16>
    %11 = vector.shape_cast %10 : vector<1x64x32xbf16> to vector<64x32xbf16>
    %cst_17 = arith.constant dense<0.000000e+00> : vector<288x32xf32>
    %12 = tpu.matmul %9, %11, %cst_17 {dimension_numbers = #tpu.dot_dimension_numbers<[1], [0], [0], [1], [0, 0, 1, 1], [], []>} : vector<288x64xbf16>, vector<64x32xbf16>, vector<288x32xf32> -> vector<288x32xf32>
    %13 = arith.addf %7, %12 : vector<288x32xf32>
    %c0_18 = arith.constant 0 : index
    %c1 = arith.constant 1 : index
    %c0_19 = arith.constant 0 : index
    %14 = vector.load %arg1[%c0_18, %c1, %c0_19] : memref<1x326x64xbf16, #tpu.memory_space<vmem>>, vector<1x288x64xbf16>
    %15 = vector.shape_cast %14 : vector<1x288x64xbf16> to vector<288x64xbf16>
    %c1_20 = arith.constant 1 : index
    %c0_21 = arith.constant 0 : index
    %c0_22 = arith.constant 0 : index
    %16 = vector.load %arg3[%c1_20, %c0_21, %c0_22] : memref<9x64x32xbf16, #tpu.memory_space<vmem>>, vector<1x64x32xbf16>
    %17 = vector.shape_cast %16 : vector<1x64x32xbf16> to vector<64x32xbf16>
    %cst_23 = arith.constant dense<0.000000e+00> : vector<288x32xf32>
    %18 = tpu.matmul %15, %17, %cst_23 {dimension_numbers = #tpu.dot_dimension_numbers<[1], [0], [0], [1], [0, 0, 1, 1], [], []>} : vector<288x64xbf16>, vector<64x32xbf16>, vector<288x32xf32> -> vector<288x32xf32>
    %19 = arith.addf %13, %18 : vector<288x32xf32>
    %c0_24 = arith.constant 0 : index
    %c2 = arith.constant 2 : index
    %c0_25 = arith.constant 0 : index
    %20 = vector.load %arg1[%c0_24, %c2, %c0_25] : memref<1x326x64xbf16, #tpu.memory_space<vmem>>, vector<1x288x64xbf16>
    %21 = vector.shape_cast %20 : vector<1x288x64xbf16> to vector<288x64xbf16>
    %c2_26 = arith.constant 2 : index
    %c0_27 = arith.constant 0 : index
    %c0_28 = arith.constant 0 : index
    %22 = vector.load %arg3[%c2_26, %c0_27, %c0_28] : memref<9x64x32xbf16, #tpu.memory_space<vmem>>, vector<1x64x32xbf16>
    %23 = vector.shape_cast %22 : vector<1x64x32xbf16> to vector<64x32xbf16>
    %cst_29 = arith.constant dense<0.000000e+00> : vector<288x32xf32>
    %24 = tpu.matmul %21, %23, %cst_29 {dimension_numbers = #tpu.dot_dimension_numbers<[1], [0], [0], [1], [0, 0, 1, 1], [], []>} : vector<288x64xbf16>, vector<64x32xbf16>, vector<288x32xf32> -> vector<288x32xf32>
    %25 = arith.addf %19, %24 : vector<288x32xf32>
    %c0_30 = arith.constant 0 : index
    %c18 = arith.constant 18 : index
    %c0_31 = arith.constant 0 : index
    %26 = vector.load %arg1[%c0_30, %c18, %c0_31] : memref<1x326x64xbf16, #tpu.memory_space<vmem>>, vector<1x288x64xbf16>
    %27 = vector.shape_cast %26 : vector<1x288x64xbf16> to vector<288x64xbf16>
    %c3 = arith.constant 3 : index
    %c0_32 = arith.constant 0 : index
    %c0_33 = arith.constant 0 : index
    %28 = vector.load %arg3[%c3, %c0_32, %c0_33] : memref<9x64x32xbf16, #tpu.memory_space<vmem>>, vector<1x64x32xbf16>
    %29 = vector.shape_cast %28 : vector<1x64x32xbf16> to vector<64x32xbf16>
    %cst_34 = arith.constant dense<0.000000e+00> : vector<288x32xf32>
    %30 = tpu.matmul %27, %29, %cst_34 {dimension_numbers = #tpu.dot_dimension_numbers<[1], [0], [0], [1], [0, 0, 1, 1], [], []>} : vector<288x64xbf16>, vector<64x32xbf16>, vector<288x32xf32> -> vector<288x32xf32>
    %31 = arith.addf %25, %30 : vector<288x32xf32>
    %c0_35 = arith.constant 0 : index
    %c19 = arith.constant 19 : index
    %c0_36 = arith.constant 0 : index
    %32 = vector.load %arg1[%c0_35, %c19, %c0_36] : memref<1x326x64xbf16, #tpu.memory_space<vmem>>, vector<1x288x64xbf16>
    %33 = vector.shape_cast %32 : vector<1x288x64xbf16> to vector<288x64xbf16>
    %c4 = arith.constant 4 : index
    %c0_37 = arith.constant 0 : index
    %c0_38 = arith.constant 0 : index
    %34 = vector.load %arg3[%c4, %c0_37, %c0_38] : memref<9x64x32xbf16, #tpu.memory_space<vmem>>, vector<1x64x32xbf16>
    %35 = vector.shape_cast %34 : vector<1x64x32xbf16> to vector<64x32xbf16>
    %cst_39 = arith.constant dense<0.000000e+00> : vector<288x32xf32>
    %36 = tpu.matmul %33, %35, %cst_39 {dimension_numbers = #tpu.dot_dimension_numbers<[1], [0], [0], [1], [0, 0, 1, 1], [], []>} : vector<288x64xbf16>, vector<64x32xbf16>, vector<288x32xf32> -> vector<288x32xf32>
    %37 = arith.addf %31, %36 : vector<288x32xf32>
    %c0_40 = arith.constant 0 : index
    %c20 = arith.constant 20 : index
    %c0_41 = arith.constant 0 : index
    %38 = vector.load %arg1[%c0_40, %c20, %c0_41] : memref<1x326x64xbf16, #tpu.memory_space<vmem>>, vector<1x288x64xbf16>
    %39 = vector.shape_cast %38 : vector<1x288x64xbf16> to vector<288x64xbf16>
    %c5 = arith.constant 5 : index
    %c0_42 = arith.constant 0 : index
    %c0_43 = arith.constant 0 : index
    %40 = vector.load %arg3[%c5, %c0_42, %c0_43] : memref<9x64x32xbf16, #tpu.memory_space<vmem>>, vector<1x64x32xbf16>
    %41 = vector.shape_cast %40 : vector<1x64x32xbf16> to vector<64x32xbf16>
    %cst_44 = arith.constant dense<0.000000e+00> : vector<288x32xf32>
    %42 = tpu.matmul %39, %41, %cst_44 {dimension_numbers = #tpu.dot_dimension_numbers<[1], [0], [0], [1], [0, 0, 1, 1], [], []>} : vector<288x64xbf16>, vector<64x32xbf16>, vector<288x32xf32> -> vector<288x32xf32>
    %43 = arith.addf %37, %42 : vector<288x32xf32>
    %c0_45 = arith.constant 0 : index
    %c36 = arith.constant 36 : index
    %c0_46 = arith.constant 0 : index
    %44 = vector.load %arg1[%c0_45, %c36, %c0_46] : memref<1x326x64xbf16, #tpu.memory_space<vmem>>, vector<1x288x64xbf16>
    %45 = vector.shape_cast %44 : vector<1x288x64xbf16> to vector<288x64xbf16>
    %c6 = arith.constant 6 : index
    %c0_47 = arith.constant 0 : index
    %c0_48 = arith.constant 0 : index
    %46 = vector.load %arg3[%c6, %c0_47, %c0_48] : memref<9x64x32xbf16, #tpu.memory_space<vmem>>, vector<1x64x32xbf16>
    %47 = vector.shape_cast %46 : vector<1x64x32xbf16> to vector<64x32xbf16>
    %cst_49 = arith.constant dense<0.000000e+00> : vector<288x32xf32>
    %48 = tpu.matmul %45, %47, %cst_49 {dimension_numbers = #tpu.dot_dimension_numbers<[1], [0], [0], [1], [0, 0, 1, 1], [], []>} : vector<288x64xbf16>, vector<64x32xbf16>, vector<288x32xf32> -> vector<288x32xf32>
    %49 = arith.addf %43, %48 : vector<288x32xf32>
    %c0_50 = arith.constant 0 : index
    %c37 = arith.constant 37 : index
    %c0_51 = arith.constant 0 : index
    %50 = vector.load %arg1[%c0_50, %c37, %c0_51] : memref<1x326x64xbf16, #tpu.memory_space<vmem>>, vector<1x288x64xbf16>
    %51 = vector.shape_cast %50 : vector<1x288x64xbf16> to vector<288x64xbf16>
    %c7 = arith.constant 7 : index
    %c0_52 = arith.constant 0 : index
    %c0_53 = arith.constant 0 : index
    %52 = vector.load %arg3[%c7, %c0_52, %c0_53] : memref<9x64x32xbf16, #tpu.memory_space<vmem>>, vector<1x64x32xbf16>
    %53 = vector.shape_cast %52 : vector<1x64x32xbf16> to vector<64x32xbf16>
    %cst_54 = arith.constant dense<0.000000e+00> : vector<288x32xf32>
    %54 = tpu.matmul %51, %53, %cst_54 {dimension_numbers = #tpu.dot_dimension_numbers<[1], [0], [0], [1], [0, 0, 1, 1], [], []>} : vector<288x64xbf16>, vector<64x32xbf16>, vector<288x32xf32> -> vector<288x32xf32>
    %55 = arith.addf %49, %54 : vector<288x32xf32>
    %c0_55 = arith.constant 0 : index
    %c38 = arith.constant 38 : index
    %c0_56 = arith.constant 0 : index
    %56 = vector.load %arg1[%c0_55, %c38, %c0_56] : memref<1x326x64xbf16, #tpu.memory_space<vmem>>, vector<1x288x64xbf16>
    %57 = vector.shape_cast %56 : vector<1x288x64xbf16> to vector<288x64xbf16>
    %c8 = arith.constant 8 : index
    %c0_57 = arith.constant 0 : index
    %c0_58 = arith.constant 0 : index
    %58 = vector.load %arg3[%c8, %c0_57, %c0_58] : memref<9x64x32xbf16, #tpu.memory_space<vmem>>, vector<1x64x32xbf16>
    %59 = vector.shape_cast %58 : vector<1x64x32xbf16> to vector<64x32xbf16>
    %cst_59 = arith.constant dense<0.000000e+00> : vector<288x32xf32>
    %60 = tpu.matmul %57, %59, %cst_59 {dimension_numbers = #tpu.dot_dimension_numbers<[1], [0], [0], [1], [0, 0, 1, 1], [], []>} : vector<288x64xbf16>, vector<64x32xbf16>, vector<288x32xf32> -> vector<288x32xf32>
    %61 = arith.addf %55, %60 : vector<288x32xf32>
    %c0_60 = arith.constant 0 : index
    %c0_61 = arith.constant 0 : index
    %62 = vector.load %arg4[%c0_60, %c0_61] : memref<1x32xf32, #tpu.memory_space<vmem>>, vector<1x32xf32>
    %63 = vector.broadcast %62 : vector<1x32xf32> to vector<288x32xf32>
    %64 = arith.addf %61, %63 : vector<288x32xf32>
    %65 = vector.broadcast %0 : vector<288x1xf32> to vector<288x32xf32>
    %66 = arith.mulf %64, %65 : vector<288x32xf32>
    %67 = arith.truncf %66 : vector<288x32xf32> to vector<288x32xbf16>
    %c19_62 = arith.constant 19 : index
    %c0_63 = arith.constant 0 : index
    %68 = vector.load %arg12[%c19_62, %c0_63] : memref<326x32xbf16, #tpu.memory_space<vmem>>, vector<288x32xbf16>
    tpu.vector_store %arg12[%c19_62, %c0_63], %67 {strides = array<i32>} : memref<326x32xbf16, #tpu.memory_space<vmem>>, vector<288x32xbf16>,
    %cst_64 = arith.constant 0.000000e+00 : f32
    %69 = vector.broadcast %cst_64 : f32 to vector<288x64xf32>
    %c0_65 = arith.constant 0 : index
    %c0_66 = arith.constant 0 : index
    %70 = vector.load %arg12[%c0_65, %c0_66] : memref<326x32xbf16, #tpu.memory_space<vmem>>, vector<288x32xbf16>
    %c0_67 = arith.constant 0 : index
    %c0_68 = arith.constant 0 : index
    %c0_69 = arith.constant 0 : index
    %71 = vector.load %arg5[%c0_67, %c0_68, %c0_69] : memref<9x32x64xbf16, #tpu.memory_space<vmem>>, vector<1x32x64xbf16>
    %72 = vector.shape_cast %71 : vector<1x32x64xbf16> to vector<32x64xbf16>
    %cst_70 = arith.constant dense<0.000000e+00> : vector<288x64xf32>
    %73 = tpu.matmul %70, %72, %cst_70 {dimension_numbers = #tpu.dot_dimension_numbers<[1], [0], [0], [1], [0, 0, 1, 1], [], []>} : vector<288x32xbf16>, vector<32x64xbf16>, vector<288x64xf32> -> vector<288x64xf32>
    %74 = arith.addf %69, %73 : vector<288x64xf32>
    %c1_71 = arith.constant 1 : index
    %c0_72 = arith.constant 0 : index
    %75 = vector.load %arg12[%c1_71, %c0_72] : memref<326x32xbf16, #tpu.memory_space<vmem>>, vector<288x32xbf16>
    %c1_73 = arith.constant 1 : index
    %c0_74 = arith.constant 0 : index
    %c0_75 = arith.constant 0 : index
    %76 = vector.load %arg5[%c1_73, %c0_74, %c0_75] : memref<9x32x64xbf16, #tpu.memory_space<vmem>>, vector<1x32x64xbf16>
    %77 = vector.shape_cast %76 : vector<1x32x64xbf16> to vector<32x64xbf16>
    %cst_76 = arith.constant dense<0.000000e+00> : vector<288x64xf32>
    %78 = tpu.matmul %75, %77, %cst_76 {dimension_numbers = #tpu.dot_dimension_numbers<[1], [0], [0], [1], [0, 0, 1, 1], [], []>} : vector<288x32xbf16>, vector<32x64xbf16>, vector<288x64xf32> -> vector<288x64xf32>
    %79 = arith.addf %74, %78 : vector<288x64xf32>
    %c2_77 = arith.constant 2 : index
    %c0_78 = arith.constant 0 : index
    %80 = vector.load %arg12[%c2_77, %c0_78] : memref<326x32xbf16, #tpu.memory_space<vmem>>, vector<288x32xbf16>
    %c2_79 = arith.constant 2 : index
    %c0_80 = arith.constant 0 : index
    %c0_81 = arith.constant 0 : index
    %81 = vector.load %arg5[%c2_79, %c0_80, %c0_81] : memref<9x32x64xbf16, #tpu.memory_space<vmem>>, vector<1x32x64xbf16>
    %82 = vector.shape_cast %81 : vector<1x32x64xbf16> to vector<32x64xbf16>
    %cst_82 = arith.constant dense<0.000000e+00> : vector<288x64xf32>
    %83 = tpu.matmul %80, %82, %cst_82 {dimension_numbers = #tpu.dot_dimension_numbers<[1], [0], [0], [1], [0, 0, 1, 1], [], []>} : vector<288x32xbf16>, vector<32x64xbf16>, vector<288x64xf32> -> vector<288x64xf32>
    %84 = arith.addf %79, %83 : vector<288x64xf32>
    %c18_83 = arith.constant 18 : index
    %c0_84 = arith.constant 0 : index
    %85 = vector.load %arg12[%c18_83, %c0_84] : memref<326x32xbf16, #tpu.memory_space<vmem>>, vector<288x32xbf16>
    %c3_85 = arith.constant 3 : index
    %c0_86 = arith.constant 0 : index
    %c0_87 = arith.constant 0 : index
    %86 = vector.load %arg5[%c3_85, %c0_86, %c0_87] : memref<9x32x64xbf16, #tpu.memory_space<vmem>>, vector<1x32x64xbf16>
    %87 = vector.shape_cast %86 : vector<1x32x64xbf16> to vector<32x64xbf16>
    %cst_88 = arith.constant dense<0.000000e+00> : vector<288x64xf32>
    %88 = tpu.matmul %85, %87, %cst_88 {dimension_numbers = #tpu.dot_dimension_numbers<[1], [0], [0], [1], [0, 0, 1, 1], [], []>} : vector<288x32xbf16>, vector<32x64xbf16>, vector<288x64xf32> -> vector<288x64xf32>
    %89 = arith.addf %84, %88 : vector<288x64xf32>
    %c19_89 = arith.constant 19 : index
    %c0_90 = arith.constant 0 : index
    %90 = vector.load %arg12[%c19_89, %c0_90] : memref<326x32xbf16, #tpu.memory_space<vmem>>, vector<288x32xbf16>
    %c4_91 = arith.constant 4 : index
    %c0_92 = arith.constant 0 : index
    %c0_93 = arith.constant 0 : index
    %91 = vector.load %arg5[%c4_91, %c0_92, %c0_93] : memref<9x32x64xbf16, #tpu.memory_space<vmem>>, vector<1x32x64xbf16>
    %92 = vector.shape_cast %91 : vector<1x32x64xbf16> to vector<32x64xbf16>
    %cst_94 = arith.constant dense<0.000000e+00> : vector<288x64xf32>
    %93 = tpu.matmul %90, %92, %cst_94 {dimension_numbers = #tpu.dot_dimension_numbers<[1], [0], [0], [1], [0, 0, 1, 1], [], []>} : vector<288x32xbf16>, vector<32x64xbf16>, vector<288x64xf32> -> vector<288x64xf32>
    %94 = arith.addf %89, %93 : vector<288x64xf32>
    %c20_95 = arith.constant 20 : index
    %c0_96 = arith.constant 0 : index
    %95 = vector.load %arg12[%c20_95, %c0_96] : memref<326x32xbf16, #tpu.memory_space<vmem>>, vector<288x32xbf16>
    %c5_97 = arith.constant 5 : index
    %c0_98 = arith.constant 0 : index
    %c0_99 = arith.constant 0 : index
    %96 = vector.load %arg5[%c5_97, %c0_98, %c0_99] : memref<9x32x64xbf16, #tpu.memory_space<vmem>>, vector<1x32x64xbf16>
    %97 = vector.shape_cast %96 : vector<1x32x64xbf16> to vector<32x64xbf16>
    %cst_100 = arith.constant dense<0.000000e+00> : vector<288x64xf32>
    %98 = tpu.matmul %95, %97, %cst_100 {dimension_numbers = #tpu.dot_dimension_numbers<[1], [0], [0], [1], [0, 0, 1, 1], [], []>} : vector<288x32xbf16>, vector<32x64xbf16>, vector<288x64xf32> -> vector<288x64xf32>
    %99 = arith.addf %94, %98 : vector<288x64xf32>
    %c36_101 = arith.constant 36 : index
    %c0_102 = arith.constant 0 : index
    %100 = vector.load %arg12[%c36_101, %c0_102] : memref<326x32xbf16, #tpu.memory_space<vmem>>, vector<288x32xbf16>
    %c6_103 = arith.constant 6 : index
    %c0_104 = arith.constant 0 : index
    %c0_105 = arith.constant 0 : index
    %101 = vector.load %arg5[%c6_103, %c0_104, %c0_105] : memref<9x32x64xbf16, #tpu.memory_space<vmem>>, vector<1x32x64xbf16>
    %102 = vector.shape_cast %101 : vector<1x32x64xbf16> to vector<32x64xbf16>
    %cst_106 = arith.constant dense<0.000000e+00> : vector<288x64xf32>
    %103 = tpu.matmul %100, %102, %cst_106 {dimension_numbers = #tpu.dot_dimension_numbers<[1], [0], [0], [1], [0, 0, 1, 1], [], []>} : vector<288x32xbf16>, vector<32x64xbf16>, vector<288x64xf32> -> vector<288x64xf32>
    %104 = arith.addf %99, %103 : vector<288x64xf32>
    %c37_107 = arith.constant 37 : index
    %c0_108 = arith.constant 0 : index
    %105 = vector.load %arg12[%c37_107, %c0_108] : memref<326x32xbf16, #tpu.memory_space<vmem>>, vector<288x32xbf16>
    %c7_109 = arith.constant 7 : index
    %c0_110 = arith.constant 0 : index
    %c0_111 = arith.constant 0 : index
    %106 = vector.load %arg5[%c7_109, %c0_110, %c0_111] : memref<9x32x64xbf16, #tpu.memory_space<vmem>>, vector<1x32x64xbf16>
    %107 = vector.shape_cast %106 : vector<1x32x64xbf16> to vector<32x64xbf16>
    %cst_112 = arith.constant dense<0.000000e+00> : vector<288x64xf32>
    %108 = tpu.matmul %105, %107, %cst_112 {dimension_numbers = #tpu.dot_dimension_numbers<[1], [0], [0], [1], [0, 0, 1, 1], [], []>} : vector<288x32xbf16>, vector<32x64xbf16>, vector<288x64xf32> -> vector<288x64xf32>
    %109 = arith.addf %104, %108 : vector<288x64xf32>
    %c38_113 = arith.constant 38 : index
    %c0_114 = arith.constant 0 : index
    %110 = vector.load %arg12[%c38_113, %c0_114] : memref<326x32xbf16, #tpu.memory_space<vmem>>, vector<288x32xbf16>
    %c8_115 = arith.constant 8 : index
    %c0_116 = arith.constant 0 : index
    %c0_117 = arith.constant 0 : index
    %111 = vector.load %arg5[%c8_115, %c0_116, %c0_117] : memref<9x32x64xbf16, #tpu.memory_space<vmem>>, vector<1x32x64xbf16>
    %112 = vector.shape_cast %111 : vector<1x32x64xbf16> to vector<32x64xbf16>
    %cst_118 = arith.constant dense<0.000000e+00> : vector<288x64xf32>
    %113 = tpu.matmul %110, %112, %cst_118 {dimension_numbers = #tpu.dot_dimension_numbers<[1], [0], [0], [1], [0, 0, 1, 1], [], []>} : vector<288x32xbf16>, vector<32x64xbf16>, vector<288x64xf32> -> vector<288x64xf32>
    %114 = arith.addf %109, %113 : vector<288x64xf32>
    %cst_119 = arith.constant 0.000000e+00 : f32
    %115 = vector.broadcast %cst_119 : f32 to vector<288x64xf32>
    %c0_120 = arith.constant 0 : index
    %c0_121 = arith.constant 0 : index
    %c0_122 = arith.constant 0 : index
    %116 = vector.load %arg2[%c0_120, %c0_121, %c0_122] : memref<1x326x32xbf16, #tpu.memory_space<vmem>>, vector<1x288x32xbf16>
    %117 = vector.shape_cast %116 : vector<1x288x32xbf16> to vector<288x32xbf16>
    %c0_123 = arith.constant 0 : index
    %c0_124 = arith.constant 0 : index
    %c0_125 = arith.constant 0 : index
    %118 = vector.load %arg6[%c0_123, %c0_124, %c0_125] : memref<9x32x64xbf16, #tpu.memory_space<vmem>>, vector<1x32x64xbf16>
    %119 = vector.shape_cast %118 : vector<1x32x64xbf16> to vector<32x64xbf16>
    %cst_126 = arith.constant dense<0.000000e+00> : vector<288x64xf32>
    %120 = tpu.matmul %117, %119, %cst_126 {dimension_numbers = #tpu.dot_dimension_numbers<[1], [0], [0], [1], [0, 0, 1, 1], [], []>} : vector<288x32xbf16>, vector<32x64xbf16>, vector<288x64xf32> -> vector<288x64xf32>
    %121 = arith.addf %115, %120 : vector<288x64xf32>
    %c0_127 = arith.constant 0 : index
    %c1_128 = arith.constant 1 : index
    %c0_129 = arith.constant 0 : index
    %122 = vector.load %arg2[%c0_127, %c1_128, %c0_129] : memref<1x326x32xbf16, #tpu.memory_space<vmem>>, vector<1x288x32xbf16>
    %123 = vector.shape_cast %122 : vector<1x288x32xbf16> to vector<288x32xbf16>
    %c1_130 = arith.constant 1 : index
    %c0_131 = arith.constant 0 : index
    %c0_132 = arith.constant 0 : index
    %124 = vector.load %arg6[%c1_130, %c0_131, %c0_132] : memref<9x32x64xbf16, #tpu.memory_space<vmem>>, vector<1x32x64xbf16>
    %125 = vector.shape_cast %124 : vector<1x32x64xbf16> to vector<32x64xbf16>
    %cst_133 = arith.constant dense<0.000000e+00> : vector<288x64xf32>
    %126 = tpu.matmul %123, %125, %cst_133 {dimension_numbers = #tpu.dot_dimension_numbers<[1], [0], [0], [1], [0, 0, 1, 1], [], []>} : vector<288x32xbf16>, vector<32x64xbf16>, vector<288x64xf32> -> vector<288x64xf32>
    %127 = arith.addf %121, %126 : vector<288x64xf32>
    %c0_134 = arith.constant 0 : index
    %c2_135 = arith.constant 2 : index
    %c0_136 = arith.constant 0 : index
    %128 = vector.load %arg2[%c0_134, %c2_135, %c0_136] : memref<1x326x32xbf16, #tpu.memory_space<vmem>>, vector<1x288x32xbf16>
    %129 = vector.shape_cast %128 : vector<1x288x32xbf16> to vector<288x32xbf16>
    %c2_137 = arith.constant 2 : index
    %c0_138 = arith.constant 0 : index
    %c0_139 = arith.constant 0 : index
    %130 = vector.load %arg6[%c2_137, %c0_138, %c0_139] : memref<9x32x64xbf16, #tpu.memory_space<vmem>>, vector<1x32x64xbf16>
    %131 = vector.shape_cast %130 : vector<1x32x64xbf16> to vector<32x64xbf16>
    %cst_140 = arith.constant dense<0.000000e+00> : vector<288x64xf32>
    %132 = tpu.matmul %129, %131, %cst_140 {dimension_numbers = #tpu.dot_dimension_numbers<[1], [0], [0], [1], [0, 0, 1, 1], [], []>} : vector<288x32xbf16>, vector<32x64xbf16>, vector<288x64xf32> -> vector<288x64xf32>
    %133 = arith.addf %127, %132 : vector<288x64xf32>
    %c0_141 = arith.constant 0 : index
    %c18_142 = arith.constant 18 : index
    %c0_143 = arith.constant 0 : index
    %134 = vector.load %arg2[%c0_141, %c18_142, %c0_143] : memref<1x326x32xbf16, #tpu.memory_space<vmem>>, vector<1x288x32xbf16>
    %135 = vector.shape_cast %134 : vector<1x288x32xbf16> to vector<288x32xbf16>
    %c3_144 = arith.constant 3 : index
    %c0_145 = arith.constant 0 : index
    %c0_146 = arith.constant 0 : index
    %136 = vector.load %arg6[%c3_144, %c0_145, %c0_146] : memref<9x32x64xbf16, #tpu.memory_space<vmem>>, vector<1x32x64xbf16>
    %137 = vector.shape_cast %136 : vector<1x32x64xbf16> to vector<32x64xbf16>
    %cst_147 = arith.constant dense<0.000000e+00> : vector<288x64xf32>
    %138 = tpu.matmul %135, %137, %cst_147 {dimension_numbers = #tpu.dot_dimension_numbers<[1], [0], [0], [1], [0, 0, 1, 1], [], []>} : vector<288x32xbf16>, vector<32x64xbf16>, vector<288x64xf32> -> vector<288x64xf32>
    %139 = arith.addf %133, %138 : vector<288x64xf32>
    %c0_148 = arith.constant 0 : index
    %c19_149 = arith.constant 19 : index
    %c0_150 = arith.constant 0 : index
    %140 = vector.load %arg2[%c0_148, %c19_149, %c0_150] : memref<1x326x32xbf16, #tpu.memory_space<vmem>>, vector<1x288x32xbf16>
    %141 = vector.shape_cast %140 : vector<1x288x32xbf16> to vector<288x32xbf16>
    %c4_151 = arith.constant 4 : index
    %c0_152 = arith.constant 0 : index
    %c0_153 = arith.constant 0 : index
    %142 = vector.load %arg6[%c4_151, %c0_152, %c0_153] : memref<9x32x64xbf16, #tpu.memory_space<vmem>>, vector<1x32x64xbf16>
    %143 = vector.shape_cast %142 : vector<1x32x64xbf16> to vector<32x64xbf16>
    %cst_154 = arith.constant dense<0.000000e+00> : vector<288x64xf32>
    %144 = tpu.matmul %141, %143, %cst_154 {dimension_numbers = #tpu.dot_dimension_numbers<[1], [0], [0], [1], [0, 0, 1, 1], [], []>} : vector<288x32xbf16>, vector<32x64xbf16>, vector<288x64xf32> -> vector<288x64xf32>
    %145 = arith.addf %139, %144 : vector<288x64xf32>
    %c0_155 = arith.constant 0 : index
    %c20_156 = arith.constant 20 : index
    %c0_157 = arith.constant 0 : index
    %146 = vector.load %arg2[%c0_155, %c20_156, %c0_157] : memref<1x326x32xbf16, #tpu.memory_space<vmem>>, vector<1x288x32xbf16>
    %147 = vector.shape_cast %146 : vector<1x288x32xbf16> to vector<288x32xbf16>
    %c5_158 = arith.constant 5 : index
    %c0_159 = arith.constant 0 : index
    %c0_160 = arith.constant 0 : index
    %148 = vector.load %arg6[%c5_158, %c0_159, %c0_160] : memref<9x32x64xbf16, #tpu.memory_space<vmem>>, vector<1x32x64xbf16>
    %149 = vector.shape_cast %148 : vector<1x32x64xbf16> to vector<32x64xbf16>
    %cst_161 = arith.constant dense<0.000000e+00> : vector<288x64xf32>
    %150 = tpu.matmul %147, %149, %cst_161 {dimension_numbers = #tpu.dot_dimension_numbers<[1], [0], [0], [1], [0, 0, 1, 1], [], []>} : vector<288x32xbf16>, vector<32x64xbf16>, vector<288x64xf32> -> vector<288x64xf32>
    %151 = arith.addf %145, %150 : vector<288x64xf32>
    %c0_162 = arith.constant 0 : index
    %c36_163 = arith.constant 36 : index
    %c0_164 = arith.constant 0 : index
    %152 = vector.load %arg2[%c0_162, %c36_163, %c0_164] : memref<1x326x32xbf16, #tpu.memory_space<vmem>>, vector<1x288x32xbf16>
    %153 = vector.shape_cast %152 : vector<1x288x32xbf16> to vector<288x32xbf16>
    %c6_165 = arith.constant 6 : index
    %c0_166 = arith.constant 0 : index
    %c0_167 = arith.constant 0 : index
    %154 = vector.load %arg6[%c6_165, %c0_166, %c0_167] : memref<9x32x64xbf16, #tpu.memory_space<vmem>>, vector<1x32x64xbf16>
    %155 = vector.shape_cast %154 : vector<1x32x64xbf16> to vector<32x64xbf16>
    %cst_168 = arith.constant dense<0.000000e+00> : vector<288x64xf32>
    %156 = tpu.matmul %153, %155, %cst_168 {dimension_numbers = #tpu.dot_dimension_numbers<[1], [0], [0], [1], [0, 0, 1, 1], [], []>} : vector<288x32xbf16>, vector<32x64xbf16>, vector<288x64xf32> -> vector<288x64xf32>
    %157 = arith.addf %151, %156 : vector<288x64xf32>
    %c0_169 = arith.constant 0 : index
    %c37_170 = arith.constant 37 : index
    %c0_171 = arith.constant 0 : index
    %158 = vector.load %arg2[%c0_169, %c37_170, %c0_171] : memref<1x326x32xbf16, #tpu.memory_space<vmem>>, vector<1x288x32xbf16>
    %159 = vector.shape_cast %158 : vector<1x288x32xbf16> to vector<288x32xbf16>
    %c7_172 = arith.constant 7 : index
    %c0_173 = arith.constant 0 : index
    %c0_174 = arith.constant 0 : index
    %160 = vector.load %arg6[%c7_172, %c0_173, %c0_174] : memref<9x32x64xbf16, #tpu.memory_space<vmem>>, vector<1x32x64xbf16>
    %161 = vector.shape_cast %160 : vector<1x32x64xbf16> to vector<32x64xbf16>
    %cst_175 = arith.constant dense<0.000000e+00> : vector<288x64xf32>
    %162 = tpu.matmul %159, %161, %cst_175 {dimension_numbers = #tpu.dot_dimension_numbers<[1], [0], [0], [1], [0, 0, 1, 1], [], []>} : vector<288x32xbf16>, vector<32x64xbf16>, vector<288x64xf32> -> vector<288x64xf32>
    %163 = arith.addf %157, %162 : vector<288x64xf32>
    %c0_176 = arith.constant 0 : index
    %c38_177 = arith.constant 38 : index
    %c0_178 = arith.constant 0 : index
    %164 = vector.load %arg2[%c0_176, %c38_177, %c0_178] : memref<1x326x32xbf16, #tpu.memory_space<vmem>>, vector<1x288x32xbf16>
    %165 = vector.shape_cast %164 : vector<1x288x32xbf16> to vector<288x32xbf16>
    %c8_179 = arith.constant 8 : index
    %c0_180 = arith.constant 0 : index
    %c0_181 = arith.constant 0 : index
    %166 = vector.load %arg6[%c8_179, %c0_180, %c0_181] : memref<9x32x64xbf16, #tpu.memory_space<vmem>>, vector<1x32x64xbf16>
    %167 = vector.shape_cast %166 : vector<1x32x64xbf16> to vector<32x64xbf16>
    %cst_182 = arith.constant dense<0.000000e+00> : vector<288x64xf32>
    %168 = tpu.matmul %165, %167, %cst_182 {dimension_numbers = #tpu.dot_dimension_numbers<[1], [0], [0], [1], [0, 0, 1, 1], [], []>} : vector<288x32xbf16>, vector<32x64xbf16>, vector<288x64xf32> -> vector<288x64xf32>
    %169 = arith.addf %163, %168 : vector<288x64xf32>
    %170 = arith.addf %114, %169 : vector<288x64xf32>
    %171 = vector.broadcast %0 : vector<288x1xf32> to vector<288x64xf32>
    %172 = arith.mulf %170, %171 : vector<288x64xf32>
    %cst_183 = arith.constant dense<0.000000e+00> : vector<64xf32>
    %173 = vector.multi_reduction <add>, %172, %cst_183 [0] : vector<288x64xf32> to vector<64xf32>
    %174 = vector.shape_cast %173 : vector<64xf32> to vector<1x64xf32>
    %cst_184 = arith.constant 3.906250e-03 : f32
    %175 = vector.broadcast %cst_184 : f32 to vector<1x64xf32>
    %176 = arith.mulf %174, %175 : vector<1x64xf32>
    %177 = vector.broadcast %176 : vector<1x64xf32> to vector<288x64xf32>
    %178 = arith.subf %170, %177 : vector<288x64xf32>
    %179 = arith.mulf %178, %178 : vector<288x64xf32>
    %180 = vector.broadcast %0 : vector<288x1xf32> to vector<288x64xf32>
    %181 = arith.mulf %179, %180 : vector<288x64xf32>
    %cst_185 = arith.constant dense<0.000000e+00> : vector<64xf32>
    %182 = vector.multi_reduction <add>, %181, %cst_185 [0] : vector<288x64xf32> to vector<64xf32>
    %183 = vector.shape_cast %182 : vector<64xf32> to vector<1x64xf32>
    %cst_186 = arith.constant 3.906250e-03 : f32
    %184 = vector.broadcast %cst_186 : f32 to vector<1x64xf32>
    %185 = arith.mulf %183, %184 : vector<1x64xf32>
    %cst_187 = arith.constant 9.99999974E-6 : f32
    %186 = vector.broadcast %cst_187 : f32 to vector<1x64xf32>
    %187 = arith.addf %185, %186 : vector<1x64xf32>
    %188 = math.rsqrt %187 : vector<1x64xf32>
    %189 = vector.broadcast %188 : vector<1x64xf32> to vector<288x64xf32>
    %190 = arith.mulf %178, %189 : vector<288x64xf32>
    %191 = vector.broadcast %1 : vector<1x64xf32> to vector<288x64xf32>
    %192 = arith.mulf %190, %191 : vector<288x64xf32>
    %193 = vector.broadcast %2 : vector<1x64xf32> to vector<288x64xf32>
    %194 = arith.addf %192, %193 : vector<288x64xf32>
    %cst_188 = arith.constant 0.000000e+00 : f32
    %195 = vector.broadcast %cst_188 : f32 to vector<288x64xf32>
    %196 = arith.maximumf %194, %195 : vector<288x64xf32>
    %197 = vector.broadcast %0 : vector<288x1xf32> to vector<288x64xf32>
    %198 = arith.mulf %196, %197 : vector<288x64xf32>
    %199 = arith.truncf %198 : vector<288x64xf32> to vector<288x64xbf16>
    %c19_189 = arith.constant 19 : index
    %c0_190 = arith.constant 0 : index
    %200 = vector.load %arg13[%c19_189, %c0_190] : memref<326x64xbf16, #tpu.memory_space<vmem>>, vector<288x64xbf16>
    tpu.vector_store %arg13[%c19_189, %c0_190], %199 {strides = array<i32>} : memref<326x64xbf16, #tpu.memory_space<vmem>>, vector<288x64xbf16>,
    %cst_191 = arith.constant 0.000000e+00 : f32
    %201 = vector.broadcast %cst_191 : f32 to vector<288x64xf32>
    %c0_192 = arith.constant 0 : index
    %c0_193 = arith.constant 0 : index
    %202 = vector.load %arg13[%c0_192, %c0_193] : memref<326x64xbf16, #tpu.memory_space<vmem>>, vector<288x64xbf16>
    %c0_194 = arith.constant 0 : index
    %c0_195 = arith.constant 0 : index
    %c0_196 = arith.constant 0 : index
    %203 = vector.load %arg7[%c0_194, %c0_195, %c0_196] : memref<9x64x64xbf16, #tpu.memory_space<vmem>>, vector<1x64x64xbf16>
    %204 = vector.shape_cast %203 : vector<1x64x64xbf16> to vector<64x64xbf16>
    %cst_197 = arith.constant dense<0.000000e+00> : vector<288x64xf32>
    %205 = tpu.matmul %202, %204, %cst_197 {dimension_numbers = #tpu.dot_dimension_numbers<[1], [0], [0], [1], [0, 0, 1, 1], [], []>} : vector<288x64xbf16>, vector<64x64xbf16>, vector<288x64xf32> -> vector<288x64xf32>
    %206 = arith.addf %201, %205 : vector<288x64xf32>
    %c1_198 = arith.constant 1 : index
    %c0_199 = arith.constant 0 : index
    %207 = vector.load %arg13[%c1_198, %c0_199] : memref<326x64xbf16, #tpu.memory_space<vmem>>, vector<288x64xbf16>
    %c1_200 = arith.constant 1 : index
    %c0_201 = arith.constant 0 : index
    %c0_202 = arith.constant 0 : index
    %208 = vector.load %arg7[%c1_200, %c0_201, %c0_202] : memref<9x64x64xbf16, #tpu.memory_space<vmem>>, vector<1x64x64xbf16>
    %209 = vector.shape_cast %208 : vector<1x64x64xbf16> to vector<64x64xbf16>
    %cst_203 = arith.constant dense<0.000000e+00> : vector<288x64xf32>
    %210 = tpu.matmul %207, %209, %cst_203 {dimension_numbers = #tpu.dot_dimension_numbers<[1], [0], [0], [1], [0, 0, 1, 1], [], []>} : vector<288x64xbf16>, vector<64x64xbf16>, vector<288x64xf32> -> vector<288x64xf32>
    %211 = arith.addf %206, %210 : vector<288x64xf32>
    %c2_204 = arith.constant 2 : index
    %c0_205 = arith.constant 0 : index
    %212 = vector.load %arg13[%c2_204, %c0_205] : memref<326x64xbf16, #tpu.memory_space<vmem>>, vector<288x64xbf16>
    %c2_206 = arith.constant 2 : index
    %c0_207 = arith.constant 0 : index
    %c0_208 = arith.constant 0 : index
    %213 = vector.load %arg7[%c2_206, %c0_207, %c0_208] : memref<9x64x64xbf16, #tpu.memory_space<vmem>>, vector<1x64x64xbf16>
    %214 = vector.shape_cast %213 : vector<1x64x64xbf16> to vector<64x64xbf16>
    %cst_209 = arith.constant dense<0.000000e+00> : vector<288x64xf32>
    %215 = tpu.matmul %212, %214, %cst_209 {dimension_numbers = #tpu.dot_dimension_numbers<[1], [0], [0], [1], [0, 0, 1, 1], [], []>} : vector<288x64xbf16>, vector<64x64xbf16>, vector<288x64xf32> -> vector<288x64xf32>
    %216 = arith.addf %211, %215 : vector<288x64xf32>
    %c18_210 = arith.constant 18 : index
    %c0_211 = arith.constant 0 : index
    %217 = vector.load %arg13[%c18_210, %c0_211] : memref<326x64xbf16, #tpu.memory_space<vmem>>, vector<288x64xbf16>
    %c3_212 = arith.constant 3 : index
    %c0_213 = arith.constant 0 : index
    %c0_214 = arith.constant 0 : index
    %218 = vector.load %arg7[%c3_212, %c0_213, %c0_214] : memref<9x64x64xbf16, #tpu.memory_space<vmem>>, vector<1x64x64xbf16>
    %219 = vector.shape_cast %218 : vector<1x64x64xbf16> to vector<64x64xbf16>
    %cst_215 = arith.constant dense<0.000000e+00> : vector<288x64xf32>
    %220 = tpu.matmul %217, %219, %cst_215 {dimension_numbers = #tpu.dot_dimension_numbers<[1], [0], [0], [1], [0, 0, 1, 1], [], []>} : vector<288x64xbf16>, vector<64x64xbf16>, vector<288x64xf32> -> vector<288x64xf32>
    %221 = arith.addf %216, %220 : vector<288x64xf32>
    %c19_216 = arith.constant 19 : index
    %c0_217 = arith.constant 0 : index
    %222 = vector.load %arg13[%c19_216, %c0_217] : memref<326x64xbf16, #tpu.memory_space<vmem>>, vector<288x64xbf16>
    %c4_218 = arith.constant 4 : index
    %c0_219 = arith.constant 0 : index
    %c0_220 = arith.constant 0 : index
    %223 = vector.load %arg7[%c4_218, %c0_219, %c0_220] : memref<9x64x64xbf16, #tpu.memory_space<vmem>>, vector<1x64x64xbf16>
    %224 = vector.shape_cast %223 : vector<1x64x64xbf16> to vector<64x64xbf16>
    %cst_221 = arith.constant dense<0.000000e+00> : vector<288x64xf32>
    %225 = tpu.matmul %222, %224, %cst_221 {dimension_numbers = #tpu.dot_dimension_numbers<[1], [0], [0], [1], [0, 0, 1, 1], [], []>} : vector<288x64xbf16>, vector<64x64xbf16>, vector<288x64xf32> -> vector<288x64xf32>
    %226 = arith.addf %221, %225 : vector<288x64xf32>
    %c20_222 = arith.constant 20 : index
    %c0_223 = arith.constant 0 : index
    %227 = vector.load %arg13[%c20_222, %c0_223] : memref<326x64xbf16, #tpu.memory_space<vmem>>, vector<288x64xbf16>
    %c5_224 = arith.constant 5 : index
    %c0_225 = arith.constant 0 : index
    %c0_226 = arith.constant 0 : index
    %228 = vector.load %arg7[%c5_224, %c0_225, %c0_226] : memref<9x64x64xbf16, #tpu.memory_space<vmem>>, vector<1x64x64xbf16>
    %229 = vector.shape_cast %228 : vector<1x64x64xbf16> to vector<64x64xbf16>
    %cst_227 = arith.constant dense<0.000000e+00> : vector<288x64xf32>
    %230 = tpu.matmul %227, %229, %cst_227 {dimension_numbers = #tpu.dot_dimension_numbers<[1], [0], [0], [1], [0, 0, 1, 1], [], []>} : vector<288x64xbf16>, vector<64x64xbf16>, vector<288x64xf32> -> vector<288x64xf32>
    %231 = arith.addf %226, %230 : vector<288x64xf32>
    %c36_228 = arith.constant 36 : index
    %c0_229 = arith.constant 0 : index
    %232 = vector.load %arg13[%c36_228, %c0_229] : memref<326x64xbf16, #tpu.memory_space<vmem>>, vector<288x64xbf16>
    %c6_230 = arith.constant 6 : index
    %c0_231 = arith.constant 0 : index
    %c0_232 = arith.constant 0 : index
    %233 = vector.load %arg7[%c6_230, %c0_231, %c0_232] : memref<9x64x64xbf16, #tpu.memory_space<vmem>>, vector<1x64x64xbf16>
    %234 = vector.shape_cast %233 : vector<1x64x64xbf16> to vector<64x64xbf16>
    %cst_233 = arith.constant dense<0.000000e+00> : vector<288x64xf32>
    %235 = tpu.matmul %232, %234, %cst_233 {dimension_numbers = #tpu.dot_dimension_numbers<[1], [0], [0], [1], [0, 0, 1, 1], [], []>} : vector<288x64xbf16>, vector<64x64xbf16>, vector<288x64xf32> -> vector<288x64xf32>
    %236 = arith.addf %231, %235 : vector<288x64xf32>
    %c37_234 = arith.constant 37 : index
    %c0_235 = arith.constant 0 : index
    %237 = vector.load %arg13[%c37_234, %c0_235] : memref<326x64xbf16, #tpu.memory_space<vmem>>, vector<288x64xbf16>
    %c7_236 = arith.constant 7 : index
    %c0_237 = arith.constant 0 : index
    %c0_238 = arith.constant 0 : index
    %238 = vector.load %arg7[%c7_236, %c0_237, %c0_238] : memref<9x64x64xbf16, #tpu.memory_space<vmem>>, vector<1x64x64xbf16>
    %239 = vector.shape_cast %238 : vector<1x64x64xbf16> to vector<64x64xbf16>
    %cst_239 = arith.constant dense<0.000000e+00> : vector<288x64xf32>
    %240 = tpu.matmul %237, %239, %cst_239 {dimension_numbers = #tpu.dot_dimension_numbers<[1], [0], [0], [1], [0, 0, 1, 1], [], []>} : vector<288x64xbf16>, vector<64x64xbf16>, vector<288x64xf32> -> vector<288x64xf32>
    %241 = arith.addf %236, %240 : vector<288x64xf32>
    %c38_240 = arith.constant 38 : index
    %c0_241 = arith.constant 0 : index
    %242 = vector.load %arg13[%c38_240, %c0_241] : memref<326x64xbf16, #tpu.memory_space<vmem>>, vector<288x64xbf16>
    %c8_242 = arith.constant 8 : index
    %c0_243 = arith.constant 0 : index
    %c0_244 = arith.constant 0 : index
    %243 = vector.load %arg7[%c8_242, %c0_243, %c0_244] : memref<9x64x64xbf16, #tpu.memory_space<vmem>>, vector<1x64x64xbf16>
    %244 = vector.shape_cast %243 : vector<1x64x64xbf16> to vector<64x64xbf16>
    %cst_245 = arith.constant dense<0.000000e+00> : vector<288x64xf32>
    %245 = tpu.matmul %242, %244, %cst_245 {dimension_numbers = #tpu.dot_dimension_numbers<[1], [0], [0], [1], [0, 0, 1, 1], [], []>} : vector<288x64xbf16>, vector<64x64xbf16>, vector<288x64xf32> -> vector<288x64xf32>
    %246 = arith.addf %241, %245 : vector<288x64xf32>
    %247 = vector.broadcast %0 : vector<288x1xf32> to vector<288x64xf32>
    %248 = arith.mulf %246, %247 : vector<288x64xf32>
    %cst_246 = arith.constant dense<0.000000e+00> : vector<64xf32>
    %249 = vector.multi_reduction <add>, %248, %cst_246 [0] : vector<288x64xf32> to vector<64xf32>
    %250 = vector.shape_cast %249 : vector<64xf32> to vector<1x64xf32>
    %cst_247 = arith.constant 3.906250e-03 : f32
    %251 = vector.broadcast %cst_247 : f32 to vector<1x64xf32>
    %252 = arith.mulf %250, %251 : vector<1x64xf32>
    %253 = vector.broadcast %252 : vector<1x64xf32> to vector<288x64xf32>
    %254 = arith.subf %246, %253 : vector<288x64xf32>
    %255 = arith.mulf %254, %254 : vector<288x64xf32>
    %256 = vector.broadcast %0 : vector<288x1xf32> to vector<288x64xf32>
    %257 = arith.mulf %255, %256 : vector<288x64xf32>
    %cst_248 = arith.constant dense<0.000000e+00> : vector<64xf32>
    %258 = vector.multi_reduction <add>, %257, %cst_248 [0] : vector<288x64xf32> to vector<64xf32>
    %259 = vector.shape_cast %258 : vector<64xf32> to vector<1x64xf32>
    %cst_249 = arith.constant 3.906250e-03 : f32
    %260 = vector.broadcast %cst_249 : f32 to vector<1x64xf32>
    %261 = arith.mulf %259, %260 : vector<1x64xf32>
    %cst_250 = arith.constant 9.99999974E-6 : f32
    %262 = vector.broadcast %cst_250 : f32 to vector<1x64xf32>
    %263 = arith.addf %261, %262 : vector<1x64xf32>
    %264 = math.rsqrt %263 : vector<1x64xf32>
    %265 = vector.broadcast %264 : vector<1x64xf32> to vector<288x64xf32>
    %266 = arith.mulf %254, %265 : vector<288x64xf32>
    %267 = vector.broadcast %1 : vector<1x64xf32> to vector<288x64xf32>
    %268 = arith.mulf %266, %267 : vector<288x64xf32>
    %269 = vector.broadcast %2 : vector<1x64xf32> to vector<288x64xf32>
    %270 = arith.addf %268, %269 : vector<288x64xf32>
    %cst_251 = arith.constant 0.000000e+00 : f32
    %271 = vector.broadcast %cst_251 : f32 to vector<288x64xf32>
    %272 = arith.maximumf %270, %271 : vector<288x64xf32>
    %c0_252 = arith.constant 0 : index
    %c0_253 = arith.constant 0 : index
    %c0_254 = arith.constant 0 : index
    %273 = vector.load %arg11[%c0_252, %c0_253, %c0_254] : memref<1x288x64xf32, #tpu.memory_space<vmem>>, vector<1x288x64xf32>
    %274 = vector.shape_cast %273 : vector<1x288x64xf32> to vector<288x64xf32>
    %275 = vector.shape_cast %272 : vector<288x64xf32> to vector<1x288x64xf32>
    tpu.vector_store %arg11[%c0_252, %c0_253, %c0_254], %275 {strides = array<i32>} : memref<1x288x64xf32, #tpu.memory_space<vmem>>, vector<1x288x64xf32>,
    return
  }
  func.func @transform_0(%arg0: i32) -> (i32, i32, i32) {
    %c0_i32 = arith.constant 0 : i32
    %c0_i32_0 = arith.constant 0 : i32
    %c0_i32_1 = arith.constant 0 : i32
    return %arg0, %c0_i32, %c0_i32_0 : i32, i32, i32
  }
  func.func @transform_1(%arg0: i32) -> (i32, i32, i32) {
    %c0_i32 = arith.constant 0 : i32
    %c0_i32_0 = arith.constant 0 : i32
    %c0_i32_1 = arith.constant 0 : i32
    return %arg0, %c0_i32, %c0_i32_0 : i32, i32, i32
  }
  func.func @transform_2(%arg0: i32) -> (i32, i32, i32) {
    %c0_i32 = arith.constant 0 : i32
    %c0_i32_0 = arith.constant 0 : i32
    %c0_i32_1 = arith.constant 0 : i32
    %c0_i32_2 = arith.constant 0 : i32
    return %c0_i32, %c0_i32_0, %c0_i32_1 : i32, i32, i32
  }
  func.func @transform_3(%arg0: i32) -> (i32, i32) {
    %c0_i32 = arith.constant 0 : i32
    %c0_i32_0 = arith.constant 0 : i32
    %c0_i32_1 = arith.constant 0 : i32
    return %c0_i32, %c0_i32_0 : i32, i32
  }
  func.func @transform_4(%arg0: i32) -> (i32, i32, i32) {
    %c0_i32 = arith.constant 0 : i32
    %c0_i32_0 = arith.constant 0 : i32
    %c0_i32_1 = arith.constant 0 : i32
    %c0_i32_2 = arith.constant 0 : i32
    return %c0_i32, %c0_i32_0, %c0_i32_1 : i32, i32, i32
  }
  func.func @transform_5(%arg0: i32) -> (i32, i32, i32) {
    %c0_i32 = arith.constant 0 : i32
    %c0_i32_0 = arith.constant 0 : i32
    %c0_i32_1 = arith.constant 0 : i32
    %c0_i32_2 = arith.constant 0 : i32
    return %c0_i32, %c0_i32_0, %c0_i32_1 : i32, i32, i32
  }
  func.func @transform_6(%arg0: i32) -> (i32, i32, i32) {
    %c0_i32 = arith.constant 0 : i32
    %c0_i32_0 = arith.constant 0 : i32
    %c0_i32_1 = arith.constant 0 : i32
    %c0_i32_2 = arith.constant 0 : i32
    return %c0_i32, %c0_i32_0, %c0_i32_1 : i32, i32, i32
  }
  func.func @transform_7(%arg0: i32) -> (i32, i32) {
    %c0_i32 = arith.constant 0 : i32
    %c0_i32_0 = arith.constant 0 : i32
    %c0_i32_1 = arith.constant 0 : i32
    return %c0_i32, %c0_i32_0 : i32, i32
  }
  func.func @transform_8(%arg0: i32) -> (i32, i32) {
    %c0_i32 = arith.constant 0 : i32
    %c0_i32_0 = arith.constant 0 : i32
    %c0_i32_1 = arith.constant 0 : i32
    return %c0_i32, %c0_i32_0 : i32, i32
  }
  func.func @transform_9(%arg0: i32) -> (i32, i32) {
    %c0_i32 = arith.constant 0 : i32
    %c0_i32_0 = arith.constant 0 : i32
    %c0_i32_1 = arith.constant 0 : i32
    return %c0_i32, %c0_i32_0 : i32, i32
  }
  func.func @transform_10(%arg0: i32) -> (i32, i32, i32) {
    %c0_i32 = arith.constant 0 : i32
    %c0_i32_0 = arith.constant 0 : i32
    %c0_i32_1 = arith.constant 0 : i32
    return %arg0, %c0_i32, %c0_i32_0 : i32, i32, i32
  }
}

</mosaic_0001>

<bundles_post_ra>
// kernel: up_forward.1
= control target key start
LH: loop header
LB: loop body
LE: loop exit
PB: predicated region body
PF: predicated region fallthrough
CT: control target
= control target key end

     0   :  { %s22708_s13 = smov 0   ;;  %s28548_s0 = inlined_call_operand.vmem [shape: bf16[2,326,64], index: 0, kind: input, shape index: {}]   ;;  %s28549_s1 = inlined_call_operand.vmem [shape: bf16[2,326,32], index: 1, kind: input, shape index: {}]   ;;  %s28550_s2 = inlined_call_operand.vmem [shape: bf16[9,64,32], index: 2, kind: input, shape index: {}]   ;;  %s28551_s3 = inlined_call_operand.vmem [shape: f32[1,32], index: 3, kind: input, shape index: {}]   ;;  %s28552_s4 = inlined_call_operand.vmem [shape: bf16[9,32,64], index: 4, kind: input, shape index: {}]   ;;  %s28553_s5 = inlined_call_operand.vmem [shape: bf16[9,32,64], index: 5, kind: input, shape index: {}]   ;;  %s28554_s6 = inlined_call_operand.vmem [shape: bf16[9,64,64], index: 6, kind: input, shape index: {}]   ;;  %s28555_s7 = inlined_call_operand.vmem [shape: f32[1,64], index: 7, kind: input, shape index: {}]   ;;  %s28556_s8 = inlined_call_operand.vmem [shape: f32[1,64], index: 8, kind: input, shape index: {}]   ;;  %s28557_s9 = inlined_call_operand.vmem [shape: f32[288,1], index: 9, kind: input, shape index: {}]   ;;  %s28558_s10 = inlined_call_operand.vmem [shape: f32[2,288,64], index: 10, kind: output, shape index: {}]  }
   0x1 LB: > { %s17433_s14 = sadd.s32 4294967295, %s22650_s13   ;;  %p17437_p0 = scmp.ge.s32.totalorder %s22650_s13, 1  ;;  %s22650_s13 = sphi %s22708_s13, %s20_s13  }
   0x2   : > { %p322_p1 = scmp.lt.s32.totalorder %s22650_s13, 3 }
   0x4   : > { %p323_p2 = pnand %p17437_p0, %p322_p1 }
   0x6   : > { %326 = sbr.rel (%p323_p2) target bundleno = 3691 (0xe6b), region = 60 }
   0xd   : > { %v22255_v0 = vld [vmem:[%s28550_s2 + $0x20] sm:$0xff]   ;;  %p365_p3 = scmp.lt.s32.totalorder %s17433_s14, 1  ;;  %v22256_v1 = vld [vmem:[%s28550_s2 + $0x28] sm:$0xff]   ;;  %v22257_v2 = vld [vmem:[%s28550_s2 + $0x30] sm:$0xff]   ;;  %vm825_vm0 = vcmask 523264   ;;  %vm1307_vm2 = vcmask 1046528  }
   0xe   : > { %19542 = vmatprep.subr.bf16.mxu0 %v22255_v0  ;;  %v22258_v3 = vld [vmem:[%s28550_s2 + $0x38] sm:$0xff]   ;;  %v22262_v13 = vld [vmem:[%s28550_s2] sm:$0xff]   ;;  %vm652_vm1 = vsmask.f32 7424  ;;  %v22267_v29 = vld [vmem:[%s28550_s2 + $0x8] sm:$0xff]   ;;  %vm2591_vm4 = vcmask 1045504  }
   0xf   : > { %s29136_s14 = smov (!%p365_p3, %s17433_s14), 1  ;;  %19543 = vmatpush3.bf16.msra.mxu0 %v22255_v0  ;;  %v22272_v41 = vld [vmem:[%s28550_s2 + $0x10] sm:$0xff]   ;;  %v22277_v51 = vld [vmem:[%s28550_s2 + $0x18] sm:$0xff]   ;;  %v22824_v63 = vld [vmem:[%s28550_s2 + $0x40] sm:$0xff]   ;;  %vm2116_vm3 = vsmask.f32 6400 }
  0x10   : > { %19544 = vmatprep.subr.bf16.mxu0 %v22256_v1  ;;  %s22242_s21 = smul.u32 164, %s29136_s14  ;;  %vm3400_vm5 = vsmask.f32 5376  ;;  %vm3875_vm6 = vcmask 1044480   ;;  %vm419_vm7 = vcmask 257024   ;;  %vm4970_vm8 = vcmask 257025  }
  0x11   : > { %vm4971_vm9 = vsmask.f32 7942  ;;  %vm4571_vm10 = vsmask.f32 1280  ;;  %vm4572_vm11 = vsmask.f32 5392 }
  0x12   : > { %s22736_s26 = scalar_lea.vmem %s28548_s0, %s22242_s21  ;;  %vm23809_vm12 = vmand %vm4970_vm8, %vm4971_vm9  ;;  %vm5315_vm14 = vcmask 261120   ;;  %vm5011_vm15 = vcmask 254976   ;;  %s25010_s28 = scalar_lea.vmem %s28549_s1, %s22242_s21 }
  0x13   : > { %19545 = vmatpush3.bf16.msra.mxu0 %v22256_v1  ;;  %v505_v4 = vld [vmem:[%s22736_s26] sm:$0xf]  ;;  %v22740_v5 = vld [vmem:[%s22736_s26 + $0x4] sm:$0xf]  ;;  %v22746_v7 = vld [vmem:[%s22736_s26 + $0x8] sm:$0xff]   ;;  %s22243_s18 = smul.u32 288, %s29136_s14 }
  0x14   : > { %19546 = vmatprep.subr.bf16.mxu0 %v22257_v2  ;;  %v22743_v6 = vcombine.low %v505_v4, %v22740_v5  ;;  %v22749_v8 = vld [vmem:[%s22736_s26 + $0x10] sm:$0xff]   ;;  %v661_v11 = vshll.u32 %v22746_v7, 16  ;;  %v665_v12 = vshrl.u32 %v22746_v7, 16  ;;  %v22760_v15 = vld [vmem:[%s22736_s26 + $0x18] sm:$0xff]   ;;  %v22764_v17 = vld [vmem:[%s22736_s26 + $0x20] sm:$0xff]  }
  0x15   : > { %v669_v14 = vshll.u32 %v22749_v8, 16  ;;  %v673_v16 = vshrl.u32 %v22749_v8, 16  ;;  %v677_v21 = vshll.u32 %v22760_v15, 16  ;;  %v685_v24 = vshll.u32 %v22764_v17, 16  ;;  %v22769_v25 = vld [vmem:[%s22736_s26 + $0x28] sm:$0xff]   ;;  %v22783_v36 = vld [vmem:[%s22736_s26 + $0x30] sm:$0xff]   ;;  %vm23816_vm13 = vmor %vm4571_vm10, %vm4572_vm11  ;;  %s28439_s20 = scalar_lea.vmem %s28558_s10, %s22243_s18 }
  0x16   : > { %v654_v9 = vshrl.u32 %v22743_v6, 16  ;;  %v656_v10 = vshll.u32 %v22743_v6, 16  ;;  %v663_v19 = vrot.slane %v661_v11, 1  ;;  %v681_v28 = vshrl.u32 %v22760_v15, 16  ;;  %v22787_v40 = vld [vmem:[%s22736_s26 + $0x38] sm:$0xff]   ;;  %v22800_v49 = vld [vmem:[%s22736_s26 + $0x40] sm:$0xff]   ;;  %vm5012_vm8 = vmand %vm5011_vm15, %vm4571_vm10 }
  0x17   : > { %19547 = vmatpush3.bf16.msra.mxu0 %v22257_v2  ;;  %v671_v20 = vrot.slane %v669_v14, 1  ;;  %v679_v27 = vrot.slane %v677_v21, 1  ;;  %v689_v32 = vshrl.u32 %v22764_v17, 16  ;;  %v693_v33 = vshll.u32 %v22769_v25, 16  ;;  %v22807_v54 = vld [vmem:[%s22736_s26 + $0x48] sm:$0xff]   ;;  %v22810_v55 = vld [vmem:[%s22736_s26 + $0x50] sm:$0xff]  }
  0x18   : > { %19548 = vmatprep.subr.bf16.mxu0 %v22258_v3  ;;  %v658_v18 = vrot.slane %v656_v10, 1  ;;  %v667_v23 = vor.u32 %v665_v12, %v663_v19  ;;  %v687_v35 = vrot.slane %v685_v24, 1  ;;  %v701_v42 = vshll.u32 %v22783_v36, 16  ;;  %v22819_v62 = vld [vmem:[%s22736_s26 + $0x58] sm:$0xff]   ;;  %v22828_v1 = vld [vmem:[%s22736_s26 + $0x60] sm:$0xff]  }
  0x19   : > { %v675_v26 = vor.u32 %v673_v16, %v671_v20  ;;  %v683_v37 = vor.u32 %v681_v28, %v679_v27  ;;  %v695_v39 = vrot.slane %v693_v33, 1  ;;  %v697_v44 = vshrl.u32 %v22769_v25, 16 }
  0x1a   : > { %v659_v22 = vor.u32 %v658_v18, %v654_v9  ;;  %v672_v31 = vsel %vm652_vm1, %v667_v23, %v671_v20  ;;  %v691_v38 = vor.u32 %v689_v32, %v687_v35  ;;  %v705_v46 = vshrl.u32 %v22783_v36, 16  ;;  %v22843_v20 = vld [vmem:[%s22736_s26 + $0x70] sm:$0xff]   ;;  %v22853_v32 = vld [vmem:[%s22736_s26 + $0x78] sm:$0xff]  }
  0x1b   : > { %19549 = vmatpush3.bf16.msra.mxu0 %v22258_v3  ;;  %v680_v34 = vsel %vm652_vm1, %v675_v26, %v679_v27  ;;  %v688_v43 = vsel %vm652_vm1, %v683_v37, %v687_v35  ;;  %v709_v47 = vshll.u32 %v22787_v40, 16  ;;  %v703_v48 = vrot.slane %v701_v42, 1  ;;  %v22832_v3 = vld [vmem:[%s22736_s26 + $0x68] sm:$0xff]  }
  0x1c   : > { %v664_v30 = vsel %vm652_vm1, %v659_v22, %v663_v19  ;;  %19586 = vmatprep.subr.bf16.mxu0 %v22262_v13  ;;  %v696_v45 = vsel %vm652_vm1, %v691_v38, %v695_v39  ;;  %v699_v50 = vor.u32 %v697_v44, %v695_v39  ;;  %v717_v56 = vshll.u32 %v22800_v49, 16  ;;  %v22866_v44 = vld [vmem:[%s22736_s26 + $0x88] sm:$0xff]  }
  0x1d   : > { %19550 = vmatprep.mubr.msk.bf16.mxu0 %vm825_vm0, %v664_v30  ;;  %v707_v52 = vor.u32 %v705_v46, %v703_v48  ;;  %v711_v53 = vrot.slane %v709_v47, 1  ;;  %v713_v58 = vshrl.u32 %v22787_v40, 16  ;;  %v721_v60 = vshrl.u32 %v22800_v49, 16 }
  0x1e   : > { %19551 = vmatmul.mubr.msk.bf16.vlgmr.msra.gmra.mrb[0].mxu0 %vm825_vm0, %v672_v31  ;;  %v704_v57 = vsel %vm652_vm1, %v699_v50, %v703_v48  ;;  %v725_v61 = vshll.u32 %v22807_v54, 16  ;;  %v733_v0 = vshll.u32 %v22810_v55, 16  ;;  %v719_v2 = vrot.slane %v717_v56, 1  ;;  %v22876_v56 = vld [vmem:[%s22736_s26 + $0x90] ss:$0 sps:$4 sm:$0x11]  }
  0x1f   : > { %19587 = vmatpush3.bf16.msra.mxu0 %v22262_v13  ;;  %19554 = vmatprep.mubr.msk.bf16.mxu0 %vm825_vm0, %v680_v34  ;;  %v712_v59 = vsel %vm652_vm1, %v707_v52, %v711_v53  ;;  %v715_v4 = vor.u32 %v713_v58, %v711_v53  ;;  %v741_v11 = vshll.u32 %v22819_v62, 16  ;;  %v729_v12 = vshrl.u32 %v22807_v54, 16 }
  0x20   : > { %19588 = vmatprep.subr.bf16.mxu0 %v22267_v29  ;;  %v723_v9 = vor.u32 %v721_v60, %v719_v2  ;;  %v727_v10 = vrot.slane %v725_v61, 1  ;;  %v735_v13 = vrot.slane %v733_v0, 1  ;;  %v737_v14 = vshrl.u32 %v22810_v55, 16 }
  0x21   : > { %v745_v16 = vshrl.u32 %v22819_v62, 16  ;;  %v749_v18 = vshll.u32 %v22828_v1, 16  ;;  %v757_v19 = vshll.u32 %v22832_v3, 16  ;;  %v720_v21 = vsel %vm652_vm1, %v715_v4, %v719_v2 }
  0x22   : > { %v728_v22 = vsel %vm652_vm1, %v723_v9, %v727_v10  ;;  %v743_v23 = vrot.slane %v741_v11, 1  ;;  %v753_v24 = vshrl.u32 %v22828_v1, 16  ;;  %v761_v27 = vshrl.u32 %v22832_v3, 16 }
  0x23   : > { %19589 = vmatpush3.bf16.msra.mxu0 %v22267_v29  ;;  %v751_v26 = vrot.slane %v749_v18, 1  ;;  %v731_v28 = vor.u32 %v729_v12, %v727_v10  ;;  %v759_v29 = vrot.slane %v757_v19, 1  ;;  %v765_v30 = vshll.u32 %v22843_v20, 16  ;;  %v1294_v18 = vld [vmem:[%s22736_s26] sm:$0xe] }
  0x24   : > { %19590 = vmatprep.subr.bf16.mxu0 %v22272_v41  ;;  %v739_v31 = vor.u32 %v737_v14, %v735_v13  ;;  %v769_v37 = vshrl.u32 %v22843_v20, 16  ;;  %v747_v38 = vor.u32 %v745_v16, %v743_v23  ;;  %v773_v39 = vshll.u32 %v22853_v32, 16  ;;  %v22283_v14 = vld [vmem:[%s28550_s2 + $0x48] sm:$0xff]   ;;  %v22284_v16 = vld [vmem:[%s28550_s2 + $0x50] sm:$0xff]  }
  0x25   : > { %v736_v33 = vsel %vm652_vm1, %v731_v28, %v735_v13  ;;  %v767_v35 = vrot.slane %v765_v30, 1  ;;  %v755_v42 = vor.u32 %v753_v24, %v751_v26  ;;  %v763_v50 = vor.u32 %v761_v27, %v759_v29 }
  0x26   : > { %19555 = vmatmul.mubr.msk.bf16.gmra.mrb[4].mxu0 %vm825_vm0, %v688_v43  ;;  %v744_v34 = vsel %vm652_vm1, %v739_v31, %v743_v23  ;;  %v22863_v43 = vld [vmem:[%s22736_s26 + $0x80] sm:$0xff]   ;;  %v789_v52 = vshll.u32 %v22866_v44, 16  ;;  %v793_v60 = vshrl.u32 %v22866_v44, 16  ;;  %v797_v2 = vshll.u32 %v22876_v56, 16  ;;  %v22290_v31 = vld [vmem:[%s28550_s2 + $0x78] sm:$0xff]  }
  0x27   : > { %19558 = vmatprep.mubr.msk.bf16.mxu0 %vm825_vm0, %v696_v45  ;;  %19591 = vmatpush3.bf16.msra.mxu0 %v22272_v41  ;;  %v777_v41 = vshrl.u32 %v22853_v32, 16  ;;  %v752_v45 = vsel %vm652_vm1, %v747_v38, %v751_v26  ;;  %v760_v46 = vsel %vm652_vm1, %v755_v42, %v759_v29  ;;  %v781_v47 = vshll.u32 %v22863_v43, 16 }
  0x28   : > { %19592 = vmatprep.subr.bf16.mxu0 %v22277_v51  ;;  %v785_v48 = vshrl.u32 %v22863_v43, 16  ;;  %v771_v53 = vor.u32 %v769_v37, %v767_v35  ;;  %v791_v0 = vrot.slane %v789_v52, 1  ;;  %v799_v12 = vrot.slane %v797_v2, 1  ;;  %v23002_v52 = vld [vmem:[%s22736_s26 + $0xc] sm:$0xf] }
  0x29   : > { %v17520_v19 = vcombine.low %v1294_v18, %v22740_v5  ;;  %v1311_v24 = vrot.slane %v22749_v8, 1  ;;  %v1313_v5 = vrot.slane %v22760_v15, 1  ;;  %v1315_v28 = vrot.slane %v22764_v17, 1 }
  0x2a   : > { %v795_v11 = vor.u32 %v793_v60, %v791_v0  ;;  %v1317_v29 = vrot.slane %v22769_v25, 1  ;;  %v1325_v37 = vrot.slane %v22807_v54, 1  ;;  %v23019_v60 = vld [vmem:[%s22736_s26 + $0x18] sm:$0xff]   ;;  %vm462_vm11 = vcmask 519168  }
  0x2b   : > { %19593 = vmatpush3.bf16.msra.mxu0 %v22277_v51  ;;  %v775_v51 = vrot.slane %v773_v39, 1  ;;  %v1314_v27 = vsel %vm1307_vm2, %v1311_v24, %v1313_v5  ;;  %v1327_v39 = vrot.slane %v22810_v55, 1  ;;  %v1778_v2 = vrot.slane %v23019_v60, 1 }
  0x2c   : > { %19630 = vmatprep.subr.bf16.mxu0 %v22824_v63  ;;  %v800_v13 = vsel %vm652_vm1, %v795_v11, %v799_v12  ;;  %v1318_v30 = vsel %vm1307_vm2, %v1315_v28, %v1317_v29  ;;  %v23035_v11 = vld [vmem:[%s22736_s26 + $0x30] sm:$0xff]   ;;  %v22299_v12 = vld [vmem:[%s28550_s2 + $0x88] sm:$0xff]  }
  0x2d   : > { %v776_v58 = vsel %vm652_vm1, %v771_v53, %v775_v51  ;;  %v779_v61 = vor.u32 %v777_v41, %v775_v51  ;;  %v1329_v41 = vrot.slane %v22819_v62, 1  ;;  %v1328_v42 = vsel %vm1307_vm2, %v1325_v37, %v1327_v39  ;;  %v1636_v51 = vld [vmem:[%s22736_s26 + $0x8] sm:$0xe] }
  0x2e   : > { %19559 = vmatmul.mubr.msk.bf16.gmra.mrb[8].mxu0 %vm825_vm0, %v704_v57  ;;  %v768_v57 = vsel %vm652_vm1, %v763_v50, %v767_v35  ;;  %v23007_v53 = vcombine.low %v1636_v51, %v23002_v52 }
  0x2f   : > { %19562 = vmatprep.mubr.msk.bf16.mxu0 %vm825_vm0, %v712_v59  ;;  %v783_v59 = vrot.slane %v781_v47, 1  ;;  %v1337_v47 = vrot.slane %v22853_v32, 1 }
  0x31   : > { %v787_v4 = vor.u32 %v785_v48, %v783_v59  ;;  %v784_v9 = vsel %vm652_vm1, %v779_v61, %v783_v59 }
  0x33   : > { %v792_v10 = vsel %vm652_vm1, %v787_v4, %v791_v0  ;;  %v23023_v0 = vld [vmem:[%s22736_s26 + $0x20] sm:$0xff]  }
  0x36   : > { %19563 = vmatmul.mubr.msk.bf16.gmra.mrb[12].mxu0 %vm825_vm0, %v720_v21  ;;  %v1308_v21 = vrot.slane %v17520_v19, 1  ;;  %v23053_v19 = vld [vmem:[%s22736_s26 + $0x40] sm:$0xff]  }
  0x37   : > { %19566 = vmatprep.mubr.msk.bf16.mxu0 %vm825_vm0, %v728_v22  ;;  %v1309_v22 = vrot.slane %v22746_v7, 1 }
  0x39   : > { %v1310_v23 = vsel %vm1307_vm2, %v1308_v21, %v1309_v22  ;;  %v1312_v26 = vsel %vm1307_vm2, %v1309_v22, %v1311_v24  ;;  %v22309_v21 = vld [vmem:[%s28550_s2 + $0x98] sm:$0xff]   ;;  %v23065_v24 = vld [vmem:[%s28550_s2 + $0xa0] sm:$0xff]  }
  0x3e   : > { %19567 = vmatmul.mubr.msk.bf16.gmra.mrb[16].mxu0 %vm825_vm0, %v736_v33  ;;  %v22294_v33 = vld [vmem:[%s28550_s2 + $0x80] sm:$0xff]  }
  0x3f   : > { %19570 = vmatprep.mubr.msk.bf16.mxu0 %vm825_vm0, %v744_v34 }
  0x46   : > { %19571 = vmatmul.mubr.msk.bf16.gmra.mrb[20].mxu0 %vm825_vm0, %v752_v45  ;;  %v1330_v45 = vsel %vm1307_vm2, %v1327_v39, %v1329_v41  ;;  %v23106_v39 = vld [vmem:[%s22736_s26 + $0x78] sm:$0xff]  }
  0x47   : > { %19574 = vmatprep.mubr.msk.bf16.mxu0 %vm825_vm0, %v760_v46 }
  0x4e   : > { %19575 = vmatmul.mubr.msk.bf16.gmra.mrb[24].mxu0 %vm825_vm0, %v768_v57  ;;  %v23010_v57 = vld [vmem:[%s22736_s26 + $0x10] sm:$0xff]  }
  0x4f   : > { %19578 = vmatprep.mubr.msk.bf16.mxu0 %vm825_vm0, %v776_v58  ;;  %v1776_v58 = vrot.slane %v23010_v57, 1  ;;  %v2129_v51 = vshll.u32 %v23010_v57, 16 }
  0x51   : > { %v1779_v4 = vsel %vm1307_vm2, %v1776_v58, %v1778_v2 }
  0x56   : > { %19579 = vmatmul.mubr.msk.bf16.gmra.mrb[28].mxu0 %vm825_vm0, %v784_v9  ;;  %v23031_v9 = vld [vmem:[%s22736_s26 + $0x28] sm:$0xff]  }
  0x57   : > { %19582 = vmatprep.mubr.msk.bf16.mxu0 %vm825_vm0, %v792_v10 }
  0x5e   : > { %19583 = vmatmul.mubr.msk.bf16.gmra.mrb[32].mxu0 %vm825_vm0, %v800_v13  ;;  %v1782_v13 = vrot.slane %v23031_v9, 1 }
  0x5f   : > { %19594 = vmatprep.mubr.msk.bf16.mxu0 %vm825_vm0, %v22743_v6  ;;  %v22285_v6 = vld [vmem:[%s28550_s2 + $0x58] sm:$0xff]  }
  0x66   : > { %19595 = vmatmul.mubr.msk.bf16.vlgmr.msra.gmra.mrb[0].mxu0 %vm825_vm0, %v22746_v7  ;;  %v22288_v7 = vld [vmem:[%s28550_s2 + $0x68] sm:$0xff]  }
  0x67   : > { %19631 = vmatpush3.bf16.msra.mxu0 %v22824_v63  ;;  %19598 = vmatprep.mubr.msk.bf16.mxu0 %vm825_vm0, %v22749_v8  ;;  %v22287_v63 = vld [vmem:[%s28550_s2 + $0x60] sm:$0xff]   ;;  %v22289_v8 = vld [vmem:[%s28550_s2 + $0x70] sm:$0xff]  }
  0x68   : > { %19632 = vmatprep.subr.bf16.mxu0 %v22283_v14 }
  0x6b   : > { %19633 = vmatpush3.bf16.msra.mxu0 %v22283_v14  ;;  %v1784_v14 = vrot.slane %v23035_v11, 1 }
  0x6c   : > { %19634 = vmatprep.subr.bf16.mxu0 %v22284_v16 }
  0x6d   : > { %v1785_v18 = vsel %vm1307_vm2, %v1782_v13, %v1784_v14 }
  0x6e   : > { %19599 = vmatmul.mubr.msk.bf16.gmra.mrb[4].mxu0 %vm825_vm0, %v22760_v15  ;;  %v1316_v15 = vsel %vm1307_vm2, %v1313_v5, %v1315_v28 }
  0x6f   : > { %19602 = vmatprep.mubr.msk.bf16.mxu0 %vm825_vm0, %v22764_v17  ;;  %19635 = vmatpush3.bf16.msra.mxu0 %v22284_v16  ;;  %v1319_v17 = vrot.slane %v22783_v36, 1  ;;  %v22304_v16 = vld [vmem:[%s28550_s2 + $0x90] sm:$0xff]  }
  0x70   : > { %19636 = vmatprep.subr.bf16.mxu0 %v22285_v6 }
  0x71   : > { %v1320_v34 = vsel %vm1307_vm2, %v1317_v29, %v1319_v17 }
  0x73   : > { %19637 = vmatpush3.bf16.msra.mxu0 %v22285_v6 }
  0x74   : > { %19674 = vmatprep.subr.bf16.mxu0 %v22287_v63 }
  0x76   : > { %19603 = vmatmul.mubr.msk.bf16.gmra.mrb[8].mxu0 %vm825_vm0, %v22769_v25  ;;  %v1321_v25 = vrot.slane %v22787_v40, 1 }
  0x77   : > { %19606 = vmatprep.mubr.msk.bf16.mxu0 %vm825_vm0, %v22783_v36  ;;  %v1323_v36 = vrot.slane %v22800_v49, 1 }
  0x78   : > { %v1322_v35 = vsel %vm1307_vm2, %v1319_v17, %v1321_v25 }
  0x79   : > { %v1326_v38 = vsel %vm1307_vm2, %v1323_v36, %v1325_v37 }
  0x7e   : > { %19607 = vmatmul.mubr.msk.bf16.gmra.mrb[12].mxu0 %vm825_vm0, %v22787_v40  ;;  %v1324_v40 = vsel %vm1307_vm2, %v1321_v25, %v1323_v36  ;;  %v23098_v36 = vld [vmem:[%s22736_s26 + $0x70] sm:$0xff]  }
  0x7f   : > { %19610 = vmatprep.mubr.msk.bf16.mxu0 %vm825_vm0, %v22800_v49  ;;  %v1331_v49 = vrot.slane %v22828_v1, 1 }
  0x81   : > { %v1332_v46 = vsel %vm1307_vm2, %v1329_v41, %v1331_v49 }
  0x86   : > { %19611 = vmatmul.mubr.msk.bf16.gmra.mrb[16].mxu0 %vm825_vm0, %v22807_v54  ;;  %v1333_v54 = vrot.slane %v22832_v3, 1 }
  0x87   : > { %19614 = vmatprep.mubr.msk.bf16.mxu0 %vm825_vm0, %v22810_v55 }
  0x88   : > { %v1334_v55 = vsel %vm1307_vm2, %v1331_v49, %v1333_v54 }
  0x8e   : > { %19615 = vmatmul.mubr.msk.bf16.gmra.mrb[20].mxu0 %vm825_vm0, %v22819_v62  ;;  %v1335_v62 = vrot.slane %v22843_v20, 1 }
  0x8f   : > { %19618 = vmatprep.mubr.msk.bf16.mxu0 %vm825_vm0, %v22828_v1  ;;  %v1339_v1 = vrot.slane %v22863_v43, 1 }
  0x90   : > { %v1336_v48 = vsel %vm1307_vm2, %v1333_v54, %v1335_v62  ;;  %v1338_v50 = vsel %vm1307_vm2, %v1335_v62, %v1337_v47 }
  0x96   : > { %19619 = vmatmul.mubr.msk.bf16.gmra.mrb[24].mxu0 %vm825_vm0, %v22832_v3  ;;  %v1341_v3 = vrot.slane %v22866_v44, 1 }
  0x97   : > { %19622 = vmatprep.mubr.msk.bf16.mxu0 %vm825_vm0, %v22843_v20  ;;  %v1340_v20 = vsel %vm1307_vm2, %v1337_v47, %v1339_v1 }
  0x9e   : > { %19623 = vmatmul.mubr.msk.bf16.gmra.mrb[28].mxu0 %vm825_vm0, %v22853_v32  ;;  %v1342_v32 = vsel %vm1307_vm2, %v1339_v1, %v1341_v3  ;;  %v2121_v1 = vshll.u32 %v23007_v53, 16 }
  0x9f   : > { %19626 = vmatprep.mubr.msk.bf16.mxu0 %vm825_vm0, %v22863_v43  ;;  %v1343_v43 = vrot.slane %v22876_v56, 1  ;;  %v1780_v56 = vrot.slane %v23023_v0, 1 }
  0xa1   : > { %v1344_v59 = vsel %vm1307_vm2, %v1341_v3, %v1343_v43  ;;  %v1781_v10 = vsel %vm1307_vm2, %v1778_v2, %v1780_v56  ;;  %v1783_v6 = vsel %vm1307_vm2, %v1780_v56, %v1782_v13  ;;  %v2126_v3 = vshrl.u32 %v23010_v57, 16  ;;  %v22313_v43 = vld [vmem:[%s22736_s26 + $0x98] ss:$0 sps:$4 sm:$0x11]  }
  0xa2   : > { %v1810_v2 = vrot.slane %v22313_v43, 1  ;;  %v2138_v56 = vshll.u32 %v23019_v60, 16  ;;  %v2147_v13 = vshll.u32 %v23023_v0, 16 }
  0xa6   : > { %19627 = vmatmul.mubr.msk.bf16.gmra.mrb[32].mxu0 %vm825_vm0, %v22866_v44  ;;  %v1775_v44 = vrot.slane %v23007_v53, 1 }
  0xa7   : > { %19638 = vmatprep.mubr.msk.bf16.mxu0 %vm825_vm0, %v1310_v23  ;;  %v1788_v23 = vrot.slane %v23053_v19, 1 }
  0xa8   : > { %v1777_v61 = vsel %vm1307_vm2, %v1775_v44, %v1776_v58  ;;  %v2123_v58 = vrot.slane %v2121_v1, 2 }
  0xae   : > { %19639 = vmatmul.mubr.msk.bf16.vlgmr.msra.gmra.mrb[0].mxu0 %vm825_vm0, %v1312_v26  ;;  %v23069_v26 = vld [vmem:[%s22736_s26 + $0x48] sm:$0xff]  }
  0xaf   : > { %19675 = vmatpush3.bf16.msra.mxu0 %v22287_v63  ;;  %19642 = vmatprep.mubr.msk.bf16.mxu0 %vm825_vm0, %v1314_v27  ;;  %v23049_v63 = vld [vmem:[%s22736_s26 + $0x38] sm:$0xff]   ;;  %v1790_v28 = vrot.slane %v23069_v26, 1  ;;  %v2189_v43 = vshrl.u32 %v23069_v26, 16 }
  0xb0   : > { %19676 = vmatprep.subr.bf16.mxu0 %v22288_v7  ;;  %v1786_v22 = vrot.slane %v23049_v63, 1 }
  0xb2   : > { %v1787_v5 = vsel %vm1307_vm2, %v1784_v14, %v1786_v22  ;;  %v1789_v27 = vsel %vm1307_vm2, %v1786_v22, %v1788_v23  ;;  %v2149_v22 = vrot.slane %v2147_v13, 2 }
  0xb3   : > { %19677 = vmatpush3.bf16.msra.mxu0 %v22288_v7  ;;  %v23073_v7 = vld [vmem:[%s22736_s26 + $0x50] sm:$0xff]  }
  0xb4   : > { %19678 = vmatprep.subr.bf16.mxu0 %v22289_v8  ;;  %v1792_v29 = vrot.slane %v23073_v7, 1 }
  0xb6   : > { %19643 = vmatmul.mubr.msk.bf16.gmra.mrb[4].mxu0 %vm825_vm0, %v1316_v15  ;;  %v23082_v15 = vld [vmem:[%s22736_s26 + $0x58] sm:$0xff]  }
  0xb7   : > { %19646 = vmatprep.mubr.msk.bf16.mxu0 %vm825_vm0, %v1318_v30  ;;  %19679 = vmatpush3.bf16.msra.mxu0 %v22289_v8  ;;  %v1791_v8 = vsel %vm1307_vm2, %v1788_v23, %v1790_v28  ;;  %v1793_v30 = vsel %vm1307_vm2, %v1790_v28, %v1792_v29  ;;  %v1794_v17 = vrot.slane %v23082_v15, 1 }
  0xb8   : > { %19680 = vmatprep.subr.bf16.mxu0 %v22290_v31 }
  0xbb   : > { %19681 = vmatpush3.bf16.msra.mxu0 %v22290_v31  ;;  %v23086_v31 = vld [vmem:[%s22736_s26 + $0x60] sm:$0xff]  }
  0xbc   : > { %19718 = vmatprep.subr.bf16.mxu0 %v22294_v33  ;;  %v1796_v25 = vrot.slane %v23086_v31, 1 }
  0xbe   : > { %19647 = vmatmul.mubr.msk.bf16.gmra.mrb[8].mxu0 %vm825_vm0, %v1320_v34  ;;  %v23094_v34 = vld [vmem:[%s22736_s26 + $0x68] sm:$0xff]  }
  0xbf   : > { %19650 = vmatprep.mubr.msk.bf16.mxu0 %vm825_vm0, %v1322_v35  ;;  %v1797_v35 = vsel %vm1307_vm2, %v1794_v17, %v1796_v25  ;;  %v1798_v37 = vrot.slane %v23094_v34, 1 }
  0xc6   : > { %19651 = vmatmul.mubr.msk.bf16.gmra.mrb[12].mxu0 %vm825_vm0, %v1324_v40  ;;  %v1800_v40 = vrot.slane %v23098_v36, 1 }
  0xc7   : > { %19654 = vmatprep.mubr.msk.bf16.mxu0 %vm825_vm0, %v1326_v38  ;;  %v1799_v38 = vsel %vm1307_vm2, %v1796_v25, %v1798_v37 }
  0xc8   : > { %v1801_v41 = vsel %vm1307_vm2, %v1798_v37, %v1800_v40 }
  0xce   : > { %19655 = vmatmul.mubr.msk.bf16.gmra.mrb[16].mxu0 %vm825_vm0, %v1328_v42  ;;  %v23110_v42 = vld [vmem:[%s22736_s26 + $0x80] sm:$0xff]  }
  0xcf   : > { %19658 = vmatprep.mubr.msk.bf16.mxu0 %vm825_vm0, %v1330_v45  ;;  %v1802_v45 = vrot.slane %v23106_v39, 1  ;;  %v1804_v49 = vrot.slane %v23110_v42, 1 }
  0xd1   : > { %v1803_v54 = vsel %vm1307_vm2, %v1800_v40, %v1802_v45  ;;  %v1805_v62 = vsel %vm1307_vm2, %v1802_v45, %v1804_v49  ;;  %v22315_v40 = vld [vmem:[%s28550_s2 + $0xa8] sm:$0xff]   ;;  %v2174_v45 = vshll.u32 %v23049_v63, 16 }
  0xd6   : > { %19659 = vmatmul.mubr.msk.bf16.gmra.mrb[20].mxu0 %vm825_vm0, %v1332_v46  ;;  %v23118_v46 = vld [vmem:[%s22736_s26 + $0x88] sm:$0xff]  }
  0xd7   : > { %19662 = vmatprep.mubr.msk.bf16.mxu0 %vm825_vm0, %v1334_v55  ;;  %v23121_v55 = vld [vmem:[%s22736_s26 + $0x90] sm:$0xff]   ;;  %v1806_v47 = vrot.slane %v23118_v46, 1 }
  0xde   : > { %19663 = vmatmul.mubr.msk.bf16.gmra.mrb[24].mxu0 %vm825_vm0, %v1336_v48  ;;  %v1808_v48 = vrot.slane %v23121_v55, 1 }
  0xdf   : > { %19666 = vmatprep.mubr.msk.bf16.mxu0 %vm825_vm0, %v1338_v50  ;;  %v2118_v50 = vshrl.u32 %v23007_v53, 16  ;;  %v2135_v53 = vshrl.u32 %v23019_v60, 16 }
  0xe0   : > { %v1811_v14 = vsel %vm1307_vm2, %v1808_v48, %v1810_v2  ;;  %v23178_v2 = vld [vmem:[%s28550_s2 + $0xc0] sm:$0xff]  }
  0xe1   : > { %v2120_v44 = vrot.slane %v2118_v50, 1  ;;  %v2176_v50 = vrot.slane %v2174_v45, 2 }
  0xe6   : > { %19667 = vmatmul.mubr.msk.bf16.gmra.mrb[28].mxu0 %vm825_vm0, %v1340_v20  ;;  %v1807_v20 = vsel %vm1307_vm2, %v1804_v49, %v1806_v47 }
  0xe7   : > { %19670 = vmatprep.mubr.msk.bf16.mxu0 %vm825_vm0, %v1342_v32  ;;  %v1809_v32 = vsel %vm1307_vm2, %v1806_v47, %v1808_v48  ;;  %v22316_v47 = vld [vmem:[%s28550_s2 + $0xb0] sm:$0xff]  }
  0xee   : > { %19671 = vmatmul.mubr.msk.bf16.gmra.mrb[32].mxu0 %vm825_vm0, %v1344_v59  ;;  %v2128_v59 = vrot.slane %v2126_v3, 1 }
  0xef   : > { %19682 = vmatprep.mubr.msk.bf16.mxu0 %vm825_vm0, %v1777_v61  ;;  %v2131_v61 = vrot.slane %v2129_v51, 2 }
  0xf6   : > { %19683 = vmatmul.mubr.msk.bf16.vlgmr.msra.gmra.mrb[0].mxu0 %vm825_vm0, %v1779_v4  ;;  %v2124_v4 = vor.u32 %v2123_v58, %v2120_v44  ;;  %v2192_v44 = vshll.u32 %v23069_v26, 16 }
  0xf7   : > { %19719 = vmatpush3.bf16.msra.mxu0 %v22294_v33  ;;  %19686 = vmatprep.mubr.msk.bf16.mxu0 %vm825_vm0, %v1781_v10  ;;  %v1795_v33 = vsel %vm1307_vm2, %v1792_v29, %v1794_v17  ;;  %v2132_v10 = vor.u32 %v2131_v61, %v2128_v59  ;;  %v2162_v29 = vshrl.u32 %v23035_v11, 16  ;;  %v2198_v59 = vshrl.u32 %v23073_v7, 16 }
  0xf8   : > { %19720 = vmatprep.subr.bf16.mxu0 %v22299_v12  ;;  %v2201_v61 = vshll.u32 %v23073_v7, 16 }
  0xfa   : > { %v2203_v13 = vrot.slane %v2201_v61, 2  ;;  %v2264_v61 = vshll.u32 %v23118_v46, 16 }
  0xfb   : > { %19721 = vmatpush3.bf16.msra.mxu0 %v22299_v12  ;;  %v2144_v12 = vshrl.u32 %v23023_v0, 16 }
  0xfc   : > { %19722 = vmatprep.subr.bf16.mxu0 %v22304_v16 }
  0xfe   : > { %19687 = vmatmul.mubr.msk.bf16.gmra.mrb[4].mxu0 %vm825_vm0, %v1783_v6  ;;  %v2140_v6 = vrot.slane %v2138_v56, 2  ;;  %v2191_v56 = vrot.slane %v2189_v43, 1 }
  0xff   : > { %19690 = vmatprep.mubr.msk.bf16.mxu0 %vm825_vm0, %v1785_v18  ;;  %19723 = vmatpush3.bf16.msra.mxu0 %v22304_v16  ;;  %v2137_v16 = vrot.slane %v2135_v53, 1  ;;  %v2133_v18 = vsel %vm2116_vm3, %v2124_v4, %v2132_v10  ;;  %v2194_v4 = vrot.slane %v2192_v44, 2 }
 0x100   : > { %19724 = vmatprep.subr.bf16.mxu0 %v22309_v21 }
 0x101   : > { %v2141_v23 = vor.u32 %v2140_v6, %v2137_v16  ;;  %v2207_v16 = vshrl.u32 %v23082_v15, 16  ;;  %v2210_v6 = vshll.u32 %v23082_v15, 16 }
 0x103   : > { %19725 = vmatpush3.bf16.msra.mxu0 %v22309_v21  ;;  %v2146_v21 = vrot.slane %v2144_v12, 1  ;;  %v2200_v12 = vrot.slane %v2198_v59, 1  ;;  %v2261_v59 = vshrl.u32 %v23118_v46, 16 }
 0x104   : > { %19762 = vmatprep.subr.bf16.mxu0 %v23065_v24 }
 0x105   : > { %v2150_v28 = vor.u32 %v2149_v22, %v2146_v21  ;;  %v2216_v21 = vshrl.u32 %v23086_v31, 16  ;;  %v2219_v22 = vshll.u32 %v23086_v31, 16 }
 0x106   : > { %19691 = vmatmul.mubr.msk.bf16.gmra.mrb[8].mxu0 %vm825_vm0, %v1787_v5  ;;  %v2153_v5 = vshrl.u32 %v23031_v9, 16 }
 0x107   : > { %19694 = vmatprep.mubr.msk.bf16.mxu0 %vm825_vm0, %v1789_v27  ;;  %v2156_v27 = vshll.u32 %v23031_v9, 16 }
 0x108   : > { %v2155_v17 = vrot.slane %v2153_v5, 1  ;;  %v2209_v5 = vrot.slane %v2207_v16, 1 }
 0x109   : > { %v2158_v25 = vrot.slane %v2156_v27, 2  ;;  %v2212_v27 = vrot.slane %v2210_v6, 2 }
 0x10e   : > { %19695 = vmatmul.mubr.msk.bf16.gmra.mrb[12].mxu0 %vm825_vm0, %v1791_v8  ;;  %v2165_v8 = vshll.u32 %v23035_v11, 16 }
 0x10f   : > { %19698 = vmatprep.mubr.msk.bf16.mxu0 %vm825_vm0, %v1793_v30  ;;  %v2142_v30 = vsel %vm2116_vm3, %v2132_v10, %v2141_v23 }
 0x110   : > { %v2167_v37 = vrot.slane %v2165_v8, 2  ;;  %v2221_v8 = vrot.slane %v2219_v22, 2 }
 0x116   : > { %19699 = vmatmul.mubr.msk.bf16.gmra.mrb[16].mxu0 %vm825_vm0, %v1795_v33  ;;  %v2151_v33 = vsel %vm2116_vm3, %v2141_v23, %v2150_v28 }
 0x117   : > { %19702 = vmatprep.mubr.msk.bf16.mxu0 %vm825_vm0, %v1797_v35  ;;  %v2164_v35 = vrot.slane %v2162_v29, 1  ;;  %v2218_v29 = vrot.slane %v2216_v21, 1 }
 0x119   : > { %v2168_v49 = vor.u32 %v2167_v37, %v2164_v35  ;;  %v2234_v35 = vshrl.u32 %v23098_v36, 16  ;;  %v2237_v37 = vshll.u32 %v23098_v36, 16 }
 0x11e   : > { %19703 = vmatmul.mubr.msk.bf16.gmra.mrb[20].mxu0 %vm825_vm0, %v1799_v38  ;;  %v2159_v38 = vor.u32 %v2158_v25, %v2155_v17  ;;  %v2225_v17 = vshrl.u32 %v23094_v34, 16  ;;  %v2228_v25 = vshll.u32 %v23094_v34, 16 }
 0x11f   : > { %19706 = vmatprep.mubr.msk.bf16.mxu0 %vm825_vm0, %v1801_v41  ;;  %v2171_v41 = vshrl.u32 %v23049_v63, 16 }
 0x120   : > { %v2160_v48 = vsel %vm2116_vm3, %v2150_v28, %v2159_v38  ;;  %v2169_v1 = vsel %vm2116_vm3, %v2159_v38, %v2168_v49  ;;  %v2227_v38 = vrot.slane %v2225_v17, 1 }
 0x126   : > { %19707 = vmatmul.mubr.msk.bf16.gmra.mrb[24].mxu0 %vm825_vm0, %v1803_v54  ;;  %v2180_v54 = vshrl.u32 %v23053_v19, 16 }
 0x127   : > { %19710 = vmatprep.mubr.msk.bf16.mxu0 %vm825_vm0, %v1805_v62  ;;  %v2183_v62 = vshll.u32 %v23053_v19, 16 }
 0x128   : > { %v2182_v3 = vrot.slane %v2180_v54, 1  ;;  %v2239_v54 = vrot.slane %v2237_v37, 2 }
 0x129   : > { %v2185_v51 = vrot.slane %v2183_v62, 2 }
 0x12b   : > { %v2186_v58 = vor.u32 %v2185_v51, %v2182_v3 }
 0x12e   : > { %19711 = vmatmul.mubr.msk.bf16.gmra.mrb[28].mxu0 %vm825_vm0, %v1807_v20  ;;  %v22317_v20 = vld [vmem:[%s28550_s2 + $0xb8] sm:$0xff]  }
 0x12f   : > { %19714 = vmatprep.mubr.msk.bf16.mxu0 %vm825_vm0, %v1809_v32 }
 0x136   : > { %19715 = vmatmul.mubr.msk.bf16.gmra.mrb[32].mxu0 %vm825_vm0, %v1811_v14  ;;  %v2195_v14 = vor.u32 %v2194_v4, %v2191_v56  ;;  %v2270_v56 = vshrl.u32 %v23121_v55, 16  ;;  %v2273_v4 = vshll.u32 %v23121_v55, 16 }
 0x137   : > { %19726 = vmatprep.mubr.msk.bf16.mxu0 %vm825_vm0, %v2133_v18  ;;  %v2204_v18 = vor.u32 %v2203_v13, %v2200_v12  ;;  %v2263_v12 = vrot.slane %v2261_v59, 1  ;;  %v2266_v13 = vrot.slane %v2264_v61, 2  ;;  %v2920_v61 = vld [vmem:[%s22736_s26 + $0x10] sm:$0xc] }
 0x138   : > { %v2196_v23 = vsel %vm2116_vm3, %v2186_v58, %v2195_v14  ;;  %v2272_v6 = vrot.slane %v2270_v56, 1 }
 0x139   : > { %v2205_v28 = vsel %vm2116_vm3, %v2195_v14, %v2204_v18  ;;  %v23215_v14 = vld [vmem:[%s22736_s26 + $0x98] ss:$0 sps:$4 sm:$0x33]   ;;  %v2267_v21 = vor.u32 %v2266_v13, %v2263_v12  ;;  %v23309_v13 = vld [vmem:[%s22736_s26 + $0x20] sm:$0xff]  }
 0x13a   : > { %v2279_v22 = vshrl.u32 %v23215_v14, 16 }
 0x13e   : > { %19727 = vmatmul.mubr.msk.bf16.vlgmr.msra.gmra.mrb[0].mxu0 %vm825_vm0, %v2142_v30  ;;  %v2213_v30 = vor.u32 %v2212_v27, %v2209_v5  ;;  %v2578_v27 = vld [vmem:[%s22736_s26 + $0x8] sm:$0xc] }
 0x13f   : > { %19763 = vmatpush3.bf16.msra.mxu0 %v23065_v24  ;;  %19730 = vmatprep.mubr.msk.bf16.mxu0 %vm825_vm0, %v2151_v33  ;;  %v2173_v24 = vrot.slane %v2171_v41, 1  ;;  %v2222_v33 = vor.u32 %v2221_v8, %v2218_v29  ;;  %v2230_v41 = vrot.slane %v2228_v25, 2  ;;  %v2281_v29 = vrot.slane %v2279_v22, 1  ;;  %v23321_v22 = vld [vmem:[%s22736_s26 + $0x30] sm:$0xff]  }
 0x140   : > { %19764 = vmatprep.subr.bf16.mxu0 %v22315_v40  ;;  %v17631_v17 = vcombine.low %v2578_v27, %v23002_v52  ;;  %v2597_v52 = vrot.slane %v23023_v0, 2  ;;  %v22322_v0 = vld [vmem:[%s28550_s2 + $0xd0] sm:$0xff]   ;;  %v22332_v27 = vld [vmem:[%s28550_s2 + $0xe8] sm:$0xff]  }
 0x141   : > { %v2177_v32 = vor.u32 %v2176_v50, %v2173_v24  ;;  %v2223_v45 = vsel %vm2116_vm3, %v2213_v30, %v2222_v33  ;;  %v2231_v62 = vor.u32 %v2230_v41, %v2227_v38  ;;  %v2252_v50 = vshrl.u32 %v23110_v42, 16 }
 0x142   : > { %v2595_v38 = vrot.slane %v23019_v60, 2  ;;  %v2601_v60 = vrot.slane %v23035_v11, 2  ;;  %v2605_v11 = vrot.slane %v23053_v19, 2 }
 0x143   : > { %19765 = vmatpush3.bf16.msra.mxu0 %v22315_v40  ;;  %v2178_v53 = vsel %vm2116_vm3, %v2168_v49, %v2177_v32  ;;  %v2187_v10 = vsel %vm2116_vm3, %v2177_v32, %v2186_v58  ;;  %v2214_v40 = vsel %vm2116_vm3, %v2204_v18, %v2213_v30  ;;  %v2236_v49 = vrot.slane %v2234_v35, 1 }
 0x144   : > { %19766 = vmatprep.subr.bf16.mxu0 %v22316_v47  ;;  %v2232_v3 = vsel %vm2116_vm3, %v2222_v33, %v2231_v62  ;;  %v2254_v43 = vrot.slane %v2252_v50, 1  ;;  %v2275_v18 = vrot.slane %v2273_v4, 2  ;;  %v2592_v33 = vrot.slane %v17631_v17, 2  ;;  %v23300_v4 = vld [vmem:[%s22736_s26 + $0x18] sm:$0xff]   ;;  %v23339_v17 = vld [vmem:[%s22736_s26 + $0x40] sm:$0xff]  }
 0x145   : > { %v2240_v24 = vor.u32 %v2239_v54, %v2236_v49  ;;  %v2593_v35 = vrot.slane %v23010_v57, 2  ;;  %v22321_v57 = vld [vmem:[%s28550_s2 + $0xc8] sm:$0xff]   ;;  %v2599_v49 = vrot.slane %v23031_v9, 2  ;;  %v2603_v9 = vrot.slane %v23049_v63, 2 }
 0x146   : > { %19731 = vmatmul.mubr.msk.bf16.gmra.mrb[4].mxu0 %vm825_vm0, %v2160_v48  ;;  %v2246_v48 = vshll.u32 %v23106_v39, 16  ;;  %v2276_v5 = vor.u32 %v2275_v18, %v2272_v6  ;;  %v2607_v63 = vrot.slane %v23069_v26, 2  ;;  %v2609_v50 = vrot.slane %v23073_v7, 2  ;;  %v23313_v6 = vld [vmem:[%s22736_s26 + $0x28] sm:$0xff]  }
 0x147   : > { %19734 = vmatprep.mubr.msk.bf16.mxu0 %vm825_vm0, %v2169_v1  ;;  %19767 = vmatpush3.bf16.msra.mxu0 %v22316_v47  ;;  %v2243_v47 = vshrl.u32 %v23106_v39, 16  ;;  %v2255_v1 = vshll.u32 %v23110_v42, 16  ;;  %v2241_v32 = vsel %vm2116_vm3, %v2231_v62, %v2240_v24  ;;  %v2596_v41 = vsel %vm2591_vm4, %v2593_v35, %v2595_v38 }
 0x148   : > { %19768 = vmatprep.subr.bf16.mxu0 %v22317_v20  ;;  %v2277_v30 = vsel %vm2116_vm3, %v2267_v21, %v2276_v5  ;;  %v2600_v54 = vsel %vm2591_vm4, %v2597_v52, %v2599_v49  ;;  %v2602_v62 = vsel %vm2591_vm4, %v2599_v49, %v2601_v60  ;;  %v2608_v19 = vsel %vm2591_vm4, %v2605_v11, %v2607_v63 }
 0x149   : > { %v2245_v51 = vrot.slane %v2243_v47, 1  ;;  %v2257_v44 = vrot.slane %v2255_v1, 2  ;;  %v22327_v47 = vld [vmem:[%s28550_s2 + $0xe0] sm:$0xff]   ;;  %v2610_v1 = vsel %vm2591_vm4, %v2607_v63, %v2609_v50  ;;  %v2615_v26 = vrot.slane %v23094_v34, 2  ;;  %v23388_v63 = vld [vmem:[%s22736_s26 + $0x78] sm:$0xff]  }
 0x14a   : > { %v2617_v7 = vrot.slane %v23098_v36, 2  ;;  %v2623_v34 = vrot.slane %v23118_v46, 2  ;;  %v2625_v36 = vrot.slane %v23121_v55, 2  ;;  %v2627_v46 = vrot.slane %v23215_v14, 2 }
 0x14b   : > { %19769 = vmatpush3.bf16.msra.mxu0 %v22317_v20  ;;  %v2248_v20 = vrot.slane %v2246_v48, 2  ;;  %v2604_v48 = vsel %vm2591_vm4, %v2601_v60, %v2603_v9  ;;  %v3062_v18 = vrot.slane %v23309_v13, 2 }
 0x14c   : > { %19806 = vmatprep.subr.bf16.mxu0 %v23178_v2  ;;  %v2628_v12 = vsel %vm2591_vm4, %v2625_v36, %v2627_v46 }
 0x14d   : > { %v2249_v58 = vor.u32 %v2248_v20, %v2245_v51  ;;  %v2613_v51 = vrot.slane %v23086_v31, 2  ;;  %v2619_v31 = vrot.slane %v23106_v39, 2 }
 0x14e   : > { %19735 = vmatmul.mubr.msk.bf16.gmra.mrb[8].mxu0 %vm825_vm0, %v2178_v53  ;;  %v2258_v53 = vor.u32 %v2257_v44, %v2254_v43  ;;  %v2621_v44 = vrot.slane %v23110_v42, 2  ;;  %v2626_v42 = vsel %vm2591_vm4, %v2623_v34, %v2625_v36  ;;  %v388_v36 = vld [vmem:[%s28557_s9 + $0x38] sm:$0xff] }
 0x14f   : > { %19738 = vmatprep.mubr.msk.bf16.mxu0 %vm825_vm0, %v2187_v10  ;;  %v2250_v10 = vsel %vm2116_vm3, %v2240_v24, %v2249_v58  ;;  %v2606_v24 = vsel %vm2591_vm4, %v2603_v9, %v2605_v11  ;;  %v2616_v43 = vsel %vm2591_vm4, %v2613_v51, %v2615_v26 }
 0x150   : > { %v2259_v16 = vsel %vm2116_vm3, %v2249_v58, %v2258_v53  ;;  %v2620_v58 = vsel %vm2591_vm4, %v2617_v7, %v2619_v31  ;;  %v2622_v59 = vsel %vm2591_vm4, %v2619_v31, %v2621_v44  ;;  %v2624_v39 = vsel %vm2591_vm4, %v2621_v44, %v2623_v34  ;;  %v385_v31 = vld [vmem:[%s28557_s9 + $0x20] sm:$0xff]  ;;  %v386_v44 = vld [vmem:[%s28557_s9 + $0x28] sm:$0xff]  ;;  %v387_v34 = vld [vmem:[%s28557_s9 + $0x30] sm:$0xff] }
 0x156   : > { %19739 = vmatmul.mubr.msk.bf16.gmra.mrb[12].mxu0 %vm825_vm0, %v2196_v23  ;;  %v2282_v23 = vshll.u32 %v23215_v14, 16  ;;  %v3064_v14 = vrot.slane %v23313_v6, 2 }
 0x157   : > { %19742 = vmatprep.mubr.msk.bf16.mxu0 %vm825_vm0, %v2205_v28  ;;  %v2268_v28 = vsel %vm2116_vm3, %v2258_v53, %v2267_v21  ;;  %v23292_v53 = vld [vmem:[%s22736_s26 + $0x14] sm:$0xf] }
 0x158   : > { %v2284_v8 = vrot.slane %v2282_v23, 2  ;;  %v23297_v56 = vcombine.low %v2920_v61, %v23292_v53  ;;  %v3065_v23 = vsel %vm2591_vm4, %v3062_v18, %v3064_v14 }
 0x15a   : > { %v2285_v25 = vor.u32 %v2284_v8, %v2281_v29  ;;  %v3059_v55 = vrot.slane %v23297_v56, 2  ;;  %v22337_v8 = vld [vmem:[%s28550_s2 + $0xf0] sm:$0xff]  }
 0x15c   : > { %v2286_v37 = vsel %vm2116_vm3, %v2276_v5, %v2285_v25  ;;  %v23325_v5 = vld [vmem:[%s22736_s26 + $0x38] sm:$0xff]  }
 0x15d   : > { %v3068_v29 = vrot.slane %v23325_v5, 2 }
 0x15e   : > { %19743 = vmatmul.mubr.msk.bf16.gmra.mrb[16].mxu0 %vm825_vm0, %v2214_v40  ;;  %v2594_v40 = vsel %vm2591_vm4, %v2592_v33, %v2593_v35  ;;  %v23343_v33 = vld [vmem:[%s22736_s26 + $0x48] sm:$0xff]   ;;  %v22342_v35 = vld [vmem:[%s28550_s2 + $0xf8] sm:$0xff]  }
 0x15f   : > { %19746 = vmatprep.mubr.msk.bf16.mxu0 %vm825_vm0, %v2223_v45  ;;  %v2598_v45 = vsel %vm2591_vm4, %v2595_v38, %v2597_v52  ;;  %v23355_v38 = vld [vmem:[%s28550_s2 + $0x100] sm:$0xff]  }
 0x166   : > { %19747 = vmatmul.mubr.msk.bf16.gmra.mrb[20].mxu0 %vm825_vm0, %v2232_v3  ;;  %v2611_v3 = vrot.slane %v23082_v15, 2  ;;  %v2618_v15 = vsel %vm2591_vm4, %v2615_v26, %v2617_v7  ;;  %v23410_v7 = vld [vmem:[%s22736_s26 + $0x80] sm:$0xff]  }
 0x167   : > { %19750 = vmatprep.mubr.msk.bf16.mxu0 %vm825_vm0, %v2241_v32 }
 0x168   : > { %v2612_v20 = vsel %vm2591_vm4, %v2609_v50, %v2611_v3  ;;  %v2614_v32 = vsel %vm2591_vm4, %v2611_v3, %v2613_v51  ;;  %v28559_v50 = vmov 0   ;;  %v3084_v51 = vrot.slane %v23388_v63, 2 }
 0x169   : > { %22253 = vset.pattern.permute.xlu0 %v28559_v50  ;;  %22254 = vset.pattern.permute.xlu1 %v28559_v50  ;;  %422 = vst.msk [vmem:[#allocation2 + $0x8] sm:$0xf] %vm419_vm7, %v28559_v50  ;;  %420 = vst.msk [vmem:[#allocation2] sm:$0xf] %vm419_vm7, %v28559_v50 }
 0x16a   : > { %421 = vst.msk [vmem:[#allocation2 + $0x4] sm:$0xf] %vm419_vm7, %v28559_v50  ;;  %423 = vst.msk [vmem:[#allocation2 + $0xc] sm:$0xf] %vm419_vm7, %v28559_v50 }
 0x16b   : > { %424 = vst.msk [vmem:[#allocation2 + $0x10] sm:$0xf] %vm419_vm7, %v28559_v50  ;;  %425 = vst.msk [vmem:[#allocation2 + $0x14] sm:$0xf] %vm419_vm7, %v28559_v50 }
 0x16c   : > { %426 = vst.msk [vmem:[#allocation2 + $0x18] sm:$0xf] %vm419_vm7, %v28559_v50  ;;  %427 = vst.msk [vmem:[#allocation2 + $0x1c] sm:$0xf] %vm419_vm7, %v28559_v50 }
 0x16d   : > { %428 = vst.msk [vmem:[#allocation2 + $0x20] sm:$0xf] %vm419_vm7, %v28559_v50  ;;  %429 = vst.msk [vmem:[#allocation2 + $0x24] sm:$0xf] %vm419_vm7, %v28559_v50 }
 0x16e   : > { %19751 = vmatmul.mubr.msk.bf16.gmra.mrb[24].mxu0 %vm825_vm0, %v2250_v10  ;;  %v3060_v10 = vrot.slane %v23300_v4, 2  ;;  %430 = vst.msk [vmem:[#allocation2 + $0x28] sm:$0xf] %vm419_vm7, %v28559_v50  ;;  %431 = vst.msk [vmem:[#allocation2 + $0x2c] sm:$0xf] %vm419_vm7, %v28559_v50 }
 0x16f   : > { %19754 = vmatprep.mubr.msk.bf16.mxu0 %vm825_vm0, %v2259_v16  ;;  %432 = vst.msk [vmem:[#allocation2 + $0x30] sm:$0xf] %vm419_vm7, %v28559_v50  ;;  %433 = vst.msk [vmem:[#allocation2 + $0x34] sm:$0xf] %vm419_vm7, %v28559_v50 }
 0x170   : > { %v3061_v16 = vsel %vm2591_vm4, %v3059_v55, %v3060_v10  ;;  %v3063_v21 = vsel %vm2591_vm4, %v3060_v10, %v3062_v18  ;;  %v389_v55 = vld [vmem:[%s28557_s9 + $0x40] sm:$0xff]  ;;  %v390_v10 = vld [vmem:[%s28557_s9 + $0x48] sm:$0xff]  ;;  %v3402_v18 = vshrl.u32 %v23297_v56, 16  ;;  %434 = vst.msk [vmem:[#allocation2 + $0x38] sm:$0xf] %vm419_vm7, %v28559_v50 }
 0x171   : > { %435 = vst.msk [vmem:[#allocation2 + $0x3c] sm:$0xf] %vm419_vm7, %v28559_v50  ;;  %436 = vst.msk [vmem:[#allocation2 + $0x40] sm:$0xf] %vm419_vm7, %v28559_v50 }
 0x172   : > { %437 = vst.msk [vmem:[#allocation2 + $0x44] sm:$0xf] %vm419_vm7, %v28559_v50  ;;  %438 = vst.msk [vmem:[#allocation2 + $0x48] sm:$0xf] %vm419_vm7, %v28559_v50 }
 0x173   : > { %439 = vst.msk [vmem:[#allocation2 + $0x4c] sm:$0xf] %vm419_vm7, %v28559_v50  ;;  %440 = vst.msk [vmem:[#allocation2 + $0x50] sm:$0xf] %vm419_vm7, %v28559_v50 }
 0x174   : > { %441 = vst.msk [vmem:[#allocation2 + $0x54] sm:$0xf] %vm419_vm7, %v28559_v50  ;;  %442 = vst.msk [vmem:[#allocation2 + $0x58] sm:$0xf] %vm419_vm7, %v28559_v50 }
 0x175   : > { %443 = vst.msk [vmem:[#allocation2 + $0x5c] sm:$0xf] %vm419_vm7, %v28559_v50  ;;  %444 = vst.msk [vmem:[#allocation2 + $0x60] sm:$0xf] %vm419_vm7, %v28559_v50 }
 0x176   : > { %19755 = vmatmul.mubr.msk.bf16.gmra.mrb[28].mxu0 %vm825_vm0, %v2268_v28  ;;  %v3066_v28 = vrot.slane %v23321_v22, 2  ;;  %445 = vst.msk [vmem:[#allocation2 + $0x64] sm:$0xf] %vm419_vm7, %v28559_v50  ;;  %446 = vst.msk [vmem:[#allocation2 + $0x68] sm:$0xf] %vm419_vm7, %v28559_v50 }
 0x177   : > { %19758 = vmatprep.mubr.msk.bf16.mxu0 %vm825_vm0, %v2277_v30  ;;  %447 = vst.msk [vmem:[#allocation2 + $0x6c] sm:$0xf] %vm419_vm7, %v28559_v50  ;;  %448 = vst.msk [vmem:[#allocation2 + $0x70] sm:$0xf] %vm419_vm7, %v28559_v50 }
 0x178   : > { %v3067_v30 = vsel %vm2591_vm4, %v3064_v14, %v3066_v28  ;;  %v3069_v25 = vsel %vm2591_vm4, %v3066_v28, %v3068_v29  ;;  %v3405_v14 = vshll.u32 %v23297_v56, 16  ;;  %v392_v28 = vld [vmem:[%s28557_s9 + $0x58] sm:$0xff]  ;;  %v3404_v56 = vrot.slane %v3402_v18, 2  ;;  %449 = vst.msk [vmem:[#allocation2 + $0x74] sm:$0xf] %vm419_vm7, %v28559_v50 }
 0x179   : > { %450 = vst.msk [vmem:[#allocation2 + $0x78] sm:$0xf] %vm419_vm7, %v28559_v50  ;;  %451 = vst.msk [vmem:[#allocation2 + $0x7c] sm:$0xf] %vm419_vm7, %v28559_v50 }
 0x17a   : > { %452 = vst.msk [vmem:[#allocation2 + $0x80] sm:$0xf] %vm419_vm7, %v28559_v50  ;;  %453 = vst.msk [vmem:[#allocation2 + $0x84] sm:$0xf] %vm419_vm7, %v28559_v50 }
 0x17b   : > { %454 = vst.msk [vmem:[#allocation2 + $0x88] sm:$0xf] %vm419_vm7, %v28559_v50  ;;  %455 = vst.msk [vmem:[#allocation2 + $0x8c] sm:$0xf] %vm419_vm7, %v28559_v50 }
 0x17c   : > { %456 = vst.msk [vmem:[#allocation2 + $0x90] sm:$0xf] %vm419_vm7, %v28559_v50  ;;  %457 = vst.msk [vmem:[#allocation2 + $0x94] sm:$0xf] %vm419_vm7, %v28559_v50 }
 0x17d   : > { %458 = vst.msk [vmem:[#allocation2 + $0x98] sm:$0xf] %vm419_vm7, %v28559_v50  ;;  %459 = vst.msk [vmem:[#allocation2 + $0x9c] sm:$0xf] %vm419_vm7, %v28559_v50 }
 0x17e   : > { %19759 = vmatmul.mubr.msk.bf16.gmra.mrb[32].mxu0 %vm825_vm0, %v2286_v37  ;;  %v3070_v37 = vrot.slane %v23339_v17, 2 }
 0x17f   : > { %19770 = vmatprep.mubr.msk.bf16.mxu0 %vm825_vm0, %v2594_v40  ;;  %v3072_v40 = vrot.slane %v23343_v33, 2 }
 0x180   : > { %v3071_v52 = vsel %vm2591_vm4, %v3068_v29, %v3070_v37 }
 0x186   : > { %19771 = vmatmul.mubr.msk.bf16.vlgmr.msra.gmra.mrb[0].mxu0 %vm825_vm0, %v2596_v41  ;;  %v23359_v41 = vld [vmem:[%s22736_s26 + $0x50] sm:$0xff]  }
 0x187   : > { %19807 = vmatpush3.bf16.msra.mxu0 %v23178_v2  ;;  %19774 = vmatprep.mubr.msk.bf16.mxu0 %vm825_vm0, %v2598_v45  ;;  %v22323_v2 = vld [vmem:[%s28550_s2 + $0xd8] sm:$0xff]   ;;  %v3073_v45 = vsel %vm2591_vm4, %v3070_v37, %v3072_v40  ;;  %v3074_v49 = vrot.slane %v23359_v41, 2 }
 0x188   : > { %19808 = vmatprep.subr.bf16.mxu0 %v22321_v57 }
 0x18b   : > { %19809 = vmatpush3.bf16.msra.mxu0 %v22321_v57  ;;  %v23363_v57 = vld [vmem:[%s22736_s26 + $0x58] sm:$0xff]  }
 0x18c   : > { %19810 = vmatprep.subr.bf16.mxu0 %v22322_v0  ;;  %v3076_v60 = vrot.slane %v23363_v57, 2 }
 0x18e   : > { %19775 = vmatmul.mubr.msk.bf16.gmra.mrb[4].mxu0 %vm825_vm0, %v2600_v54  ;;  %v23372_v54 = vld [vmem:[%s22736_s26 + $0x60] sm:$0xff]  }
 0x18f   : > { %19778 = vmatprep.mubr.msk.bf16.mxu0 %vm825_vm0, %v2602_v62  ;;  %19811 = vmatpush3.bf16.msra.mxu0 %v22322_v0  ;;  %v3075_v0 = vsel %vm2591_vm4, %v3072_v40, %v3074_v49  ;;  %v3077_v62 = vsel %vm2591_vm4, %v3074_v49, %v3076_v60  ;;  %v3078_v9 = vrot.slane %v23372_v54, 2  ;;  %v393_v40 = vld [vmem:[%s28557_s9 + $0x60] sm:$0xff]  ;;  %v3419_v49 = vshrl.u32 %v23309_v13, 16 }
 0x190   : > { %19812 = vmatprep.subr.bf16.mxu0 %v22323_v2 }
 0x193   : > { %19813 = vmatpush3.bf16.msra.mxu0 %v22323_v2  ;;  %v23376_v2 = vld [vmem:[%s22736_s26 + $0x68] sm:$0xff]  }
 0x194   : > { %19850 = vmatprep.subr.bf16.mxu0 %v22327_v47  ;;  %v3080_v11 = vrot.slane %v23376_v2, 2 }
 0x196   : > { %19779 = vmatmul.mubr.msk.bf16.gmra.mrb[8].mxu0 %vm825_vm0, %v2604_v48  ;;  %v23384_v48 = vld [vmem:[%s22736_s26 + $0x70] sm:$0xff]  }
 0x197   : > { %19782 = vmatprep.mubr.msk.bf16.mxu0 %vm825_vm0, %v2606_v24  ;;  %v3081_v24 = vsel %vm2591_vm4, %v3078_v9, %v3080_v11  ;;  %v3082_v3 = vrot.slane %v23384_v48, 2 }
 0x199   : > { %v3083_v26 = vsel %vm2591_vm4, %v3080_v11, %v3082_v3  ;;  %v3431_v11 = vshll.u32 %v23313_v6, 16 }
 0x19e   : > { %19783 = vmatmul.mubr.msk.bf16.gmra.mrb[12].mxu0 %vm825_vm0, %v2608_v19  ;;  %v381_v19 = vld [vmem:[%s28557_s9] sm:$0xff] }
 0x19f   : > { %19786 = vmatprep.mubr.msk.bf16.mxu0 %vm825_vm0, %v2610_v1  ;;  %v383_v1 = vld [vmem:[%s28557_s9 + $0x10] sm:$0xff]  ;;  %4249 = vperm.xlu0 %22253, %v381_v19  }
 0x1a0   : > { %4259 = vperm.xlu1 %22254, %v383_v1   ;;  %v3421_v1 = vrot.slane %v3419_v49, 2 }
 0x1a6   : > { %19787 = vmatmul.mubr.msk.bf16.gmra.mrb[16].mxu0 %vm825_vm0, %v2612_v20  ;;  %v382_v20 = vld [vmem:[%s28557_s9 + $0x8] sm:$0xff] }
 0x1a7   : > { %19790 = vmatprep.mubr.msk.bf16.mxu0 %vm825_vm0, %v2614_v32  ;;  %v384_v32 = vld [vmem:[%s28557_s9 + $0x18] sm:$0xff]  ;;  %4254 = vperm.xlu0 %22253, %v382_v20  }
 0x1a8   : > { %4264 = vperm.xlu1 %22254, %v384_v32   ;;  %v3433_v32 = vrot.slane %v3431_v11, 3  ;;  %v406_v11 = vld [vmem:[%s28557_s9 + $0xc8] sm:$0xff] }
 0x1ab   : > { %4269 = vperm.xlu0 %22253, %v385_v31  }
 0x1ac   : > { %4274 = vperm.xlu1 %22254, %v386_v44   ;;  %v3437_v44 = vshrl.u32 %v23321_v22, 16 }
 0x1ae   : > { %19791 = vmatmul.mubr.msk.bf16.gmra.mrb[20].mxu0 %vm825_vm0, %v2616_v43  ;;  %v3085_v43 = vsel %vm2591_vm4, %v3082_v3, %v3084_v51 }
 0x1af   : > { %19794 = vmatprep.mubr.msk.bf16.mxu0 %vm825_vm0, %v2618_v15  ;;  %v23414_v15 = vld [vmem:[%s22736_s26 + $0x88] sm:$0xff]   ;;  %4279 = vperm.xlu0 %22253, %v387_v34   ;;  %v3446_v34 = vshrl.u32 %v23325_v5, 16 }
 0x1b0   : > { %4284 = vperm.xlu1 %22254, %v388_v36   ;;  %v3449_v36 = vshll.u32 %v23325_v5, 16 }
 0x1b1   : > { %v3448_v18 = vrot.slane %v3446_v34, 2  ;;  %v409_v34 = vld [vmem:[%s28557_s9 + $0xe0] sm:$0xff] }
 0x1b3   : > { %4289 = vperm.xlu0 %22253, %v389_v55  }
 0x1b4   : > { %4294 = vperm.xlu1 %22254, %v390_v10   ;;  %v3439_v10 = vrot.slane %v3437_v44, 2 }
 0x1b6   : > { %19795 = vmatmul.mubr.msk.bf16.gmra.mrb[24].mxu0 %vm825_vm0, %v2620_v58  ;;  %v3086_v58 = vrot.slane %v23410_v7, 2 }
 0x1b7   : > { %19798 = vmatprep.mubr.msk.bf16.mxu0 %vm825_vm0, %v2622_v59  ;;  %v3088_v59 = vrot.slane %v23414_v15, 2 }
 0x1b8   : > { %v3087_v61 = vsel %vm2591_vm4, %v3084_v51, %v3086_v58  ;;  %4304 = vperm.xlu1 %22254, %v392_v28  }
 0x1b9   : > { %v3089_v46 = vsel %vm2591_vm4, %v3086_v58, %v3088_v59  ;;  %v3440_v58 = vshll.u32 %v23321_v22, 16 }
 0x1be   : > { %19799 = vmatmul.mubr.msk.bf16.gmra.mrb[28].mxu0 %vm825_vm0, %v2624_v39  ;;  %v23434_v39 = vld [vmem:[%s22736_s26 + $0x90] sm:$0xff]  }
 0x1bf   : > { %19802 = vmatprep.mubr.msk.bf16.mxu0 %vm825_vm0, %v2626_v42  ;;  %v23437_v42 = vld [vmem:[%s22736_s26 + $0x98] sm:$0xff]  }
 0x1c6   : > { %19803 = vmatmul.mubr.msk.bf16.gmra.mrb[32].mxu0 %vm825_vm0, %v2628_v12  ;;  %v3090_v12 = vrot.slane %v23434_v39, 2 }
 0x1c7   : > { %19814 = vmatprep.mubr.msk.bf16.mxu0 %vm825_vm0, %v3061_v16  ;;  %v3092_v16 = vrot.slane %v23437_v42, 2 }
 0x1c8   : > { %v3091_v29 = vsel %vm2591_vm4, %v3088_v59, %v3090_v12 }
 0x1ce   : > { %19815 = vmatmul.mubr.msk.bf16.vlgmr.msra.gmra.mrb[0].mxu0 %vm825_vm0, %v3063_v21  ;;  %v3410_v21 = vshrl.u32 %v23300_v4, 16 }
 0x1cf   : > { %19851 = vmatpush3.bf16.msra.mxu0 %v22327_v47  ;;  %19818 = vmatprep.mubr.msk.bf16.mxu0 %vm825_vm0, %v3065_v23  ;;  %v3079_v47 = vsel %vm2591_vm4, %v3076_v60, %v3078_v9  ;;  %v3413_v23 = vshll.u32 %v23300_v4, 16  ;;  %v3422_v60 = vshll.u32 %v23309_v13, 16  ;;  %v3428_v9 = vshrl.u32 %v23313_v6, 16 }
 0x1d0   : > { %19852 = vmatprep.subr.bf16.mxu0 %v22332_v27 }
 0x1d1   : > { %v3415_v37 = vrot.slane %v3413_v23, 3  ;;  %v3424_v3 = vrot.slane %v3422_v60, 3  ;;  %v3430_v20 = vrot.slane %v3428_v9, 2  ;;  %v401_v23 = vld [vmem:[%s28557_s9 + $0xa0] sm:$0xff] }
 0x1d2   : > { %v405_v9 = vld [vmem:[%s28557_s9 + $0xc0] sm:$0xff] }
 0x1d3   : > { %19853 = vmatpush3.bf16.msra.mxu0 %v22332_v27  ;;  %v391_v27 = vld [vmem:[%s28557_s9 + $0x50] sm:$0xff]  ;;  %v3425_v31 = vor.u32 %v3424_v3, %v3421_v1  ;;  %v3434_v59 = vor.u32 %v3433_v32, %v3430_v20  ;;  %v3482_v3 = vshrl.u32 %v23363_v57, 16  ;;  %v408_v32 = vld [vmem:[%s28557_s9 + $0xd8] sm:$0xff] }
 0x1d4   : > { %19854 = vmatprep.subr.bf16.mxu0 %v22337_v8  ;;  %4299 = vperm.xlu0 %22253, %v391_v27   ;;  %v402_v27 = vld [vmem:[%s28557_s9 + $0xa8] sm:$0xff]  ;;  %v407_v20 = vld [vmem:[%s28557_s9 + $0xd0] sm:$0xff] }
 0x1d6   : > { %19819 = vmatmul.mubr.msk.bf16.gmra.mrb[4].mxu0 %vm825_vm0, %v3067_v30  ;;  %v22346_v30 = vld [vmem:[%s22736_s26 + $0xa0] ss:$0 sps:$4 sm:$0x33]  }
 0x1d7   : > { %19822 = vmatprep.mubr.msk.bf16.mxu0 %vm825_vm0, %v3069_v25  ;;  %19855 = vmatpush3.bf16.msra.mxu0 %v22337_v8  ;;  %v3093_v8 = vsel %vm2591_vm4, %v3090_v12, %v3092_v16  ;;  %v3407_v25 = vrot.slane %v3405_v14, 3  ;;  %v3442_v12 = vrot.slane %v3440_v58, 3  ;;  %v3451_v14 = vrot.slane %v3449_v36, 3  ;;  %v410_v36 = vld [vmem:[%s28557_s9 + $0xe8] sm:$0xff] }
 0x1d8   : > { %19856 = vmatprep.subr.bf16.mxu0 %v22342_v35  ;;  %4309 = vperm.xlu0 %22253, %v393_v40   ;;  %v3484_v58 = vrot.slane %v3482_v3, 2 }
 0x1d9   : > { %v3443_v28 = vor.u32 %v3442_v12, %v3439_v10  ;;  %v3500_v12 = vshrl.u32 %v23376_v2, 16 }
 0x1db   : > { %19857 = vmatpush3.bf16.msra.mxu0 %v22342_v35  ;;  %v3412_v35 = vrot.slane %v3410_v21, 2  ;;  %v22348_v21 = vld [vmem:[%s28550_s2 + $0x108] sm:$0xff]   ;;  %v3444_v40 = vsel %vm3400_vm5, %v3434_v59, %v3443_v28 }
 0x1dc   : > { %19894 = vmatprep.subr.bf16.mxu0 %v23355_v38 }
 0x1de   : > { %19823 = vmatmul.mubr.msk.bf16.gmra.mrb[8].mxu0 %vm825_vm0, %v3071_v52  ;;  %v394_v52 = vld [vmem:[%s28557_s9 + $0x68] sm:$0xff] }
 0x1df   : > { %19826 = vmatprep.mubr.msk.bf16.mxu0 %vm825_vm0, %v3073_v45  ;;  %v3094_v45 = vrot.slane %v22346_v30, 2  ;;  %4314 = vperm.xlu1 %22254, %v394_v52   ;;  %v3452_v30 = vor.u32 %v3451_v14, %v3448_v18  ;;  %v411_v18 = vld [vmem:[%s28557_s9 + $0xf0] sm:$0xff]  ;;  %v412_v14 = vld [vmem:[%s28557_s9 + $0xf8] sm:$0xff] }
 0x1e1   : > { %v3095_v19 = vsel %vm2591_vm4, %v3092_v16, %v3094_v45  ;;  %v3435_v16 = vsel %vm3400_vm5, %v3425_v31, %v3434_v59  ;;  %v3453_v49 = vsel %vm3400_vm5, %v3443_v28, %v3452_v30 }
 0x1e6   : > { %19827 = vmatmul.mubr.msk.bf16.gmra.mrb[12].mxu0 %vm825_vm0, %v3075_v0  ;;  %v3408_v0 = vor.u32 %v3407_v25, %v3404_v56  ;;  %v3464_v56 = vshrl.u32 %v23343_v33, 16  ;;  %v3467_v25 = vshll.u32 %v23343_v33, 16 }
 0x1e7   : > { %19830 = vmatprep.mubr.msk.bf16.mxu0 %vm825_vm0, %v3077_v62  ;;  %v3416_v62 = vor.u32 %v3415_v37, %v3412_v35  ;;  %v22349_v35 = vld [vmem:[%s28550_s2 + $0x110] sm:$0xff]   ;;  %v404_v37 = vld [vmem:[%s28557_s9 + $0xb8] sm:$0xff] }
 0x1e8   : > { %v3466_v60 = vrot.slane %v3464_v56, 2  ;;  %v414_v56 = vld [vmem:[%s28557_s9 + $0x108] sm:$0xff] }
 0x1e9   : > { %v3417_v51 = vsel %vm3400_vm5, %v3408_v0, %v3416_v62  ;;  %v3426_v55 = vsel %vm3400_vm5, %v3416_v62, %v3425_v31  ;;  %v3469_v0 = vrot.slane %v3467_v25, 3  ;;  %v22350_v62 = vld [vmem:[%s28550_s2 + $0x118] sm:$0xff]  }
 0x1eb   : > { %v3470_v1 = vor.u32 %v3469_v0, %v3466_v60 }
 0x1ee   : > { %19831 = vmatmul.mubr.msk.bf16.gmra.mrb[16].mxu0 %vm825_vm0, %v3079_v47  ;;  %v395_v47 = vld [vmem:[%s28557_s9 + $0x70] sm:$0xff] }
 0x1ef   : > { %19834 = vmatprep.mubr.msk.bf16.mxu0 %vm825_vm0, %v3081_v24  ;;  %v396_v24 = vld [vmem:[%s28557_s9 + $0x78] sm:$0xff]  ;;  %4319 = vperm.xlu0 %22253, %v395_v47  }
 0x1f0   : > { %4324 = vperm.xlu1 %22254, %v396_v24   ;;  %v3473_v24 = vshrl.u32 %v23359_v41, 16 }
 0x1f6   : > { %19835 = vmatmul.mubr.msk.bf16.gmra.mrb[20].mxu0 %vm825_vm0, %v3083_v26  ;;  %v397_v26 = vld [vmem:[%s28557_s9 + $0x80] sm:$0xff] }
 0x1f7   : > { %19838 = vmatprep.mubr.msk.bf16.mxu0 %vm825_vm0, %v3085_v43  ;;  %v398_v43 = vld [vmem:[%s28557_s9 + $0x88] sm:$0xff]  ;;  %4329 = vperm.xlu0 %22253, %v397_v26  }
 0x1f8   : > { %4334 = vperm.xlu1 %22254, %v398_v43   ;;  %v3475_v43 = vrot.slane %v3473_v24, 2 }
 0x1fe   : > { %19839 = vmatmul.mubr.msk.bf16.gmra.mrb[24].mxu0 %vm825_vm0, %v3087_v61  ;;  %v399_v61 = vld [vmem:[%s28557_s9 + $0x90] sm:$0xff] }
 0x1ff   : > { %19842 = vmatprep.mubr.msk.bf16.mxu0 %vm825_vm0, %v3089_v46  ;;  %v400_v46 = vld [vmem:[%s28557_s9 + $0x98] sm:$0xff]  ;;  %4339 = vperm.xlu0 %22253, %v399_v61  }
 0x200   : > { %4344 = vperm.xlu1 %22254, %v400_v46   ;;  %v3491_v46 = vshrl.u32 %v23372_v54, 16 }
 0x203   : > { %4349 = vperm.xlu0 %22253, %v401_v23   ;;  %v3493_v23 = vrot.slane %v3491_v46, 2  ;;  %v3554_v46 = vshrl.u32 %v23437_v42, 16 }
 0x204   : > { %4354 = vperm.xlu1 %22254, %v402_v27  }
 0x206   : > { %19843 = vmatmul.mubr.msk.bf16.gmra.mrb[28].mxu0 %vm825_vm0, %v3091_v29  ;;  %v3455_v29 = vshrl.u32 %v23339_v17, 16 }
 0x207   : > { %19846 = vmatprep.mubr.msk.bf16.mxu0 %vm825_vm0, %v3093_v8  ;;  %v3458_v8 = vshll.u32 %v23339_v17, 16 }
 0x208   : > { %v3457_v52 = vrot.slane %v3455_v29, 2  ;;  %4364 = vperm.xlu1 %22254, %v404_v37   ;;  %v3502_v29 = vrot.slane %v3500_v12, 2 }
 0x209   : > { %v3460_v45 = vrot.slane %v3458_v8, 3 }
 0x20b   : > { %v3461_v47 = vor.u32 %v3460_v45, %v3457_v52  ;;  %v3521_v52 = vshll.u32 %v23388_v63, 16  ;;  %v415_v45 = vld [vmem:[%s28557_s9 + $0x110] sm:$0xff] }
 0x20c   : > { %4374 = vperm.xlu1 %22254, %v406_v11  }
 0x20d   : > { %v3462_v26 = vsel %vm3400_vm5, %v3452_v30, %v3461_v47  ;;  %v3471_v44 = vsel %vm3400_vm5, %v3461_v47, %v3470_v1  ;;  %v413_v30 = vld [vmem:[%s28557_s9 + $0x100] sm:$0xff]  ;;  %v3523_v47 = vrot.slane %v3521_v52, 3 }
 0x20e   : > { %19847 = vmatmul.mubr.msk.bf16.gmra.mrb[32].mxu0 %vm825_vm0, %v3095_v19  ;;  %v3476_v19 = vshll.u32 %v23359_v41, 16 }
 0x20f   : > { %19858 = vmatprep.mubr.msk.bf16.mxu0 %vm825_vm0, %v3417_v51  ;;  %v3485_v51 = vshll.u32 %v23363_v57, 16 }
 0x210   : > { %v3478_v31 = vrot.slane %v3476_v19, 3  ;;  %4384 = vperm.xlu1 %22254, %v408_v32   ;;  %v3527_v19 = vshrl.u32 %v23410_v7, 16 }
 0x211   : > { %v3487_v59 = vrot.slane %v3485_v51, 3  ;;  %v3536_v51 = vshrl.u32 %v23414_v15, 16 }
 0x212   : > { %v3479_v61 = vor.u32 %v3478_v31, %v3475_v43 }
 0x213   : > { %v3488_v10 = vor.u32 %v3487_v59, %v3484_v58 }
 0x214   : > { %4394 = vperm.xlu1 %22254, %v410_v36   ;;  %v3548_v36 = vshll.u32 %v23434_v39, 16 }
 0x215   : > { %v3489_v28 = vsel %vm3400_vm5, %v3479_v61, %v3488_v10 }
 0x216   : > { %19859 = vmatmul.mubr.msk.bf16.vlgmr.msra.gmra.mrb[0].mxu0 %vm825_vm0, %v3426_v55  ;;  %v3494_v55 = vshll.u32 %v23372_v54, 16 }
 0x217   : > { %19895 = vmatpush3.bf16.msra.mxu0 %v23355_v38  ;;  %19862 = vmatprep.mubr.msk.bf16.mxu0 %vm825_vm0, %v3435_v16  ;;  %v403_v38 = vld [vmem:[%s28557_s9 + $0xb0] sm:$0xff]  ;;  %v3503_v16 = vshll.u32 %v23376_v2, 16 }
 0x218   : > { %19896 = vmatprep.subr.bf16.mxu0 %v22348_v21  ;;  %4359 = vperm.xlu0 %22253, %v403_v38   ;;  %v3496_v27 = vrot.slane %v3494_v55, 3  ;;  %v3512_v38 = vshll.u32 %v23384_v48, 16  ;;  %v3557_v55 = vshll.u32 %v23437_v42, 16 }
 0x219   : > { %v3505_v8 = vrot.slane %v3503_v16, 3  ;;  %4404 = vperm.xlu1 %22254, %v412_v14   ;;  %v3550_v16 = vrot.slane %v3548_v36, 3 }
 0x21a   : > { %v3497_v25 = vor.u32 %v3496_v27, %v3493_v23  ;;  %v3559_v23 = vrot.slane %v3557_v55, 3  ;;  %v5016_v55 = vld [vmem:[#allocation2] sm:$0xf] }
 0x21b   : > { %19897 = vmatpush3.bf16.msra.mxu0 %v22348_v21  ;;  %v3480_v21 = vsel %vm3400_vm5, %v3470_v1, %v3479_v61  ;;  %v3506_v37 = vor.u32 %v3505_v8, %v3502_v29  ;;  %v3530_v1 = vshll.u32 %v23410_v7, 16 }
 0x21c   : > { %19898 = vmatprep.subr.bf16.mxu0 %v22349_v35  ;;  %4369 = vperm.xlu0 %22253, %v405_v9   ;;  %v3498_v60 = vsel %vm3400_vm5, %v3488_v10, %v3497_v25 }
 0x21d   : > { %4414 = vperm.xlu1 %22254, %v414_v56   ;;  %v3507_v9 = vsel %vm3400_vm5, %v3497_v25, %v3506_v37  ;;  %v3532_v43 = vrot.slane %v3530_v1, 3 }
 0x21e   : > { %19863 = vmatmul.mubr.msk.bf16.gmra.mrb[4].mxu0 %vm825_vm0, %v3444_v40  ;;  %v3518_v40 = vshrl.u32 %v23388_v63, 16  ;;  %v23770_v36 = vpop.permute.xlu0 %4249 }
 0x21f   : > { %19866 = vmatprep.mubr.msk.bf16.mxu0 %vm825_vm0, %v3453_v49  ;;  %19899 = vmatpush3.bf16.msra.mxu0 %v22349_v35  ;;  %v3509_v35 = vshrl.u32 %v23384_v48, 16  ;;  %v416_v49 = vld [vmem:[%s28557_s9 + $0x118] sm:$0xff]  ;;  %28665 = vst [vmem:[#allocation4_spill] sm:$0xff] %v23770_v36 }
 0x220   : > { %19900 = vmatprep.subr.bf16.mxu0 %v22350_v62  ;;  %4379 = vperm.xlu0 %22253, %v407_v20   ;;  %v3520_v11 = vrot.slane %v3518_v40, 2  ;;  %v3539_v20 = vshll.u32 %v23414_v15, 16 }
 0x221   : > { %v3511_v0 = vrot.slane %v3509_v35, 2  ;;  %4424 = vperm.xlu1 %22254, %v416_v49  }
 0x222   : > { %v3524_v3 = vor.u32 %v3523_v47, %v3520_v11  ;;  %v3541_v58 = vrot.slane %v3539_v20, 3  ;;  %v3885_v11 = vrot.slane %v23325_v5, 3  ;;  %v3893_v5 = vrot.slane %v23363_v57, 3 }
 0x223   : > { %19901 = vmatpush3.bf16.msra.mxu0 %v22350_v62  ;;  %v3514_v62 = vrot.slane %v3512_v38, 3  ;;  %v3901_v57 = vrot.slane %v23388_v63, 3  ;;  %v3909_v63 = vrot.slane %v23437_v42, 3  ;;  %v22354_v42 = vld [vmem:[%s28552_s4 + $0x18] sm:$0xff]  }
 0x224   : > { %4389 = vperm.xlu0 %22253, %v409_v34   ;;  %v3545_v34 = vshrl.u32 %v23434_v39, 16 }
 0x225   : > { %v3515_v24 = vor.u32 %v3514_v62, %v3511_v0  ;;  %v3879_v0 = vrot.slane %v23309_v13, 3  ;;  %v3887_v13 = vrot.slane %v23339_v17, 3  ;;  %v3895_v17 = vrot.slane %v23372_v54, 3 }
 0x226   : > { %19867 = vmatmul.mubr.msk.bf16.gmra.mrb[8].mxu0 %vm825_vm0, %v3462_v26  ;;  %v3529_v26 = vrot.slane %v3527_v19, 2  ;;  %v3547_v12 = vrot.slane %v3545_v34, 2  ;;  %v3903_v54 = vrot.slane %v23410_v7, 3  ;;  %v23767_v34 = vld [vmem:[%s28552_s4] sm:$0xff]  }
 0x227   : > { %19870 = vmatprep.mubr.msk.bf16.mxu0 %vm825_vm0, %v3471_v44  ;;  %v3516_v32 = vsel %vm3400_vm5, %v3506_v37, %v3515_v24  ;;  %v3525_v31 = vsel %vm3400_vm5, %v3515_v24, %v3524_v3  ;;  %v3538_v44 = vrot.slane %v3536_v51, 2  ;;  %v3888_v19 = vsel %vm3875_vm6, %v3885_v11, %v3887_v13 }
 0x228   : > { %4399 = vperm.xlu0 %22253, %v411_v18   ;;  %v3533_v59 = vor.u32 %v3532_v43, %v3529_v26  ;;  %v23609_v18 = vld [vmem:[%s22736_s26 + $0xa0] ss:$0 sps:$4 sm:$0x77]   ;;  %v3551_v27 = vor.u32 %v3550_v16, %v3547_v12  ;;  %v3896_v20 = vsel %vm3875_vm6, %v3893_v5, %v3895_v17 }
 0x229   : > { %v3542_v61 = vor.u32 %v3541_v58, %v3538_v44  ;;  %v3566_v29 = vshll.u32 %v23609_v18, 16  ;;  %v3911_v7 = vrot.slane %v23609_v18, 3 }
 0x22a   : > { %v3534_v10 = vsel %vm3400_vm5, %v3524_v3, %v3533_v59 }
 0x22b   : > { %v3543_v14 = vsel %vm3400_vm5, %v3533_v59, %v3542_v61  ;;  %v3552_v56 = vsel %vm3400_vm5, %v3542_v61, %v3551_v27  ;;  %v3568_v35 = vrot.slane %v3566_v29, 3  ;;  %v23772_v61 = vpop.permute.xlu1 %4259 }
 0x22c   : > { %4409 = vperm.xlu0 %22253, %v413_v30   ;;  %v3862_v30 = vld [vmem:[%s22736_s26 + $0x10] sm:$0x8]  ;;  %28666 = vst [vmem:[#allocation5_spill] sm:$0xff] %v23772_v61 }
 0x22d   : > { %v17742_v37 = vcombine.low %v3862_v30, %v23292_v53  ;;  %v3881_v53 = vrot.slane %v23313_v6, 3  ;;  %v3889_v6 = vrot.slane %v23343_v33, 3  ;;  %v3897_v33 = vrot.slane %v23376_v2, 3 }
 0x22e   : > { %19871 = vmatmul.mubr.msk.bf16.gmra.mrb[12].mxu0 %vm825_vm0, %v3480_v21  ;;  %v3556_v21 = vrot.slane %v3554_v46, 2  ;;  %v3905_v2 = vrot.slane %v23414_v15, 3  ;;  %v3912_v15 = vsel %vm3875_vm6, %v3909_v63, %v3911_v7  ;;  %v23774_v46 = vpop.permute.xlu0 %4254 }
 0x22f   : > { %19874 = vmatprep.mubr.msk.bf16.mxu0 %vm825_vm0, %v3489_v28  ;;  %v3563_v28 = vshrl.u32 %v23609_v18, 16  ;;  %v3876_v52 = vrot.slane %v17742_v37, 3  ;;  %v3890_v1 = vsel %vm3875_vm6, %v3887_v13, %v3889_v6  ;;  %28667 = vst [vmem:[#allocation6_spill] sm:$0xff] %v23774_v46  ;;  %v23778_v16 = vpop.permute.xlu1 %4264 }
 0x230   : > { %4419 = vperm.xlu0 %22253, %v415_v45   ;;  %v3560_v8 = vor.u32 %v3559_v23, %v3556_v21  ;;  %v3877_v45 = vrot.slane %v23300_v4, 3  ;;  %v3883_v4 = vrot.slane %v23321_v22, 3  ;;  %v3891_v22 = vrot.slane %v23359_v41, 3  ;;  %28668 = vst [vmem:[#allocation7_spill] sm:$0xff] %v23778_v16 }
 0x231   : > { %v3565_v25 = vrot.slane %v3563_v28, 2  ;;  %v3899_v41 = vrot.slane %v23384_v48, 3  ;;  %v3906_v44 = vsel %vm3875_vm6, %v3903_v54, %v3905_v2  ;;  %v3907_v48 = vrot.slane %v23434_v39, 3  ;;  %v22353_v39 = vld [vmem:[%s28552_s4 + $0x10] sm:$0xff]  }
 0x232   : > { %v3561_v38 = vsel %vm3400_vm5, %v3551_v27, %v3560_v8  ;;  %v3880_v62 = vsel %vm3875_vm6, %v3877_v45, %v3879_v0  ;;  %v3884_v47 = vsel %vm3875_vm6, %v3881_v53, %v3883_v4  ;;  %v3886_v24 = vsel %vm3875_vm6, %v3883_v4, %v3885_v11  ;;  %19938 = vmatprep.subr.bf16.mxu1 %v22353_v39  ;;  %v23780_v18 = vpop.permute.xlu0 %4269 }
 0x233   : > { %v3569_v40 = vor.u32 %v3568_v35, %v3565_v25  ;;  %v3892_v3 = vsel %vm3875_vm6, %v3889_v6, %v3891_v22  ;;  %v3894_v51 = vsel %vm3875_vm6, %v3891_v22, %v3893_v5  ;;  %v3900_v26 = vsel %vm3875_vm6, %v3897_v33, %v3899_v41  ;;  %19939 = vmatpush3.bf16.msra.mxu1 %v22353_v39  ;;  %v23790_v30 = vpop.permute.xlu1 %4274 }
 0x234   : > { %v3902_v43 = vsel %vm3875_vm6, %v3899_v41, %v3901_v57  ;;  %v3908_v58 = vsel %vm3875_vm6, %v3905_v2, %v3907_v48  ;;  %v3910_v59 = vsel %vm3875_vm6, %v3907_v48, %v3909_v63  ;;  %19940 = vmatprep.subr.bf16.mxu1 %v22354_v42  ;;  %28669 = vst [vmem:[#allocation8_spill] sm:$0xff] %v23780_v18  ;;  %28670 = vst [vmem:[#allocation9_spill] sm:$0xff] %v23790_v30 }
 0x235   : > { %v3570_v49 = vsel %vm3400_vm5, %v3560_v8, %v3569_v40 }
 0x236   : > { %19875 = vmatmul.mubr.msk.bf16.gmra.mrb[16].mxu0 %vm825_vm0, %v3498_v60  ;;  %v3878_v60 = vsel %vm3875_vm6, %v3876_v52, %v3877_v45 }
 0x237   : > { %19878 = vmatprep.mubr.msk.bf16.mxu0 %vm825_vm0, %v3507_v9  ;;  %v3882_v9 = vsel %vm3875_vm6, %v3879_v0, %v3881_v53  ;;  %19941 = vmatpush3.bf16.msra.mxu1 %v22354_v42 }
 0x238   : > { %19978 = vmatprep.subr.bf16.mxu1 %v23767_v34 }
 0x23e   : > { %19879 = vmatmul.mubr.msk.bf16.gmra.mrb[20].mxu0 %vm825_vm0, %v3516_v32  ;;  %v3898_v32 = vsel %vm3875_vm6, %v3895_v17, %v3897_v33 }
 0x23f   : > { %19882 = vmatprep.mubr.msk.bf16.mxu0 %vm825_vm0, %v3525_v31  ;;  %v3904_v31 = vsel %vm3875_vm6, %v3901_v57, %v3903_v54  ;;  %v4973_v54 = vld [vmem:[#allocation2 + $0x8] sm:$0xe] }
 0x246   : > { %19883 = vmatmul.mubr.msk.bf16.gmra.mrb[24].mxu0 %vm825_vm0, %v3534_v10  ;;  %v5017_v10 = vld [vmem:[#allocation2 + $0x4] sm:$0xf] }
 0x247   : > { %19886 = vmatprep.mubr.msk.bf16.mxu0 %vm825_vm0, %v3543_v14  ;;  %v23776_v12 = vcombine.low %v5016_v55, %v5017_v10  ;;  %v23785_v14 = vld [vmem:[%s28551_s3] ss:$0 sm:$0xff] }
 0x249   : > { %v5158_v23 = vshll.u32 %v23776_v12, 16  ;;  %v5156_v52 = vshrl.u32 %v23776_v12, 16 }
 0x24b   : > { %v5160_v45 = vrot.slane %v5158_v23, 1 }
 0x24d   : > { %v23801_v6 = vor.u32 %v5160_v45, %v5156_v52 }
 0x24e   : > { %19887 = vmatmul.mubr.msk.bf16.gmra.mrb[28].mxu0 %vm825_vm0, %v3552_v56 }
 0x24f   : > { %19890 = vmatprep.mubr.msk.bf16.mxu0 %vm825_vm0, %v3561_v38  ;;  %v23794_v38 = vpop.permute.xlu0 %4279 }
 0x250   : > { %28671 = vst [vmem:[#allocation10_spill] sm:$0xff] %v23794_v38 }
 0x253   : > { %v23805_v17 = vpop.permute.xlu0 %4289 }
 0x254   : > { %28673 = vst [vmem:[#allocation12_spill] sm:$0xff] %v23805_v17 }
 0x256   : > { %19891 = vmatmul.mubr.msk.bf16.gmra.mrb[32].mxu0 %vm825_vm0, %v3570_v49 }
 0x257   : > { %19902 = vmatprep.mubr.msk.bf16.mxu0 %vm825_vm0, %v3878_v60 }
 0x25e   : > { %19903 = vmatmul.mubr.msk.bf16.vlgmr.msra.gmra.mrb[0].mxu0 %vm825_vm0, %v3880_v62 }
 0x25f   : > { %19906 = vmatprep.mubr.msk.bf16.mxu0 %vm825_vm0, %v3882_v9 }
 0x266   : > { %19907 = vmatmul.mubr.msk.bf16.gmra.mrb[4].mxu0 %vm825_vm0, %v3884_v47 }
 0x267   : > { %19910 = vmatprep.mubr.msk.bf16.mxu0 %vm825_vm0, %v3886_v24 }
 0x26e   : > { %19911 = vmatmul.mubr.msk.bf16.gmra.mrb[8].mxu0 %vm825_vm0, %v3888_v19  ;;  %v23803_v19 = vpop.permute.xlu1 %4284 }
 0x26f   : > { %19914 = vmatprep.mubr.msk.bf16.mxu0 %vm825_vm0, %v3890_v1  ;;  %28672 = vst [vmem:[#allocation11_spill] sm:$0xff] %v23803_v19 }
 0x276   : > { %19915 = vmatmul.mubr.msk.bf16.gmra.mrb[12].mxu0 %vm825_vm0, %v3892_v3 }
 0x277   : > { %19918 = vmatprep.mubr.msk.bf16.mxu0 %vm825_vm0, %v3894_v51 }
 0x27e   : > { %19919 = vmatmul.mubr.msk.bf16.gmra.mrb[16].mxu0 %vm825_vm0, %v3896_v20 }
 0x27f   : > { %19922 = vmatprep.mubr.msk.bf16.mxu0 %vm825_vm0, %v3898_v32 }
 0x286   : > { %19923 = vmatmul.mubr.msk.bf16.gmra.mrb[20].mxu0 %vm825_vm0, %v3900_v26 }
 0x287   : > { %19926 = vmatprep.mubr.msk.bf16.mxu0 %vm825_vm0, %v3902_v43 }
 0x28e   : > { %19927 = vmatmul.mubr.msk.bf16.gmra.mrb[24].mxu0 %vm825_vm0, %v3904_v31 }
 0x28f   : > { %19930 = vmatprep.mubr.msk.bf16.mxu0 %vm825_vm0, %v3906_v44 }
 0x296   : > { %19931 = vmatmul.mubr.msk.bf16.gmra.mrb[28].mxu0 %vm825_vm0, %v3908_v58  ;;  %v28676_v58 = vmov 0 }
 0x297   : > { %19934 = vmatprep.mubr.msk.bf16.mxu0 %vm825_vm0, %v3910_v59  ;;  %v28677_v58 = vsel %vm23816_vm13, 4294967295, %v28676_v58 }
 0x298   : > { %28678 = vst [vmem:[#allocation13_spill] sm:$0xff] %v28677_v58 }
 0x29e   : > { %19935 = vmatmul.mubr.msk.bf16.gmra.mrb[32].mxu0 %vm825_vm0, %v3912_v15 }
 0x331   : > { %v19904_v21 = vpop.f32.mrb[0].mxu0 }
 0x332   : > { %v4213_v27 = vadd.f32 %v19904_v21, %v23785_v14  ;;  %v4025_v28 = vpop.f32.mrb[1].mxu0 }
 0x333   : > { %v4211_v29 = vadd.f32 %v23785_v14, %v4025_v28  ;;  %v19905_v8 = vpop.f32.mrb[2].mxu0 }
 0x334   : > { %v4429_v56 = vmul.f32 %v23772_v61, %v4213_v27  ;;  %v4214_v25 = vadd.f32 %v19905_v8, %v23785_v14  ;;  %v4028_v35 = vpop.f32.mrb[3].mxu0 }
 0x335   : > { %v4427_v37 = vmul.f32 %v23770_v36, %v4211_v29  ;;  %v4212_v40 = vadd.f32 %v23785_v14, %v4028_v35  ;;  %v23826_v29 = vpop.permute.xlu1 %4294 }
 0x336   : > { %v18716_v49 = vpack.c.bf16 %v4429_v56, %v4429_v56  ;;  %v4430_v60 = vmul.f32 %v23778_v16, %v4214_v25  ;;  %28679 = vst [vmem:[#allocation14_spill] sm:$0xff] %v23826_v29 }
 0x337   : > { %v18714_v0 = vpack.c.bf16 %v4427_v37, %v4427_v37  ;;  %v4428_v53 = vmul.f32 %v23774_v46, %v4212_v40  ;;  %v23831_v37 = vpop.permute.xlu0 %4299 }
 0x338   : > { %v4594_v62 = vshrl.u32 %v18716_v49, 16  ;;  %v4597_v9 = vshll.u32 %v18716_v49, 16  ;;  %v18717_v4 = vpack.c.bf16 %v4430_v60, %v4430_v60  ;;  %28680 = vst [vmem:[#allocation15_spill] sm:$0xff] %v23831_v37 }
 0x339   : > { %v4575_v11 = vshrl.u32 %v18714_v0, 16  ;;  %v4578_v47 = vshll.u32 %v18714_v0, 16  ;;  %v18715_v24 = vpack.c.bf16 %v4428_v53, %v4428_v53  ;;  %v19908_v13 = vpop.f32.mrb[4].mxu0  ;;  %v23844_v43 = vpop.permute.xlu1 %4304 }
 0x33a   : > { %v4596_v1 = vrot.slane %v4594_v62, 6  ;;  %v4599_v22 = vrot.slane %v4597_v9, 7  ;;  %v4604_v5 = vshrl.u32 %v18717_v4, 16  ;;  %v4607_v3 = vshll.u32 %v18717_v4, 16  ;;  %v4041_v51 = vpop.f32.mrb[5].mxu0  ;;  %28681 = vst [vmem:[#allocation16_spill] sm:$0xff] %v23844_v43 }
 0x33b   : > { %v4577_v33 = vrot.slane %v4575_v11, 6  ;;  %v4580_v20 = vrot.slane %v4578_v47, 7  ;;  %v4584_v32 = vshrl.u32 %v18715_v24, 16  ;;  %v4587_v41 = vshll.u32 %v18715_v24, 16  ;;  %v19909_v57 = vpop.f32.mrb[6].mxu0 }
 0x33c   : > { %v4600_v26 = vor.u32 %v4599_v22, %v4596_v1  ;;  %v4606_v2 = vrot.slane %v4604_v5, 6  ;;  %v4609_v31 = vrot.slane %v4607_v3, 7  ;;  %v4217_v44 = vadd.f32 %v19908_v13, %v23785_v14  ;;  %v4044_v48 = vpop.f32.mrb[7].mxu0 }
 0x33d   : > { %v4581_v63 = vor.u32 %v4580_v20, %v4577_v33  ;;  %v4586_v59 = vrot.slane %v4584_v32, 6  ;;  %v4589_v7 = vrot.slane %v4587_v41, 7  ;;  %v4215_v15 = vadd.f32 %v23785_v14, %v4041_v51 }
 0x33e   : > { %v4602_v39 = vrot.slane %v4600_v26, 4  ;;  %v4610_v42 = vor.u32 %v4609_v31, %v4606_v2  ;;  %v4433_v55 = vmul.f32 %v23794_v38, %v4217_v44  ;;  %v4218_v10 = vadd.f32 %v19909_v57, %v23785_v14  ;;  %v23847_v44 = vpop.permute.xlu0 %4309 }
 0x33f   : > { %v4582_v21 = vrot.slane %v4581_v63, 4  ;;  %v4974_v23 = vsel %vm23809_vm12, %v4581_v63, %v4973_v54  ;;  %v4590_v27 = vor.u32 %v4589_v7, %v4586_v59  ;;  %v4431_v28 = vmul.f32 %v23780_v18, %v4215_v15  ;;  %28682 = vst [vmem:[#allocation17_spill] sm:$0xff] %v23847_v44 }
 0x340   : > { %4975 = vst [vmem:[#allocation2 + $0x8] sm:$0xe] %v4974_v23  ;;  %v4611_v8 = vsel %vm23816_vm13, %v4602_v39, %v4610_v42  ;;  %v4612_v56 = vrot.slane %v4610_v42, 4  ;;  %v18720_v25 = vpack.c.bf16 %v4433_v55, %v4433_v55  ;;  %v4434_v35 = vmul.f32 %v23803_v19, %v4218_v10 }
 0x341   : > { %4978 = vst.msk [vmem:[#allocation2 + $0x14] sm:$0xf] %vm419_vm7, %v4611_v8  ;;  %v4591_v40 = vsel %vm23816_vm13, %v4582_v21, %v4590_v27  ;;  %v4592_v52 = vrot.slane %v4590_v27, 4  ;;  %v18718_v45 = vpack.c.bf16 %v4431_v28, %v4431_v28  ;;  %v4216_v49 = vadd.f32 %v23785_v14, %v4044_v48  ;;  %v19912_v60 = vpop.f32.mrb[8].mxu0 }
 0x342   : > { %4976 = vst.msk [vmem:[#allocation2 + $0xc] sm:$0xf] %vm419_vm7, %v4591_v40  ;;  %v4634_v0 = vshrl.u32 %v18720_v25, 16  ;;  %v4637_v53 = vshll.u32 %v18720_v25, 16  ;;  %v18721_v62 = vpack.c.bf16 %v4434_v35, %v4434_v35  ;;  %v4221_v9 = vadd.f32 %v19912_v60, %v23785_v14  ;;  %v4057_v4 = vpop.f32.mrb[9].mxu0 }
 0x343   : > { %v4601_v11 = vsel %vm23816_vm13, %v4592_v52, %v4600_v26  ;;  %v4614_v47 = vshrl.u32 %v18718_v45, 16  ;;  %v4617_v24 = vshll.u32 %v18718_v45, 16  ;;  %v4432_v13 = vmul.f32 %v23790_v30, %v4216_v49  ;;  %v19913_v1 = vpop.f32.mrb[10].mxu0 }
 0x344   : > { %4977 = vst.msk [vmem:[#allocation2 + $0x10] sm:$0xf] %vm419_vm7, %v4601_v11  ;;  %v4636_v22 = vrot.slane %v4634_v0, 6  ;;  %v4639_v5 = vrot.slane %v4637_v53, 7  ;;  %v4644_v3 = vshrl.u32 %v18721_v62, 16  ;;  %v4647_v51 = vshll.u32 %v18721_v62, 16  ;;  %v23859_v53 = vpop.permute.xlu1 %4314 }
 0x345   : > { %v4060_v33 = vpop.f32.mrb[11].mxu0  ;;  %v4616_v20 = vrot.slane %v4614_v47, 6  ;;  %v4619_v32 = vrot.slane %v4617_v24, 7  ;;  %v18719_v41 = vpack.c.bf16 %v4432_v13, %v4432_v13  ;;  %v4437_v57 = vmul.f32 %v23831_v37, %v4221_v9  ;;  %28683 = vst [vmem:[#allocation18_spill] sm:$0xff] %v23859_v53  ;;  %v23863_v24 = vpop.permute.xlu0 %4319 }
 0x346   : > { %v4640_v26 = vor.u32 %v4639_v5, %v4636_v22  ;;  %v4646_v54 = vrot.slane %v4644_v3, 6  ;;  %v4649_v2 = vrot.slane %v4647_v51, 7  ;;  %v4219_v31 = vadd.f32 %v23785_v14, %v4057_v4  ;;  %28684 = vst [vmem:[#allocation19_spill] sm:$0xff] %v23863_v24 }
 0x347   : > { %v4620_v48 = vor.u32 %v4619_v32, %v4616_v20  ;;  %v4624_v63 = vshrl.u32 %v18719_v41, 16  ;;  %v4627_v59 = vshll.u32 %v18719_v41, 16  ;;  %v18724_v7 = vpack.c.bf16 %v4437_v57, %v4437_v57 }
 0x348   : > { %v4642_v15 = vrot.slane %v4640_v26, 4  ;;  %v4650_v39 = vor.u32 %v4649_v2, %v4646_v54  ;;  %v4435_v42 = vmul.f32 %v23805_v17, %v4219_v31  ;;  %v4222_v55 = vadd.f32 %v19913_v1, %v23785_v14 }
 0x349   : > { %v4621_v10 = vsel %vm23816_vm13, %v4612_v56, %v4620_v48  ;;  %v4622_v21 = vrot.slane %v4620_v48, 4  ;;  %v4626_v23 = vrot.slane %v4624_v63, 6  ;;  %v4629_v27 = vrot.slane %v4627_v59, 7  ;;  %v19916_v28 = vpop.f32.mrb[12].mxu0 }
 0x34a   : > { %4979 = vst.msk [vmem:[#allocation2 + $0x18] sm:$0xf] %vm419_vm7, %v4621_v10  ;;  %v4651_v8 = vsel %vm23816_vm13, %v4642_v15, %v4650_v39  ;;  %v4652_v25 = vrot.slane %v4650_v39, 4  ;;  %v4674_v35 = vshrl.u32 %v18724_v7, 16  ;;  %v4677_v40 = vshll.u32 %v18724_v7, 16  ;;  %v4073_v52 = vpop.f32.mrb[13].mxu0 }
 0x34b   : > { %4982 = vst.msk [vmem:[#allocation2 + $0x24] sm:$0xf] %vm419_vm7, %v4651_v8  ;;  %v4630_v45 = vor.u32 %v4629_v27, %v4626_v23  ;;  %v18722_v49 = vpack.c.bf16 %v4435_v42, %v4435_v42  ;;  %v4438_v60 = vmul.f32 %v23844_v43, %v4222_v55  ;;  %v4220_v56 = vadd.f32 %v23785_v14, %v4060_v33  ;;  %v19917_v0 = vpop.f32.mrb[14].mxu0  ;;  %v23878_v55 = vpop.permute.xlu1 %4324  ;;  %v23880_v27 = vld [vmem:[#allocation2 + $0x8] sm:$0xff]  }
 0x34c   : > { %v4676_v62 = vrot.slane %v4674_v35, 6  ;;  %v4679_v9 = vrot.slane %v4677_v40, 7  ;;  %v4225_v4 = vadd.f32 %v19916_v28, %v23785_v14  ;;  %v4223_v11 = vadd.f32 %v23785_v14, %v4073_v52  ;;  %v4076_v47 = vpop.f32.mrb[15].mxu0  ;;  %28685 = vst [vmem:[#allocation20_spill] sm:$0xff] %v23878_v55  ;;  %v23882_v8 = vpop.permute.xlu0 %4329 }
 0x34d   : > { %v4631_v13 = vsel %vm23816_vm13, %v4622_v21, %v4630_v45  ;;  %v4632_v1 = vrot.slane %v4630_v45, 4  ;;  %v4654_v22 = vshrl.u32 %v18722_v49, 16  ;;  %v4657_v5 = vshll.u32 %v18722_v49, 16  ;;  %28686 = vst [vmem:[#allocation21_spill] sm:$0xff] %v23882_v8 }
 0x34e   : > { %4980 = vst.msk [vmem:[#allocation2 + $0x1c] sm:$0xf] %vm419_vm7, %v4631_v13  ;;  %v23868_v3 = vor.u32 %v4679_v9, %v4676_v62  ;;  %v18725_v51 = vpack.c.bf16 %v4438_v60, %v4438_v60  ;;  %v4436_v33 = vmul.f32 %v23826_v29, %v4220_v56  ;;  %v4441_v20 = vmul.f32 %v23863_v24, %v4225_v4 }
 0x34f   : > { %v4641_v32 = vsel %vm23816_vm13, %v4632_v1, %v4640_v26  ;;  %v4656_v41 = vrot.slane %v4654_v22, 6  ;;  %v4659_v57 = vrot.slane %v4657_v5, 7  ;;  %v4439_v54 = vmul.f32 %v23847_v44, %v4223_v11 }
 0x350   : > { %4981 = vst.msk [vmem:[#allocation2 + $0x20] sm:$0xf] %vm419_vm7, %v4641_v32  ;;  %v4682_v2 = vrot.slane %v23868_v3, 4  ;;  %v4684_v31 = vshrl.u32 %v18725_v51, 16  ;;  %v4687_v48 = vshll.u32 %v18725_v51, 16  ;;  %v18723_v63 = vpack.c.bf16 %v4436_v33, %v4436_v33 }
 0x351   : > { %v4660_v59 = vor.u32 %v4659_v57, %v4656_v41  ;;  %v18728_v7 = vpack.c.bf16 %v4441_v20, %v4441_v20  ;;  %v18726_v15 = vpack.c.bf16 %v4439_v54, %v4439_v54  ;;  %v4226_v39 = vadd.f32 %v19917_v0, %v23785_v14  ;;  %v19920_v42 = vpop.f32.mrb[16].mxu0  ;;  %v23896_v57 = vpop.permute.xlu1 %4334 }
 0x352   : > { %v4686_v26 = vrot.slane %v4684_v31, 6  ;;  %v4689_v10 = vrot.slane %v4687_v48, 7  ;;  %v4664_v21 = vshrl.u32 %v18723_v63, 16  ;;  %v4667_v23 = vshll.u32 %v18723_v63, 16  ;;  %v4089_v28 = vpop.f32.mrb[17].mxu0  ;;  %28687 = vst [vmem:[#allocation22_spill] sm:$0xff] %v23896_v57 }
 0x353   : > { %v4661_v35 = vsel %vm23816_vm13, %v4652_v25, %v4660_v59  ;;  %v4662_v40 = vrot.slane %v4660_v59, 4  ;;  %v4714_v52 = vshrl.u32 %v18728_v7, 16  ;;  %v4717_v45 = vshll.u32 %v18728_v7, 16  ;;  %v19921_v49 = vpop.f32.mrb[18].mxu0  ;;  %v23902_v63 = vld [vmem:[#allocation2 + $0x10] sm:$0xff]   ;;  %v23904_v59 = vpop.permute.xlu0 %4339 }
 0x354   : > { %4983 = vst.msk [vmem:[#allocation2 + $0x28] sm:$0xf] %vm419_vm7, %v4661_v35  ;;  %v4690_v60 = vor.u32 %v4689_v10, %v4686_v26  ;;  %v4666_v56 = vrot.slane %v4664_v21, 6  ;;  %v4669_v0 = vrot.slane %v4667_v23, 7  ;;  %v4694_v62 = vshrl.u32 %v18726_v15, 16  ;;  %v23887_v9 = vpop.f32.mrb[19].mxu0 }
 0x355   : > { %v4716_v4 = vrot.slane %v4714_v52, 6  ;;  %v4719_v11 = vrot.slane %v4717_v45, 7  ;;  %v4697_v13 = vshll.u32 %v18726_v15, 16  ;;  %v4442_v1 = vmul.f32 %v23878_v55, %v4226_v39  ;;  %28688 = vst [vmem:[#allocation23_spill] sm:$0xff] %v23904_v59 }
 0x356   : > { %v4691_v25 = vsel %vm23816_vm13, %v4682_v2, %v4690_v60  ;;  %v4692_v22 = vrot.slane %v4690_v60, 4  ;;  %v4670_v5 = vor.u32 %v4669_v0, %v4666_v56  ;;  %v4696_v51 = vrot.slane %v4694_v62, 6 }
 0x357   : > { %4986 = vst.msk [vmem:[#allocation2 + $0x34] sm:$0xf] %vm419_vm7, %v4691_v25  ;;  %v23893_v33 = vor.u32 %v4719_v11, %v4716_v4  ;;  %v4699_v20 = vrot.slane %v4697_v13, 7  ;;  %v18729_v32 = vpack.c.bf16 %v4442_v1, %v4442_v1  ;;  %v4224_v41 = vadd.f32 %v23785_v14, %v4076_v47 }
 0x358   : > { %v4671_v54 = vsel %vm23816_vm13, %v4662_v40, %v4670_v5  ;;  %v4672_v31 = vrot.slane %v4670_v5, 4  ;;  %v4229_v48 = vadd.f32 %v19920_v42, %v23785_v14  ;;  %v5163_v2 = vshll.u32 %v23880_v27, 16 }
 0x359   : > { %4984 = vst.msk [vmem:[#allocation2 + $0x2c] sm:$0xf] %vm419_vm7, %v4671_v54  ;;  %v4722_v7 = vrot.slane %v23893_v33, 4  ;;  %v4700_v15 = vor.u32 %v4699_v20, %v4696_v51  ;;  %v4724_v47 = vshrl.u32 %v18729_v32, 16  ;;  %v4727_v39 = vshll.u32 %v18729_v32, 16  ;;  %v19924_v26 = vpop.f32.mrb[20].mxu0 }
 0x35a   : > { %v4681_v10 = vsel %vm23816_vm13, %v4672_v31, %v23868_v3  ;;  %v4440_v42 = vmul.f32 %v23859_v53, %v4224_v41  ;;  %v4445_v21 = vmul.f32 %v23904_v59, %v4229_v48  ;;  %v5165_v23 = vrot.slane %v5163_v2, 1  ;;  %v23913_v35 = vpop.f32.mrb[21].mxu0  ;;  %v23932_v41 = vpop.permute.xlu1 %4344  ;;  %v24295_v59 = vld [vmem:[#allocation2 + $0x10] sm:$0xff]  }
 0x35b   : > { %4985 = vst.msk [vmem:[#allocation2 + $0x30] sm:$0xf] %vm419_vm7, %v4681_v10  ;;  %v4701_v40 = vsel %vm23816_vm13, %v4692_v22, %v4700_v15  ;;  %v4702_v52 = vrot.slane %v4700_v15, 4  ;;  %v4726_v45 = vrot.slane %v4724_v47, 6  ;;  %v4729_v60 = vrot.slane %v4727_v39, 7  ;;  %v23918_v56 = vpop.f32.mrb[22].mxu0 }
 0x35c   : > { %4987 = vst.msk [vmem:[#allocation2 + $0x38] sm:$0xf] %vm419_vm7, %v4701_v40  ;;  %v18727_v3 = vpack.c.bf16 %v4440_v42, %v4440_v42  ;;  %v18732_v0 = vpack.c.bf16 %v4445_v21, %v4445_v21  ;;  %v5166_v62 = vsel %vm652_vm1, %v23801_v6, %v5165_v23  ;;  %v5167_v4 = vshrl.u32 %v23880_v27, 16  ;;  %v23924_v11 = vpop.f32.mrb[23].mxu0  ;;  %28689 = vst [vmem:[#allocation24_spill] sm:$0xff] %v23932_v41  ;;  %v23934_v6 = vpop.permute.xlu0 %4349 }
 0x35d   : > { %v23926_v13 = vor.u32 %v4729_v60, %v4726_v45  ;;  %19942 = vmatprep.mubr.msk.bf16.mxu1 %vm5315_vm14, %v5166_v62  ;;  %v4227_v1 = vadd.f32 %v23785_v14, %v4089_v28  ;;  %v4230_v25 = vadd.f32 %v19921_v49, %v23785_v14  ;;  %v5171_v22 = vshll.u32 %v23902_v63, 16  ;;  %28690 = vst [vmem:[#allocation25_spill] sm:$0xff] %v23934_v6 }
 0x35e   : > { %v4704_v5 = vshrl.u32 %v18727_v3, 16  ;;  %v4707_v51 = vshll.u32 %v18727_v3, 16  ;;  %v4754_v20 = vshrl.u32 %v18732_v0, 16  ;;  %v4757_v32 = vshll.u32 %v18732_v0, 16  ;;  %v22367_v3 = vld [vmem:[%s28552_s4 + $0x8] sm:$0xff]  }
 0x35f   : > { %v4731_v27 = vsel %vm23816_vm13, %v4722_v7, %v23926_v13  ;;  %v4732_v54 = vrot.slane %v23926_v13, 4  ;;  %v5169_v31 = vor.u32 %v5167_v4, %v5165_v23  ;;  %v4443_v28 = vmul.f32 %v23882_v8, %v4227_v1  ;;  %v23957_v13 = vld [vmem:[#allocation2 + $0x18] sm:$0xff]  }
 0x360   : > { %4990 = vst.msk [vmem:[#allocation2 + $0x44] sm:$0xf] %vm419_vm7, %v4731_v27  ;;  %v4706_v49 = vrot.slane %v4704_v5, 6  ;;  %v4709_v48 = vrot.slane %v4707_v51, 7  ;;  %v4756_v2 = vrot.slane %v4754_v20, 6  ;;  %v4759_v15 = vrot.slane %v4757_v32, 7  ;;  %v23968_v51 = vpop.permute.xlu1 %4354  ;;  %v23970_v20 = vpop.permute.xlu0 %4359 }
 0x361   : > { %v18730_v47 = vpack.c.bf16 %v4443_v28, %v4443_v28  ;;  %v4446_v39 = vmul.f32 %v23932_v41, %v4230_v25  ;;  %v5173_v10 = vrot.slane %v5171_v22, 1  ;;  %v4228_v42 = vadd.f32 %v23785_v14, %v23887_v9  ;;  %v23945_v21 = vpop.f32.mrb[24].mxu0  ;;  %28691 = vst [vmem:[#allocation26_spill] sm:$0xff] %v23968_v51  ;;  %28692 = vst [vmem:[#allocation27_spill] sm:$0xff] %v23970_v20 }
 0x362   : > { %v4710_v7 = vor.u32 %v4709_v48, %v4706_v49  ;;  %v23947_v40 = vor.u32 %v4759_v15, %v4756_v2  ;;  %v4233_v23 = vadd.f32 %v19924_v26, %v23785_v14  ;;  %v5175_v45 = vshrl.u32 %v23902_v63, 16  ;;  %v23951_v60 = vpop.f32.mrb[25].mxu0  ;;  %v23981_v15 = vld [vmem:[%s28552_s4 + $0x20] sm:$0xff]  }
 0x363   : > { %v4734_v0 = vshrl.u32 %v18730_v47, 16  ;;  %v4737_v62 = vshll.u32 %v18730_v47, 16  ;;  %v18733_v4 = vpack.c.bf16 %v4446_v39, %v4446_v39  ;;  %v5174_v9 = vsel %vm652_vm1, %v5169_v31, %v5173_v10  ;;  %v23959_v1 = vpop.f32.mrb[26].mxu0 }
 0x364   : > { %v4711_v26 = vsel %vm23816_vm13, %v4702_v52, %v4710_v7  ;;  %v4712_v25 = vrot.slane %v4710_v7, 4  ;;  %v4762_v63 = vrot.slane %v23947_v40, 4  ;;  %19943 = vmatmul.mubr.msk.bf16.vlgmr.msra.gmra.mrb[0].mxu1 %vm5315_vm14, %v5174_v9  ;;  %v4444_v22 = vmul.f32 %v23896_v57, %v4228_v42  ;;  %v23966_v5 = vpop.f32.mrb[27].mxu0  ;;  %v23991_v9 = vld [vmem:[#allocation2 + $0x20] sm:$0xff]  }
 0x365   : > { %4988 = vst.msk [vmem:[#allocation2 + $0x3c] sm:$0xf] %vm419_vm7, %v4711_v26  ;;  %v4736_v32 = vrot.slane %v4734_v0, 6  ;;  %v4739_v27 = vrot.slane %v4737_v62, 7  ;;  %v4764_v31 = vshrl.u32 %v18733_v4, 16  ;;  %v4767_v28 = vshll.u32 %v18733_v4, 16  ;;  %19979 = vmatpush3.bf16.msra.mxu1 %v23767_v34 }
 0x366   : > { %v4721_v52 = vsel %vm23816_vm13, %v4712_v25, %v23893_v33  ;;  %v18731_v49 = vpack.c.bf16 %v4444_v22, %v4444_v22  ;;  %v4449_v48 = vmul.f32 %v23970_v20, %v4233_v23  ;;  %v5177_v2 = vor.u32 %v5175_v45, %v5173_v10  ;;  %19980 = vmatprep.subr.bf16.mxu1 %v22367_v3  ;;  %v24059_v20 = vld [vmem:[#allocation2 + $0x30] sm:$0xff]  }
 0x367   : > { %4989 = vst.msk [vmem:[#allocation2 + $0x40] sm:$0xf] %vm419_vm7, %v4721_v52  ;;  %v4740_v47 = vor.u32 %v4739_v27, %v4736_v32  ;;  %v4766_v39 = vrot.slane %v4764_v31, 6  ;;  %v4769_v42 = vrot.slane %v4767_v28, 7  ;;  %v5179_v34 = vshll.u32 %v23957_v13, 16 }
 0x368   : > { %v4744_v7 = vshrl.u32 %v18731_v49, 16  ;;  %v4747_v0 = vshll.u32 %v18731_v49, 16  ;;  %v18736_v33 = vpack.c.bf16 %v4449_v48, %v4449_v48  ;;  %v4231_v23 = vadd.f32 %v23785_v14, %v23913_v35  ;;  %v23999_v35 = vpop.permute.xlu1 %4364  ;;  %v24009_v48 = vpop.permute.xlu0 %4369 }
 0x369   : > { %v4741_v10 = vsel %vm23816_vm13, %v4732_v54, %v4740_v47  ;;  %v4742_v45 = vrot.slane %v4740_v47, 4  ;;  %v23989_v62 = vor.u32 %v4769_v42, %v4766_v39  ;;  %v5181_v4 = vrot.slane %v5179_v34, 1  ;;  %v23993_v26 = vpop.f32.mrb[28].mxu0  ;;  %19981 = vmatpush3.bf16.msra.mxu1 %v22367_v3  ;;  %28693 = vst [vmem:[#allocation28_spill] sm:$0xff] %v23999_v35  ;;  %28694 = vst [vmem:[#allocation29_spill] sm:$0xff] %v24009_v48 }
 0x36a   : > { %4991 = vst.msk [vmem:[#allocation2 + $0x48] sm:$0xf] %vm419_vm7, %v4741_v10  ;;  %v4746_v25 = vrot.slane %v4744_v7, 6  ;;  %v4749_v22 = vrot.slane %v4747_v0, 7  ;;  %v4794_v32 = vshrl.u32 %v18736_v33, 16  ;;  %v4797_v27 = vshll.u32 %v18736_v33, 16  ;;  %20018 = vmatprep.subr.bf16.mxu1 %v23981_v15 }
 0x36b   : > { %v23996_v31 = vpop.f32.mrb[29].mxu0  ;;  %v4771_v54 = vsel %vm23816_vm13, %v4762_v63, %v23989_v62  ;;  %v4772_v28 = vrot.slane %v23989_v62, 4  ;;  %v5182_v3 = vsel %vm652_vm1, %v5177_v2, %v5181_v4  ;;  %v4447_v52 = vmul.f32 %v23934_v6, %v4231_v23 }
 0x36c   : > { %v24007_v49 = vpop.f32.mrb[30].mxu0  ;;  %4994 = vst.msk [vmem:[#allocation2 + $0x54] sm:$0xf] %vm419_vm7, %v4771_v54  ;;  %v4750_v47 = vor.u32 %v4749_v22, %v4746_v25  ;;  %v4796_v39 = vrot.slane %v4794_v32, 6  ;;  %v4799_v42 = vrot.slane %v4797_v27, 7  ;;  %19946 = vmatprep.mubr.msk.bf16.mxu1 %vm5315_vm14, %v5182_v3  ;;  %v4234_v63 = vadd.f32 %v23918_v56, %v23785_v14 }
 0x36d   : > { %v24015_v34 = vpop.f32.mrb[31].mxu0  ;;  %v18734_v7 = vpack.c.bf16 %v4447_v52, %v4447_v52  ;;  %v5183_v2 = vshrl.u32 %v23957_v13, 16  ;;  %v5187_v0 = vshll.u32 %v23991_v9, 16  ;;  %v4232_v33 = vadd.f32 %v23785_v14, %v23924_v11  ;;  %v24027_v13 = vld [vmem:[#allocation2 + $0x28] sm:$0xff]   ;;  %v24034_v52 = vpop.permute.xlu1 %4374 }
 0x36e   : > { %v4751_v23 = vsel %vm23816_vm13, %v4742_v45, %v4750_v47  ;;  %v4752_v10 = vrot.slane %v4750_v47, 4  ;;  %v24023_v62 = vor.u32 %v4799_v42, %v4796_v39  ;;  %v4450_v25 = vmul.f32 %v23999_v35, %v4234_v63  ;;  %28695 = vst [vmem:[#allocation30_spill] sm:$0xff] %v24034_v52 }
 0x36f   : > { %4992 = vst.msk [vmem:[#allocation2 + $0x4c] sm:$0xf] %vm419_vm7, %v4751_v23  ;;  %v4774_v56 = vshrl.u32 %v18734_v7, 16  ;;  %v4777_v22 = vshll.u32 %v18734_v7, 16  ;;  %v5185_v32 = vor.u32 %v5183_v2, %v5181_v4  ;;  %v5189_v27 = vrot.slane %v5187_v0, 1  ;;  %v24042_v7 = vpop.permute.xlu0 %4379 }
 0x370   : > { %v4761_v11 = vsel %vm23816_vm13, %v4752_v10, %v23947_v40  ;;  %v4802_v54 = vrot.slane %v24023_v62, 4  ;;  %v18737_v45 = vpack.c.bf16 %v4450_v25, %v4450_v25  ;;  %v4448_v3 = vmul.f32 %v23968_v51, %v4232_v33  ;;  %28696 = vst [vmem:[#allocation31_spill] sm:$0xff] %v24042_v7 }
 0x371   : > { %4993 = vst.msk [vmem:[#allocation2 + $0x50] sm:$0xf] %vm419_vm7, %v4761_v11  ;;  %v4776_v47 = vrot.slane %v4774_v56, 6  ;;  %v4779_v39 = vrot.slane %v4777_v22, 7  ;;  %v5190_v4 = vsel %vm652_vm1, %v5185_v32, %v5189_v27  ;;  %v4237_v42 = vadd.f32 %v23945_v21, %v23785_v14  ;;  %v24040_v63 = vpop.f32.mrb[32].mxu0  ;;  %v24064_v41 = vpop.permute.xlu1 %4384 }
 0x372   : > { %v4804_v40 = vshrl.u32 %v18737_v45, 16  ;;  %v4807_v2 = vshll.u32 %v18737_v45, 16  ;;  %19947 = vmatmul.mubr.msk.bf16.gmra.mrb[4].mxu1 %vm5315_vm14, %v5190_v4  ;;  %v18735_v0 = vpack.c.bf16 %v4448_v3, %v4448_v3  ;;  %v5191_v33 = vshrl.u32 %v23991_v9, 16  ;;  %v24046_v23 = vpop.f32.mrb[33].mxu0  ;;  %28697 = vst [vmem:[#allocation32_spill] sm:$0xff] %v24064_v41 }
 0x373   : > { %v4780_v10 = vor.u32 %v4779_v39, %v4776_v47  ;;  %v4453_v25 = vmul.f32 %v24042_v7, %v4237_v42  ;;  %v5195_v56 = vshll.u32 %v24027_v13, 16  ;;  %v4235_v21 = vadd.f32 %v23785_v14, %v23951_v60  ;;  %v24052_v22 = vpop.f32.mrb[34].mxu0 }
 0x374   : > { %v4806_v32 = vrot.slane %v4804_v40, 6  ;;  %v4809_v11 = vrot.slane %v4807_v2, 7  ;;  %v4784_v45 = vshrl.u32 %v18735_v0, 16  ;;  %v4787_v50 = vshll.u32 %v18735_v0, 16  ;;  %v24054_v4 = vpop.f32.mrb[35].mxu0 }
 0x375   : > { %v4781_v3 = vsel %vm23816_vm13, %v4772_v28, %v4780_v10  ;;  %v4782_v35 = vrot.slane %v4780_v10, 4  ;;  %v18740_v47 = vpack.c.bf16 %v4453_v25, %v4453_v25  ;;  %v5193_v39 = vor.u32 %v5191_v33, %v5189_v27 }
 0x376   : > { %4995 = vst.msk [vmem:[#allocation2 + $0x58] sm:$0xf] %vm419_vm7, %v4781_v3  ;;  %v4810_v42 = vor.u32 %v4809_v11, %v4806_v32  ;;  %v4786_v7 = vrot.slane %v4784_v45, 6  ;;  %v4789_v51 = vrot.slane %v4787_v50, 7  ;;  %v5197_v60 = vrot.slane %v5195_v56, 1  ;;  %v24069_v50 = vpop.permute.xlu0 %4389 }
 0x377   : > { %v4834_v40 = vshrl.u32 %v18740_v47, 16  ;;  %v4837_v2 = vshll.u32 %v18740_v47, 16  ;;  %v4451_v0 = vmul.f32 %v24009_v48, %v4235_v21  ;;  %v4238_v6 = vadd.f32 %v23959_v1, %v23785_v14  ;;  %28698 = vst [vmem:[#allocation33_spill] sm:$0xff] %v24069_v50 }
 0x378   : > { %v4811_v28 = vsel %vm23816_vm13, %v4802_v54, %v4810_v42  ;;  %v4812_v27 = vrot.slane %v4810_v42, 4  ;;  %v4790_v33 = vor.u32 %v4789_v51, %v4786_v7  ;;  %v5198_v10 = vsel %vm652_vm1, %v5193_v39, %v5197_v60  ;;  %v24081_v39 = vld [vmem:[#allocation2 + $0x38] sm:$0xff]   ;;  %v24281_v48 = vld [vmem:[#allocation2 + $0x50] sm:$0xff]  }
 0x379   : > { %4998 = vst.msk [vmem:[#allocation2 + $0x64] sm:$0xf] %vm419_vm7, %v4811_v28  ;;  %v4836_v25 = vrot.slane %v4834_v40, 6  ;;  %v4839_v56 = vrot.slane %v4837_v2, 7  ;;  %19950 = vmatprep.mubr.msk.bf16.mxu1 %vm5315_vm14, %v5198_v10  ;;  %v18738_v21 = vpack.c.bf16 %v4451_v0, %v4451_v0  ;;  %v4454_v1 = vmul.f32 %v24064_v41, %v4238_v6  ;;  %v24090_v10 = vpop.permute.xlu1 %4394 }
 0x37a   : > { %v4791_v32 = vsel %vm23816_vm13, %v4782_v35, %v4790_v33  ;;  %v4792_v11 = vrot.slane %v4790_v33, 4  ;;  %v5199_v54 = vshrl.u32 %v24027_v13, 16  ;;  %v5203_v51 = vshll.u32 %v24059_v20, 16  ;;  %28699 = vst [vmem:[#allocation34_spill] sm:$0xff] %v24090_v10 }
 0x37b   : > { %4996 = vst.msk [vmem:[#allocation2 + $0x5c] sm:$0xf] %vm419_vm7, %v4791_v32  ;;  %v24079_v7 = vor.u32 %v4839_v56, %v4836_v25  ;;  %v4814_v45 = vshrl.u32 %v18738_v21, 16  ;;  %v4817_v3 = vshll.u32 %v18738_v21, 16  ;;  %v18741_v47 = vpack.c.bf16 %v4454_v1, %v4454_v1 }
 0x37c   : > { %v4801_v6 = vsel %vm23816_vm13, %v4792_v11, %v24023_v62  ;;  %v5201_v42 = vor.u32 %v5199_v54, %v5197_v60  ;;  %v5205_v35 = vrot.slane %v5203_v51, 1  ;;  %v4236_v40 = vadd.f32 %v23785_v14, %v23966_v5  ;;  %v24096_v60 = vpop.permute.xlu0 %4399 }
 0x37d   : > { %4997 = vst.msk [vmem:[#allocation2 + $0x60] sm:$0xf] %vm419_vm7, %v4801_v6  ;;  %v4842_v2 = vrot.slane %v24079_v7, 4  ;;  %v4816_v0 = vrot.slane %v4814_v45, 6  ;;  %v4819_v28 = vrot.slane %v4817_v3, 7  ;;  %v4844_v33 = vshrl.u32 %v18741_v47, 16 }
 0x37e   : > { %v4847_v25 = vshll.u32 %v18741_v47, 16  ;;  %v5206_v56 = vsel %vm652_vm1, %v5201_v42, %v5205_v35  ;;  %v4452_v21 = vmul.f32 %v24034_v52, %v4236_v40  ;;  %v4241_v62 = vadd.f32 %v23993_v26, %v23785_v14  ;;  %28700 = vst [vmem:[#allocation35_spill] sm:$0xff] %v24096_v60 }
 0x37f   : > { %v4820_v5 = vor.u32 %v4819_v28, %v4816_v0  ;;  %v4846_v1 = vrot.slane %v4844_v33, 6  ;;  %19951 = vmatmul.mubr.msk.bf16.gmra.mrb[8].mxu1 %vm5315_vm14, %v5206_v56  ;;  %v5207_v32 = vshrl.u32 %v24059_v20, 16  ;;  %v5211_v11 = vshll.u32 %v24081_v39, 16  ;;  %v24107_v56 = vld [vmem:[#allocation2 + $0x40] sm:$0xff]  }
 0x380   : > { %v4849_v54 = vrot.slane %v4847_v25, 7  ;;  %v18739_v51 = vpack.c.bf16 %v4452_v21, %v4452_v21  ;;  %v4457_v45 = vmul.f32 %v24096_v60, %v4241_v62  ;;  %v4239_v3 = vadd.f32 %v23785_v14, %v23996_v31  ;;  %v24114_v62 = vpop.permute.xlu1 %4404 }
 0x381   : > { %v4821_v26 = vsel %vm23816_vm13, %v4812_v27, %v4820_v5  ;;  %v4822_v47 = vrot.slane %v4820_v5, 4  ;;  %v5209_v6 = vor.u32 %v5207_v32, %v5205_v35  ;;  %v5213_v42 = vrot.slane %v5211_v11, 1  ;;  %28701 = vst [vmem:[#allocation36_spill] sm:$0xff] %v24114_v62 }
 0x382   : > { %4999 = vst.msk [vmem:[#allocation2 + $0x68] sm:$0xf] %vm419_vm7, %v4821_v26  ;;  %v4850_v40 = vor.u32 %v4849_v54, %v4846_v1  ;;  %v4824_v0 = vshrl.u32 %v18739_v51, 16  ;;  %v4827_v28 = vshll.u32 %v18739_v51, 16  ;;  %v18744_v33 = vpack.c.bf16 %v4457_v45, %v4457_v45 }
 0x383   : > { %v5214_v25 = vsel %vm652_vm1, %v5209_v6, %v5213_v42  ;;  %v4455_v21 = vmul.f32 %v24069_v50, %v4239_v3  ;;  %v4242_v31 = vadd.f32 %v24007_v49, %v23785_v14  ;;  %v5215_v27 = vshrl.u32 %v24081_v39, 16  ;;  %v24272_v50 = vld [vmem:[#allocation2 + $0x40] sm:$0xff]  }
 0x384   : > { %v4851_v35 = vsel %vm23816_vm13, %v4842_v2, %v4850_v40  ;;  %v4852_v5 = vrot.slane %v4850_v40, 4  ;;  %v4826_v1 = vrot.slane %v4824_v0, 6  ;;  %v4829_v32 = vrot.slane %v4827_v28, 7  ;;  %19954 = vmatprep.mubr.msk.bf16.mxu1 %vm5315_vm14, %v5214_v25  ;;  %v24124_v2 = vpop.permute.xlu0 %4409 }
 0x385   : > { %5002 = vst.msk [vmem:[#allocation2 + $0x74] sm:$0xf] %vm419_vm7, %v4851_v35  ;;  %v4874_v11 = vshrl.u32 %v18744_v33, 16  ;;  %v4877_v54 = vshll.u32 %v18744_v33, 16  ;;  %v18742_v51 = vpack.c.bf16 %v4455_v21, %v4455_v21  ;;  %v4458_v45 = vmul.f32 %v24114_v62, %v4242_v31  ;;  %28702 = vst [vmem:[#allocation37_spill] sm:$0xff] %v24124_v2  ;;  %v24128_v31 = vld [vmem:[#allocation2 + $0x48] sm:$0xff]  }
 0x386   : > { %v4830_v49 = vor.u32 %v4829_v32, %v4826_v1  ;;  %v5217_v3 = vor.u32 %v5215_v27, %v5213_v42  ;;  %v5219_v26 = vshll.u32 %v24107_v56, 16  ;;  %v4240_v6 = vadd.f32 %v23785_v14, %v24015_v34  ;;  %v24132_v34 = vpop.permute.xlu1 %4414 }
 0x387   : > { %v4876_v40 = vrot.slane %v4874_v11, 6  ;;  %v4879_v0 = vrot.slane %v4877_v54, 7  ;;  %v4854_v28 = vshrl.u32 %v18742_v51, 16  ;;  %v4857_v25 = vshll.u32 %v18742_v51, 16  ;;  %28703 = vst [vmem:[#allocation38_spill] sm:$0xff] %v24132_v34 }
 0x388   : > { %v4831_v35 = vsel %vm23816_vm13, %v4822_v47, %v4830_v49  ;;  %v4832_v33 = vrot.slane %v4830_v49, 4  ;;  %v18745_v21 = vpack.c.bf16 %v4458_v45, %v4458_v45  ;;  %v5221_v60 = vrot.slane %v5219_v26, 1  ;;  %v22612_v26 = vld [vmem:[%s28551_s3] ss:$0 sm:$0xff] }
 0x389   : > { %5000 = vst.msk [vmem:[#allocation2 + $0x6c] sm:$0xf] %vm419_vm7, %v4831_v35  ;;  %v4880_v42 = vor.u32 %v4879_v0, %v4876_v40  ;;  %v4856_v27 = vrot.slane %v4854_v28, 6  ;;  %v4859_v1 = vrot.slane %v4857_v25, 7  ;;  %v4456_v14 = vmul.f32 %v24090_v10, %v4240_v6 }
 0x38a   : > { %v4841_v32 = vsel %vm23816_vm13, %v4832_v33, %v24079_v7  ;;  %v4884_v11 = vshrl.u32 %v18745_v21, 16  ;;  %v4887_v47 = vshll.u32 %v18745_v21, 16  ;;  %v5222_v54 = vsel %vm652_vm1, %v5217_v3, %v5221_v60  ;;  %v24146_v3 = vpop.permute.xlu0 %4419 }
 0x38b   : > { %5001 = vst.msk [vmem:[#allocation2 + $0x70] sm:$0xf] %vm419_vm7, %v4841_v32  ;;  %v4882_v51 = vrot.slane %v4880_v42, 4  ;;  %v4860_v45 = vor.u32 %v4859_v1, %v4856_v27  ;;  %19955 = vmatmul.mubr.msk.bf16.gmra.mrb[12].mxu1 %vm5315_vm14, %v5222_v54  ;;  %v18743_v49 = vpack.c.bf16 %v4456_v14, %v4456_v14  ;;  %v4245_v6 = vadd.f32 %v22612_v26, %v24040_v63  ;;  %v24154_v32 = vld [vmem:[#allocation2 + $0x50] sm:$0xff]  }
 0x38c   : > { %v4886_v40 = vrot.slane %v4884_v11, 6  ;;  %v4889_v0 = vrot.slane %v4887_v47, 7  ;;  %v5223_v7 = vshrl.u32 %v24107_v56, 16  ;;  %v5227_v28 = vshll.u32 %v24128_v31, 16  ;;  %28704 = vst [vmem:[#allocation39_spill] sm:$0xff] %v24146_v3 }
 0x38d   : > { %v4861_v25 = vsel %vm23816_vm13, %v4852_v5, %v4860_v45  ;;  %v4862_v35 = vrot.slane %v4860_v45, 4  ;;  %v4864_v33 = vshrl.u32 %v18743_v49, 16  ;;  %v4867_v21 = vshll.u32 %v18743_v49, 16  ;;  %v24158_v5 = vpop.permute.xlu1 %4424 }
 0x38e   : > { %5003 = vst.msk [vmem:[#allocation2 + $0x78] sm:$0xf] %vm419_vm7, %v4861_v25  ;;  %v24151_v27 = vor.u32 %v4889_v0, %v4886_v40  ;;  %v4461_v63 = vmul.f32 %v24146_v3, %v4245_v6  ;;  %v5225_v1 = vor.u32 %v5223_v7, %v5221_v60  ;;  %v5229_v14 = vrot.slane %v5227_v28, 1  ;;  %28705 = vst [vmem:[#allocation40_spill] sm:$0xff] %v24158_v5 }
 0x38f   : > { %v4866_v11 = vrot.slane %v4864_v33, 6  ;;  %v4869_v47 = vrot.slane %v4867_v21, 7  ;;  %v4243_v54 = vadd.f32 %v22612_v26, %v24046_v23  ;;  %v4246_v62 = vadd.f32 %v22612_v26, %v24052_v22 }
 0x390   : > { %v4891_v45 = vsel %vm23816_vm13, %v4882_v51, %v24151_v27  ;;  %v4892_v49 = vrot.slane %v24151_v27, 4  ;;  %v18748_v40 = vpack.c.bf16 %v4461_v63, %v4461_v63  ;;  %v5230_v60 = vsel %vm652_vm1, %v5225_v1, %v5229_v14  ;;  %v24320_v44 = vld [vmem:[#allocation2 + $0x68] sm:$0xff]  }
 0x391   : > { %5006 = vst.msk [vmem:[#allocation2 + $0x84] sm:$0xf] %vm419_vm7, %v4891_v45  ;;  %v4870_v6 = vor.u32 %v4869_v47, %v4866_v11  ;;  %19958 = vmatprep.mubr.msk.bf16.mxu1 %vm5315_vm14, %v5230_v60  ;;  %v4459_v23 = vmul.f32 %v24124_v2, %v4243_v54  ;;  %v4462_v22 = vmul.f32 %v24158_v5, %v4246_v62  ;;  %v5231_v0 = vshrl.u32 %v24128_v31, 16  ;;  %v24175_v54 = vld [vmem:[#allocation2 + $0x58] sm:$0xff]  }
 0x392   : > { %v4914_v7 = vshrl.u32 %v18748_v40, 16  ;;  %v4917_v28 = vshll.u32 %v18748_v40, 16  ;;  %v5235_v51 = vshll.u32 %v24154_v32, 16  ;;  %v4244_v25 = vadd.f32 %v22612_v26, %v24054_v4  ;;  %v24179_v26 = vld [vmem:[#allocation2 + $0x60] sm:$0xff]  }
 0x393   : > { %v4871_v33 = vsel %vm23816_vm13, %v4862_v35, %v4870_v6  ;;  %v4872_v21 = vrot.slane %v4870_v6, 4  ;;  %v18746_v27 = vpack.c.bf16 %v4459_v23, %v4459_v23  ;;  %v18749_v63 = vpack.c.bf16 %v4462_v22, %v4462_v22 }
 0x394   : > { %5004 = vst.msk [vmem:[#allocation2 + $0x7c] sm:$0xf] %vm419_vm7, %v4871_v33  ;;  %v4916_v1 = vrot.slane %v4914_v7, 6  ;;  %v4919_v11 = vrot.slane %v4917_v28, 7  ;;  %v5233_v47 = vor.u32 %v5231_v0, %v5229_v14  ;;  %v5237_v62 = vrot.slane %v5235_v51, 1 }
 0x395   : > { %v4881_v45 = vsel %vm23816_vm13, %v4872_v21, %v4880_v42  ;;  %v4894_v40 = vshrl.u32 %v18746_v27, 16  ;;  %v4897_v60 = vshll.u32 %v18746_v27, 16  ;;  %v4924_v4 = vshrl.u32 %v18749_v63, 16  ;;  %v24187_v27 = vld [vmem:[#allocation2 + $0x68] sm:$0xff]  }
 0x396   : > { %5005 = vst.msk [vmem:[#allocation2 + $0x80] sm:$0xf] %vm419_vm7, %v4881_v45  ;;  %v4920_v35 = vor.u32 %v4919_v11, %v4916_v1  ;;  %v4927_v6 = vshll.u32 %v18749_v63, 16  ;;  %v5238_v23 = vsel %vm652_vm1, %v5233_v47, %v5237_v62  ;;  %v4460_v22 = vmul.f32 %v24132_v34, %v4244_v25  ;;  %v5013_v45 = vld [vmem:[#allocation2 + $0x98] sm:$0x3] }
 0x397   : > { %v4896_v14 = vrot.slane %v4894_v40, 6  ;;  %v4899_v0 = vrot.slane %v4897_v60, 7  ;;  %v4926_v7 = vrot.slane %v4924_v4, 6  ;;  %19959 = vmatmul.mubr.msk.bf16.gmra.mrb[16].mxu1 %vm5315_vm14, %v5238_v23  ;;  %v5239_v42 = vshrl.u32 %v24154_v32, 16  ;;  %v24191_v23 = vld [vmem:[#allocation2 + $0x70] sm:$0xff]  }
 0x398   : > { %v4922_v28 = vrot.slane %v4920_v35, 4  ;;  %v4929_v51 = vrot.slane %v4927_v6, 7  ;;  %v18747_v33 = vpack.c.bf16 %v4460_v22, %v4460_v22  ;;  %v5243_v21 = vshll.u32 %v24175_v54, 16 }
 0x399   : > { %v4900_v1 = vor.u32 %v4899_v0, %v4896_v14  ;;  %v5241_v63 = vor.u32 %v5239_v42, %v5237_v62  ;;  %v5247_v11 = vshrl.u32 %v24175_v54, 16  ;;  %v5251_v25 = vshll.u32 %v24179_v26, 16 }
 0x39a   : > { %v4930_v47 = vor.u32 %v4929_v51, %v4926_v7  ;;  %v4904_v40 = vshrl.u32 %v18747_v33, 16  ;;  %v4907_v60 = vshll.u32 %v18747_v33, 16  ;;  %v5245_v4 = vrot.slane %v5243_v21, 1 }
 0x39b   : > { %v4901_v6 = vsel %vm23816_vm13, %v4892_v49, %v4900_v1  ;;  %v4902_v22 = vrot.slane %v4900_v1, 4  ;;  %v5253_v14 = vrot.slane %v5251_v25, 1  ;;  %v5255_v62 = vshrl.u32 %v24179_v26, 16  ;;  %v24198_v0 = vld [vmem:[#allocation2 + $0x78] sm:$0xff]  }
 0x39c   : > { %5007 = vst.msk [vmem:[#allocation2 + $0x88] sm:$0xf] %vm419_vm7, %v4901_v6  ;;  %v4931_v7 = vsel %vm23816_vm13, %v4922_v28, %v4930_v47  ;;  %v4932_v42 = vrot.slane %v4930_v47, 4  ;;  %v4906_v51 = vrot.slane %v4904_v40, 6  ;;  %v4909_v33 = vrot.slane %v4907_v60, 7 }
 0x39d   : > { %5010 = vst.msk [vmem:[#allocation2 + $0x94] sm:$0xf] %vm419_vm7, %v4931_v7  ;;  %v5246_v49 = vsel %vm652_vm1, %v5241_v63, %v5245_v4  ;;  %v5249_v21 = vor.u32 %v5247_v11, %v5245_v4  ;;  %v5259_v1 = vshll.u32 %v24187_v27, 16  ;;  %v5257_v34 = vor.u32 %v5255_v62, %v5253_v14  ;;  %v24214_v4 = vld [vmem:[#allocation2 + $0x80] sm:$0xff]  }
 0x39e   : > { %v5014_v25 = vsel %vm5012_vm8, %v4932_v42, %v5013_v45  ;;  %v4910_v5 = vor.u32 %v4909_v33, %v4906_v51  ;;  %19962 = vmatprep.mubr.msk.bf16.mxu1 %vm5315_vm14, %v5246_v49  ;;  %v5267_v6 = vshll.u32 %v24191_v23, 16  ;;  %v5263_v40 = vshrl.u32 %v24187_v27, 16 }
 0x39f   : > { %5015 = vst [vmem:[#allocation2 + $0x98] sm:$0x3] %v5014_v25  ;;  %v5254_v28 = vsel %vm652_vm1, %v5249_v21, %v5253_v14  ;;  %v5261_v47 = vrot.slane %v5259_v1, 1  ;;  %v5275_v60 = vshll.u32 %v24198_v0, 16  ;;  %v5271_v42 = vshrl.u32 %v24191_v23, 16 }
 0x3a0   : > { %v4911_v63 = vsel %vm23816_vm13, %v4902_v22, %v4910_v5  ;;  %v4912_v11 = vrot.slane %v4910_v5, 4  ;;  %19963 = vmatmul.mubr.msk.bf16.gmra.mrb[20].mxu1 %vm5315_vm14, %v5254_v28  ;;  %v5269_v45 = vrot.slane %v5267_v6, 1  ;;  %v5283_v22 = vshll.u32 %v24214_v4, 16 }
 0x3a1   : > { %5008 = vst.msk [vmem:[#allocation2 + $0x8c] sm:$0xf] %vm419_vm7, %v4911_v63  ;;  %v5262_v62 = vsel %vm652_vm1, %v5257_v34, %v5261_v47  ;;  %v5265_v7 = vor.u32 %v5263_v40, %v5261_v47  ;;  %v5277_v51 = vrot.slane %v5275_v60, 1  ;;  %v5279_v34 = vshrl.u32 %v24198_v0, 16 }
 0x3a2   : > { %v4921_v14 = vsel %vm23816_vm13, %v4912_v11, %v4920_v35  ;;  %19966 = vmatprep.mubr.msk.bf16.mxu1 %vm5315_vm14, %v5262_v62  ;;  %v5273_v5 = vor.u32 %v5271_v42, %v5269_v45  ;;  %v5285_v21 = vrot.slane %v5283_v22, 1  ;;  %v5287_v25 = vshrl.u32 %v24214_v4, 16  ;;  %v6097_v42 = vld [vmem:[#allocation2 + $0x8] sm:$0xe] }
 0x3a3   : > { %5009 = vst.msk [vmem:[#allocation2 + $0x90] sm:$0xf] %vm419_vm7, %v4921_v14  ;;  %v5270_v33 = vsel %vm652_vm1, %v5265_v7, %v5269_v45  ;;  %v5281_v1 = vor.u32 %v5279_v34, %v5277_v51  ;;  %v24241_v14 = vld [vmem:[#allocation2 + $0xc] sm:$0xf]  ;;  %v6638_v24 = vshrl.u32 %v24281_v48, 16  ;;  %v6665_v38 = vshrl.u32 %v24320_v44, 16 }
 0x3a4   : > { %v5278_v49 = vsel %vm652_vm1, %v5273_v5, %v5277_v51  ;;  %v5289_v47 = vor.u32 %v5287_v25, %v5285_v21  ;;  %v24244_v51 = vcombine.low %v6097_v42, %v24241_v14  ;;  %v24246_v5 = vld [vmem:[#allocation2 + $0x10] sm:$0xff]   ;;  %v24254_v34 = vld [vmem:[#allocation2 + $0x28] sm:$0xff]   ;;  %vm460_vm7 = vcmask 256000  }
 0x3a5   : > { %v5286_v60 = vsel %vm652_vm1, %v5281_v1, %v5285_v21  ;;  %v6566_v25 = vshrl.u32 %v24246_v5, 16  ;;  %v6593_v2 = vshrl.u32 %v24254_v34, 16  ;;  %v6596_v10 = vshll.u32 %v24254_v34, 16 }
 0x3a6   : > { %v6558_v21 = vshrl.u32 %v24244_v51, 16  ;;  %v6561_v1 = vshll.u32 %v24244_v51, 16  ;;  %vm13147_vm12 = vcmask 519169  }
 0x3a7   : > { %vm26920_vm15 = vmand %vm13147_vm12, %vm4971_vm9 }
 0x3a8   : > { %19967 = vmatmul.mubr.msk.bf16.gmra.mrb[24].mxu1 %vm5315_vm14, %v5270_v33  ;;  %v24228_v35 = vld [vmem:[#allocation2 + $0x88] sm:$0xff]   ;;  %v24249_v33 = vld [vmem:[#allocation2 + $0x18] sm:$0xff]  }
 0x3a9   : > { %19970 = vmatprep.mubr.msk.bf16.mxu1 %vm5315_vm14, %v5278_v49  ;;  %v5291_v6 = vshll.u32 %v24228_v35, 16  ;;  %v5295_v45 = vshrl.u32 %v24228_v35, 16  ;;  %v24251_v49 = vld [vmem:[#allocation2 + $0x20] sm:$0xff]   ;;  %v24355_v18 = vld [vmem:[#allocation2 + $0x88] sm:$0xff]  }
 0x3aa   : > { %v24233_v28 = vld [vmem:[#allocation2 + $0x90] ss:$0 sps:$4 sm:$0x11]   ;;  %v6587_v58 = vshll.u32 %v24251_v49, 16  ;;  %28717 = vst [vmem:[#allocation52_spill] sm:$0xff] %v24355_v18 }
 0x3ab   : > { %v5293_v40 = vrot.slane %v5291_v6, 1  ;;  %v5299_v63 = vshll.u32 %v24233_v28, 16  ;;  %v24261_v6 = vld [vmem:[#allocation2 + $0x30] sm:$0xff]  }
 0x3ac   : > { %v6602_v41 = vshrl.u32 %v24261_v6, 16 }
 0x3ad   : > { %v5294_v11 = vsel %vm652_vm1, %v5289_v47, %v5293_v40  ;;  %v5297_v62 = vor.u32 %v5295_v45, %v5293_v40  ;;  %v5301_v7 = vrot.slane %v5299_v63, 1  ;;  %v6569_v47 = vshll.u32 %v24246_v5, 16 }
 0x3ae   : > { %v6575_v40 = vshrl.u32 %v24249_v33, 16  ;;  %v6563_v63 = vrot.slane %v6561_v1, 2  ;;  %v6578_v45 = vshll.u32 %v24249_v33, 16 }
 0x3af   : > { %v5302_v22 = vsel %vm652_vm1, %v5297_v62, %v5301_v7  ;;  %v24266_v62 = vld [vmem:[#allocation2 + $0x38] sm:$0xff]   ;;  %v6571_v7 = vrot.slane %v6569_v47, 2  ;;  %v22377_v47 = vld [vmem:[%s28552_s4 + $0x28] sm:$0xff]  }
 0x3b0   : > { %19971 = vmatmul.mubr.msk.bf16.gmra.mrb[28].mxu1 %vm5315_vm14, %v5286_v60  ;;  %v6560_v60 = vrot.slane %v6558_v21, 1  ;;  %v6577_v42 = vrot.slane %v6575_v40, 1  ;;  %v6580_v3 = vrot.slane %v6578_v45, 2  ;;  %v24278_v40 = vld [vmem:[#allocation2 + $0x48] sm:$0xff]   ;;  %v6605_v45 = vshll.u32 %v24261_v6, 16 }
 0x3b1   : > { %19974 = vmatprep.mubr.msk.bf16.mxu1 %vm5315_vm14, %v5294_v11  ;;  %v6568_v11 = vrot.slane %v6566_v25, 1  ;;  %v6589_v25 = vrot.slane %v6587_v58, 2  ;;  %v6604_v58 = vrot.slane %v6602_v41, 1  ;;  %v24300_v41 = vld [vmem:[#allocation2 + $0x58] sm:$0xff]   ;;  %v6632_v53 = vshll.u32 %v24278_v40, 16 }
 0x3b2   : > { %v6581_v52 = vor.u32 %v6580_v3, %v6577_v42  ;;  %v6614_v42 = vshll.u32 %v24266_v62, 16 }
 0x3b3   : > { %v6572_v21 = vor.u32 %v6571_v7, %v6568_v11  ;;  %v6611_v7 = vshrl.u32 %v24266_v62, 16 }
 0x3b4   : > { %v6616_v8 = vrot.slane %v6614_v42, 2  ;;  %v6634_v42 = vrot.slane %v6632_v53, 2 }
 0x3b5   : > { %v24292_v3 = vsel %vm2116_vm3, %v6572_v21, %v6581_v52 }
 0x3b6   : > { %28707 = vst [vmem:[#allocation42_spill] sm:$0xff] %v24292_v3 }
 0x3b8   : > { %19975 = vmatmul.mubr.msk.bf16.gmra.mrb[32].mxu1 %vm5315_vm14, %v5302_v22  ;;  %v6584_v22 = vshrl.u32 %v24251_v49, 16 }
 0x3b9   : > { %19982 = vmatprep.mubr.msk.bf16.mxu1 %vm5315_vm14, %v23776_v12  ;;  %v6564_v12 = vor.u32 %v6563_v63, %v6560_v60  ;;  %v6595_v60 = vrot.slane %v6593_v2, 1  ;;  %v6598_v63 = vrot.slane %v6596_v10, 2  ;;  %v6607_v2 = vrot.slane %v6605_v45, 2 }
 0x3ba   : > { %v6586_v1 = vrot.slane %v6584_v22, 1  ;;  %v24287_v22 = vld [vmem:[#allocation2 + $0x8] sm:$0xff]  }
 0x3bb   : > { %v24284_v57 = vsel %vm2116_vm3, %v6564_v12, %v6572_v21  ;;  %v6599_v10 = vor.u32 %v6598_v63, %v6595_v60  ;;  %v6620_v21 = vshrl.u32 %v24272_v50, 16  ;;  %v24310_v60 = vld [vmem:[%s28552_s4 + $0x30] sm:$0xff]   ;;  %v24312_v63 = vld [vmem:[#allocation2 + $0x60] sm:$0xff]   ;;  %v6608_v45 = vor.u32 %v6607_v2, %v6604_v58 }
 0x3bc   : > { %28706 = vst [vmem:[#allocation41_spill] sm:$0xff] %v24284_v57  ;;  %v6590_v11 = vor.u32 %v6589_v25, %v6586_v1  ;;  %v6613_v1 = vrot.slane %v6611_v7, 1  ;;  %v6623_v25 = vshll.u32 %v24272_v50, 16  ;;  %v24326_v58 = vld [vmem:[#allocation2 + $0x70] sm:$0xff]  }
 0x3bd   : > { %v6622_v7 = vrot.slane %v6620_v21, 1  ;;  %v24323_v43 = vsel %vm2116_vm3, %v6599_v10, %v6608_v45  ;;  %28711 = vst [vmem:[#allocation46_spill] sm:$0xff] %v24326_v58  ;;  %v6640_v21 = vrot.slane %v6638_v24, 1  ;;  %v6659_v24 = vshll.u32 %v24312_v63, 16 }
 0x3be   : > { %v24303_v12 = vsel %vm2116_vm3, %v6581_v52, %v6590_v11  ;;  %v6629_v52 = vshrl.u32 %v24278_v40, 16  ;;  %v6625_v55 = vrot.slane %v6623_v25, 2  ;;  %28710 = vst [vmem:[#allocation45_spill] sm:$0xff] %v24323_v43  ;;  %v6617_v29 = vor.u32 %v6616_v8, %v6613_v1  ;;  %v24335_v1 = vld [vmem:[#allocation2 + $0x78] sm:$0xff]  }
 0x3bf   : > { %28708 = vst [vmem:[#allocation43_spill] sm:$0xff] %v24303_v12  ;;  %v6647_v25 = vshrl.u32 %v24300_v41, 16  ;;  %v6656_v8 = vshrl.u32 %v24312_v63, 16  ;;  %28713 = vst [vmem:[#allocation48_spill] sm:$0xff] %v24335_v1 }
 0x3c0   : > { %19983 = vmatmul.mubr.msk.bf16.vlgmr.msra.gmra.mrb[0].mxu1 %vm5315_vm14, %v24287_v22  ;;  %v6631_v37 = vrot.slane %v6629_v52, 1  ;;  %v6626_v2 = vor.u32 %v6625_v55, %v6622_v7  ;;  %v24331_v17 = vsel %vm2116_vm3, %v6608_v45, %v6617_v29  ;;  %v24341_v52 = vld [vmem:[#allocation2 + $0x18] sm:$0xff]   ;;  %v24345_v45 = vld [vmem:[#allocation2 + $0x80] sm:$0xff]  }
 0x3c1   : > { %19986 = vmatprep.mubr.msk.bf16.mxu1 %vm5315_vm14, %v24295_v59  ;;  %20019 = vmatpush3.bf16.msra.mxu1 %v23981_v15  ;;  %v24315_v15 = vsel %vm2116_vm3, %v6590_v11, %v6599_v10  ;;  %v6641_v11 = vshll.u32 %v24281_v48, 16  ;;  %28712 = vst [vmem:[#allocation47_spill] sm:$0xff] %v24331_v17  ;;  %v6650_v10 = vshll.u32 %v24300_v41, 16  ;;  %v6649_v53 = vrot.slane %v6647_v25, 1  ;;  %28715 = vst [vmem:[#allocation50_spill] sm:$0xff] %v24345_v45 }
 0x3c2   : > { %20020 = vmatprep.subr.bf16.mxu1 %v22377_v47  ;;  %28709 = vst [vmem:[#allocation44_spill] sm:$0xff] %v24315_v15  ;;  %v6635_v55 = vor.u32 %v6634_v42, %v6631_v37  ;;  %v6658_v30 = vrot.slane %v6656_v8, 1  ;;  %v6661_v37 = vrot.slane %v6659_v24, 2  ;;  %v6668_v42 = vshll.u32 %v24320_v44, 16  ;;  %v24361_v8 = vld [vmem:[#allocation2 + $0x90] sm:$0xff]  }
 0x3c3   : > { %v6643_v19 = vrot.slane %v6641_v11, 2  ;;  %v6652_v11 = vrot.slane %v6650_v10, 2  ;;  %v6674_v25 = vshrl.u32 %v24326_v58, 16  ;;  %v6677_v10 = vshll.u32 %v24326_v58, 16  ;;  %28719 = vst [vmem:[#allocation54_spill] sm:$0xff] %v24361_v8 }
 0x3c4   : > { %v6670_v46 = vrot.slane %v6668_v42, 2  ;;  %v6683_v24 = vshrl.u32 %v24335_v1, 16 }
 0x3c5   : > { %20021 = vmatpush3.bf16.msra.mxu1 %v22377_v47  ;;  %v24338_v47 = vsel %vm2116_vm3, %v6617_v29, %v6626_v2  ;;  %v6644_v7 = vor.u32 %v6643_v19, %v6640_v21  ;;  %v24351_v29 = vsel %vm2116_vm3, %v6626_v2, %v6635_v55  ;;  %v6653_v19 = vor.u32 %v6652_v11, %v6649_v53 }
 0x3c6   : > { %20058 = vmatprep.subr.bf16.mxu1 %v24310_v60  ;;  %28714 = vst [vmem:[#allocation49_spill] sm:$0xff] %v24338_v47  ;;  %28716 = vst [vmem:[#allocation51_spill] sm:$0xff] %v24351_v29  ;;  %v6667_v21 = vrot.slane %v6665_v38, 1  ;;  %v6676_v2 = vrot.slane %v6674_v25, 1  ;;  %v6679_v36 = vrot.slane %v6677_v10, 2  ;;  %v6686_v29 = vshll.u32 %v24335_v1, 16 }
 0x3c7   : > { %v24358_v16 = vsel %vm2116_vm3, %v6635_v55, %v6644_v7  ;;  %v24365_v61 = vsel %vm2116_vm3, %v6644_v7, %v6653_v19  ;;  %v6692_v55 = vshrl.u32 %v24345_v45, 16  ;;  %v6685_v11 = vrot.slane %v6683_v24, 1 }
 0x3c8   : > { %19987 = vmatmul.mubr.msk.bf16.gmra.mrb[4].mxu1 %vm5315_vm14, %v24341_v52  ;;  %28718 = vst [vmem:[#allocation53_spill] sm:$0xff] %v24358_v16  ;;  %28720 = vst [vmem:[#allocation55_spill] sm:$0xff] %v24365_v61  ;;  %v6671_v38 = vor.u32 %v6670_v46, %v6667_v21  ;;  %v6695_v16 = vshll.u32 %v24345_v45, 16  ;;  %v6701_v25 = vshrl.u32 %v24355_v18, 16  ;;  %v6704_v61 = vshll.u32 %v24355_v18, 16 }
 0x3c9   : > { %19990 = vmatprep.mubr.msk.bf16.mxu1 %vm5315_vm14, %v23991_v9  ;;  %v6662_v9 = vor.u32 %v6661_v37, %v6658_v30  ;;  %v6680_v30 = vor.u32 %v6679_v36, %v6676_v2  ;;  %v6688_v37 = vrot.slane %v6686_v29, 2  ;;  %v6694_v42 = vrot.slane %v6692_v55, 1  ;;  %v7006_v2 = vld [vmem:[#allocation2 + $0x8] sm:$0xc] }
 0x3ca   : > { %v6697_v10 = vrot.slane %v6695_v16, 2  ;;  %v6710_v47 = vshrl.u32 %v24361_v8, 16  ;;  %v6703_v36 = vrot.slane %v6701_v25, 1  ;;  %v6713_v29 = vshll.u32 %v24361_v8, 16 }
 0x3cb   : > { %v24370_v53 = vsel %vm2116_vm3, %v6653_v19, %v6662_v9  ;;  %v24375_v7 = vsel %vm2116_vm3, %v6662_v9, %v6671_v38  ;;  %v24382_v46 = vsel %vm2116_vm3, %v6671_v38, %v6680_v30  ;;  %v6689_v19 = vor.u32 %v6688_v37, %v6685_v11 }
 0x3cc   : > { %28721 = vst [vmem:[#allocation56_spill] sm:$0xff] %v24370_v53  ;;  %28722 = vst [vmem:[#allocation57_spill] sm:$0xff] %v24375_v7  ;;  %v6698_v21 = vor.u32 %v6697_v10, %v6694_v42  ;;  %v6706_v9 = vrot.slane %v6704_v61, 2  ;;  %v6712_v16 = vrot.slane %v6710_v47, 1  ;;  %v6715_v55 = vrot.slane %v6713_v29, 2 }
 0x3cd   : > { %28723 = vst [vmem:[#allocation58_spill] sm:$0xff] %v24382_v46  ;;  %v24388_v24 = vsel %vm2116_vm3, %v6680_v30, %v6689_v19  ;;  %v7016_v37 = vrot.slane %v24246_v5, 2  ;;  %v7020_v47 = vrot.slane %v24251_v49, 2  ;;  %v7022_v30 = vrot.slane %v24254_v34, 2 }
 0x3ce   : > { %28724 = vst [vmem:[#allocation59_spill] sm:$0xff] %v24388_v24  ;;  %v24392_v38 = vsel %vm2116_vm3, %v6689_v19, %v6698_v21  ;;  %v6707_v11 = vor.u32 %v6706_v9, %v6703_v36  ;;  %v24395_v25 = vor.u32 %v6715_v55, %v6712_v16  ;;  %v7026_v9 = vrot.slane %v24266_v62, 2  ;;  %v24431_v55 = vld [vmem:[#allocation2 + $0x98] ss:$0 sps:$4 sm:$0x33]  }
 0x3cf   : > { %28725 = vst [vmem:[#allocation60_spill] sm:$0xff] %v24392_v38  ;;  %v24418_v29 = vsel %vm2591_vm4, %v7020_v47, %v7022_v30  ;;  %v7030_v16 = vrot.slane %v24278_v40, 2  ;;  %28734 = vst [vmem:[#allocation69_spill] sm:$0xff] %v24431_v55 }
 0x3d0   : > { %19991 = vmatmul.mubr.msk.bf16.gmra.mrb[8].mxu1 %vm5315_vm14, %v24027_v13  ;;  %v17962_v13 = vcombine.low %v7006_v2, %v24241_v14  ;;  %28726 = vst [vmem:[#allocation61_spill] sm:$0xff] %v24395_v25  ;;  %v24399_v61 = vsel %vm2116_vm3, %v6698_v21, %v6707_v11  ;;  %v7024_v14 = vrot.slane %v24261_v6, 2  ;;  %v24406_v42 = vsel %vm2116_vm3, %v6707_v11, %v24395_v25 }
 0x3d1   : > { %19994 = vmatprep.mubr.msk.bf16.mxu1 %vm5315_vm14, %v24059_v20  ;;  %v7018_v20 = vrot.slane %v24249_v33, 2  ;;  %28727 = vst [vmem:[#allocation62_spill] sm:$0xff] %v24399_v61  ;;  %28728 = vst [vmem:[#allocation63_spill] sm:$0xff] %v24406_v42  ;;  %v7032_v2 = vrot.slane %v24281_v48, 2  ;;  %v7034_v11 = vrot.slane %v24300_v41, 2 }
 0x3d2   : > { %v7015_v46 = vrot.slane %v17962_v13, 2  ;;  %28732 = vst [vmem:[#allocation67_spill] sm:$0xff] %v24418_v29  ;;  %v24421_v21 = vsel %vm2591_vm4, %v7022_v30, %v7024_v14  ;;  %v24434_v13 = vsel %vm2591_vm4, %v7024_v14, %v7026_v9 }
 0x3d3   : > { %v24412_v19 = vsel %vm2591_vm4, %v7016_v37, %v7018_v20  ;;  %v24415_v36 = vsel %vm2591_vm4, %v7018_v20, %v7020_v47  ;;  %28733 = vst [vmem:[#allocation68_spill] sm:$0xff] %v24421_v21  ;;  %28735 = vst [vmem:[#allocation70_spill] sm:$0xff] %v24434_v13  ;;  %v24446_v30 = vsel %vm2591_vm4, %v7030_v16, %v7032_v2 }
 0x3d4   : > { %v24409_v10 = vsel %vm2591_vm4, %v7015_v46, %v7016_v37  ;;  %28730 = vst [vmem:[#allocation65_spill] sm:$0xff] %v24412_v19  ;;  %28731 = vst [vmem:[#allocation66_spill] sm:$0xff] %v24415_v36  ;;  %v7028_v46 = vrot.slane %v24272_v50, 2  ;;  %v7036_v37 = vrot.slane %v24312_v63, 2  ;;  %v24450_v14 = vsel %vm2591_vm4, %v7032_v2, %v7034_v11 }
 0x3d5   : > { %28729 = vst [vmem:[#allocation64_spill] sm:$0xff] %v24409_v10  ;;  %28738 = vst [vmem:[#allocation73_spill] sm:$0xff] %v24446_v30  ;;  %v7048_v30 = vrot.slane %v24361_v8, 2 }
 0x3d6   : > { %v24440_v20 = vsel %vm2591_vm4, %v7026_v9, %v7028_v46  ;;  %v24443_v47 = vsel %vm2591_vm4, %v7028_v46, %v7030_v16  ;;  %28739 = vst [vmem:[#allocation74_spill] sm:$0xff] %v24450_v14  ;;  %v24453_v13 = vsel %vm2591_vm4, %v7034_v11, %v7036_v37  ;;  %v7042_v9 = vrot.slane %v24335_v1, 2 }
 0x3d7   : > { %28736 = vst [vmem:[#allocation71_spill] sm:$0xff] %v24440_v20  ;;  %28737 = vst [vmem:[#allocation72_spill] sm:$0xff] %v24443_v47  ;;  %v7044_v46 = vrot.slane %v24345_v45, 2  ;;  %v7046_v16 = vrot.slane %v24355_v18, 2  ;;  %v7050_v11 = vrot.slane %v24431_v55, 2  ;;  %v24511_v47 = vld [vmem:[#allocation2 + $0x40] sm:$0xff]  }
 0x3d8   : > { %19995 = vmatmul.mubr.msk.bf16.gmra.mrb[12].mxu1 %vm5315_vm14, %v24081_v39  ;;  %v7038_v39 = vrot.slane %v24320_v44, 2  ;;  %28740 = vst [vmem:[#allocation75_spill] sm:$0xff] %v24453_v13 }
 0x3d9   : > { %19998 = vmatprep.mubr.msk.bf16.mxu1 %vm5315_vm14, %v24107_v56  ;;  %v7040_v56 = vrot.slane %v24326_v58, 2  ;;  %v24470_v13 = vsel %vm2591_vm4, %v7042_v9, %v7044_v46 }
 0x3da   : > { %v24456_v21 = vsel %vm2591_vm4, %v7036_v37, %v7038_v39  ;;  %28744 = vst [vmem:[#allocation79_spill] sm:$0xff] %v24470_v13  ;;  %v24473_v37 = vsel %vm2591_vm4, %v7044_v46, %v7046_v16 }
 0x3db   : > { %28741 = vst [vmem:[#allocation76_spill] sm:$0xff] %v24456_v21  ;;  %v24460_v20 = vsel %vm2591_vm4, %v7038_v39, %v7040_v56  ;;  %v24466_v2 = vsel %vm2591_vm4, %v7040_v56, %v7042_v9  ;;  %28745 = vst [vmem:[#allocation80_spill] sm:$0xff] %v24473_v37  ;;  %v24476_v39 = vsel %vm2591_vm4, %v7046_v16, %v7048_v30  ;;  %v5772_v21 = vld [vmem:[#allocation2] sm:$0xe]  ;;  %v7331_v56 = vld [vmem:[#allocation2 + $0x10] sm:$0xc] }
 0x3dc   : > { %28742 = vst [vmem:[#allocation77_spill] sm:$0xff] %v24460_v20  ;;  %28743 = vst [vmem:[#allocation78_spill] sm:$0xff] %v24466_v2  ;;  %v24479_v20 = vsel %vm2591_vm4, %v7048_v30, %v7050_v11  ;;  %v24485_v2 = vld [vmem:[#allocation2 + $0x14] sm:$0xf]  ;;  %v22616_v9 = vld [vmem:[#allocation2 + $0x4] sm:$0xf] }
 0x3dd   : > { %28746 = vst [vmem:[#allocation81_spill] sm:$0xff] %v24476_v39  ;;  %28747 = vst [vmem:[#allocation82_spill] sm:$0xff] %v24479_v20  ;;  %v17869_v13 = vcombine.low %v5772_v21, %v22616_v9  ;;  %v24488_v46 = vcombine.low %v7331_v56, %v24485_v2  ;;  %v24490_v16 = vld [vmem:[#allocation2 + $0x18] sm:$0xff]   ;;  %v24492_v39 = vld [vmem:[#allocation2 + $0x20] sm:$0xff]   ;;  %v28749_v9 = vmov 0  }
 0x3de   : > { %v24494_v30 = vld [vmem:[#allocation2 + $0x28] sm:$0xff]   ;;  %v24503_v56 = vld [vmem:[#allocation2 + $0x38] sm:$0xff]   ;;  %461 = vst.msk [vmem:[#allocation2 + $0xa0] sm:$0x7] %vm460_vm7, %v28749_v9  ;;  %v7800_v37 = vshrl.u32 %v24490_v16, 16  ;;  %v7809_v14 = vshrl.u32 %v24492_v39, 16 }
 0x3df   : > { %28748 = vst [vmem:[#allocation83_spill] sm:$0xff] %v24488_v46  ;;  %v5781_v11 = vrot.slane %v17869_v13, 1  ;;  %v7792_v20 = vshrl.u32 %v24488_v46, 16  ;;  %v7803_v13 = vshll.u32 %v24490_v16, 16  ;;  %v7818_v21 = vshrl.u32 %v24494_v30, 16 }
 0x3e0   : > { %19999 = vmatmul.mubr.msk.bf16.gmra.mrb[16].mxu1 %vm5315_vm14, %v24128_v31  ;;  %v24496_v31 = vld [vmem:[#allocation2 + $0x30] sm:$0xff]   ;;  %v7802_v36 = vrot.slane %v7800_v37, 2  ;;  %v7811_v9 = vrot.slane %v7809_v14, 2  ;;  %v7821_v10 = vshll.u32 %v24494_v30, 16  ;;  %v7839_v37 = vshll.u32 %v24503_v56, 16 }
 0x3e1   : > { %20002 = vmatprep.mubr.msk.bf16.mxu1 %vm5315_vm14, %v24154_v32  ;;  %v7795_v32 = vshll.u32 %v24488_v46, 16  ;;  %v7794_v46 = vrot.slane %v7792_v20, 2  ;;  %v7805_v19 = vrot.slane %v7803_v13, 3  ;;  %v7820_v61 = vrot.slane %v7818_v21, 2  ;;  %v24523_v13 = vld [vmem:[#allocation2 + $0x50] sm:$0xff]  }
 0x3e2   : > { %v7827_v55 = vshrl.u32 %v24496_v31, 16  ;;  %v7830_v24 = vshll.u32 %v24496_v31, 16  ;;  %v7836_v20 = vshrl.u32 %v24503_v56, 16  ;;  %v7845_v14 = vshrl.u32 %v24511_v47, 16 }
 0x3e3   : > { %v7797_v29 = vrot.slane %v7795_v32, 3  ;;  %v7806_v38 = vor.u32 %v7805_v19, %v7802_v36  ;;  %v24519_v32 = vld [vmem:[#allocation2 + $0x48] sm:$0xff]  }
 0x3e4   : > { %v7829_v53 = vrot.slane %v7827_v55, 2  ;;  %v7832_v19 = vrot.slane %v7830_v24, 3  ;;  %v24536_v55 = vld [vmem:[#allocation2 + $0x58] sm:$0xff]   ;;  %v7848_v24 = vshll.u32 %v24511_v47, 16  ;;  %v7854_v36 = vshrl.u32 %v24519_v32, 16 }
 0x3e5   : > { %v7798_v25 = vor.u32 %v7797_v29, %v7794_v46  ;;  %v7875_v12 = vshll.u32 %v24536_v55, 16 }
 0x3e7   : > { %v24526_v29 = vsel %vm3400_vm5, %v7798_v25, %v7806_v38  ;;  %v7833_v25 = vor.u32 %v7832_v19, %v7829_v53  ;;  %v7863_v19 = vshrl.u32 %v24523_v13, 16 }
 0x3e8   : > { %20003 = vmatmul.mubr.msk.bf16.gmra.mrb[20].mxu1 %vm5315_vm14, %v24175_v54  ;;  %v7812_v54 = vshll.u32 %v24492_v39, 16  ;;  %28750 = vst [vmem:[#allocation84_spill] sm:$0xff] %v24526_v29 }
 0x3e9   : > { %20006 = vmatprep.mubr.msk.bf16.mxu1 %vm5315_vm14, %v24179_v26  ;;  %v7823_v26 = vrot.slane %v7821_v10, 3  ;;  %v7838_v10 = vrot.slane %v7836_v20, 2  ;;  %v24549_v20 = vld [vmem:[#allocation2 + $0x60] sm:$0xff]   ;;  %v7865_v43 = vrot.slane %v7863_v19, 2  ;;  %v7877_v19 = vrot.slane %v7875_v12, 3 }
 0x3ea   : > { %v7814_v42 = vrot.slane %v7812_v54, 3  ;;  %v7841_v54 = vrot.slane %v7839_v37, 3 }
 0x3eb   : > { %v7824_v46 = vor.u32 %v7823_v26, %v7820_v61  ;;  %v7847_v61 = vrot.slane %v7845_v14, 2  ;;  %v7850_v14 = vrot.slane %v7848_v24, 3  ;;  %v24568_v24 = vld [vmem:[#allocation2 + $0x78] sm:$0xff]  }
 0x3ec   : > { %v7815_v7 = vor.u32 %v7814_v42, %v7811_v9  ;;  %v24532_v42 = vld [vmem:[#allocation2 + $0x10] sm:$0x8]  ;;  %v7842_v37 = vor.u32 %v7841_v54, %v7838_v10 }
 0x3ed   : > { %v24556_v53 = vsel %vm3400_vm5, %v7824_v46, %v7833_v25  ;;  %v24565_v54 = vld [vmem:[#allocation2 + $0x70] sm:$0xff]   ;;  %v7851_v17 = vor.u32 %v7850_v14, %v7847_v61 }
 0x3ee   : > { %v24530_v21 = vsel %vm3400_vm5, %v7806_v38, %v7815_v7  ;;  %v24539_v9 = vsel %vm3400_vm5, %v7815_v7, %v7824_v46  ;;  %v28753_v38 = vrot.slane %v24287_v22, 1  ;;  %v7857_v7 = vshll.u32 %v24519_v32, 16  ;;  %28754 = vst [vmem:[#allocation87_spill] sm:$0xff] %v24556_v53 }
 0x3ef   : > { %28751 = vst [vmem:[#allocation85_spill] sm:$0xff] %v24530_v21  ;;  %28752 = vst [vmem:[#allocation86_spill] sm:$0xff] %v24539_v9  ;;  %v24553_v9 = vld [vmem:[#allocation2 + $0x68] sm:$0xff]   ;;  %v7866_v21 = vshll.u32 %v24523_v13, 16  ;;  %v7872_v46 = vshrl.u32 %v24536_v55, 16  ;;  %v24576_v10 = vsel %vm3400_vm5, %v7842_v37, %v7851_v17 }
 0x3f0   : > { %20007 = vmatmul.mubr.msk.bf16.gmra.mrb[24].mxu1 %vm5315_vm14, %v24187_v27  ;;  %v24547_v26 = vsel %vm1307_vm2, %v5781_v11, %v28753_v38  ;;  %v24561_v11 = vsel %vm3400_vm5, %v7833_v25, %v7842_v37  ;;  %v7856_v38 = vrot.slane %v7854_v36, 2  ;;  %v7859_v29 = vrot.slane %v7857_v7, 3  ;;  %v24573_v7 = vld [vmem:[#allocation2 + $0x80] sm:$0xff]   ;;  %28756 = vst [vmem:[#allocation89_spill] sm:$0xff] %v24576_v10 }
 0x3f1   : > { %20010 = vmatprep.mubr.msk.bf16.mxu1 %vm5315_vm14, %v24191_v23  ;;  %28755 = vst [vmem:[#allocation88_spill] sm:$0xff] %v24561_v11  ;;  %v7868_v15 = vrot.slane %v7866_v21, 3  ;;  %v7881_v25 = vshrl.u32 %v24549_v20, 16  ;;  %v7884_v36 = vshll.u32 %v24549_v20, 16  ;;  %v7874_v61 = vrot.slane %v7872_v46, 2 }
 0x3f2   : > { %v7860_v53 = vor.u32 %v7859_v29, %v7856_v38  ;;  %v7890_v21 = vshrl.u32 %v24553_v9, 16  ;;  %v7893_v37 = vshll.u32 %v24553_v9, 16 }
 0x3f3   : > { %v7869_v11 = vor.u32 %v7868_v15, %v7865_v43  ;;  %v7883_v29 = vrot.slane %v7881_v25, 2  ;;  %v7886_v38 = vrot.slane %v7884_v36, 3  ;;  %v7899_v43 = vshrl.u32 %v24565_v54, 16  ;;  %v24591_v15 = vld [vmem:[#allocation2 + $0x88] sm:$0xff]  }
 0x3f4   : > { %v24580_v14 = vsel %vm3400_vm5, %v7851_v17, %v7860_v53  ;;  %v7892_v57 = vrot.slane %v7890_v21, 2  ;;  %v24593_v17 = vld [vmem:[#allocation2 + $0x90] sm:$0xff]   ;;  %v7878_v12 = vor.u32 %v7877_v19, %v7874_v61  ;;  %v7902_v25 = vshll.u32 %v24565_v54, 16  ;;  %v24605_v61 = vld [vmem:[#allocation2 + $0x98] sm:$0xff]  }
 0x3f5   : > { %28757 = vst [vmem:[#allocation90_spill] sm:$0xff] %v24580_v14  ;;  %v24585_v3 = vsel %vm3400_vm5, %v7860_v53, %v7869_v11  ;;  %v7887_v46 = vor.u32 %v7886_v38, %v7883_v29  ;;  %v7908_v36 = vshrl.u32 %v24568_v24, 16  ;;  %v7895_v53 = vrot.slane %v7893_v37, 3 }
 0x3f6   : > { %28758 = vst [vmem:[#allocation91_spill] sm:$0xff] %v24585_v3  ;;  %v7901_v3 = vrot.slane %v7899_v43, 2  ;;  %v7911_v21 = vshll.u32 %v24568_v24, 16  ;;  %v7917_v14 = vshrl.u32 %v24573_v7, 16  ;;  %v24600_v10 = vsel %vm3400_vm5, %v7869_v11, %v7878_v12 }
 0x3f7   : > { %28759 = vst [vmem:[#allocation92_spill] sm:$0xff] %v24600_v10  ;;  %v24603_v8 = vsel %vm3400_vm5, %v7878_v12, %v7887_v46  ;;  %v7904_v18 = vrot.slane %v7902_v25, 3  ;;  %v7910_v45 = vrot.slane %v7908_v36, 2  ;;  %v7896_v19 = vor.u32 %v7895_v53, %v7892_v57 }
 0x3f8   : > { %20011 = vmatmul.mubr.msk.bf16.gmra.mrb[28].mxu1 %vm5315_vm14, %v24198_v0  ;;  %28760 = vst [vmem:[#allocation93_spill] sm:$0xff] %v24603_v8  ;;  %v7913_v29 = vrot.slane %v7911_v21, 3  ;;  %v7919_v38 = vrot.slane %v7917_v14, 2  ;;  %v7920_v37 = vshll.u32 %v24573_v7, 16  ;;  %v7926_v1 = vshrl.u32 %v24591_v15, 16 }
 0x3f9   : > { %20014 = vmatprep.mubr.msk.bf16.mxu1 %vm5315_vm14, %v24214_v4  ;;  %v7905_v43 = vor.u32 %v7904_v18, %v7901_v3  ;;  %v7929_v58 = vshll.u32 %v24591_v15, 16  ;;  %v7935_v11 = vshrl.u32 %v24593_v17, 16  ;;  %v24612_v10 = vsel %vm3400_vm5, %v7887_v46, %v7896_v19 }
 0x3fa   : > { %v7914_v12 = vor.u32 %v7913_v29, %v7910_v45  ;;  %v7922_v25 = vrot.slane %v7920_v37, 3  ;;  %v7938_v36 = vshll.u32 %v24593_v17, 16  ;;  %v7928_v14 = vrot.slane %v7926_v1, 2 }
 0x3fb   : > { %v24616_v57 = vsel %vm3400_vm5, %v7896_v19, %v7905_v43  ;;  %v7931_v53 = vrot.slane %v7929_v58, 3  ;;  %v7937_v21 = vrot.slane %v7935_v11, 2  ;;  %v7944_v46 = vshrl.u32 %v24605_v61, 16  ;;  %v24628_v58 = vld [vmem:[#allocation2 + $0x20] sm:$0xff]  }
 0x3fc   : > { %v24621_v18 = vsel %vm3400_vm5, %v7905_v43, %v7914_v12  ;;  %v7923_v3 = vor.u32 %v7922_v25, %v7919_v38  ;;  %v7940_v8 = vrot.slane %v7938_v36, 3  ;;  %v7947_v1 = vshll.u32 %v24605_v61, 16 }
 0x3fd   : > { %v7932_v19 = vor.u32 %v7931_v53, %v7928_v14  ;;  %v5788_v29 = vrot.slane %v24628_v58, 1  ;;  %v7946_v38 = vrot.slane %v7944_v46, 2  ;;  %v28761_v11 = vrot.slane %v24295_v59, 1 }
 0x3fe   : > { %v24632_v37 = vsel %vm3400_vm5, %v7914_v12, %v7923_v3  ;;  %v7941_v43 = vor.u32 %v7940_v8, %v7937_v21  ;;  %v28762_v25 = vrot.slane %v24287_v22, 1  ;;  %v7949_v14 = vrot.slane %v7947_v1, 3  ;;  %v22618_v22 = vld [vmem:[#allocation2 + $0x28] sm:$0xff]  }
 0x3ff   : > { %v24640_v36 = vsel %vm3400_vm5, %v7923_v3, %v7932_v19  ;;  %v28763_v53 = vcombine.low %v24532_v42, %v24485_v2  ;;  %v8250_v8 = vrot.slane %v24490_v16, 3  ;;  %v8252_v12 = vrot.slane %v24492_v39, 3  ;;  %v22379_v2 = vld [vmem:[%s28552_s4 + $0x38] sm:$0xff]  }
 0x400   : > { %20015 = vmatmul.mubr.msk.bf16.gmra.mrb[32].mxu1 %vm5315_vm14, %v24228_v35  ;;  %v24646_v58 = vsel %vm3400_vm5, %v7932_v19, %v7941_v43  ;;  %v8254_v21 = vrot.slane %v24494_v30, 3  ;;  %v5790_v46 = vrot.slane %v22618_v22, 1  ;;  %v8256_v3 = vrot.slane %v24496_v31, 3 }
 0x401   : > { %20022 = vmatprep.mubr.msk.bf16.mxu1 %vm5315_vm14, %v24547_v26  ;;  %v5785_v26 = vsel %vm1307_vm2, %v28762_v25, %v28761_v11  ;;  %v8249_v45 = vrot.slane %v28763_v53, 3  ;;  %28764 = vst [vmem:[#allocation94_spill] sm:$0xff] %v24646_v58  ;;  %v24651_v11 = vor.u32 %v7949_v14, %v7946_v38  ;;  %v8258_v1 = vrot.slane %v24503_v56, 3 }
 0x402   : > { %v24662_v19 = vsel %vm3875_vm6, %v8250_v8, %v8252_v12  ;;  %v24665_v25 = vsel %vm3875_vm6, %v8252_v12, %v8254_v21  ;;  %v8260_v38 = vrot.slane %v24511_v47, 3  ;;  %v28768_v14 = vrot.slane %v24341_v52, 1  ;;  %v24684_v12 = vld [vmem:[#allocation2 + $0xa0] ss:$0 sps:$4 sm:$0x77]  }
 0x403   : > { %v24659_v42 = vsel %vm3875_vm6, %v8249_v45, %v8250_v8  ;;  %28766 = vst [vmem:[#allocation96_spill] sm:$0xff] %v24662_v19  ;;  %28767 = vst [vmem:[#allocation97_spill] sm:$0xff] %v24665_v25  ;;  %v28769_v53 = vrot.slane %v24295_v59, 1  ;;  %v24675_v58 = vsel %vm3400_vm5, %v7941_v43, %v24651_v11  ;;  %v24678_v45 = vsel %vm3875_vm6, %v8254_v21, %v8256_v3 }
 0x404   : > { %28765 = vst [vmem:[#allocation95_spill] sm:$0xff] %v24659_v42  ;;  %28770 = vst [vmem:[#allocation98_spill] sm:$0xff] %v24678_v45  ;;  %v24681_v8 = vsel %vm3875_vm6, %v8256_v3, %v8258_v1  ;;  %v24687_v25 = vsel %vm3875_vm6, %v8258_v1, %v8260_v38  ;;  %v8262_v59 = vrot.slane %v24519_v32, 3  ;;  %v8266_v43 = vrot.slane %v24536_v55, 3  ;;  %v24701_v1 = vld [vmem:[%s28552_s4 + $0x40] sm:$0xff]  }
 0x405   : > { %v5787_v22 = vsel %vm1307_vm2, %v28769_v53, %v28768_v14  ;;  %28771 = vst [vmem:[#allocation99_spill] sm:$0xff] %v24681_v8  ;;  %28772 = vst [vmem:[#allocation100_spill] sm:$0xff] %v24687_v25  ;;  %v8264_v14 = vrot.slane %v24523_v13, 3  ;;  %v8268_v21 = vrot.slane %v24549_v20, 3  ;;  %v8270_v3 = vrot.slane %v24553_v9, 3 }
 0x406   : > { %v8274_v53 = vrot.slane %v24568_v24, 3  ;;  %v24704_v25 = vsel %vm3875_vm6, %v8260_v38, %v8262_v59  ;;  %v8276_v8 = vrot.slane %v24573_v7, 3 }
 0x407   : > { %v24714_v45 = vsel %vm3875_vm6, %v8266_v43, %v8268_v21  ;;  %v24717_v19 = vsel %vm3875_vm6, %v8268_v21, %v8270_v3 }
 0x408   : > { %20023 = vmatmul.mubr.msk.bf16.vlgmr.msra.gmra.mrb[0].mxu1 %vm5315_vm14, %v5785_v26  ;;  %v8272_v26 = vrot.slane %v24565_v54, 3 }
 0x409   : > { %20026 = vmatprep.mubr.msk.bf16.mxu1 %vm5315_vm14, %v5787_v22  ;;  %20059 = vmatpush3.bf16.msra.mxu1 %v24310_v60  ;;  %v24707_v22 = vsel %vm3875_vm6, %v8262_v59, %v8264_v14  ;;  %v24710_v60 = vsel %vm3875_vm6, %v8264_v14, %v8266_v43  ;;  %v24726_v59 = vsel %vm3875_vm6, %v8274_v53, %v8276_v8  ;;  %v8278_v14 = vrot.slane %v24591_v15, 3 }
 0x40a   : > { %20060 = vmatprep.subr.bf16.mxu1 %v22379_v2  ;;  %28773 = vst [vmem:[#allocation101_spill] sm:$0xff] %v24707_v22  ;;  %28774 = vst [vmem:[#allocation102_spill] sm:$0xff] %v24710_v60  ;;  %v24720_v42 = vsel %vm3875_vm6, %v8270_v3, %v8272_v26  ;;  %v24723_v38 = vsel %vm3875_vm6, %v8272_v26, %v8274_v53  ;;  %v8280_v60 = vrot.slane %v24593_v17, 3  ;;  %v8282_v22 = vrot.slane %v24605_v61, 3 }
 0x40b   : > { %28775 = vst [vmem:[#allocation103_spill] sm:$0xff] %v24723_v38  ;;  %28776 = vst [vmem:[#allocation104_spill] sm:$0xff] %v24726_v59  ;;  %v8284_v43 = vrot.slane %v24684_v12, 3  ;;  %v24734_v21 = vsel %vm3875_vm6, %v8276_v8, %v8278_v14  ;;  %v28779_v53 = vrot.slane %v24341_v52, 1  ;;  %v22619_v8 = vld [vmem:[#allocation2 + $0x30] sm:$0xff]  }
 0x40c   : > { %28777 = vst [vmem:[#allocation105_spill] sm:$0xff] %v24734_v21  ;;  %v24737_v3 = vsel %vm3875_vm6, %v8278_v14, %v8280_v60  ;;  %v24740_v26 = vsel %vm3875_vm6, %v8280_v60, %v8282_v22  ;;  %v5792_v21 = vrot.slane %v22619_v8, 1  ;;  %v22620_v14 = vld [vmem:[#allocation2 + $0x38] sm:$0xff]   ;;  %v22623_v8 = vld [vmem:[#allocation2 + $0x50] sm:$0xff]  }
 0x40d   : > { %20061 = vmatpush3.bf16.msra.mxu1 %v22379_v2  ;;  %28778 = vst [vmem:[#allocation106_spill] sm:$0xff] %v24737_v3  ;;  %v5789_v59 = vsel %vm1307_vm2, %v28779_v53, %v5788_v29  ;;  %v24746_v38 = vsel %vm3875_vm6, %v8282_v22, %v8284_v43  ;;  %v5791_v2 = vsel %vm1307_vm2, %v5788_v29, %v5790_v46  ;;  %v5794_v3 = vrot.slane %v22620_v14, 1  ;;  %v22621_v22 = vld [vmem:[#allocation2 + $0x40] sm:$0xff]   ;;  %v22622_v53 = vld [vmem:[#allocation2 + $0x48] sm:$0xff]   ;;  %v22624_v14 = vld [vmem:[#allocation2 + $0x58] sm:$0xff]  }
 0x40e   : > { %20098 = vmatprep.subr.bf16.mxu1 %v24701_v1  ;;  %v5793_v60 = vsel %vm1307_vm2, %v5790_v46, %v5792_v21  ;;  %v5796_v43 = vrot.slane %v22621_v22, 1  ;;  %v5800_v46 = vrot.slane %v22623_v8, 1  ;;  %v22625_v22 = vld [vmem:[#allocation2 + $0x60] sm:$0xff]  }
 0x40f   : > { %v5795_v52 = vsel %vm1307_vm2, %v5792_v21, %v5794_v3 }
 0x410   : > { %20027 = vmatmul.mubr.msk.bf16.gmra.mrb[4].mxu1 %vm5315_vm14, %v5789_v59  ;;  %v5798_v59 = vrot.slane %v22622_v53, 1  ;;  %v5797_v29 = vsel %vm1307_vm2, %v5794_v3, %v5796_v43  ;;  %v5804_v3 = vrot.slane %v22625_v22, 1  ;;  %v5806_v53 = vrot.slane %v24187_v27, 1 }
 0x411   : > { %20030 = vmatprep.mubr.msk.bf16.mxu1 %vm5315_vm14, %v5791_v2  ;;  %v5812_v27 = vrot.slane %v24214_v4, 1 }
 0x412   : > { %v5799_v2 = vsel %vm1307_vm2, %v5796_v43, %v5798_v59  ;;  %v5801_v21 = vsel %vm1307_vm2, %v5798_v59, %v5800_v46  ;;  %v5808_v59 = vrot.slane %v24191_v23, 1 }
 0x414   : > { %v5809_v8 = vsel %vm1307_vm2, %v5806_v53, %v5808_v59 }
 0x418   : > { %20031 = vmatmul.mubr.msk.bf16.gmra.mrb[8].mxu1 %vm5315_vm14, %v5793_v60  ;;  %v5802_v60 = vrot.slane %v22624_v14, 1  ;;  %v5814_v14 = vrot.slane %v24228_v35, 1  ;;  %v6235_v35 = vrot.slane %v24249_v33, 1  ;;  %v22401_v33 = vld [vmem:[%s28552_s4 + $0x50] sm:$0xff]  }
 0x419   : > { %20034 = vmatprep.mubr.msk.bf16.mxu1 %vm5315_vm14, %v5795_v52 }
 0x41a   : > { %v5803_v52 = vsel %vm1307_vm2, %v5800_v46, %v5802_v60  ;;  %v5805_v43 = vsel %vm1307_vm2, %v5802_v60, %v5804_v3  ;;  %v5815_v23 = vsel %vm1307_vm2, %v5812_v27, %v5814_v14 }
 0x420   : > { %20035 = vmatmul.mubr.msk.bf16.gmra.mrb[12].mxu1 %vm5315_vm14, %v5797_v29  ;;  %v5807_v29 = vsel %vm1307_vm2, %v5804_v3, %v5806_v53  ;;  %v6237_v3 = vrot.slane %v24251_v49, 1  ;;  %v6239_v49 = vrot.slane %v24254_v34, 1  ;;  %v6241_v53 = vrot.slane %v24261_v6, 1 }
 0x421   : > { %20038 = vmatprep.mubr.msk.bf16.mxu1 %vm5315_vm14, %v5799_v2  ;;  %v5810_v2 = vrot.slane %v24198_v0, 1  ;;  %v5816_v0 = vrot.slane %v24233_v28, 1  ;;  %v22393_v28 = vld [vmem:[%s28552_s4 + $0x48] sm:$0xff]   ;;  %v6247_v6 = vrot.slane %v24278_v40, 1 }
 0x423   : > { %v5811_v46 = vsel %vm1307_vm2, %v5808_v59, %v5810_v2  ;;  %v5813_v60 = vsel %vm1307_vm2, %v5810_v2, %v5812_v27  ;;  %v5817_v22 = vsel %vm1307_vm2, %v5814_v14, %v5816_v0  ;;  %v6245_v59 = vrot.slane %v24272_v50, 1 }
 0x424   : > { %v6251_v50 = vrot.slane %v24300_v41, 1  ;;  %v6253_v27 = vrot.slane %v24312_v63, 1  ;;  %v28781_v63 = vld [vmem:[#allocation48_spill] sm:$0xff] }
 0x426   : > { %v6254_v40 = vsel %vm1307_vm2, %v6251_v50, %v6253_v27 }
 0x428   : > { %20039 = vmatmul.mubr.msk.bf16.gmra.mrb[16].mxu1 %vm5315_vm14, %v5801_v21  ;;  %v6232_v21 = vrot.slane %v24244_v51, 1 }
 0x429   : > { %20042 = vmatprep.mubr.msk.bf16.mxu1 %vm5315_vm14, %v5803_v52  ;;  %v6233_v52 = vrot.slane %v24246_v5, 1  ;;  %v6238_v5 = vsel %vm1307_vm2, %v6235_v35, %v6237_v3 }
 0x42b   : > { %v6234_v4 = vsel %vm1307_vm2, %v6232_v21, %v6233_v52  ;;  %v6236_v51 = vsel %vm1307_vm2, %v6233_v52, %v6235_v35  ;;  %v6259_v21 = vrot.slane %v28781_v63, 1  ;;  %v28782_v52 = vld [vmem:[#allocation50_spill] sm:$0xff]  ;;  %v28783_v35 = vld [vmem:[#allocation52_spill] sm:$0xff] }
 0x430   : > { %20043 = vmatmul.mubr.msk.bf16.gmra.mrb[20].mxu1 %vm5315_vm14, %v5805_v43  ;;  %v6240_v43 = vsel %vm1307_vm2, %v6237_v3, %v6239_v49  ;;  %v6263_v3 = vrot.slane %v28783_v35, 1 }
 0x431   : > { %20046 = vmatprep.mubr.msk.bf16.mxu1 %vm5315_vm14, %v5807_v29  ;;  %v6242_v29 = vsel %vm1307_vm2, %v6239_v49, %v6241_v53  ;;  %v22400_v49 = vld [vmem:[#allocation2 + $0x98] ss:$0 sps:$4 sm:$0x11]  }
 0x438   : > { %20047 = vmatmul.mubr.msk.bf16.gmra.mrb[24].mxu1 %vm5315_vm14, %v5809_v8  ;;  %v6249_v8 = vrot.slane %v24281_v48, 1  ;;  %v6255_v48 = vrot.slane %v24320_v44, 1 }
 0x439   : > { %20050 = vmatprep.mubr.msk.bf16.mxu1 %vm5315_vm14, %v5811_v46  ;;  %v6248_v46 = vsel %vm1307_vm2, %v6245_v59, %v6247_v6 }
 0x43a   : > { %v6252_v14 = vsel %vm1307_vm2, %v6249_v8, %v6251_v50  ;;  %v6256_v0 = vsel %vm1307_vm2, %v6253_v27, %v6255_v48  ;;  %v28791_v50 = vld [vmem:[#allocation49_spill] sm:$0xff] }
 0x43b   : > { %v28793_v27 = vld [vmem:[#allocation53_spill] sm:$0xff] }
 0x440   : > { %20051 = vmatmul.mubr.msk.bf16.gmra.mrb[28].mxu1 %vm5315_vm14, %v5813_v60  ;;  %v28780_v60 = vld [vmem:[#allocation46_spill] sm:$0xff] }
 0x441   : > { %20054 = vmatprep.mubr.msk.bf16.mxu1 %vm5315_vm14, %v5815_v23  ;;  %v6257_v23 = vrot.slane %v28780_v60, 1  ;;  %v28797_v60 = vld [vmem:[#allocation58_spill] sm:$0xff] }
 0x443   : > { %v6258_v41 = vsel %vm1307_vm2, %v6255_v48, %v6257_v23  ;;  %v28796_v48 = vld [vmem:[#allocation57_spill] sm:$0xff] }
 0x448   : > { %20055 = vmatmul.mubr.msk.bf16.gmra.mrb[32].mxu1 %vm5315_vm14, %v5817_v22  ;;  %v6261_v22 = vrot.slane %v28782_v52, 1 }
 0x449   : > { %20062 = vmatprep.mubr.msk.bf16.mxu1 %vm5315_vm14, %v6234_v4  ;;  %v6260_v4 = vsel %vm1307_vm2, %v6257_v23, %v6259_v21  ;;  %v28798_v23 = vld [vmem:[#allocation59_spill] sm:$0xff] }
 0x44a   : > { %v6262_v44 = vsel %vm1307_vm2, %v6259_v21, %v6261_v22 }
 0x450   : > { %20063 = vmatmul.mubr.msk.bf16.vlgmr.msra.gmra.mrb[0].mxu1 %vm5315_vm14, %v6236_v51 }
 0x451   : > { %20066 = vmatprep.mubr.msk.bf16.mxu1 %vm5315_vm14, %v6238_v5  ;;  %20099 = vmatpush3.bf16.msra.mxu1 %v24701_v1  ;;  %v6243_v1 = vrot.slane %v24266_v62, 1  ;;  %v6250_v62 = vsel %vm1307_vm2, %v6247_v6, %v6249_v8  ;;  %v6264_v5 = vsel %vm1307_vm2, %v6261_v22, %v6263_v3  ;;  %v22405_v6 = vld [vmem:[%s28552_s4 + $0x60] sm:$0xff]   ;;  %v28788_v8 = vld [vmem:[#allocation44_spill] sm:$0xff] }
 0x452   : > { %20100 = vmatprep.subr.bf16.mxu1 %v22393_v28 }
 0x453   : > { %v6244_v2 = vsel %vm1307_vm2, %v6241_v53, %v6243_v1  ;;  %v6246_v34 = vsel %vm1307_vm2, %v6243_v1, %v6245_v59  ;;  %v28785_v1 = vld [vmem:[#allocation41_spill] sm:$0xff]  ;;  %v22402_v59 = vld [vmem:[%s28552_s4 + $0x58] sm:$0xff]  }
 0x455   : > { %20101 = vmatpush3.bf16.msra.mxu1 %v22393_v28  ;;  %v28784_v28 = vld [vmem:[#allocation54_spill] sm:$0xff] }
 0x456   : > { %20138 = vmatprep.subr.bf16.mxu1 %v22401_v33  ;;  %v6265_v51 = vrot.slane %v28784_v28, 1 }
 0x458   : > { %20067 = vmatmul.mubr.msk.bf16.gmra.mrb[4].mxu1 %vm5315_vm14, %v6240_v43  ;;  %v6266_v53 = vsel %vm1307_vm2, %v6263_v3, %v6265_v51  ;;  %v6267_v43 = vrot.slane %v22400_v49, 1  ;;  %v28803_v3 = vld [vmem:[#allocation61_spill] sm:$0xff] }
 0x459   : > { %20070 = vmatprep.mubr.msk.bf16.mxu1 %vm5315_vm14, %v6242_v29  ;;  %v28805_v49 = vld [vmem:[#allocation65_spill] sm:$0xff] }
 0x45a   : > { %v6268_v29 = vsel %vm1307_vm2, %v6265_v51, %v6267_v43  ;;  %v28804_v51 = vld [vmem:[#allocation64_spill] sm:$0xff]  ;;  %v22410_v43 = vld [vmem:[%s28552_s4 + $0x70] sm:$0xff]  }
 0x460   : > { %20071 = vmatmul.mubr.msk.bf16.gmra.mrb[8].mxu1 %vm5315_vm14, %v6244_v2  ;;  %v28786_v2 = vld [vmem:[#allocation42_spill] sm:$0xff] }
 0x461   : > { %20074 = vmatprep.mubr.msk.bf16.mxu1 %vm5315_vm14, %v6246_v34  ;;  %v28787_v34 = vld [vmem:[#allocation43_spill] sm:$0xff] }
 0x468   : > { %20075 = vmatmul.mubr.msk.bf16.gmra.mrb[12].mxu1 %vm5315_vm14, %v6248_v46  ;;  %v28789_v46 = vld [vmem:[#allocation45_spill] sm:$0xff] }
 0x469   : > { %20078 = vmatprep.mubr.msk.bf16.mxu1 %vm5315_vm14, %v6250_v62  ;;  %v28790_v62 = vld [vmem:[#allocation47_spill] sm:$0xff] }
 0x470   : > { %20079 = vmatmul.mubr.msk.bf16.gmra.mrb[16].mxu1 %vm5315_vm14, %v6252_v14  ;;  %v28794_v14 = vld [vmem:[#allocation55_spill] sm:$0xff] }
 0x471   : > { %20082 = vmatprep.mubr.msk.bf16.mxu1 %vm5315_vm14, %v6254_v40  ;;  %v28795_v40 = vld [vmem:[#allocation56_spill] sm:$0xff] }
 0x478   : > { %20083 = vmatmul.mubr.msk.bf16.gmra.mrb[20].mxu1 %vm5315_vm14, %v6256_v0  ;;  %v28799_v0 = vld [vmem:[#allocation60_spill] sm:$0xff] }
 0x479   : > { %20086 = vmatprep.mubr.msk.bf16.mxu1 %vm5315_vm14, %v6258_v41  ;;  %v28800_v41 = vld [vmem:[#allocation69_spill] sm:$0xff] }
 0x47a   : > { %v6719_v63 = vshrl.u32 %v28800_v41, 16  ;;  %v6722_v21 = vshll.u32 %v28800_v41, 16 }
 0x47c   : > { %v6721_v52 = vrot.slane %v6719_v63, 1  ;;  %v6724_v22 = vrot.slane %v6722_v21, 2  ;;  %v7469_v63 = vrot.slane %v24492_v39, 2  ;;  %v7471_v21 = vrot.slane %v24494_v30, 2  ;;  %v22428_v39 = vld [vmem:[%s28552_s4 + $0x80] sm:$0xff]  }
 0x47d   : > { %v7473_v30 = vrot.slane %v24496_v31, 2 }
 0x47e   : > { %v6725_v35 = vor.u32 %v6724_v22, %v6721_v52  ;;  %v22420_v52 = vld [vmem:[%s28552_s4 + $0x78] sm:$0xff]  }
 0x480   : > { %20087 = vmatmul.mubr.msk.bf16.gmra.mrb[24].mxu1 %vm5315_vm14, %v6260_v4  ;;  %v28801_v4 = vld [vmem:[#allocation62_spill] sm:$0xff]  ;;  %v6726_v28 = vsel %vm2116_vm3, %v28803_v3, %v6725_v35  ;;  %v7477_v3 = vrot.slane %v24511_v47, 2 }
 0x481   : > { %20090 = vmatprep.mubr.msk.bf16.mxu1 %vm5315_vm14, %v6262_v44  ;;  %v28802_v44 = vld [vmem:[#allocation63_spill] sm:$0xff] }
 0x488   : > { %20091 = vmatmul.mubr.msk.bf16.gmra.mrb[28].mxu1 %vm5315_vm14, %v6264_v5  ;;  %v22406_v5 = vld [vmem:[%s28552_s4 + $0x68] sm:$0xff]  }
 0x489   : > { %20094 = vmatprep.mubr.msk.bf16.mxu1 %vm5315_vm14, %v6266_v53  ;;  %v28806_v53 = vld [vmem:[#allocation66_spill] sm:$0xff] }
 0x490   : > { %20095 = vmatmul.mubr.msk.bf16.gmra.mrb[32].mxu1 %vm5315_vm14, %v6268_v29  ;;  %v28807_v29 = vld [vmem:[#allocation67_spill] sm:$0xff] }
 0x491   : > { %20102 = vmatprep.mubr.msk.bf16.mxu1 %vm5315_vm14, %v28785_v1  ;;  %v28808_v1 = vld [vmem:[#allocation68_spill] sm:$0xff] }
 0x498   : > { %20103 = vmatmul.mubr.msk.bf16.vlgmr.msra.gmra.mrb[0].mxu1 %vm5315_vm14, %v28786_v2  ;;  %v28810_v2 = vld [vmem:[#allocation71_spill] sm:$0xff] }
 0x499   : > { %20106 = vmatprep.mubr.msk.bf16.mxu1 %vm5315_vm14, %v28787_v34  ;;  %20139 = vmatpush3.bf16.msra.mxu1 %v22401_v33  ;;  %v28792_v33 = vld [vmem:[#allocation51_spill] sm:$0xff]  ;;  %v28811_v34 = vld [vmem:[#allocation72_spill] sm:$0xff] }
 0x49a   : > { %20140 = vmatprep.subr.bf16.mxu1 %v22402_v59 }
 0x49d   : > { %20141 = vmatpush3.bf16.msra.mxu1 %v22402_v59  ;;  %v28809_v59 = vld [vmem:[#allocation70_spill] sm:$0xff] }
 0x49e   : > { %20178 = vmatprep.subr.bf16.mxu1 %v22405_v6 }
 0x4a0   : > { %20107 = vmatmul.mubr.msk.bf16.gmra.mrb[4].mxu1 %vm5315_vm14, %v28788_v8  ;;  %v28813_v8 = vld [vmem:[#allocation74_spill] sm:$0xff] }
 0x4a1   : > { %20110 = vmatprep.mubr.msk.bf16.mxu1 %vm5315_vm14, %v28789_v46  ;;  %v28814_v46 = vld [vmem:[#allocation75_spill] sm:$0xff] }
 0x4a8   : > { %20111 = vmatmul.mubr.msk.bf16.gmra.mrb[8].mxu1 %vm5315_vm14, %v28790_v62  ;;  %v28815_v62 = vld [vmem:[#allocation76_spill] sm:$0xff] }
 0x4a9   : > { %20114 = vmatprep.mubr.msk.bf16.mxu1 %vm5315_vm14, %v28791_v50  ;;  %v28816_v50 = vld [vmem:[#allocation77_spill] sm:$0xff] }
 0x4b0   : > { %20115 = vmatmul.mubr.msk.bf16.gmra.mrb[12].mxu1 %vm5315_vm14, %v28792_v33  ;;  %v28817_v33 = vld [vmem:[#allocation78_spill] sm:$0xff] }
 0x4b1   : > { %20118 = vmatprep.mubr.msk.bf16.mxu1 %vm5315_vm14, %v28793_v27  ;;  %v28818_v27 = vld [vmem:[#allocation79_spill] sm:$0xff] }
 0x4b8   : > { %20119 = vmatmul.mubr.msk.bf16.gmra.mrb[16].mxu1 %vm5315_vm14, %v28794_v14  ;;  %v28819_v14 = vld [vmem:[#allocation80_spill] sm:$0xff] }
 0x4b9   : > { %20122 = vmatprep.mubr.msk.bf16.mxu1 %vm5315_vm14, %v28795_v40  ;;  %v28820_v40 = vld [vmem:[#allocation81_spill] sm:$0xff] }
 0x4c0   : > { %20123 = vmatmul.mubr.msk.bf16.gmra.mrb[20].mxu1 %vm5315_vm14, %v28796_v48  ;;  %v7467_v48 = vrot.slane %v24490_v16, 2  ;;  %v7472_v16 = vsel %vm2591_vm4, %v7469_v63, %v7471_v21 }
 0x4c1   : > { %20126 = vmatprep.mubr.msk.bf16.mxu1 %vm5315_vm14, %v28797_v60  ;;  %v28821_v60 = vld [vmem:[#allocation83_spill] sm:$0xff] }
 0x4c2   : > { %v7470_v22 = vsel %vm2591_vm4, %v7467_v48, %v7469_v63  ;;  %v7956_v63 = vshll.u32 %v24684_v12, 16 }
 0x4c8   : > { %20127 = vmatmul.mubr.msk.bf16.gmra.mrb[24].mxu1 %vm5315_vm14, %v28798_v23  ;;  %v7466_v23 = vrot.slane %v28821_v60, 2  ;;  %v28830_v60 = vld [vmem:[#allocation91_spill] sm:$0xff] }
 0x4c9   : > { %20130 = vmatprep.mubr.msk.bf16.mxu1 %vm5315_vm14, %v28799_v0  ;;  %v28822_v0 = vld [vmem:[#allocation82_spill] sm:$0xff] }
 0x4ca   : > { %v7468_v41 = vsel %vm2591_vm4, %v7466_v23, %v7467_v48  ;;  %v28829_v48 = vld [vmem:[#allocation90_spill] sm:$0xff]  ;;  %v28831_v23 = vld [vmem:[#allocation92_spill] sm:$0xff] }
 0x4d0   : > { %20131 = vmatmul.mubr.msk.bf16.gmra.mrb[28].mxu1 %vm5315_vm14, %v28801_v4  ;;  %v7475_v4 = vrot.slane %v24503_v56, 2  ;;  %v7481_v56 = vrot.slane %v24523_v13, 2 }
 0x4d1   : > { %20134 = vmatprep.mubr.msk.bf16.mxu1 %vm5315_vm14, %v28802_v44  ;;  %v7474_v44 = vsel %vm2591_vm4, %v7471_v21, %v7473_v30 }
 0x4d2   : > { %v7476_v35 = vsel %vm2591_vm4, %v7473_v30, %v7475_v4  ;;  %v28840_v30 = vld [vmem:[#allocation101_spill] sm:$0xff] }
 0x4d8   : > { %20135 = vmatmul.mubr.msk.bf16.gmra.mrb[32].mxu1 %vm5315_vm14, %v6726_v28  ;;  %v7479_v28 = vrot.slane %v24519_v32, 2  ;;  %v7485_v32 = vrot.slane %v24549_v20, 2 }
 0x4d9   : > { %20142 = vmatprep.mubr.msk.bf16.mxu1 %vm5315_vm14, %v28804_v51  ;;  %v7478_v51 = vsel %vm2591_vm4, %v7475_v4, %v7477_v3  ;;  %v28841_v4 = vld [vmem:[#allocation102_spill] sm:$0xff] }
 0x4da   : > { %v7480_v31 = vsel %vm2591_vm4, %v7477_v3, %v7479_v28 }
 0x4e0   : > { %20143 = vmatmul.mubr.msk.bf16.vlgmr.msra.gmra.mrb[0].mxu1 %vm5315_vm14, %v28805_v49  ;;  %v7482_v49 = vsel %vm2591_vm4, %v7479_v28, %v7481_v56  ;;  %v28843_v28 = vld [vmem:[#allocation104_spill] sm:$0xff] }
 0x4e1   : > { %20146 = vmatprep.mubr.msk.bf16.mxu1 %vm5315_vm14, %v28806_v53  ;;  %20179 = vmatpush3.bf16.msra.mxu1 %v22405_v6  ;;  %v28812_v6 = vld [vmem:[#allocation73_spill] sm:$0xff]  ;;  %v7487_v53 = vrot.slane %v24553_v9, 2  ;;  %v7493_v9 = vrot.slane %v24573_v7, 2 }
 0x4e2   : > { %20180 = vmatprep.subr.bf16.mxu1 %v22406_v5 }
 0x4e3   : > { %v7488_v13 = vsel %vm2591_vm4, %v7485_v32, %v7487_v53 }
 0x4e5   : > { %20181 = vmatpush3.bf16.msra.mxu1 %v22406_v5  ;;  %v7483_v5 = vrot.slane %v24536_v55, 2  ;;  %v7489_v55 = vrot.slane %v24565_v54, 2 }
 0x4e6   : > { %20218 = vmatprep.subr.bf16.mxu1 %v22410_v43 }
 0x4e7   : > { %v7484_v47 = vsel %vm2591_vm4, %v7481_v56, %v7483_v5 }
 0x4e8   : > { %20147 = vmatmul.mubr.msk.bf16.gmra.mrb[4].mxu1 %vm5315_vm14, %v28807_v29  ;;  %v7491_v29 = vrot.slane %v24568_v24, 2  ;;  %v7497_v24 = vrot.slane %v24593_v17, 2  ;;  %v22429_v17 = vld [vmem:[%s28552_s4 + $0x88] sm:$0xff]  }
 0x4e9   : > { %20150 = vmatprep.mubr.msk.bf16.mxu1 %vm5315_vm14, %v28808_v1  ;;  %v7490_v1 = vsel %vm2591_vm4, %v7487_v53, %v7489_v55  ;;  %v25100_v53 = vld [vmem:[%s25010_s28 + $0x18] sm:$0xff]  }
 0x4ea   : > { %v7492_v20 = vsel %vm2591_vm4, %v7489_v55, %v7491_v29 }
 0x4f0   : > { %20151 = vmatmul.mubr.msk.bf16.gmra.mrb[8].mxu1 %vm5315_vm14, %v28809_v59  ;;  %v7495_v59 = vrot.slane %v24591_v15, 2 }
 0x4f1   : > { %20154 = vmatprep.mubr.msk.bf16.mxu1 %vm5315_vm14, %v28810_v2  ;;  %v7494_v2 = vsel %vm2591_vm4, %v7491_v29, %v7493_v9 }
 0x4f2   : > { %v7496_v54 = vsel %vm2591_vm4, %v7493_v9, %v7495_v59 }
 0x4f8   : > { %20155 = vmatmul.mubr.msk.bf16.gmra.mrb[12].mxu1 %vm5315_vm14, %v28811_v34  ;;  %v7499_v34 = vrot.slane %v24605_v61, 2  ;;  %v28824_v61 = vld [vmem:[#allocation85_spill] sm:$0xff] }
 0x4f9   : > { %20158 = vmatprep.mubr.msk.bf16.mxu1 %vm5315_vm14, %v28812_v6  ;;  %v7498_v6 = vsel %vm2591_vm4, %v7495_v59, %v7497_v24 }
 0x4fa   : > { %v7500_v7 = vsel %vm2591_vm4, %v7497_v24, %v7499_v34 }
 0x500   : > { %20159 = vmatmul.mubr.msk.bf16.gmra.mrb[16].mxu1 %vm5315_vm14, %v28813_v8  ;;  %v22427_v8 = vld [vmem:[#allocation2 + $0xa0] ss:$0 sps:$4 sm:$0x33]  }
 0x501   : > { %20162 = vmatprep.mubr.msk.bf16.mxu1 %vm5315_vm14, %v28814_v46  ;;  %v7501_v15 = vrot.slane %v22427_v8, 2 }
 0x503   : > { %v7502_v46 = vsel %vm2591_vm4, %v7499_v34, %v7501_v15  ;;  %v22445_v15 = vld [vmem:[%s28553_s5 + $0x8] sm:$0xff]  }
 0x508   : > { %20163 = vmatmul.mubr.msk.bf16.gmra.mrb[20].mxu1 %vm5315_vm14, %v28815_v62  ;;  %v28823_v62 = vld [vmem:[#allocation84_spill] sm:$0xff] }
 0x509   : > { %20166 = vmatprep.mubr.msk.bf16.mxu1 %vm5315_vm14, %v28816_v50  ;;  %v28825_v50 = vld [vmem:[#allocation86_spill] sm:$0xff] }
 0x510   : > { %20167 = vmatmul.mubr.msk.bf16.gmra.mrb[24].mxu1 %vm5315_vm14, %v28817_v33  ;;  %v22431_v33 = vld [vmem:[%s28553_s5 + $0x10] sm:$0xff]  }
 0x511   : > { %20170 = vmatprep.mubr.msk.bf16.mxu1 %vm5315_vm14, %v28818_v27  ;;  %v28826_v27 = vld [vmem:[#allocation87_spill] sm:$0xff] }
 0x518   : > { %20171 = vmatmul.mubr.msk.bf16.gmra.mrb[28].mxu1 %vm5315_vm14, %v28819_v14  ;;  %v28827_v14 = vld [vmem:[#allocation88_spill] sm:$0xff] }
 0x519   : > { %20174 = vmatprep.mubr.msk.bf16.mxu1 %vm5315_vm14, %v28820_v40  ;;  %v28828_v40 = vld [vmem:[#allocation89_spill] sm:$0xff] }
 0x520   : > { %20175 = vmatmul.mubr.msk.bf16.gmra.mrb[32].mxu1 %vm5315_vm14, %v28822_v0  ;;  %v28832_v0 = vld [vmem:[#allocation93_spill] sm:$0xff] }
 0x521   : > { %20182 = vmatprep.mubr.msk.bf16.mxu1 %vm5315_vm14, %v7468_v41  ;;  %v7953_v41 = vshrl.u32 %v24684_v12, 16  ;;  %v28836_v12 = vld [vmem:[#allocation97_spill] sm:$0xff] }
 0x523   : > { %v7955_v21 = vrot.slane %v7953_v41, 2 }
 0x528   : > { %20183 = vmatmul.mubr.msk.bf16.vlgmr.msra.gmra.mrb[0].mxu1 %vm5315_vm14, %v7470_v22  ;;  %v28833_v22 = vld [vmem:[#allocation94_spill] sm:$0xff] }
 0x529   : > { %20186 = vmatprep.mubr.msk.bf16.mxu1 %vm5315_vm14, %v7472_v16  ;;  %20219 = vmatpush3.bf16.msra.mxu1 %v22410_v43  ;;  %v7486_v43 = vsel %vm2591_vm4, %v7483_v5, %v7485_v32  ;;  %v28838_v16 = vld [vmem:[#allocation99_spill] sm:$0xff]  ;;  %v28845_v5 = vld [vmem:[#allocation106_spill] sm:$0xff] }
 0x52a   : > { %20220 = vmatprep.subr.bf16.mxu1 %v22420_v52 }
 0x52d   : > { %20221 = vmatpush3.bf16.msra.mxu1 %v22420_v52  ;;  %v7958_v52 = vrot.slane %v7956_v63, 3  ;;  %v25147_v63 = vld [vmem:[%s25010_s28 + $0x40] sm:$0xff]  }
 0x52e   : > { %20258 = vmatprep.subr.bf16.mxu1 %v22428_v39 }
 0x530   : > { %20187 = vmatmul.mubr.msk.bf16.gmra.mrb[4].mxu1 %vm5315_vm14, %v7474_v44  ;;  %v28842_v44 = vld [vmem:[#allocation103_spill] sm:$0xff] }
 0x531   : > { %20190 = vmatprep.mubr.msk.bf16.mxu1 %vm5315_vm14, %v7476_v35  ;;  %v25077_v35 = vld [vmem:[%s25010_s28 + $0x4] sm:$0xf] }
 0x538   : > { %20191 = vmatmul.mubr.msk.bf16.gmra.mrb[8].mxu1 %vm5315_vm14, %v7478_v51 }
 0x539   : > { %20194 = vmatprep.mubr.msk.bf16.mxu1 %vm5315_vm14, %v7480_v31 }
 0x540   : > { %20195 = vmatmul.mubr.msk.bf16.gmra.mrb[12].mxu1 %vm5315_vm14, %v7482_v49  ;;  %v25095_v49 = vld [vmem:[%s25010_s28 + $0x10] sm:$0xff]  }
 0x541   : > { %20198 = vmatprep.mubr.msk.bf16.mxu1 %vm5315_vm14, %v7484_v47  ;;  %v8724_v29 = vshrl.u32 %v25095_v49, 16 }
 0x548   : > { %20199 = vmatmul.mubr.msk.bf16.gmra.mrb[16].mxu1 %vm5315_vm14, %v7486_v43  ;;  %v8720_v43 = vshll.u32 %v25095_v49, 16 }
 0x549   : > { %20202 = vmatprep.mubr.msk.bf16.mxu1 %vm5315_vm14, %v7488_v13 }
 0x550   : > { %20203 = vmatmul.mubr.msk.bf16.gmra.mrb[20].mxu1 %vm5315_vm14, %v7490_v1  ;;  %v8728_v1 = vshll.u32 %v25100_v53, 16 }
 0x551   : > { %20206 = vmatprep.mubr.msk.bf16.mxu1 %vm5315_vm14, %v7492_v20  ;;  %v8722_v20 = vrot.slane %v8720_v43, 1 }
 0x553   : > { %v8726_v59 = vor.u32 %v8724_v29, %v8722_v20 }
 0x558   : > { %20207 = vmatmul.mubr.msk.bf16.gmra.mrb[24].mxu1 %vm5315_vm14, %v7494_v2  ;;  %v8730_v2 = vrot.slane %v8728_v1, 1 }
 0x559   : > { %20210 = vmatprep.mubr.msk.bf16.mxu1 %vm5315_vm14, %v7496_v54  ;;  %v25114_v54 = vld [vmem:[%s25010_s28 + $0x28] sm:$0xff]  }
 0x560   : > { %20211 = vmatmul.mubr.msk.bf16.gmra.mrb[28].mxu1 %vm5315_vm14, %v7498_v6  ;;  %v8732_v6 = vshrl.u32 %v25100_v53, 16 }
 0x561   : > { %20214 = vmatprep.mubr.msk.bf16.mxu1 %vm5315_vm14, %v7500_v7  ;;  %v8744_v7 = vshll.u32 %v25114_v54, 16 }
 0x568   : > { %20215 = vmatmul.mubr.msk.bf16.gmra.mrb[32].mxu1 %vm5315_vm14, %v7502_v46 }
 0x569   : > { %20222 = vmatprep.mubr.msk.bf16.mxu1 %vm5315_vm14, %v28823_v62  ;;  %v25127_v62 = vld [vmem:[%s25010_s28 + $0x30] sm:$0xff]  }
 0x570   : > { %20223 = vmatmul.mubr.msk.bf16.vlgmr.msra.gmra.mrb[0].mxu1 %vm5315_vm14, %v28824_v61 }
 0x571   : > { %20226 = vmatprep.mubr.msk.bf16.mxu1 %vm5315_vm14, %v28825_v50  ;;  %20259 = vmatpush3.bf16.msra.mxu1 %v22428_v39  ;;  %v28839_v39 = vld [vmem:[#allocation100_spill] sm:$0xff]  ;;  %v8746_v50 = vrot.slane %v8744_v7, 1 }
 0x572   : > { %20260 = vmatprep.subr.bf16.mxu1 %v22429_v17 }
 0x575   : > { %20261 = vmatpush3.bf16.msra.mxu1 %v22429_v17  ;;  %v8734_v17 = vor.u32 %v8732_v6, %v8730_v2 }
 0x576   : > { %20298 = vmatprep.subr.bf16.mxu1 %v22431_v33 }
 0x578   : > { %20227 = vmatmul.mubr.msk.bf16.gmra.mrb[4].mxu1 %vm5315_vm14, %v28826_v27  ;;  %v25136_v27 = vld [vmem:[%s28553_s5 + $0x20] sm:$0xff]  }
 0x579   : > { %20230 = vmatprep.mubr.msk.bf16.mxu1 %vm5315_vm14, %v28827_v14  ;;  %v8752_v14 = vshll.u32 %v25127_v62, 16 }
 0x57b   : > { %v8754_v41 = vrot.slane %v8752_v14, 1 }
 0x580   : > { %20231 = vmatmul.mubr.msk.bf16.gmra.mrb[8].mxu1 %vm5315_vm14, %v28828_v40 }
 0x581   : > { %20234 = vmatprep.mubr.msk.bf16.mxu1 %vm5315_vm14, %v28829_v48  ;;  %v8748_v48 = vshrl.u32 %v25114_v54, 16 }
 0x588   : > { %20235 = vmatmul.mubr.msk.bf16.gmra.mrb[12].mxu1 %vm5315_vm14, %v28830_v60 }
 0x589   : > { %20238 = vmatprep.mubr.msk.bf16.mxu1 %vm5315_vm14, %v28831_v23  ;;  %v8756_v23 = vshrl.u32 %v25127_v62, 16 }
 0x590   : > { %20239 = vmatmul.mubr.msk.bf16.gmra.mrb[16].mxu1 %vm5315_vm14, %v28832_v0 }
 0x591   : > { %20242 = vmatprep.mubr.msk.bf16.mxu1 %vm5315_vm14, %v24612_v10  ;;  %v7959_v10 = vor.u32 %v7958_v52, %v7955_v21  ;;  %v8750_v21 = vor.u32 %v8748_v48, %v8746_v50  ;;  %v8758_v52 = vor.u32 %v8756_v23, %v8754_v41 }
 0x598   : > { %20243 = vmatmul.mubr.msk.bf16.gmra.mrb[20].mxu1 %vm5315_vm14, %v24616_v57  ;;  %v7960_v57 = vsel %vm3400_vm5, %v24651_v11, %v7959_v10  ;;  %v28837_v11 = vld [vmem:[#allocation98_spill] sm:$0xff]  ;;  %v25151_v10 = vld [vmem:[%s25010_s28 + $0x48] sm:$0xff]  }
 0x599   : > { %20246 = vmatprep.mubr.msk.bf16.mxu1 %vm5315_vm14, %v24621_v18  ;;  %v28834_v18 = vld [vmem:[#allocation95_spill] sm:$0xff] }
 0x5a0   : > { %20247 = vmatmul.mubr.msk.bf16.gmra.mrb[24].mxu1 %vm5315_vm14, %v24632_v37  ;;  %v22432_v37 = vld [vmem:[%s28553_s5 + $0x18] sm:$0xff]  }
 0x5a1   : > { %20250 = vmatprep.mubr.msk.bf16.mxu1 %vm5315_vm14, %v24640_v36  ;;  %v28835_v36 = vld [vmem:[#allocation96_spill] sm:$0xff] }
 0x5a8   : > { %20251 = vmatmul.mubr.msk.bf16.gmra.mrb[28].mxu1 %vm5315_vm14, %v28833_v22 }
 0x5a9   : > { %20254 = vmatprep.mubr.msk.bf16.mxu1 %vm5315_vm14, %v24675_v58  ;;  %v22436_v58 = vld [vmem:[%s28553_s5] sm:$0xff]  }
 0x5b0   : > { %20255 = vmatmul.mubr.msk.bf16.gmra.mrb[32].mxu1 %vm5315_vm14, %v7960_v57  ;;  %v8768_v57 = vshll.u32 %v25147_v63, 16 }
 0x5b1   : > { %20262 = vmatprep.mubr.msk.bf16.mxu1 %vm5315_vm14, %v28834_v18  ;;  %v8755_v18 = vsel %vm652_vm1, %v8750_v21, %v8754_v41 }
 0x5b8   : > { %20263 = vmatmul.mubr.msk.bf16.vlgmr.msra.gmra.mrb[0].mxu1 %vm5315_vm14, %v28835_v36 }
 0x5b9   : > { %20266 = vmatprep.mubr.msk.bf16.mxu1 %vm5315_vm14, %v28836_v12  ;;  %20299 = vmatpush3.bf16.msra.mxu1 %v22431_v33  ;;  %v25131_v33 = vld [vmem:[%s25010_s28 + $0x38] sm:$0xff]   ;;  %v8772_v12 = vshrl.u32 %v25147_v63, 16 }
 0x5ba   : > { %20300 = vmatprep.subr.bf16.mxu1 %v22432_v37  ;;  %v8760_v0 = vshll.u32 %v25131_v33, 16 }
 0x5bc   : > { %v8762_v22 = vrot.slane %v8760_v0, 1  ;;  %v25207_v0 = vld [vmem:[%s25010_s28 + $0x88] sm:$0xff]  }
 0x5bd   : > { %20301 = vmatpush3.bf16.msra.mxu1 %v22432_v37  ;;  %v8764_v37 = vshrl.u32 %v25131_v33, 16 }
 0x5be   : > { %20338 = vmatprep.subr.bf16.mxu1 %v22436_v58  ;;  %v8763_v36 = vsel %vm652_vm1, %v8758_v52, %v8762_v22 }
 0x5c0   : > { %20267 = vmatmul.mubr.msk.bf16.gmra.mrb[4].mxu1 %vm5315_vm14, %v28837_v11  ;;  %v8770_v11 = vrot.slane %v8768_v57, 1 }
 0x5c1   : > { %20270 = vmatprep.mubr.msk.bf16.mxu1 %vm5315_vm14, %v28838_v16  ;;  %v25161_v16 = vld [vmem:[%s25010_s28 + $0x50] sm:$0xff]  }
 0x5c8   : > { %20271 = vmatmul.mubr.msk.bf16.gmra.mrb[8].mxu1 %vm5315_vm14, %v28839_v39  ;;  %v8766_v39 = vor.u32 %v8764_v37, %v8762_v22 }
 0x5c9   : > { %20274 = vmatprep.mubr.msk.bf16.mxu1 %vm5315_vm14, %v24704_v25  ;;  %v8565_v25 = vld [vmem:[%s25010_s28] sm:$0xf] }
 0x5ca   : > { %v25080_v3 = vcombine.low %v8565_v25, %v25077_v35  ;;  %v8784_v25 = vshll.u32 %v25161_v16, 16 }
 0x5cc   : > { %v8705_v51 = vshrl.u32 %v25080_v3, 16 }
 0x5d0   : > { %20275 = vmatmul.mubr.msk.bf16.gmra.mrb[12].mxu1 %vm5315_vm14, %v28840_v30  ;;  %v8774_v30 = vor.u32 %v8772_v12, %v8770_v11  ;;  %v25218_v12 = vld [vmem:[%s25010_s28 + $0x90] ss:$0 sps:$4 sm:$0x11]  }
 0x5d1   : > { %20278 = vmatprep.mubr.msk.bf16.mxu1 %vm5315_vm14, %v28841_v4 }
 0x5d8   : > { %20279 = vmatmul.mubr.msk.bf16.gmra.mrb[16].mxu1 %vm5315_vm14, %v24714_v45  ;;  %v28844_v45 = vld [vmem:[#allocation105_spill] sm:$0xff] }
 0x5d9   : > { %20282 = vmatprep.mubr.msk.bf16.mxu1 %vm5315_vm14, %v24717_v19  ;;  %v25087_v19 = vld [vmem:[%s25010_s28 + $0x8] sm:$0xff]  }
 0x5da   : > { %v8712_v56 = vshll.u32 %v25087_v19, 16  ;;  %v8716_v13 = vshrl.u32 %v25087_v19, 16 }
 0x5dc   : > { %v8714_v32 = vrot.slane %v8712_v56, 1  ;;  %v8786_v56 = vrot.slane %v8784_v25, 1 }
 0x5de   : > { %v8718_v9 = vor.u32 %v8716_v13, %v8714_v32  ;;  %v25179_v13 = vld [vmem:[%s25010_s28 + $0x68] sm:$0xff]  }
 0x5e0   : > { %20283 = vmatmul.mubr.msk.bf16.gmra.mrb[20].mxu1 %vm5315_vm14, %v24720_v42  ;;  %v8707_v42 = vshll.u32 %v25080_v3, 16  ;;  %v8723_v34 = vsel %vm652_vm1, %v8718_v9, %v8722_v20 }
 0x5e1   : > { %20286 = vmatprep.mubr.msk.bf16.mxu1 %vm5315_vm14, %v28842_v44  ;;  %v25165_v44 = vld [vmem:[%s25010_s28 + $0x58] sm:$0xff]  }
 0x5e2   : > { %v8709_v31 = vrot.slane %v8707_v42, 1  ;;  %v8796_v1 = vshrl.u32 %v25165_v44, 16 }
 0x5e4   : > { %v8710_v47 = vor.u32 %v8709_v31, %v8705_v51  ;;  %v8788_v51 = vshrl.u32 %v25161_v16, 16  ;;  %v8792_v31 = vshll.u32 %v25165_v44, 16 }
 0x5e6   : > { %v8715_v55 = vsel %vm652_vm1, %v8710_v47, %v8714_v32  ;;  %v8790_v32 = vor.u32 %v8788_v51, %v8786_v56  ;;  %v8794_v43 = vrot.slane %v8792_v31, 1  ;;  %v22455_v51 = vld [vmem:[%s28553_s5 + $0x28] sm:$0xff]   ;;  %v22457_v31 = vld [vmem:[%s28553_s5 + $0x30] sm:$0xff]  }
 0x5e8   : > { %20287 = vmatmul.mubr.msk.bf16.gmra.mrb[24].mxu1 %vm5315_vm14, %v28843_v28  ;;  %v8771_v28 = vsel %vm652_vm1, %v8766_v39, %v8770_v11  ;;  %v8795_v20 = vsel %vm652_vm1, %v8790_v32, %v8794_v43 }
 0x5e9   : > { %20290 = vmatprep.mubr.msk.bf16.mxu1 %vm5315_vm14, %v28844_v45  ;;  %v8780_v45 = vshrl.u32 %v25151_v10, 16 }
 0x5f0   : > { %20291 = vmatmul.mubr.msk.bf16.gmra.mrb[28].mxu1 %vm5315_vm14, %v28845_v5  ;;  %v25175_v5 = vld [vmem:[%s25010_s28 + $0x60] sm:$0xff]  }
 0x5f1   : > { %20294 = vmatprep.mubr.msk.bf16.mxu1 %vm5315_vm14, %v24740_v26  ;;  %v25110_v26 = vld [vmem:[%s25010_s28 + $0x20] sm:$0xff]   ;;  %v8804_v9 = vshrl.u32 %v25175_v5, 16 }
 0x5f2   : > { %v8736_v24 = vshll.u32 %v25110_v26, 16  ;;  %v8740_v8 = vshrl.u32 %v25110_v26, 16 }
 0x5f4   : > { %v8738_v46 = vrot.slane %v8736_v24, 1  ;;  %v25189_v24 = vld [vmem:[%s25010_s28 + $0x70] sm:$0xff]  }
 0x5f5   : > { %v8816_v7 = vshll.u32 %v25189_v24, 16 }
 0x5f6   : > { %v8742_v61 = vor.u32 %v8740_v8, %v8738_v46  ;;  %v8739_v40 = vsel %vm652_vm1, %v8734_v17, %v8738_v46  ;;  %v25193_v8 = vld [vmem:[%s25010_s28 + $0x78] sm:$0xff]   ;;  %v8812_v46 = vshrl.u32 %v25179_v13, 16 }
 0x5f7   : > { %v8818_v14 = vrot.slane %v8816_v7, 1  ;;  %v8828_v52 = vshrl.u32 %v25193_v8, 16 }
 0x5f8   : > { %20295 = vmatmul.mubr.msk.bf16.gmra.mrb[32].mxu1 %vm5315_vm14, %v24746_v38  ;;  %v8731_v38 = vsel %vm652_vm1, %v8726_v59, %v8730_v2  ;;  %v8747_v60 = vsel %vm652_vm1, %v8742_v61, %v8746_v50  ;;  %v8808_v59 = vshll.u32 %v25179_v13, 16  ;;  %v8820_v61 = vshrl.u32 %v25189_v24, 16 }
 0x5f9   : > { %20302 = vmatprep.mubr.msk.bf16.mxu1 %vm5315_vm14, %v8715_v55  ;;  %v8800_v55 = vshll.u32 %v25175_v5, 16  ;;  %v8824_v50 = vshll.u32 %v25193_v8, 16 }
 0x5fb   : > { %v8802_v2 = vrot.slane %v8800_v55, 1  ;;  %v8826_v23 = vrot.slane %v8824_v50, 1 }
 0x5fd   : > { %v8806_v6 = vor.u32 %v8804_v9, %v8802_v2 }
 0x600   : > { %20303 = vmatmul.mubr.msk.bf16.vlgmr.msra.gmra.mrb[0].mxu1 %vm5315_vm14, %v8723_v34  ;;  %v8798_v34 = vor.u32 %v8796_v1, %v8794_v43  ;;  %v9332_v43 = vrot.slane %v25095_v49, 1  ;;  %v22458_v1 = vld [vmem:[%s28553_s5 + $0x38] sm:$0xff]  }
 0x601   : > { %20339 = vmatpush3.bf16.msra.mxu1 %v22436_v58  ;;  %20306 = vmatprep.mubr.msk.bf16.mxu1 %vm5315_vm14, %v8731_v38  ;;  %v8776_v58 = vshll.u32 %v25151_v10, 16  ;;  %v8810_v38 = vrot.slane %v8808_v59, 1 }
 0x602   : > { %20340 = vmatprep.subr.bf16.mxu1 %v22445_v15 }
 0x603   : > { %v8778_v4 = vrot.slane %v8776_v58, 1  ;;  %v8811_v17 = vsel %vm652_vm1, %v8806_v6, %v8810_v38  ;;  %v8814_v48 = vor.u32 %v8812_v46, %v8810_v38  ;;  %v9346_v6 = vrot.slane %v25151_v10, 1 }
 0x605   : > { %20341 = vmatpush3.bf16.msra.mxu1 %v22445_v15  ;;  %v8779_v42 = vsel %vm652_vm1, %v8774_v30, %v8778_v4  ;;  %v8782_v47 = vor.u32 %v8780_v45, %v8778_v4  ;;  %v8803_v15 = vsel %vm652_vm1, %v8798_v34, %v8802_v2  ;;  %v8819_v21 = vsel %vm652_vm1, %v8814_v48, %v8818_v14  ;;  %v9645_v48 = vld [vmem:[%s25010_s28 + $0x8] sm:$0xe] }
 0x606   : > { %20378 = vmatprep.subr.bf16.mxu1 %v25136_v27  ;;  %v8844_v30 = vshrl.u32 %v25207_v0, 16  ;;  %v8848_v4 = vshll.u32 %v25218_v12, 16  ;;  %v9344_v34 = vrot.slane %v25147_v63, 1 }
 0x607   : > { %v8787_v29 = vsel %vm652_vm1, %v8782_v47, %v8786_v56  ;;  %v9330_v47 = vrot.slane %v25087_v19, 1 }
 0x608   : > { %20307 = vmatmul.mubr.msk.bf16.gmra.mrb[4].mxu1 %vm5315_vm14, %v8739_v40  ;;  %v25203_v40 = vld [vmem:[%s25010_s28 + $0x80] sm:$0xff]   ;;  %v8850_v45 = vrot.slane %v8848_v4, 1  ;;  %v9347_v7 = vsel %vm1307_vm2, %v9344_v34, %v9346_v6 }
 0x609   : > { %20310 = vmatprep.mubr.msk.bf16.mxu1 %vm5315_vm14, %v8747_v60  ;;  %v8822_v60 = vor.u32 %v8820_v61, %v8818_v14  ;;  %v8832_v41 = vshll.u32 %v25203_v40, 16  ;;  %v8836_v57 = vshrl.u32 %v25203_v40, 16  ;;  %v9333_v55 = vsel %vm1307_vm2, %v9330_v47, %v9332_v43 }
 0x60a   : > { %v9358_v61 = vrot.slane %v25193_v8, 1 }
 0x60b   : > { %v8827_v22 = vsel %vm652_vm1, %v8822_v60, %v8826_v23  ;;  %v8834_v37 = vrot.slane %v8832_v41, 1  ;;  %v25331_v60 = vld [vmem:[%s25010_s28 + $0xc] sm:$0xf]  ;;  %v25339_v41 = vld [vmem:[%s25010_s28 + $0x10] sm:$0xff]  }
 0x60d   : > { %v8838_v58 = vor.u32 %v8836_v57, %v8834_v37 }
 0x610   : > { %20311 = vmatmul.mubr.msk.bf16.gmra.mrb[8].mxu1 %vm5315_vm14, %v8755_v18  ;;  %v8840_v18 = vshll.u32 %v25207_v0, 16 }
 0x611   : > { %20314 = vmatprep.mubr.msk.bf16.mxu1 %vm5315_vm14, %v8763_v36  ;;  %v8830_v36 = vor.u32 %v8828_v52, %v8826_v23  ;;  %v25336_v23 = vcombine.low %v9645_v48, %v25331_v60 }
 0x612   : > { %v8842_v11 = vrot.slane %v8840_v18, 1  ;;  %v25352_v18 = vld [vmem:[%s25010_s28 + $0x20] sm:$0xff]  }
 0x613   : > { %v8835_v39 = vsel %vm652_vm1, %v8830_v36, %v8834_v37  ;;  %v9785_v36 = vrot.slane %v25352_v18, 1 }
 0x614   : > { %v8843_v25 = vsel %vm652_vm1, %v8838_v58, %v8842_v11  ;;  %v25360_v58 = vld [vmem:[%s25010_s28 + $0x28] sm:$0xff]  }
 0x615   : > { %v9787_v4 = vrot.slane %v25360_v58, 1 }
 0x618   : > { %20315 = vmatmul.mubr.msk.bf16.gmra.mrb[12].mxu1 %vm5315_vm14, %v8771_v28  ;;  %v8846_v28 = vor.u32 %v8844_v30, %v8842_v11  ;;  %v22471_v30 = vld [vmem:[%s28553_s5 + $0x48] sm:$0xff]  }
 0x619   : > { %20318 = vmatprep.mubr.msk.bf16.mxu1 %vm5315_vm14, %v8779_v42 }
 0x61a   : > { %v8851_v42 = vsel %vm652_vm1, %v8846_v28, %v8850_v45  ;;  %v25377_v28 = vld [vmem:[%s28553_s5 + $0x50] sm:$0xff]   ;;  %v9788_v45 = vsel %vm1307_vm2, %v9785_v36, %v9787_v4 }
 0x620   : > { %20319 = vmatmul.mubr.msk.bf16.gmra.mrb[16].mxu1 %vm5315_vm14, %v8787_v29 }
 0x621   : > { %20322 = vmatprep.mubr.msk.bf16.mxu1 %vm5315_vm14, %v8795_v20  ;;  %v9338_v20 = vrot.slane %v25114_v54, 1 }
 0x628   : > { %20323 = vmatmul.mubr.msk.bf16.gmra.mrb[20].mxu1 %vm5315_vm14, %v8803_v15 }
 0x629   : > { %20326 = vmatprep.mubr.msk.bf16.mxu1 %vm5315_vm14, %v8811_v17 }
 0x630   : > { %20327 = vmatmul.mubr.msk.bf16.gmra.mrb[24].mxu1 %vm5315_vm14, %v8819_v21  ;;  %v9781_v21 = vrot.slane %v25339_v41, 1 }
 0x631   : > { %20330 = vmatprep.mubr.msk.bf16.mxu1 %vm5315_vm14, %v8827_v22  ;;  %v25348_v22 = vld [vmem:[%s25010_s28 + $0x18] sm:$0xff]  }
 0x632   : > { %v9783_v37 = vrot.slane %v25348_v22, 1 }
 0x634   : > { %v9786_v11 = vsel %vm1307_vm2, %v9783_v37, %v9785_v36 }
 0x638   : > { %20331 = vmatmul.mubr.msk.bf16.gmra.mrb[28].mxu1 %vm5315_vm14, %v8835_v39  ;;  %v25364_v39 = vld [vmem:[%s25010_s28 + $0x30] sm:$0xff]  }
 0x639   : > { %20334 = vmatprep.mubr.msk.bf16.mxu1 %vm5315_vm14, %v8843_v25  ;;  %v9789_v25 = vrot.slane %v25364_v39, 1 }
 0x640   : > { %20335 = vmatmul.mubr.msk.bf16.gmra.mrb[32].mxu1 %vm5315_vm14, %v8851_v42  ;;  %v25381_v42 = vld [vmem:[%s25010_s28 + $0x38] sm:$0xff]  }
 0x641   : > { %20342 = vmatprep.mubr.msk.bf16.mxu1 %vm5315_vm14, %v25080_v3  ;;  %v9320_v3 = vld [vmem:[%s25010_s28] sm:$0xe] }
 0x648   : > { %20343 = vmatmul.mubr.msk.bf16.vlgmr.msra.gmra.mrb[0].mxu1 %vm5315_vm14, %v25087_v19  ;;  %v9336_v19 = vrot.slane %v25110_v26, 1 }
 0x649   : > { %20379 = vmatpush3.bf16.msra.mxu1 %v25136_v27  ;;  %20346 = vmatprep.mubr.msk.bf16.mxu1 %vm5315_vm14, %v25095_v49  ;;  %v18143_v27 = vcombine.low %v9320_v3, %v25077_v35  ;;  %v9334_v35 = vrot.slane %v25100_v53, 1  ;;  %v25290_v49 = vld [vmem:[%s28553_s5 + $0x40] sm:$0xff]   ;;  %v9791_v3 = vrot.slane %v25381_v42, 1 }
 0x64a   : > { %20380 = vmatprep.subr.bf16.mxu1 %v22455_v51  ;;  %v9339_v9 = vsel %vm1307_vm2, %v9336_v19, %v9338_v20 }
 0x64b   : > { %v9329_v56 = vrot.slane %v18143_v27, 1  ;;  %v9335_v29 = vsel %vm1307_vm2, %v9332_v43, %v9334_v35  ;;  %v25398_v43 = vld [vmem:[%s25010_s28 + $0x50] sm:$0xff]  }
 0x64d   : > { %20381 = vmatpush3.bf16.msra.mxu1 %v22455_v51  ;;  %v9331_v32 = vsel %vm1307_vm2, %v9329_v56, %v9330_v47  ;;  %v9790_v51 = vsel %vm1307_vm2, %v9787_v4, %v9789_v25  ;;  %v9792_v56 = vsel %vm1307_vm2, %v9789_v25, %v9791_v3  ;;  %v25394_v47 = vld [vmem:[%s25010_s28 + $0x48] sm:$0xff]  }
 0x64e   : > { %20418 = vmatprep.subr.bf16.mxu1 %v22457_v31 }
 0x650   : > { %20347 = vmatmul.mubr.msk.bf16.gmra.mrb[4].mxu1 %vm5315_vm14, %v25100_v53  ;;  %v9337_v53 = vsel %vm1307_vm2, %v9334_v35, %v9336_v19  ;;  %v9795_v35 = vrot.slane %v25394_v47, 1 }
 0x651   : > { %20350 = vmatprep.mubr.msk.bf16.mxu1 %vm5315_vm14, %v25110_v26  ;;  %v9340_v26 = vrot.slane %v25127_v62, 1 }
 0x653   : > { %v9341_v59 = vsel %vm1307_vm2, %v9338_v20, %v9340_v26  ;;  %v25410_v20 = vld [vmem:[%s25010_s28 + $0x60] sm:$0xff]  }
 0x658   : > { %20351 = vmatmul.mubr.msk.bf16.gmra.mrb[8].mxu1 %vm5315_vm14, %v25114_v54  ;;  %v9342_v54 = vrot.slane %v25131_v33, 1 }
 0x659   : > { %20354 = vmatprep.mubr.msk.bf16.mxu1 %vm5315_vm14, %v25127_v62  ;;  %v9348_v62 = vrot.slane %v25161_v16, 1 }
 0x65a   : > { %v9343_v2 = vsel %vm1307_vm2, %v9340_v26, %v9342_v54  ;;  %v9345_v38 = vsel %vm1307_vm2, %v9342_v54, %v9344_v34  ;;  %v25418_v26 = vld [vmem:[%s25010_s28 + $0x68] sm:$0xff]  }
 0x65b   : > { %v9349_v15 = vsel %vm1307_vm2, %v9346_v6, %v9348_v62 }
 0x660   : > { %20355 = vmatmul.mubr.msk.bf16.gmra.mrb[12].mxu1 %vm5315_vm14, %v25131_v33  ;;  %v9350_v33 = vrot.slane %v25165_v44, 1 }
 0x661   : > { %20358 = vmatprep.mubr.msk.bf16.mxu1 %vm5315_vm14, %v25147_v63  ;;  %v9352_v63 = vrot.slane %v25175_v5, 1 }
 0x662   : > { %v9351_v46 = vsel %vm1307_vm2, %v9348_v62, %v9350_v33  ;;  %v25434_v62 = vld [vmem:[%s25010_s28 + $0x80] sm:$0xff]  }
 0x663   : > { %v9353_v17 = vsel %vm1307_vm2, %v9350_v33, %v9352_v63 }
 0x668   : > { %20359 = vmatmul.mubr.msk.bf16.gmra.mrb[16].mxu1 %vm5315_vm14, %v25151_v10  ;;  %v9354_v10 = vrot.slane %v25179_v13, 1 }
 0x669   : > { %20362 = vmatprep.mubr.msk.bf16.mxu1 %vm5315_vm14, %v25161_v16 }
 0x66a   : > { %v9355_v16 = vsel %vm1307_vm2, %v9352_v63, %v9354_v10  ;;  %v25442_v63 = vld [vmem:[%s25010_s28 + $0x88] sm:$0xff]  }
 0x670   : > { %20363 = vmatmul.mubr.msk.bf16.gmra.mrb[20].mxu1 %vm5315_vm14, %v25165_v44  ;;  %v9356_v44 = vrot.slane %v25189_v24, 1 }
 0x671   : > { %20366 = vmatprep.mubr.msk.bf16.mxu1 %vm5315_vm14, %v25175_v5  ;;  %v9360_v5 = vrot.slane %v25203_v40, 1 }
 0x672   : > { %v9357_v50 = vsel %vm1307_vm2, %v9354_v10, %v9356_v44  ;;  %v9359_v14 = vsel %vm1307_vm2, %v9356_v44, %v9358_v61  ;;  %v25445_v10 = vld [vmem:[%s25010_s28 + $0x90] sm:$0xff]  }
 0x673   : > { %v9813_v44 = vrot.slane %v25445_v10, 1 }
 0x678   : > { %20367 = vmatmul.mubr.msk.bf16.gmra.mrb[24].mxu1 %vm5315_vm14, %v25179_v13  ;;  %v9362_v13 = vrot.slane %v25207_v0, 1 }
 0x679   : > { %20370 = vmatprep.mubr.msk.bf16.mxu1 %vm5315_vm14, %v25189_v24  ;;  %v9361_v24 = vsel %vm1307_vm2, %v9358_v61, %v9360_v5  ;;  %v10106_v61 = vshrl.u32 %v25336_v23, 16 }
 0x680   : > { %20371 = vmatmul.mubr.msk.bf16.gmra.mrb[28].mxu1 %vm5315_vm14, %v25193_v8  ;;  %v9363_v8 = vsel %vm1307_vm2, %v9360_v5, %v9362_v13  ;;  %v10117_v5 = vshll.u32 %v25339_v41, 16 }
 0x681   : > { %20374 = vmatprep.mubr.msk.bf16.mxu1 %vm5315_vm14, %v25203_v40  ;;  %v9364_v40 = vrot.slane %v25218_v12, 1  ;;  %v9784_v12 = vsel %vm1307_vm2, %v9781_v21, %v9783_v37 }
 0x683   : > { %v9365_v52 = vsel %vm1307_vm2, %v9362_v13, %v9364_v40 }
 0x688   : > { %20375 = vmatmul.mubr.msk.bf16.gmra.mrb[32].mxu1 %vm5315_vm14, %v25207_v0  ;;  %v9780_v0 = vrot.slane %v25336_v23, 1 }
 0x689   : > { %20382 = vmatprep.mubr.msk.bf16.mxu1 %vm5315_vm14, %v9331_v32 }
 0x68a   : > { %v9782_v57 = vsel %vm1307_vm2, %v9780_v0, %v9781_v21  ;;  %v10119_v21 = vrot.slane %v10117_v5, 2 }
 0x690   : > { %20383 = vmatmul.mubr.msk.bf16.vlgmr.msra.gmra.mrb[0].mxu1 %vm5315_vm14, %v9333_v55  ;;  %v9797_v55 = vrot.slane %v25398_v43, 1 }
 0x691   : > { %20419 = vmatpush3.bf16.msra.mxu1 %v22457_v31  ;;  %20386 = vmatprep.mubr.msk.bf16.mxu1 %vm5315_vm14, %v9335_v29  ;;  %v25385_v31 = vld [vmem:[%s25010_s28 + $0x40] sm:$0xff]  }
 0x692   : > { %20420 = vmatprep.subr.bf16.mxu1 %v22458_v1  ;;  %v9793_v27 = vrot.slane %v25385_v31, 1  ;;  %v9798_v19 = vsel %vm1307_vm2, %v9795_v35, %v9797_v55 }
 0x694   : > { %v9794_v32 = vsel %vm1307_vm2, %v9791_v3, %v9793_v27  ;;  %v9796_v29 = vsel %vm1307_vm2, %v9793_v27, %v9795_v35 }
 0x695   : > { %20421 = vmatpush3.bf16.msra.mxu1 %v22458_v1  ;;  %v25406_v1 = vld [vmem:[%s25010_s28 + $0x58] sm:$0xff]  }
 0x696   : > { %20458 = vmatprep.subr.bf16.mxu1 %v25290_v49 }
 0x698   : > { %20387 = vmatmul.mubr.msk.bf16.gmra.mrb[4].mxu1 %vm5315_vm14, %v9337_v53  ;;  %v9801_v53 = vrot.slane %v25410_v20, 1 }
 0x699   : > { %20390 = vmatprep.mubr.msk.bf16.mxu1 %vm5315_vm14, %v9339_v9 }
 0x6a0   : > { %20391 = vmatmul.mubr.msk.bf16.gmra.mrb[8].mxu1 %vm5315_vm14, %v9341_v59  ;;  %v25422_v59 = vld [vmem:[%s25010_s28 + $0x70] sm:$0xff]  }
 0x6a1   : > { %20394 = vmatprep.mubr.msk.bf16.mxu1 %vm5315_vm14, %v9343_v2  ;;  %v9803_v2 = vrot.slane %v25418_v26, 1  ;;  %v9805_v34 = vrot.slane %v25422_v59, 1 }
 0x6a3   : > { %v9804_v6 = vsel %vm1307_vm2, %v9801_v53, %v9803_v2 }
 0x6a8   : > { %20395 = vmatmul.mubr.msk.bf16.gmra.mrb[12].mxu1 %vm5315_vm14, %v9345_v38  ;;  %v25430_v38 = vld [vmem:[%s25010_s28 + $0x78] sm:$0xff]  }
 0x6a9   : > { %20398 = vmatprep.mubr.msk.bf16.mxu1 %vm5315_vm14, %v9347_v7  ;;  %v9806_v7 = vsel %vm1307_vm2, %v9803_v2, %v9805_v34  ;;  %v9807_v33 = vrot.slane %v25430_v38, 1 }
 0x6b0   : > { %20399 = vmatmul.mubr.msk.bf16.gmra.mrb[16].mxu1 %vm5315_vm14, %v9349_v15  ;;  %v9809_v15 = vrot.slane %v25434_v62, 1 }
 0x6b1   : > { %20402 = vmatprep.mubr.msk.bf16.mxu1 %vm5315_vm14, %v9351_v46  ;;  %v9808_v46 = vsel %vm1307_vm2, %v9805_v34, %v9807_v33  ;;  %v22481_v34 = vld [vmem:[%s28553_s5 + $0x58] sm:$0xff]  }
 0x6b8   : > { %20403 = vmatmul.mubr.msk.bf16.gmra.mrb[20].mxu1 %vm5315_vm14, %v9353_v17  ;;  %v9810_v17 = vsel %vm1307_vm2, %v9807_v33, %v9809_v15  ;;  %v10162_v33 = vshll.u32 %v25381_v42, 16 }
 0x6b9   : > { %20406 = vmatprep.mubr.msk.bf16.mxu1 %vm5315_vm14, %v9355_v16  ;;  %v9811_v16 = vrot.slane %v25442_v63, 1 }
 0x6bb   : > { %v9812_v13 = vsel %vm1307_vm2, %v9809_v15, %v9811_v16  ;;  %v9814_v48 = vsel %vm1307_vm2, %v9811_v16, %v9813_v44  ;;  %v25488_v16 = vld [vmem:[%s28553_s5 + $0x60] sm:$0xff]  }
 0x6c0   : > { %20407 = vmatmul.mubr.msk.bf16.gmra.mrb[24].mxu1 %vm5315_vm14, %v9357_v50  ;;  %v10109_v50 = vshll.u32 %v25336_v23, 16  ;;  %v10123_v23 = vshrl.u32 %v25348_v22, 16 }
 0x6c1   : > { %20410 = vmatprep.mubr.msk.bf16.mxu1 %vm5315_vm14, %v9359_v14  ;;  %v10114_v14 = vshrl.u32 %v25339_v41, 16 }
 0x6c2   : > { %v10111_v40 = vrot.slane %v10109_v50, 2  ;;  %v10125_v4 = vrot.slane %v10123_v23, 1 }
 0x6c3   : > { %v10116_v0 = vrot.slane %v10114_v14, 1 }
 0x6c5   : > { %v10120_v36 = vor.u32 %v10119_v21, %v10116_v0  ;;  %v10189_v0 = vshll.u32 %v25398_v43, 16 }
 0x6c8   : > { %20411 = vmatmul.mubr.msk.bf16.gmra.mrb[28].mxu1 %vm5315_vm14, %v9361_v24  ;;  %v22479_v24 = vld [vmem:[%s25010_s28 + $0x98] ss:$0 sps:$4 sm:$0x11]  }
 0x6c9   : > { %20414 = vmatprep.mubr.msk.bf16.mxu1 %vm5315_vm14, %v9363_v8  ;;  %v10108_v8 = vrot.slane %v10106_v61, 1  ;;  %v10164_v61 = vrot.slane %v10162_v33, 2 }
 0x6cb   : > { %v10112_v37 = vor.u32 %v10111_v40, %v10108_v8  ;;  %v10186_v40 = vshrl.u32 %v25398_v43, 16 }
 0x6d0   : > { %20415 = vmatmul.mubr.msk.bf16.gmra.mrb[32].mxu1 %vm5315_vm14, %v9365_v52  ;;  %v9815_v52 = vrot.slane %v22479_v24, 1  ;;  %v10180_v24 = vshll.u32 %v25394_v47, 16 }
 0x6d1   : > { %20422 = vmatprep.mubr.msk.bf16.mxu1 %vm5315_vm14, %v9782_v57  ;;  %v10126_v57 = vshll.u32 %v25348_v22, 16 }
 0x6d2   : > { %v10182_v23 = vrot.slane %v10180_v24, 2 }
 0x6d3   : > { %v10128_v25 = vrot.slane %v10126_v57, 2 }
 0x6d5   : > { %v10129_v27 = vor.u32 %v10128_v25, %v10125_v4  ;;  %v10204_v25 = vshrl.u32 %v25410_v20, 16 }
 0x6d8   : > { %20423 = vmatmul.mubr.msk.bf16.vlgmr.msra.gmra.mrb[0].mxu1 %vm5315_vm14, %v9784_v12  ;;  %v10132_v12 = vshrl.u32 %v25352_v18, 16 }
 0x6d9   : > { %20459 = vmatpush3.bf16.msra.mxu1 %v25290_v49  ;;  %20426 = vmatprep.mubr.msk.bf16.mxu1 %vm5315_vm14, %v9786_v11  ;;  %v9799_v49 = vrot.slane %v25406_v1, 1  ;;  %v10135_v11 = vshll.u32 %v25352_v18, 16 }
 0x6da   : > { %20460 = vmatprep.subr.bf16.mxu1 %v22471_v30 }
 0x6db   : > { %v9800_v9 = vsel %vm1307_vm2, %v9797_v55, %v9799_v49  ;;  %v9802_v54 = vsel %vm1307_vm2, %v9799_v49, %v9801_v53  ;;  %v10137_v3 = vrot.slane %v10135_v11, 2  ;;  %v10150_v55 = vshrl.u32 %v25364_v39, 16 }
 0x6dc   : > { %v10195_v11 = vshrl.u32 %v25406_v1, 16 }
 0x6dd   : > { %20461 = vmatpush3.bf16.msra.mxu1 %v22471_v30  ;;  %v9816_v30 = vsel %vm1307_vm2, %v9813_v44, %v9815_v52 }
 0x6de   : > { %20498 = vmatprep.subr.bf16.mxu1 %v25377_v28 }
 0x6e0   : > { %20427 = vmatmul.mubr.msk.bf16.gmra.mrb[4].mxu1 %vm5315_vm14, %v9788_v45  ;;  %v10121_v45 = vsel %vm2116_vm3, %v10112_v37, %v10120_v36  ;;  %v10188_v37 = vrot.slane %v10186_v40, 1  ;;  %v10249_v40 = vshrl.u32 %v25442_v63, 16 }
 0x6e1   : > { %20430 = vmatprep.mubr.msk.bf16.mxu1 %vm5315_vm14, %v9790_v51  ;;  %v10134_v51 = vrot.slane %v10132_v12, 1 }
 0x6e3   : > { %v10138_v35 = vor.u32 %v10137_v3, %v10134_v51  ;;  %v10197_v3 = vrot.slane %v10195_v11, 1 }
 0x6e8   : > { %20431 = vmatmul.mubr.msk.bf16.gmra.mrb[8].mxu1 %vm5315_vm14, %v9792_v56  ;;  %v10141_v56 = vshrl.u32 %v25360_v58, 16 }
 0x6e9   : > { %20434 = vmatprep.mubr.msk.bf16.mxu1 %vm5315_vm14, %v9794_v32  ;;  %v10144_v32 = vshll.u32 %v25360_v58, 16 }
 0x6ea   : > { %v10143_v49 = vrot.slane %v10141_v56, 1 }
 0x6eb   : > { %v10146_v53 = vrot.slane %v10144_v32, 2  ;;  %v10206_v32 = vrot.slane %v10204_v25, 1 }
 0x6f0   : > { %20435 = vmatmul.mubr.msk.bf16.gmra.mrb[12].mxu1 %vm5315_vm14, %v9796_v29  ;;  %v10153_v29 = vshll.u32 %v25364_v39, 16 }
 0x6f1   : > { %20438 = vmatprep.mubr.msk.bf16.mxu1 %vm5315_vm14, %v9798_v19  ;;  %v10130_v19 = vsel %vm2116_vm3, %v10120_v36, %v10129_v27  ;;  %v10191_v36 = vrot.slane %v10189_v0, 2  ;;  %v10252_v0 = vshll.u32 %v25442_v63, 16 }
 0x6f2   : > { %v10155_v2 = vrot.slane %v10153_v29, 2  ;;  %v10213_v29 = vshrl.u32 %v25418_v26, 16 }
 0x6f3   : > { %v10192_v4 = vor.u32 %v10191_v36, %v10188_v37  ;;  %v10251_v37 = vrot.slane %v10249_v40, 1  ;;  %v10254_v36 = vrot.slane %v10252_v0, 2  ;;  %v25607_v40 = vld [vmem:[%s25010_s28 + $0x14] sm:$0xf] }
 0x6f5   : > { %v10255_v25 = vor.u32 %v10254_v36, %v10251_v37  ;;  %v25628_v36 = vld [vmem:[%s25010_s28 + $0x28] sm:$0xff]  }
 0x6f8   : > { %20439 = vmatmul.mubr.msk.bf16.gmra.mrb[16].mxu1 %vm5315_vm14, %v9800_v9  ;;  %v10139_v9 = vsel %vm2116_vm3, %v10129_v27, %v10138_v35 }
 0x6f9   : > { %20442 = vmatprep.mubr.msk.bf16.mxu1 %vm5315_vm14, %v9802_v54  ;;  %v10152_v54 = vrot.slane %v10150_v55, 1 }
 0x6fb   : > { %v10156_v15 = vor.u32 %v10155_v2, %v10152_v54  ;;  %v10215_v2 = vrot.slane %v10213_v29, 1 }
 0x700   : > { %20443 = vmatmul.mubr.msk.bf16.gmra.mrb[20].mxu1 %vm5315_vm14, %v9804_v6  ;;  %v10147_v6 = vor.u32 %v10146_v53, %v10143_v49  ;;  %v10222_v53 = vshrl.u32 %v25422_v59, 16 }
 0x701   : > { %20446 = vmatprep.mubr.msk.bf16.mxu1 %vm5315_vm14, %v9806_v7  ;;  %v10159_v7 = vshrl.u32 %v25381_v42, 16 }
 0x702   : > { %v10157_v50 = vsel %vm2116_vm3, %v10147_v6, %v10156_v15 }
 0x703   : > { %v10161_v44 = vrot.slane %v10159_v7, 1  ;;  %v10224_v7 = vrot.slane %v10222_v53, 1  ;;  %v10564_v53 = vrot.slane %v25339_v41, 2  ;;  %v22485_v41 = vld [vmem:[%s28553_s5 + $0x68] sm:$0xff]  }
 0x708   : > { %20447 = vmatmul.mubr.msk.bf16.gmra.mrb[24].mxu1 %vm5315_vm14, %v9808_v46  ;;  %v10168_v46 = vshrl.u32 %v25385_v31, 16 }
 0x709   : > { %20450 = vmatprep.mubr.msk.bf16.mxu1 %vm5315_vm14, %v9810_v17  ;;  %v10171_v17 = vshll.u32 %v25385_v31, 16 }
 0x70a   : > { %v10170_v14 = vrot.slane %v10168_v46, 1  ;;  %v10231_v46 = vshrl.u32 %v25430_v38, 16 }
 0x70b   : > { %v10173_v5 = vrot.slane %v10171_v17, 2  ;;  %v10234_v17 = vshll.u32 %v25430_v38, 16 }
 0x70d   : > { %v10174_v8 = vor.u32 %v10173_v5, %v10170_v14  ;;  %v10233_v14 = vrot.slane %v10231_v46, 1  ;;  %v10236_v5 = vrot.slane %v10234_v17, 2  ;;  %v10578_v17 = vrot.slane %v25394_v47, 2 }
 0x710   : > { %20451 = vmatmul.mubr.msk.bf16.gmra.mrb[28].mxu1 %vm5315_vm14, %v9812_v13  ;;  %v10165_v13 = vor.u32 %v10164_v61, %v10161_v44  ;;  %v10240_v44 = vshrl.u32 %v25434_v62, 16  ;;  %v10243_v61 = vshll.u32 %v25434_v62, 16 }
 0x711   : > { %20454 = vmatprep.mubr.msk.bf16.mxu1 %vm5315_vm14, %v9814_v48  ;;  %v10177_v48 = vshrl.u32 %v25394_v47, 16  ;;  %v10586_v47 = vrot.slane %v25418_v26, 2 }
 0x712   : > { %v10166_v21 = vsel %vm2116_vm3, %v10156_v15, %v10165_v13  ;;  %v10175_v57 = vsel %vm2116_vm3, %v10165_v13, %v10174_v8  ;;  %v10245_v24 = vrot.slane %v10243_v61, 2 }
 0x713   : > { %v10179_v52 = vrot.slane %v10177_v48, 1  ;;  %v10242_v48 = vrot.slane %v10240_v44, 1 }
 0x715   : > { %v10183_v12 = vor.u32 %v10182_v23, %v10179_v52  ;;  %v10258_v52 = vshrl.u32 %v25445_v10, 16  ;;  %v10261_v23 = vshll.u32 %v25445_v10, 16 }
 0x717   : > { %v10184_v51 = vsel %vm2116_vm3, %v10174_v8, %v10183_v12  ;;  %v10193_v56 = vsel %vm2116_vm3, %v10183_v12, %v10192_v4  ;;  %v10237_v8 = vor.u32 %v10236_v5, %v10233_v14  ;;  %v25533_v12 = vld [vmem:[%s25010_s28 + $0x98] ss:$0 sps:$4 sm:$0x33]  }
 0x718   : > { %20455 = vmatmul.mubr.msk.bf16.gmra.mrb[32].mxu1 %vm5315_vm14, %v9816_v30  ;;  %v10198_v30 = vshll.u32 %v25406_v1, 16 }
 0x719   : > { %20462 = vmatprep.mubr.msk.bf16.mxu1 %vm5315_vm14, %v10121_v45  ;;  %v10207_v45 = vshll.u32 %v25410_v20, 16 }
 0x71a   : > { %v10200_v27 = vrot.slane %v10198_v30, 2  ;;  %v10260_v30 = vrot.slane %v10258_v52, 1 }
 0x71c   : > { %v10201_v55 = vor.u32 %v10200_v27, %v10197_v3  ;;  %v10554_v27 = vld [vmem:[%s25010_s28 + $0x8] sm:$0xc] }
 0x71d   : > { %v18236_v29 = vcombine.low %v10554_v27, %v25331_v60  ;;  %v10568_v60 = vrot.slane %v25352_v18, 2  ;;  %v25566_v18 = vld [vmem:[%s28553_s5 + $0x70] sm:$0xff]  }
 0x71e   : > { %v10202_v54 = vsel %vm2116_vm3, %v10192_v4, %v10201_v55  ;;  %v10263_v4 = vrot.slane %v10261_v23, 2 }
 0x720   : > { %20463 = vmatmul.mubr.msk.bf16.vlgmr.msra.gmra.mrb[0].mxu1 %vm5315_vm14, %v10130_v19  ;;  %v10216_v19 = vshll.u32 %v25418_v26, 16  ;;  %v10264_v3 = vor.u32 %v10263_v4, %v10260_v30  ;;  %v10594_v26 = vrot.slane %v25442_v63, 2  ;;  %v10598_v63 = vrot.slane %v25533_v12, 2  ;;  %v25636_v4 = vld [vmem:[%s25010_s28 + $0x30] sm:$0xff]  }
 0x721   : > { %20499 = vmatpush3.bf16.msra.mxu1 %v25377_v28  ;;  %20466 = vmatprep.mubr.msk.bf16.mxu1 %vm5315_vm14, %v10139_v9  ;;  %v10148_v28 = vsel %vm2116_vm3, %v10138_v35, %v10147_v6  ;;  %v10209_v35 = vrot.slane %v10207_v45, 2  ;;  %v10225_v9 = vshll.u32 %v25422_v59, 16  ;;  %v10267_v45 = vshrl.u32 %v25533_v12, 16 }
 0x722   : > { %20500 = vmatprep.subr.bf16.mxu1 %v22481_v34 }
 0x723   : > { %v10210_v49 = vor.u32 %v10209_v35, %v10206_v32  ;;  %v10227_v33 = vrot.slane %v10225_v9, 2  ;;  %v10269_v32 = vrot.slane %v10267_v45, 1  ;;  %v25640_v45 = vld [vmem:[%s25010_s28 + $0x38] sm:$0xff]  }
 0x724   : > { %v11023_v27 = vrot.slane %v25640_v45, 2 }
 0x725   : > { %20501 = vmatpush3.bf16.msra.mxu1 %v22481_v34  ;;  %v10218_v34 = vrot.slane %v10216_v19, 2  ;;  %v10211_v6 = vsel %vm2116_vm3, %v10201_v55, %v10210_v49  ;;  %v10265_v55 = vsel %vm2116_vm3, %v10255_v25, %v10264_v3 }
 0x726   : > { %20538 = vmatprep.subr.bf16.mxu1 %v25488_v16 }
 0x727   : > { %v10219_v15 = vor.u32 %v10218_v34, %v10215_v2  ;;  %v10566_v2 = vrot.slane %v25348_v22, 2  ;;  %v10572_v22 = vrot.slane %v25364_v39, 2  ;;  %v10576_v39 = vrot.slane %v25385_v31, 2 }
 0x728   : > { %20467 = vmatmul.mubr.msk.bf16.gmra.mrb[4].mxu1 %vm5315_vm14, %v10148_v28  ;;  %v10228_v28 = vor.u32 %v10227_v33, %v10224_v7  ;;  %v10570_v7 = vrot.slane %v25360_v58, 2  ;;  %v10574_v58 = vrot.slane %v25381_v42, 2  ;;  %v10582_v42 = vrot.slane %v25406_v1, 2 }
 0x729   : > { %20470 = vmatprep.mubr.msk.bf16.mxu1 %vm5315_vm14, %v10157_v50  ;;  %v10220_v50 = vsel %vm2116_vm3, %v10210_v49, %v10219_v15  ;;  %v10563_v49 = vrot.slane %v18236_v29, 2  ;;  %v10567_v34 = vsel %vm2591_vm4, %v10564_v53, %v10566_v2  ;;  %v10579_v44 = vsel %vm2591_vm4, %v10576_v39, %v10578_v17  ;;  %v25661_v29 = vld [vmem:[%s25010_s28 + $0x48] sm:$0xff]  }
 0x72a   : > { %v10229_v13 = vsel %vm2116_vm3, %v10219_v15, %v10228_v28  ;;  %v10571_v33 = vsel %vm2591_vm4, %v10568_v60, %v10570_v7  ;;  %v10573_v15 = vsel %vm2591_vm4, %v10570_v7, %v10572_v22  ;;  %v10577_v46 = vsel %vm2591_vm4, %v10574_v58, %v10576_v39 }
 0x72b   : > { %v10584_v31 = vrot.slane %v25410_v20, 2  ;;  %v10590_v20 = vrot.slane %v25430_v38, 2 }
 0x72d   : > { %v10585_v14 = vsel %vm2591_vm4, %v10582_v42, %v10584_v31  ;;  %v10587_v5 = vsel %vm2591_vm4, %v10584_v31, %v10586_v47 }
 0x730   : > { %20471 = vmatmul.mubr.msk.bf16.gmra.mrb[8].mxu1 %vm5315_vm14, %v10166_v21  ;;  %v10246_v21 = vor.u32 %v10245_v24, %v10242_v48 }
 0x731   : > { %20474 = vmatprep.mubr.msk.bf16.mxu1 %vm5315_vm14, %v10175_v57  ;;  %v10238_v57 = vsel %vm2116_vm3, %v10228_v28, %v10237_v8  ;;  %v10580_v28 = vrot.slane %v25398_v43, 2  ;;  %v10588_v43 = vrot.slane %v25422_v59, 2  ;;  %v10596_v59 = vrot.slane %v25445_v10, 2 }
 0x732   : > { %v10247_v11 = vsel %vm2116_vm3, %v10237_v8, %v10246_v21  ;;  %v10879_v8 = vld [vmem:[%s25010_s28 + $0x10] sm:$0xc] }
 0x733   : > { %v10581_v61 = vsel %vm2591_vm4, %v10578_v17, %v10580_v28  ;;  %v10589_v1 = vsel %vm2591_vm4, %v10586_v47, %v10588_v43  ;;  %v10591_v48 = vsel %vm2591_vm4, %v10588_v43, %v10590_v20  ;;  %v25612_v0 = vcombine.low %v10879_v8, %v25607_v40  ;;  %v25718_v47 = vld [vmem:[%s25010_s28 + $0x90] sm:$0xff]   ;;  %v25721_v43 = vld [vmem:[%s25010_s28 + $0x98] sm:$0xff]  }
 0x734   : > { %v10599_v23 = vsel %vm2591_vm4, %v10596_v59, %v10598_v63 }
 0x735   : > { %v11014_v10 = vrot.slane %v25612_v0, 2 }
 0x738   : > { %20475 = vmatmul.mubr.msk.bf16.gmra.mrb[12].mxu1 %vm5315_vm14, %v10184_v51  ;;  %v10270_v51 = vshll.u32 %v25533_v12, 16  ;;  %v11019_v12 = vrot.slane %v25628_v36, 2 }
 0x739   : > { %20478 = vmatprep.mubr.msk.bf16.mxu1 %vm5315_vm14, %v10193_v56  ;;  %v10256_v56 = vsel %vm2116_vm3, %v10246_v21, %v10255_v25  ;;  %v25615_v21 = vld [vmem:[%s25010_s28 + $0x18] sm:$0xff]  }
 0x73a   : > { %v10272_v35 = vrot.slane %v10270_v51, 2  ;;  %v11015_v52 = vrot.slane %v25615_v21, 2  ;;  %v22498_v51 = vld [vmem:[%s28553_s5 + $0x78] sm:$0xff]  }
 0x73c   : > { %v10273_v19 = vor.u32 %v10272_v35, %v10269_v32  ;;  %v11016_v37 = vsel %vm2591_vm4, %v11014_v10, %v11015_v52  ;;  %v25657_v35 = vld [vmem:[%s25010_s28 + $0x40] sm:$0xff]  }
 0x73e   : > { %v10274_v9 = vsel %vm2116_vm3, %v10264_v3, %v10273_v19  ;;  %v11021_v3 = vrot.slane %v25636_v4, 2  ;;  %v11025_v19 = vrot.slane %v25657_v35, 2 }
 0x740   : > { %20479 = vmatmul.mubr.msk.bf16.gmra.mrb[16].mxu1 %vm5315_vm14, %v10202_v54  ;;  %v10565_v54 = vsel %vm2591_vm4, %v10563_v49, %v10564_v53  ;;  %v11022_v32 = vsel %vm2591_vm4, %v11019_v12, %v11021_v3  ;;  %v11027_v49 = vrot.slane %v25661_v29, 2  ;;  %v11026_v53 = vsel %vm2591_vm4, %v11023_v27, %v11025_v19 }
 0x741   : > { %20482 = vmatprep.mubr.msk.bf16.mxu1 %vm5315_vm14, %v10211_v6  ;;  %v10569_v6 = vsel %vm2591_vm4, %v10566_v2, %v10568_v60  ;;  %v25674_v2 = vld [vmem:[%s25010_s28 + $0x58] sm:$0xff]  }
 0x748   : > { %20483 = vmatmul.mubr.msk.bf16.gmra.mrb[20].mxu1 %vm5315_vm14, %v10220_v50  ;;  %v10583_v50 = vsel %vm2591_vm4, %v10580_v28, %v10582_v42  ;;  %v25710_v42 = vld [vmem:[%s25010_s28 + $0x88] sm:$0xff]  }
 0x749   : > { %20486 = vmatprep.mubr.msk.bf16.mxu1 %vm5315_vm14, %v10229_v13  ;;  %v10592_v13 = vrot.slane %v25434_v62, 2  ;;  %v10597_v62 = vsel %vm2591_vm4, %v10594_v26, %v10596_v59 }
 0x74b   : > { %v10593_v24 = vsel %vm2591_vm4, %v10590_v20, %v10592_v13  ;;  %v10595_v38 = vsel %vm2591_vm4, %v10592_v13, %v10594_v26  ;;  %v11047_v20 = vrot.slane %v25721_v43, 2  ;;  %v11340_v13 = vshrl.u32 %v25612_v0, 16 }
 0x74c   : > { %v11351_v26 = vshll.u32 %v25615_v21, 16 }
 0x750   : > { %20487 = vmatmul.mubr.msk.bf16.gmra.mrb[24].mxu1 %vm5315_vm14, %v10238_v57  ;;  %v25624_v57 = vld [vmem:[%s25010_s28 + $0x20] sm:$0xff]  }
 0x751   : > { %20490 = vmatprep.mubr.msk.bf16.mxu1 %vm5315_vm14, %v10247_v11  ;;  %v11017_v11 = vrot.slane %v25624_v57, 2 }
 0x753   : > { %v11018_v30 = vsel %vm2591_vm4, %v11015_v52, %v11017_v11  ;;  %v11020_v25 = vsel %vm2591_vm4, %v11017_v11, %v11019_v12  ;;  %v11353_v52 = vrot.slane %v11351_v26, 3 }
 0x758   : > { %20491 = vmatmul.mubr.msk.bf16.gmra.mrb[28].mxu1 %vm5315_vm14, %v10256_v56  ;;  %v25653_v56 = vld [vmem:[%s28553_s5 + $0x80] sm:$0xff]  }
 0x759   : > { %20494 = vmatprep.mubr.msk.bf16.mxu1 %vm5315_vm14, %v10265_v55  ;;  %v11024_v55 = vsel %vm2591_vm4, %v11021_v3, %v11023_v27 }
 0x760   : > { %20495 = vmatmul.mubr.msk.bf16.gmra.mrb[32].mxu1 %vm5315_vm14, %v10274_v9  ;;  %v25670_v9 = vld [vmem:[%s25010_s28 + $0x50] sm:$0xff]  }
 0x761   : > { %20502 = vmatprep.mubr.msk.bf16.mxu1 %vm5315_vm14, %v10565_v54  ;;  %v11028_v54 = vsel %vm2591_vm4, %v11025_v19, %v11027_v49  ;;  %v11029_v60 = vrot.slane %v25670_v9, 2 }
 0x768   : > { %20503 = vmatmul.mubr.msk.bf16.vlgmr.msra.gmra.mrb[0].mxu1 %vm5315_vm14, %v10567_v34  ;;  %v11031_v34 = vrot.slane %v25674_v2, 2 }
 0x769   : > { %20539 = vmatpush3.bf16.msra.mxu1 %v25488_v16  ;;  %20506 = vmatprep.mubr.msk.bf16.mxu1 %vm5315_vm14, %v10569_v6  ;;  %v10575_v16 = vsel %vm2591_vm4, %v10572_v22, %v10574_v58  ;;  %v11030_v6 = vsel %vm2591_vm4, %v11027_v49, %v11029_v60  ;;  %v25686_v22 = vld [vmem:[%s25010_s28 + $0x68] sm:$0xff]   ;;  %v25694_v58 = vld [vmem:[%s25010_s28 + $0x70] sm:$0xff]  }
 0x76a   : > { %20540 = vmatprep.subr.bf16.mxu1 %v22485_v41  ;;  %v11032_v7 = vsel %vm2591_vm4, %v11029_v60, %v11031_v34 }
 0x76d   : > { %20541 = vmatpush3.bf16.msra.mxu1 %v22485_v41  ;;  %v25682_v41 = vld [vmem:[%s25010_s28 + $0x60] sm:$0xff]  }
 0x76e   : > { %20578 = vmatprep.subr.bf16.mxu1 %v25566_v18 }
 0x770   : > { %20507 = vmatmul.mubr.msk.bf16.gmra.mrb[4].mxu1 %vm5315_vm14, %v10571_v33  ;;  %v11035_v33 = vrot.slane %v25686_v22, 2 }
 0x771   : > { %20510 = vmatprep.mubr.msk.bf16.mxu1 %vm5315_vm14, %v10573_v15 }
 0x778   : > { %20511 = vmatmul.mubr.msk.bf16.gmra.mrb[8].mxu1 %vm5315_vm14, %v10575_v16  ;;  %v25698_v16 = vld [vmem:[%s25010_s28 + $0x78] sm:$0xff]  }
 0x779   : > { %20514 = vmatprep.mubr.msk.bf16.mxu1 %vm5315_vm14, %v10577_v46  ;;  %v11037_v46 = vrot.slane %v25694_v58, 2  ;;  %v11039_v17 = vrot.slane %v25698_v16, 2 }
 0x77b   : > { %v11038_v28 = vsel %vm2591_vm4, %v11035_v33, %v11037_v46 }
 0x780   : > { %20515 = vmatmul.mubr.msk.bf16.gmra.mrb[12].mxu1 %vm5315_vm14, %v10579_v44  ;;  %v25706_v44 = vld [vmem:[%s25010_s28 + $0x80] sm:$0xff]  }
 0x781   : > { %20518 = vmatprep.mubr.msk.bf16.mxu1 %vm5315_vm14, %v10581_v61  ;;  %v11040_v61 = vsel %vm2591_vm4, %v11037_v46, %v11039_v17  ;;  %v11041_v31 = vrot.slane %v25706_v44, 2 }
 0x788   : > { %20519 = vmatmul.mubr.msk.bf16.gmra.mrb[16].mxu1 %vm5315_vm14, %v10583_v50  ;;  %v11043_v50 = vrot.slane %v25710_v42, 2 }
 0x789   : > { %20522 = vmatprep.mubr.msk.bf16.mxu1 %vm5315_vm14, %v10585_v14  ;;  %v11042_v14 = vsel %vm2591_vm4, %v11039_v17, %v11041_v31  ;;  %v22508_v17 = vld [vmem:[%s28553_s5 + $0x88] sm:$0xff]  }
 0x790   : > { %20523 = vmatmul.mubr.msk.bf16.gmra.mrb[20].mxu1 %vm5315_vm14, %v10587_v5  ;;  %v11044_v5 = vsel %vm2591_vm4, %v11041_v31, %v11043_v50  ;;  %v11396_v31 = vshll.u32 %v25657_v35, 16 }
 0x791   : > { %20526 = vmatprep.mubr.msk.bf16.mxu1 %vm5315_vm14, %v10589_v1  ;;  %v11045_v1 = vrot.slane %v25718_v47, 2 }
 0x793   : > { %v11046_v59 = vsel %vm2591_vm4, %v11043_v50, %v11045_v1  ;;  %v11048_v8 = vsel %vm2591_vm4, %v11045_v1, %v11047_v20 }
 0x798   : > { %20527 = vmatmul.mubr.msk.bf16.gmra.mrb[24].mxu1 %vm5315_vm14, %v10591_v48  ;;  %v11343_v48 = vshll.u32 %v25612_v0, 16  ;;  %v11357_v0 = vshrl.u32 %v25624_v57, 16 }
 0x799   : > { %20530 = vmatprep.mubr.msk.bf16.mxu1 %vm5315_vm14, %v10593_v24  ;;  %v11348_v24 = vshrl.u32 %v25615_v21, 16 }
 0x79a   : > { %v11345_v63 = vrot.slane %v11343_v48, 3  ;;  %v11359_v3 = vrot.slane %v11357_v0, 2 }
 0x79b   : > { %v11350_v10 = vrot.slane %v11348_v24, 2 }
 0x79d   : > { %v11354_v12 = vor.u32 %v11353_v52, %v11350_v10 }
 0x7a0   : > { %20531 = vmatmul.mubr.msk.bf16.gmra.mrb[28].mxu1 %vm5315_vm14, %v10595_v38  ;;  %v22506_v38 = vld [vmem:[%s25010_s28 + $0xa0] ss:$0 sps:$4 sm:$0x33]  }
 0x7a1   : > { %20534 = vmatprep.mubr.msk.bf16.mxu1 %vm5315_vm14, %v10597_v62  ;;  %v11342_v62 = vrot.slane %v11340_v13, 2  ;;  %v11398_v13 = vrot.slane %v11396_v31, 3 }
 0x7a3   : > { %v11346_v11 = vor.u32 %v11345_v63, %v11342_v62  ;;  %v11420_v62 = vshrl.u32 %v25674_v2, 16  ;;  %v11423_v63 = vshll.u32 %v25674_v2, 16 }
 0x7a8   : > { %20535 = vmatmul.mubr.msk.bf16.gmra.mrb[32].mxu1 %vm5315_vm14, %v10599_v23  ;;  %v11049_v23 = vrot.slane %v22506_v38, 2 }
 0x7a9   : > { %20542 = vmatprep.mubr.msk.bf16.mxu1 %vm5315_vm14, %v11016_v37  ;;  %v11360_v37 = vshll.u32 %v25624_v57, 16 }
 0x7ab   : > { %v11362_v27 = vrot.slane %v11360_v37, 3  ;;  %v11422_v37 = vrot.slane %v11420_v62, 2  ;;  %v11486_v62 = vshll.u32 %v25718_v47, 16 }
 0x7ad   : > { %v11363_v49 = vor.u32 %v11362_v27, %v11359_v3  ;;  %v11438_v3 = vshrl.u32 %v25686_v22, 16  ;;  %v11441_v27 = vshll.u32 %v25686_v22, 16 }
 0x7b0   : > { %20543 = vmatmul.mubr.msk.bf16.vlgmr.msra.gmra.mrb[0].mxu1 %vm5315_vm14, %v11018_v30  ;;  %v11366_v30 = vshrl.u32 %v25628_v36, 16 }
 0x7b1   : > { %20579 = vmatpush3.bf16.msra.mxu1 %v25566_v18  ;;  %20546 = vmatprep.mubr.msk.bf16.mxu1 %vm5315_vm14, %v11020_v25  ;;  %v11033_v18 = vrot.slane %v25682_v41, 2  ;;  %v11369_v25 = vshll.u32 %v25628_v36, 16 }
 0x7b2   : > { %20580 = vmatprep.subr.bf16.mxu1 %v22498_v51 }
 0x7b3   : > { %v11034_v15 = vsel %vm2591_vm4, %v11031_v34, %v11033_v18  ;;  %v11036_v39 = vsel %vm2591_vm4, %v11033_v18, %v11035_v33  ;;  %v11371_v19 = vrot.slane %v11369_v25, 3  ;;  %v11384_v34 = vshrl.u32 %v25640_v45, 16 }
 0x7b4   : > { %v11432_v25 = vshll.u32 %v25682_v41, 16 }
 0x7b5   : > { %20581 = vmatpush3.bf16.msra.mxu1 %v22498_v51  ;;  %v11050_v51 = vsel %vm2591_vm4, %v11047_v20, %v11049_v23 }
 0x7b6   : > { %20618 = vmatprep.subr.bf16.mxu1 %v25653_v56 }
 0x7b8   : > { %20547 = vmatmul.mubr.msk.bf16.gmra.mrb[4].mxu1 %vm5315_vm14, %v11022_v32  ;;  %v11355_v32 = vsel %vm3400_vm5, %v11346_v11, %v11354_v12  ;;  %v11425_v11 = vrot.slane %v11423_v63, 3 }
 0x7b9   : > { %20550 = vmatprep.mubr.msk.bf16.mxu1 %vm5315_vm14, %v11024_v55  ;;  %v11368_v55 = vrot.slane %v11366_v30, 2  ;;  %v11429_v30 = vshrl.u32 %v25682_v41, 16 }
 0x7bb   : > { %v11372_v60 = vor.u32 %v11371_v19, %v11368_v55  ;;  %v11431_v55 = vrot.slane %v11429_v30, 2  ;;  %v11434_v19 = vrot.slane %v11432_v25, 3 }
 0x7c0   : > { %20551 = vmatmul.mubr.msk.bf16.gmra.mrb[8].mxu1 %vm5315_vm14, %v11026_v53  ;;  %v11375_v53 = vshrl.u32 %v25636_v4, 16 }
 0x7c1   : > { %20554 = vmatprep.mubr.msk.bf16.mxu1 %vm5315_vm14, %v11028_v54  ;;  %v11378_v54 = vshll.u32 %v25636_v4, 16 }
 0x7c2   : > { %v11377_v18 = vrot.slane %v11375_v53, 2  ;;  %v11440_v53 = vrot.slane %v11438_v3, 2 }
 0x7c3   : > { %v11380_v33 = vrot.slane %v11378_v54, 3  ;;  %v11443_v54 = vrot.slane %v11441_v27, 3 }
 0x7c8   : > { %20555 = vmatmul.mubr.msk.bf16.gmra.mrb[12].mxu1 %vm5315_vm14, %v11030_v6  ;;  %v11387_v6 = vshll.u32 %v25640_v45, 16 }
 0x7c9   : > { %20558 = vmatprep.mubr.msk.bf16.mxu1 %vm5315_vm14, %v11032_v7  ;;  %v11364_v7 = vsel %vm3400_vm5, %v11354_v12, %v11363_v49 }
 0x7ca   : > { %v11389_v46 = vrot.slane %v11387_v6, 3  ;;  %v11450_v6 = vshll.u32 %v25694_v58, 16 }
 0x7d0   : > { %20559 = vmatmul.mubr.msk.bf16.gmra.mrb[16].mxu1 %vm5315_vm14, %v11034_v15  ;;  %v11373_v15 = vsel %vm3400_vm5, %v11363_v49, %v11372_v60 }
 0x7d1   : > { %20562 = vmatprep.mubr.msk.bf16.mxu1 %vm5315_vm14, %v11036_v39  ;;  %v11386_v39 = vrot.slane %v11384_v34, 2  ;;  %v11447_v34 = vshrl.u32 %v25694_v58, 16 }
 0x7d3   : > { %v11390_v50 = vor.u32 %v11389_v46, %v11386_v39  ;;  %v11449_v39 = vrot.slane %v11447_v34, 2  ;;  %v11452_v46 = vrot.slane %v11450_v6, 3 }
 0x7d5   : > { %v11453_v31 = vor.u32 %v11452_v46, %v11449_v39 }
 0x7d8   : > { %20563 = vmatmul.mubr.msk.bf16.gmra.mrb[20].mxu1 %vm5315_vm14, %v11038_v28  ;;  %v11381_v28 = vor.u32 %v11380_v33, %v11377_v18  ;;  %v11456_v18 = vshrl.u32 %v25698_v16, 16  ;;  %v11459_v33 = vshll.u32 %v25698_v16, 16 }
 0x7d9   : > { %20566 = vmatprep.mubr.msk.bf16.mxu1 %vm5315_vm14, %v11040_v61  ;;  %v11393_v61 = vshrl.u32 %v25657_v35, 16 }
 0x7da   : > { %v11382_v1 = vsel %vm3400_vm5, %v11372_v60, %v11381_v28  ;;  %v11435_v60 = vor.u32 %v11434_v19, %v11431_v55  ;;  %v11788_v55 = vld [vmem:[%s25010_s28 + $0x10] sm:$0x8] }
 0x7db   : > { %v11395_v20 = vrot.slane %v11393_v61, 2  ;;  %v11461_v61 = vrot.slane %v11459_v33, 3 }
 0x7dd   : > { %v11399_v26 = vor.u32 %v11398_v13, %v11395_v20  ;;  %v11477_v20 = vshll.u32 %v25710_v42, 16 }
 0x7df   : > { %v11400_v10 = vsel %vm3400_vm5, %v11390_v50, %v11399_v26 }
 0x7e0   : > { %20567 = vmatmul.mubr.msk.bf16.gmra.mrb[24].mxu1 %vm5315_vm14, %v11042_v14  ;;  %v11402_v14 = vshrl.u32 %v25661_v29, 16 }
 0x7e1   : > { %20570 = vmatprep.mubr.msk.bf16.mxu1 %vm5315_vm14, %v11044_v5  ;;  %v11405_v5 = vshll.u32 %v25661_v29, 16 }
 0x7e2   : > { %v11404_v48 = vrot.slane %v11402_v14, 2  ;;  %v11468_v14 = vshll.u32 %v25706_v44, 16 }
 0x7e3   : > { %v11407_v24 = vrot.slane %v11405_v5, 3 }
 0x7e5   : > { %v11408_v38 = vor.u32 %v11407_v24, %v11404_v48  ;;  %v11470_v48 = vrot.slane %v11468_v14, 3 }
 0x7e7   : > { %v11409_v0 = vsel %vm3400_vm5, %v11399_v26, %v11408_v38 }
 0x7e8   : > { %20571 = vmatmul.mubr.msk.bf16.gmra.mrb[28].mxu1 %vm5315_vm14, %v11046_v59  ;;  %v11411_v59 = vshrl.u32 %v25670_v9, 16 }
 0x7e9   : > { %20574 = vmatprep.mubr.msk.bf16.mxu1 %vm5315_vm14, %v11048_v8  ;;  %v11414_v8 = vshll.u32 %v25670_v9, 16 }
 0x7ea   : > { %v11413_v52 = vrot.slane %v11411_v59, 2  ;;  %v11479_v59 = vrot.slane %v11477_v20, 3 }
 0x7eb   : > { %v11416_v23 = vrot.slane %v11414_v8, 3 }
 0x7ed   : > { %v11417_v12 = vor.u32 %v11416_v23, %v11413_v52  ;;  %v11495_v52 = vshll.u32 %v25721_v43, 16 }
 0x7ef   : > { %v11497_v25 = vrot.slane %v11495_v52, 3  ;;  %v28848_v52 = vld [vmem:[#allocation5_spill] sm:$0xff] }
 0x7f0   : > { %20575 = vmatmul.mubr.msk.bf16.gmra.mrb[32].mxu1 %vm5315_vm14, %v11050_v51  ;;  %v11426_v51 = vor.u32 %v11425_v11, %v11422_v37  ;;  %v11488_v37 = vrot.slane %v11486_v62, 3  ;;  %v25803_v11 = vld [vmem:[%s25010_s28 + $0xa0] ss:$0 sps:$4 sm:$0x77]  }
 0x7f1   : > { %20582 = vmatprep.mubr.msk.bf16.mxu1 %vm5315_vm14, %v11355_v32  ;;  %v11418_v32 = vsel %vm3400_vm5, %v11408_v38, %v11417_v12  ;;  %v11483_v38 = vshrl.u32 %v25718_v47, 16  ;;  %v11501_v3 = vshrl.u32 %v25803_v11, 16  ;;  %v11504_v27 = vshll.u32 %v25803_v11, 16 }
 0x7f2   : > { %v11427_v49 = vsel %vm3400_vm5, %v11417_v12, %v11426_v51 }
 0x7f8   : > { %20583 = vmatmul.mubr.msk.bf16.vlgmr.msra.gmra.mrb[0].mxu1 %vm5315_vm14, %v11364_v7  ;;  %v11444_v7 = vor.u32 %v11443_v54, %v11440_v53  ;;  %v11506_v53 = vrot.slane %v11504_v27, 3 }
 0x7f9   : > { %20619 = vmatpush3.bf16.msra.mxu1 %v25653_v56  ;;  %20586 = vmatprep.mubr.msk.bf16.mxu1 %vm5315_vm14, %v11373_v15  ;;  %v11391_v56 = vsel %vm3400_vm5, %v11381_v28, %v11390_v50  ;;  %v11436_v15 = vsel %vm3400_vm5, %v11426_v51, %v11435_v60  ;;  %v11458_v28 = vrot.slane %v11456_v18, 2  ;;  %v11465_v50 = vshrl.u32 %v25706_v44, 16 }
 0x7fa   : > { %20620 = vmatprep.subr.bf16.mxu1 %v22508_v17  ;;  %v11454_v13 = vsel %vm3400_vm5, %v11444_v7, %v11453_v31 }
 0x7fb   : > { %v11462_v5 = vor.u32 %v11461_v61, %v11458_v28 }
 0x7fd   : > { %20621 = vmatpush3.bf16.msra.mxu1 %v22508_v17  ;;  %v11445_v17 = vsel %vm3400_vm5, %v11435_v60, %v11444_v7  ;;  %v11463_v24 = vsel %vm3400_vm5, %v11453_v31, %v11462_v5  ;;  %v18329_v60 = vcombine.low %v11788_v55, %v25607_v40  ;;  %v11798_v7 = vrot.slane %v25615_v21, 3 }
 0x7fe   : > { %v11802_v40 = vrot.slane %v25628_v36, 3  ;;  %v11804_v21 = vrot.slane %v25636_v4, 3  ;;  %v11810_v36 = vrot.slane %v25661_v29, 3  ;;  %v11812_v4 = vrot.slane %v25670_v9, 3 }
 0x7ff   : > { %v11797_v6 = vrot.slane %v18329_v60, 3  ;;  %v11818_v29 = vrot.slane %v25686_v22, 3  ;;  %v11820_v9 = vrot.slane %v25694_v58, 3  ;;  %v11826_v22 = vrot.slane %v25710_v42, 3 }
 0x800   : > { %20587 = vmatmul.mubr.msk.bf16.gmra.mrb[4].mxu1 %vm5315_vm14, %v11382_v1  ;;  %v11474_v1 = vshrl.u32 %v25710_v42, 16  ;;  %v11805_v28 = vsel %vm3875_vm6, %v11802_v40, %v11804_v21  ;;  %v11813_v14 = vsel %vm3875_vm6, %v11810_v36, %v11812_v4  ;;  %v11828_v58 = vrot.slane %v25718_v47, 3 }
 0x801   : > { %20590 = vmatprep.mubr.msk.bf16.mxu1 %vm5315_vm14, %v11391_v56  ;;  %v11467_v56 = vrot.slane %v11465_v50, 2  ;;  %v11799_v33 = vsel %vm3875_vm6, %v11797_v6, %v11798_v7  ;;  %v28852_v6 = vld [vmem:[#allocation10_spill] sm:$0xff] }
 0x802   : > { %v11476_v26 = vrot.slane %v11474_v1, 2 }
 0x803   : > { %v11471_v8 = vor.u32 %v11470_v48, %v11467_v56 }
 0x804   : > { %v11480_v63 = vor.u32 %v11479_v59, %v11476_v26  ;;  %v11829_v26 = vsel %vm3875_vm6, %v11826_v22, %v11828_v58 }
 0x805   : > { %v11472_v23 = vsel %vm3400_vm5, %v11462_v5, %v11471_v8 }
 0x806   : > { %v11481_v12 = vsel %vm3400_vm5, %v11471_v8, %v11480_v63  ;;  %v28846_v8 = vmov 0  }
 0x807   : > { %465 = vst.msk [vmem:[#allocation3 + $0x8] sm:$0xf] %vm462_vm11, %v28846_v8  ;;  %463 = vst.msk [vmem:[#allocation3] sm:$0xf] %vm462_vm11, %v28846_v8 }
 0x808   : > { %20591 = vmatmul.mubr.msk.bf16.gmra.mrb[8].mxu1 %vm5315_vm14, %v11400_v10  ;;  %v11492_v10 = vshrl.u32 %v25721_v43, 16  ;;  %464 = vst.msk [vmem:[#allocation3 + $0x4] sm:$0xf] %vm462_vm11, %v28846_v8  ;;  %466 = vst.msk [vmem:[#allocation3 + $0xc] sm:$0xf] %vm462_vm11, %v28846_v8 }
 0x809   : > { %20594 = vmatprep.mubr.msk.bf16.mxu1 %vm5315_vm14, %v11409_v0  ;;  %v11485_v0 = vrot.slane %v11483_v38, 2  ;;  %467 = vst.msk [vmem:[#allocation3 + $0x10] sm:$0xf] %vm462_vm11, %v28846_v8  ;;  %468 = vst.msk [vmem:[#allocation3 + $0x14] sm:$0xf] %vm462_vm11, %v28846_v8  ;;  %v28847_v38 = vld [vmem:[#allocation4_spill] sm:$0xff] }
 0x80a   : > { %v11494_v30 = vrot.slane %v11492_v10, 2  ;;  %469 = vst.msk [vmem:[#allocation3 + $0x18] sm:$0xf] %vm462_vm11, %v28846_v8  ;;  %470 = vst.msk [vmem:[#allocation3 + $0x1c] sm:$0xf] %vm462_vm11, %v28846_v8 }
 0x80b   : > { %v11489_v51 = vor.u32 %v11488_v37, %v11485_v0  ;;  %471 = vst.msk [vmem:[#allocation3 + $0x20] sm:$0xf] %vm462_vm11, %v28846_v8  ;;  %472 = vst.msk [vmem:[#allocation3 + $0x24] sm:$0xf] %vm462_vm11, %v28846_v8  ;;  %v28849_v0 = vld [vmem:[#allocation6_spill] sm:$0xff] }
 0x80c   : > { %473 = vst.msk [vmem:[#allocation3 + $0x28] sm:$0xf] %vm462_vm11, %v28846_v8  ;;  %474 = vst.msk [vmem:[#allocation3 + $0x2c] sm:$0xf] %vm462_vm11, %v28846_v8 }
 0x80d   : > { %v11490_v19 = vsel %vm3400_vm5, %v11480_v63, %v11489_v51  ;;  %475 = vst.msk [vmem:[#allocation3 + $0x30] sm:$0xf] %vm462_vm11, %v28846_v8  ;;  %476 = vst.msk [vmem:[#allocation3 + $0x34] sm:$0xf] %vm462_vm11, %v28846_v8 }
 0x80e   : > { %477 = vst.msk [vmem:[#allocation3 + $0x38] sm:$0xf] %vm462_vm11, %v28846_v8  ;;  %478 = vst.msk [vmem:[#allocation3 + $0x3c] sm:$0xf] %vm462_vm11, %v28846_v8 }
 0x80f   : > { %479 = vst.msk [vmem:[#allocation3 + $0x40] sm:$0xf] %vm462_vm11, %v28846_v8  ;;  %480 = vst.msk [vmem:[#allocation3 + $0x44] sm:$0xf] %vm462_vm11, %v28846_v8 }
 0x810   : > { %20595 = vmatmul.mubr.msk.bf16.gmra.mrb[12].mxu1 %vm5315_vm14, %v11418_v32  ;;  %v11498_v32 = vor.u32 %v11497_v25, %v11494_v30  ;;  %481 = vst.msk [vmem:[#allocation3 + $0x48] sm:$0xf] %vm462_vm11, %v28846_v8  ;;  %482 = vst.msk [vmem:[#allocation3 + $0x4c] sm:$0xf] %vm462_vm11, %v28846_v8 }
 0x811   : > { %20598 = vmatprep.mubr.msk.bf16.mxu1 %vm5315_vm14, %v11427_v49  ;;  %v11503_v49 = vrot.slane %v11501_v3, 2  ;;  %483 = vst.msk [vmem:[#allocation3 + $0x50] sm:$0xf] %vm462_vm11, %v28846_v8  ;;  %484 = vst.msk [vmem:[#allocation3 + $0x54] sm:$0xf] %vm462_vm11, %v28846_v8 }
 0x812   : > { %v11499_v54 = vsel %vm3400_vm5, %v11489_v51, %v11498_v32  ;;  %485 = vst.msk [vmem:[#allocation3 + $0x58] sm:$0xf] %vm462_vm11, %v28846_v8  ;;  %486 = vst.msk [vmem:[#allocation3 + $0x5c] sm:$0xf] %vm462_vm11, %v28846_v8 }
 0x813   : > { %v11507_v34 = vor.u32 %v11506_v53, %v11503_v49  ;;  %487 = vst.msk [vmem:[#allocation3 + $0x60] sm:$0xf] %vm462_vm11, %v28846_v8  ;;  %488 = vst.msk [vmem:[#allocation3 + $0x64] sm:$0xf] %vm462_vm11, %v28846_v8  ;;  %v28851_v49 = vld [vmem:[#allocation8_spill] sm:$0xff] }
 0x814   : > { %489 = vst.msk [vmem:[#allocation3 + $0x68] sm:$0xf] %vm462_vm11, %v28846_v8  ;;  %490 = vst.msk [vmem:[#allocation3 + $0x6c] sm:$0xf] %vm462_vm11, %v28846_v8 }
 0x815   : > { %v11508_v18 = vsel %vm3400_vm5, %v11498_v32, %v11507_v34  ;;  %491 = vst.msk [vmem:[#allocation3 + $0x70] sm:$0xf] %vm462_vm11, %v28846_v8  ;;  %492 = vst.msk [vmem:[#allocation3 + $0x74] sm:$0xf] %vm462_vm11, %v28846_v8 }
 0x816   : > { %493 = vst.msk [vmem:[#allocation3 + $0x78] sm:$0xf] %vm462_vm11, %v28846_v8  ;;  %494 = vst.msk [vmem:[#allocation3 + $0x7c] sm:$0xf] %vm462_vm11, %v28846_v8 }
 0x817   : > { %495 = vst.msk [vmem:[#allocation3 + $0x80] sm:$0xf] %vm462_vm11, %v28846_v8  ;;  %496 = vst.msk [vmem:[#allocation3 + $0x84] sm:$0xf] %vm462_vm11, %v28846_v8 }
 0x818   : > { %20599 = vmatmul.mubr.msk.bf16.gmra.mrb[16].mxu1 %vm5315_vm14, %v11436_v15  ;;  %v11800_v15 = vrot.slane %v25624_v57, 3  ;;  %v11808_v57 = vrot.slane %v25657_v35, 3  ;;  %v11816_v35 = vrot.slane %v25682_v41, 3  ;;  %v11824_v41 = vrot.slane %v25706_v44, 3  ;;  %497 = vst.msk [vmem:[#allocation3 + $0x88] sm:$0xf] %vm462_vm11, %v28846_v8 }
 0x819   : > { %20602 = vmatprep.mubr.msk.bf16.mxu1 %vm5315_vm14, %v11445_v17  ;;  %v11806_v17 = vrot.slane %v25640_v45, 3  ;;  %v11814_v45 = vrot.slane %v25674_v2, 3  ;;  %v11822_v2 = vrot.slane %v25698_v16, 3  ;;  %v11830_v16 = vrot.slane %v25721_v43, 3  ;;  %498 = vst.msk [vmem:[#allocation3 + $0x8c] sm:$0xf] %vm462_vm11, %v28846_v8 }
 0x81a   : > { %v11801_v39 = vsel %vm3875_vm6, %v11798_v7, %v11800_v15  ;;  %v11803_v46 = vsel %vm3875_vm6, %v11800_v15, %v11802_v40  ;;  %v11811_v50 = vsel %vm3875_vm6, %v11808_v57, %v11810_v36  ;;  %v11819_v20 = vsel %vm3875_vm6, %v11816_v35, %v11818_v29  ;;  %499 = vst.msk [vmem:[#allocation3 + $0x90] sm:$0xf] %vm462_vm11, %v28846_v8 }
 0x81b   : > { %v11807_v61 = vsel %vm3875_vm6, %v11804_v21, %v11806_v17  ;;  %v11809_v31 = vsel %vm3875_vm6, %v11806_v17, %v11808_v57  ;;  %v11815_v5 = vsel %vm3875_vm6, %v11812_v4, %v11814_v45  ;;  %v11817_v1 = vsel %vm3875_vm6, %v11814_v45, %v11816_v35  ;;  %500 = vst.msk [vmem:[#allocation3 + $0x94] sm:$0xf] %vm462_vm11, %v28846_v8  ;;  %v28856_v35 = vld [vmem:[#allocation15_spill] sm:$0xff] }
 0x81c   : > { %v11823_v56 = vsel %vm3875_vm6, %v11820_v9, %v11822_v2  ;;  %v11825_v48 = vsel %vm3875_vm6, %v11822_v2, %v11824_v41  ;;  %v11831_v59 = vsel %vm3875_vm6, %v11828_v58, %v11830_v16  ;;  %v11832_v44 = vrot.slane %v25803_v11, 3  ;;  %501 = vst.msk [vmem:[#allocation3 + $0x98] sm:$0xf] %vm462_vm11, %v28846_v8  ;;  %502 = vst.msk [vmem:[#allocation3 + $0x9c] sm:$0xf] %vm462_vm11, %v28846_v8 }
 0x81e   : > { %v11833_v42 = vsel %vm3875_vm6, %v11830_v16, %v11832_v44 }
 0x820   : > { %20603 = vmatmul.mubr.msk.bf16.gmra.mrb[20].mxu1 %vm5315_vm14, %v11454_v13  ;;  %v11821_v13 = vsel %vm3875_vm6, %v11818_v29, %v11820_v9 }
 0x821   : > { %20606 = vmatprep.mubr.msk.bf16.mxu1 %vm5315_vm14, %v11463_v24  ;;  %v11827_v24 = vsel %vm3875_vm6, %v11824_v41, %v11826_v22 }
 0x828   : > { %20607 = vmatmul.mubr.msk.bf16.gmra.mrb[24].mxu1 %vm5315_vm14, %v11472_v23 }
 0x829   : > { %20610 = vmatprep.mubr.msk.bf16.mxu1 %vm5315_vm14, %v11481_v12  ;;  %v28850_v12 = vld [vmem:[#allocation7_spill] sm:$0xff] }
 0x830   : > { %20611 = vmatmul.mubr.msk.bf16.gmra.mrb[28].mxu1 %vm5315_vm14, %v11490_v19 }
 0x831   : > { %20614 = vmatprep.mubr.msk.bf16.mxu1 %vm5315_vm14, %v11499_v54 }
 0x838   : > { %20615 = vmatmul.mubr.msk.bf16.gmra.mrb[32].mxu1 %vm5315_vm14, %v11508_v18 }
 0x839   : > { %20622 = vmatprep.mubr.msk.bf16.mxu1 %vm5315_vm14, %v11799_v33  ;;  %v28853_v33 = vld [vmem:[#allocation9_spill] sm:$0xff] }
 0x840   : > { %20623 = vmatmul.mubr.msk.bf16.vlgmr.msra.gmra.mrb[0].mxu1 %vm5315_vm14, %v11801_v39  ;;  %v28854_v39 = vld [vmem:[#allocation11_spill] sm:$0xff] }
 0x841   : > { %20626 = vmatprep.mubr.msk.bf16.mxu1 %vm5315_vm14, %v11803_v46 }
 0x848   : > { %20627 = vmatmul.mubr.msk.bf16.gmra.mrb[4].mxu1 %vm5315_vm14, %v11805_v28 }
 0x849   : > { %20630 = vmatprep.mubr.msk.bf16.mxu1 %vm5315_vm14, %v11807_v61 }
 0x850   : > { %20631 = vmatmul.mubr.msk.bf16.gmra.mrb[8].mxu1 %vm5315_vm14, %v11809_v31 }
 0x851   : > { %20634 = vmatprep.mubr.msk.bf16.mxu1 %vm5315_vm14, %v11811_v50  ;;  %v28855_v50 = vld [vmem:[#allocation12_spill] sm:$0xff] }
 0x858   : > { %20635 = vmatmul.mubr.msk.bf16.gmra.mrb[12].mxu1 %vm5315_vm14, %v11813_v14 }
 0x859   : > { %20638 = vmatprep.mubr.msk.bf16.mxu1 %vm5315_vm14, %v11815_v5 }
 0x860   : > { %20639 = vmatmul.mubr.msk.bf16.gmra.mrb[16].mxu1 %vm5315_vm14, %v11817_v1 }
 0x861   : > { %20642 = vmatprep.mubr.msk.bf16.mxu1 %vm5315_vm14, %v11819_v20  ;;  %v28857_v20 = vld [vmem:[#allocation14_spill] sm:$0xff] }
 0x868   : > { %20643 = vmatmul.mubr.msk.bf16.gmra.mrb[20].mxu1 %vm5315_vm14, %v11821_v13  ;;  %v28858_v13 = vld [vmem:[#allocation16_spill] sm:$0xff] }
 0x869   : > { %20646 = vmatprep.mubr.msk.bf16.mxu1 %vm5315_vm14, %v11823_v56 }
 0x870   : > { %20647 = vmatmul.mubr.msk.bf16.gmra.mrb[24].mxu1 %vm5315_vm14, %v11825_v48 }
 0x871   : > { %20650 = vmatprep.mubr.msk.bf16.mxu1 %vm5315_vm14, %v11827_v24 }
 0x878   : > { %20651 = vmatmul.mubr.msk.bf16.gmra.mrb[28].mxu1 %vm5315_vm14, %v11829_v26 }
 0x879   : > { %20654 = vmatprep.mubr.msk.bf16.mxu1 %vm5315_vm14, %v11831_v59  ;;  %v28859_v59 = vld [vmem:[#allocation17_spill] sm:$0xff] }
 0x880   : > { %20655 = vmatmul.mubr.msk.bf16.gmra.mrb[32].mxu1 %vm5315_vm14, %v11833_v42  ;;  %vm13187_vm14 = vcmask 517120  }
 0x881   : > { %vm13188_vm9 = vmand %vm13187_vm14, %vm4571_vm10 }
 0x913   : > { %v25952_v47 = vpop.f32.mrb[0].mxu1 }
 0x914   : > { %v25954_v43 = vpop.f32.mrb[1].mxu1  ;;  %v12151_v23 = vmul.f32 %v25952_v47, %v28848_v52 }
 0x915   : > { %v12149_v62 = vmul.f32 %v25954_v43, %v28847_v38  ;;  %v25958_v63 = vpop.f32.mrb[2].mxu1 }
 0x916   : > { %v25960_v10 = vpop.f32.mrb[3].mxu1  ;;  %v12152_v30 = vmul.f32 %v25958_v63, %v28850_v12  ;;  %v12188_v3 = vsel %vm825_vm0, %v12151_v23, 0.0 }
 0x917   : > { %v12150_v37 = vmul.f32 %v25960_v10, %v28849_v0  ;;  %v12185_v11 = vsel %vm825_vm0, %v12149_v62, 0.0 }
 0x918   : > { %v12190_v19 = vsel %vm825_vm0, %v12152_v30, 0.0 }
 0x919   : > { %v12186_v25 = vsel %vm825_vm0, %v12150_v37, 0.0  ;;  %v28860_v37 = vld [vmem:[#allocation19_spill] sm:$0xff] }
 0x91a   : > { %v12187_v51 = vadd.f32 %v12186_v25, %v12185_v11  ;;  %v28861_v25 = vld [vmem:[#allocation18_spill] sm:$0xff] }
 0x91b   : > { %v25971_v27 = vpop.f32.mrb[4].mxu1 }
 0x91c   : > { %v12189_v32 = vadd.f32 %v12188_v3, %v12187_v51  ;;  %v25973_v55 = vpop.f32.mrb[5].mxu1  ;;  %v12155_v7 = vmul.f32 %v25971_v27, %v28852_v6 }
 0x91d   : > { %v12153_v53 = vmul.f32 %v25973_v55, %v28851_v49  ;;  %v25978_v54 = vpop.f32.mrb[6].mxu1 }
 0x91e   : > { %v12191_v60 = vadd.f32 %v12190_v19, %v12189_v32  ;;  %v25980_v34 = vpop.f32.mrb[7].mxu1  ;;  %v12156_v46 = vmul.f32 %v25978_v54, %v28854_v39  ;;  %v12196_v28 = vsel %vm825_vm0, %v12155_v7, 0.0  ;;  %v28862_v32 = vld [vmem:[#allocation20_spill] sm:$0xff] }
 0x91f   : > { %v12192_v18 = vsel %vm825_vm0, %v12153_v53, 0.0  ;;  %v12154_v15 = vmul.f32 %v25980_v34, %v28853_v33 }
 0x920   : > { %v12193_v40 = vadd.f32 %v12192_v18, %v12191_v60  ;;  %v12198_v31 = vsel %vm825_vm0, %v12156_v46, 0.0 }
 0x921   : > { %v12194_v21 = vsel %vm825_vm0, %v12154_v15, 0.0 }
 0x922   : > { %v12195_v17 = vadd.f32 %v12194_v21, %v12193_v40  ;;  %v28863_v21 = vld [vmem:[#allocation21_spill] sm:$0xff] }
 0x923   : > { %v25991_v61 = vpop.f32.mrb[8].mxu1 }
 0x924   : > { %v12197_v57 = vadd.f32 %v12196_v28, %v12195_v17  ;;  %v25993_v36 = vpop.f32.mrb[9].mxu1  ;;  %v12159_v29 = vmul.f32 %v25991_v61, %v28856_v35 }
 0x925   : > { %v12157_v4 = vmul.f32 %v25993_v36, %v28855_v50  ;;  %v25998_v45 = vpop.f32.mrb[10].mxu1 }
 0x926   : > { %v12199_v14 = vadd.f32 %v12198_v31, %v12197_v57  ;;  %v26000_v5 = vpop.f32.mrb[11].mxu1  ;;  %v12160_v56 = vmul.f32 %v25998_v45, %v28858_v13  ;;  %v12204_v48 = vsel %vm825_vm0, %v12159_v29, 0.0 }
 0x927   : > { %v12200_v1 = vsel %vm825_vm0, %v12157_v4, 0.0  ;;  %v12158_v9 = vmul.f32 %v26000_v5, %v28857_v20  ;;  %v28864_v4 = vld [vmem:[#allocation23_spill] sm:$0xff] }
 0x928   : > { %v12201_v2 = vadd.f32 %v12200_v1, %v12199_v14  ;;  %v12206_v26 = vsel %vm825_vm0, %v12160_v56, 0.0  ;;  %v28865_v1 = vld [vmem:[#allocation22_spill] sm:$0xff]  ;;  %v28866_v56 = vld [vmem:[#allocation24_spill] sm:$0xff] }
 0x929   : > { %v12202_v41 = vsel %vm825_vm0, %v12158_v9, 0.0 }
 0x92a   : > { %v12203_v22 = vadd.f32 %v12202_v41, %v12201_v2 }
 0x92b   : > { %v26011_v24 = vpop.f32.mrb[12].mxu1 }
 0x92c   : > { %v12205_v58 = vadd.f32 %v12204_v48, %v12203_v22  ;;  %v26013_v16 = vpop.f32.mrb[13].mxu1  ;;  %v12163_v11 = vmul.f32 %v26011_v24, %v28860_v37 }
 0x92d   : > { %v12161_v44 = vmul.f32 %v26013_v16, %v28859_v59  ;;  %v26018_v42 = vpop.f32.mrb[14].mxu1 }
 0x92e   : > { %v12207_v62 = vadd.f32 %v12206_v26, %v12205_v58  ;;  %v26020_v23 = vpop.f32.mrb[15].mxu1  ;;  %v12164_v19 = vmul.f32 %v26018_v42, %v28862_v32  ;;  %v12212_v7 = vsel %vm825_vm0, %v12163_v11, 0.0 }
 0x92f   : > { %v12208_v30 = vsel %vm825_vm0, %v12161_v44, 0.0  ;;  %v12162_v51 = vmul.f32 %v26020_v23, %v28861_v25 }
 0x930   : > { %v12209_v3 = vadd.f32 %v12208_v30, %v12207_v62  ;;  %v12214_v46 = vsel %vm825_vm0, %v12164_v19, 0.0  ;;  %v28867_v30 = vld [vmem:[#allocation25_spill] sm:$0xff] }
 0x931   : > { %v12210_v53 = vsel %vm825_vm0, %v12162_v51, 0.0 }
 0x932   : > { %v12211_v60 = vadd.f32 %v12210_v53, %v12209_v3 }
 0x933   : > { %v26031_v18 = vpop.f32.mrb[16].mxu1 }
 0x934   : > { %v12213_v15 = vadd.f32 %v12212_v7, %v12211_v60  ;;  %v26033_v40 = vpop.f32.mrb[17].mxu1  ;;  %v12167_v14 = vmul.f32 %v26031_v18, %v28864_v4  ;;  %v28868_v60 = vld [vmem:[#allocation27_spill] sm:$0xff] }
 0x935   : > { %v12165_v17 = vmul.f32 %v26033_v40, %v28863_v21  ;;  %v26038_v28 = vpop.f32.mrb[18].mxu1 }
 0x936   : > { %v12215_v57 = vadd.f32 %v12214_v46, %v12213_v15  ;;  %v26040_v31 = vpop.f32.mrb[19].mxu1  ;;  %v12168_v41 = vmul.f32 %v26038_v28, %v28866_v56  ;;  %v12220_v58 = vsel %vm825_vm0, %v12167_v14, 0.0  ;;  %v28869_v46 = vld [vmem:[#allocation26_spill] sm:$0xff]  ;;  %v28870_v14 = vld [vmem:[#allocation28_spill] sm:$0xff] }
 0x937   : > { %v12216_v29 = vsel %vm825_vm0, %v12165_v17, 0.0  ;;  %v12166_v9 = vmul.f32 %v26040_v31, %v28865_v1 }
 0x938   : > { %v12217_v2 = vadd.f32 %v12216_v29, %v12215_v57  ;;  %v12222_v11 = vsel %vm825_vm0, %v12168_v41, 0.0 }
 0x939   : > { %v12218_v22 = vsel %vm825_vm0, %v12166_v9, 0.0 }
 0x93a   : > { %v12219_v48 = vadd.f32 %v12218_v22, %v12217_v2 }
 0x93b   : > { %v26051_v26 = vpop.f32.mrb[20].mxu1 }
 0x93c   : > { %v12221_v44 = vadd.f32 %v12220_v58, %v12219_v48  ;;  %v26053_v62 = vpop.f32.mrb[21].mxu1  ;;  %v12171_v7 = vmul.f32 %v26051_v26, %v28868_v60 }
 0x93d   : > { %v12169_v51 = vmul.f32 %v26053_v62, %v28867_v30  ;;  %v26058_v3 = vpop.f32.mrb[22].mxu1 }
 0x93e   : > { %v12223_v19 = vadd.f32 %v12222_v11, %v12221_v44  ;;  %v26060_v53 = vpop.f32.mrb[23].mxu1  ;;  %v12172_v29 = vmul.f32 %v26058_v3, %v28870_v14  ;;  %v12228_v41 = vsel %vm825_vm0, %v12171_v7, 0.0  ;;  %v28871_v11 = vld [vmem:[#allocation29_spill] sm:$0xff]  ;;  %v28872_v14 = vld [vmem:[#allocation31_spill] sm:$0xff] }
 0x93f   : > { %v12224_v15 = vsel %vm825_vm0, %v12169_v51, 0.0  ;;  %v12170_v17 = vmul.f32 %v26060_v53, %v28869_v46 }
 0x940   : > { %v12225_v57 = vadd.f32 %v12224_v15, %v12223_v19  ;;  %v12230_v44 = vsel %vm825_vm0, %v12172_v29, 0.0 }
 0x941   : > { %v12226_v9 = vsel %vm825_vm0, %v12170_v17, 0.0 }
 0x942   : > { %v12227_v2 = vadd.f32 %v12226_v9, %v12225_v57  ;;  %v28873_v57 = vld [vmem:[#allocation30_spill] sm:$0xff] }
 0x943   : > { %v26071_v22 = vpop.f32.mrb[24].mxu1 }
 0x944   : > { %v12229_v48 = vadd.f32 %v12228_v41, %v12227_v2  ;;  %v26073_v58 = vpop.f32.mrb[25].mxu1  ;;  %v12175_v17 = vmul.f32 %v26071_v22, %v28872_v14  ;;  %v28874_v41 = vld [vmem:[#allocation32_spill] sm:$0xff] }
 0x945   : > { %v12173_v51 = vmul.f32 %v26073_v58, %v28871_v11  ;;  %v26078_v8 = vpop.f32.mrb[26].mxu1 }
 0x946   : > { %v12231_v19 = vadd.f32 %v12230_v44, %v12229_v48  ;;  %v26080_v15 = vpop.f32.mrb[27].mxu1  ;;  %v12176_v29 = vmul.f32 %v26078_v8, %v28874_v41  ;;  %v12236_v46 = vsel %vm825_vm0, %v12175_v17, 0.0  ;;  %v28876_v41 = vld [vmem:[#allocation35_spill] sm:$0xff] }
 0x947   : > { %v12232_v7 = vsel %vm825_vm0, %v12173_v51, 0.0  ;;  %v12174_v9 = vmul.f32 %v26080_v15, %v28873_v57  ;;  %v28875_v51 = vld [vmem:[#allocation33_spill] sm:$0xff] }
 0x948   : > { %v12233_v2 = vadd.f32 %v12232_v7, %v12231_v19  ;;  %v12238_v14 = vsel %vm825_vm0, %v12176_v29, 0.0 }
 0x949   : > { %v12234_v60 = vsel %vm825_vm0, %v12174_v9, 0.0  ;;  %v28877_v9 = vld [vmem:[#allocation34_spill] sm:$0xff] }
 0x94a   : > { %v12235_v11 = vadd.f32 %v12234_v60, %v12233_v2  ;;  %v28878_v2 = vld [vmem:[#allocation36_spill] sm:$0xff] }
 0x94b   : > { %v26091_v48 = vpop.f32.mrb[28].mxu1 }
 0x94c   : > { %v12237_v44 = vadd.f32 %v12236_v46, %v12235_v11  ;;  %v26093_v30 = vpop.f32.mrb[29].mxu1  ;;  %v12179_v60 = vmul.f32 %v26091_v48, %v28876_v41  ;;  %v28879_v41 = vld [vmem:[#allocation37_spill] sm:$0xff] }
 0x94d   : > { %v12177_v56 = vmul.f32 %v26093_v30, %v28875_v51  ;;  %v26098_v57 = vpop.f32.mrb[30].mxu1 }
 0x94e   : > { %v12239_v19 = vadd.f32 %v12238_v14, %v12237_v44  ;;  %v26100_v7 = vpop.f32.mrb[31].mxu1  ;;  %v12180_v29 = vmul.f32 %v26098_v57, %v28878_v2  ;;  %v12244_v1 = vsel %vm825_vm0, %v12179_v60, 0.0  ;;  %v28881_v2 = vld [vmem:[#allocation38_spill] sm:$0xff] }
 0x94f   : > { %v12240_v17 = vsel %vm825_vm0, %v12177_v56, 0.0  ;;  %v12178_v46 = vmul.f32 %v26100_v7, %v28877_v9  ;;  %v28880_v9 = vld [vmem:[#allocation39_spill] sm:$0xff] }
 0x950   : > { %v12241_v11 = vadd.f32 %v12240_v17, %v12239_v19  ;;  %v12246_v32 = vsel %vm825_vm0, %v12180_v29, 0.0 }
 0x951   : > { %v12242_v4 = vsel %vm825_vm0, %v12178_v46, 0.0 }
 0x952   : > { %v12243_v51 = vadd.f32 %v12242_v4, %v12241_v11  ;;  %v28882_v4 = vld [vmem:[#allocation40_spill] sm:$0xff] }
 0x953   : > { %v20656_v14 = vpop.f32.mrb[32].mxu1 }
 0x954   : > { %v12245_v44 = vadd.f32 %v12244_v1, %v12243_v51  ;;  %v12062_v21 = vpop.f32.mrb[33].mxu1  ;;  %v12183_v19 = vmul.f32 %v20656_v14, %v28880_v9 }
 0x955   : > { %v12181_v37 = vmul.f32 %v12062_v21, %v28879_v41  ;;  %v20657_v56 = vpop.f32.mrb[34].mxu1 }
 0x956   : > { %v12247_v25 = vadd.f32 %v12246_v32, %v12245_v44  ;;  %v12065_v59 = vpop.f32.mrb[35].mxu1  ;;  %v12184_v11 = vmul.f32 %v20657_v56, %v28882_v4  ;;  %v12252_v51 = vsel %vm825_vm0, %v12183_v19, 0.0 }
 0x957   : > { %v12248_v17 = vsel %vm825_vm0, %v12181_v37, 0.0  ;;  %v12182_v13 = vmul.f32 %v12065_v59, %v28881_v2 }
 0x958   : > { %v12249_v46 = vadd.f32 %v12248_v17, %v12247_v25  ;;  %v12254_v41 = vsel %vm825_vm0, %v12184_v11, 0.0 }
 0x959   : > { %v12250_v60 = vsel %vm825_vm0, %v12182_v13, 0.0 }
 0x95a   : > { %v12251_v1 = vadd.f32 %v12250_v60, %v12249_v46 }
 0x95c   : > { %v12253_v29 = vadd.f32 %v12252_v51, %v12251_v1 }
 0x95e   : > { %v12255_v35 = vadd.f32 %v12254_v41, %v12253_v29 }
 0x960   : > { %v12256_v32 = vrot.slane %v12255_v35, 4 }
 0x962   : > { %v12257_v44 = vadd.f32 %v12256_v32, %v12255_v35 }
 0x964   : > { %v12258_v20 = vrot.slane %v12257_v44, 2 }
 0x966   : > { %v12259_v9 = vadd.f32 %v12258_v20, %v12257_v44 }
 0x968   : > { %v12260_v50 = vrot.slane %v12259_v9, 1 }
 0x96a   : > { %v12261_v37 = vadd.f32 %v12260_v50, %v12259_v9 }
 0x96c   : > { %v12262_v39 = vmul.f32 0.00390625, %v12261_v37 }
 0x96e   : > { %v26121_v25 = vsub.f32 %v25954_v43, %v12262_v39  ;;  %v26124_v17 = vsub.f32 %v25960_v10, %v12262_v39  ;;  %v26127_v13 = vsub.f32 %v25952_v47, %v12262_v39  ;;  %v26130_v19 = vsub.f32 %v25958_v63, %v12262_v39 }
 0x96f   : > { %v26133_v41 = vsub.f32 %v25973_v55, %v12262_v39  ;;  %v26136_v35 = vsub.f32 %v25980_v34, %v12262_v39  ;;  %v26139_v50 = vsub.f32 %v25971_v27, %v12262_v39  ;;  %v26142_v43 = vsub.f32 %v25978_v54, %v12262_v39 }
 0x970   : > { %v26145_v10 = vsub.f32 %v25993_v36, %v12262_v39  ;;  %v26148_v47 = vsub.f32 %v26000_v5, %v12262_v39  ;;  %v26151_v63 = vsub.f32 %v25991_v61, %v12262_v39  ;;  %v26154_v55 = vsub.f32 %v25998_v45, %v12262_v39 }
 0x971   : > { %v26157_v34 = vsub.f32 %v26013_v16, %v12262_v39  ;;  %v26160_v27 = vsub.f32 %v26020_v23, %v12262_v39  ;;  %v26163_v54 = vsub.f32 %v26011_v24, %v12262_v39  ;;  %v26166_v36 = vsub.f32 %v26018_v42, %v12262_v39 }
 0x972   : > { %v26169_v5 = vsub.f32 %v26033_v40, %v12262_v39  ;;  %v26172_v61 = vsub.f32 %v26040_v31, %v12262_v39  ;;  %v26175_v45 = vsub.f32 %v26031_v18, %v12262_v39  ;;  %v26178_v20 = vsub.f32 %v26038_v28, %v12262_v39 }
 0x973   : > { %v26181_v16 = vsub.f32 %v26053_v62, %v12262_v39  ;;  %v26184_v24 = vsub.f32 %v26060_v53, %v12262_v39  ;;  %v26187_v42 = vsub.f32 %v26051_v26, %v12262_v39  ;;  %v26190_v23 = vsub.f32 %v26058_v3, %v12262_v39 }
 0x974   : > { %v26193_v40 = vsub.f32 %v26073_v58, %v12262_v39  ;;  %v26196_v18 = vsub.f32 %v26080_v15, %v12262_v39  ;;  %v26199_v28 = vsub.f32 %v26071_v22, %v12262_v39  ;;  %v26202_v31 = vsub.f32 %v26078_v8, %v12262_v39 }
 0x975   : > { %v26205_v62 = vsub.f32 %v26093_v30, %v12262_v39  ;;  %v26208_v26 = vsub.f32 %v26100_v7, %v12262_v39  ;;  %v26211_v3 = vsub.f32 %v26091_v48, %v12262_v39  ;;  %v26214_v53 = vsub.f32 %v26098_v57, %v12262_v39 }
 0x976   : > { %v26216_v58 = vsub.f32 %v12062_v21, %v12262_v39  ;;  %v26218_v15 = vsub.f32 %v12065_v59, %v12262_v39  ;;  %v26220_v22 = vsub.f32 %v20656_v14, %v12262_v39  ;;  %v26222_v8 = vsub.f32 %v20657_v56, %v12262_v39 }
 0x977   : > { %v12299_v30 = vmul.f32 %v26121_v25, %v26121_v25  ;;  %v12300_v7 = vmul.f32 %v26124_v17, %v26124_v17  ;;  %v12301_v48 = vmul.f32 %v26127_v13, %v26127_v13  ;;  %v12302_v57 = vmul.f32 %v26130_v19, %v26130_v19 }
 0x978   : > { %v12303_v39 = vmul.f32 %v26133_v41, %v26133_v41  ;;  %v12304_v14 = vmul.f32 %v26136_v35, %v26136_v35  ;;  %v12305_v1 = vmul.f32 %v26139_v50, %v26139_v50  ;;  %v12306_v44 = vmul.f32 %v26142_v43, %v26142_v43 }
 0x979   : > { %v12335_v21 = vmul.f32 %v12299_v30, %v28847_v38  ;;  %v12336_v59 = vmul.f32 %v12300_v7, %v28849_v0  ;;  %v12337_v9 = vmul.f32 %v12301_v48, %v28848_v52  ;;  %v12338_v56 = vmul.f32 %v12302_v57, %v28850_v12 }
 0x97a   : > { %v12339_v51 = vmul.f32 %v12303_v39, %v28851_v49  ;;  %v12340_v37 = vmul.f32 %v12304_v14, %v28853_v33  ;;  %v12307_v48 = vmul.f32 %v26145_v10, %v26145_v10  ;;  %v12341_v57 = vmul.f32 %v12305_v1, %v28852_v6 }
 0x97b   : > { %v12371_v46 = vsel %vm825_vm0, %v12335_v21, 0.0  ;;  %v12372_v11 = vsel %vm825_vm0, %v12336_v59, 0.0  ;;  %v12374_v29 = vsel %vm825_vm0, %v12337_v9, 0.0  ;;  %v12376_v30 = vsel %vm825_vm0, %v12338_v56, 0.0  ;;  %v28883_v9 = vld [vmem:[#allocation11_spill] sm:$0xff]  ;;  %v28884_v56 = vld [vmem:[#allocation12_spill] sm:$0xff] }
 0x97c   : > { %v12373_v60 = vadd.f32 %v12372_v11, %v12371_v46  ;;  %v12378_v21 = vsel %vm825_vm0, %v12339_v51, 0.0  ;;  %v12308_v39 = vmul.f32 %v26148_v47, %v26148_v47  ;;  %v12342_v46 = vmul.f32 %v12306_v44, %v28883_v9  ;;  %v28885_v51 = vld [vmem:[#allocation14_spill] sm:$0xff] }
 0x97d   : > { %v12380_v11 = vsel %vm825_vm0, %v12340_v37, 0.0  ;;  %v12309_v14 = vmul.f32 %v26151_v63, %v26151_v63  ;;  %v12310_v1 = vmul.f32 %v26154_v55, %v26154_v55  ;;  %v12311_v44 = vmul.f32 %v26157_v34, %v26157_v34  ;;  %v28886_v37 = vld [vmem:[#allocation15_spill] sm:$0xff] }
 0x97e   : > { %v12375_v32 = vadd.f32 %v12374_v29, %v12373_v60  ;;  %v12343_v29 = vmul.f32 %v12307_v48, %v28884_v56  ;;  %v12312_v48 = vmul.f32 %v26160_v27, %v26160_v27 }
 0x980   : > { %v12377_v7 = vadd.f32 %v12376_v30, %v12375_v32  ;;  %v12382_v32 = vsel %vm825_vm0, %v12341_v57, 0.0  ;;  %v28887_v57 = vld [vmem:[#allocation16_spill] sm:$0xff] }
 0x982   : > { %v12379_v59 = vadd.f32 %v12378_v21, %v12377_v7  ;;  %v12344_v7 = vmul.f32 %v12308_v39, %v28885_v51  ;;  %v12384_v21 = vsel %vm825_vm0, %v12342_v46, 0.0  ;;  %v12313_v39 = vmul.f32 %v26163_v54, %v26163_v54  ;;  %v28888_v46 = vld [vmem:[#allocation17_spill] sm:$0xff] }
 0x984   : > { %v12381_v60 = vadd.f32 %v12380_v11, %v12379_v59  ;;  %v12345_v59 = vmul.f32 %v12309_v14, %v28886_v37  ;;  %v12386_v11 = vsel %vm825_vm0, %v12343_v29, 0.0  ;;  %v12314_v14 = vmul.f32 %v26166_v36, %v26166_v36 }
 0x986   : > { %v12383_v30 = vadd.f32 %v12382_v32, %v12381_v60  ;;  %v12346_v60 = vmul.f32 %v12310_v1, %v28887_v57  ;;  %v12388_v32 = vsel %vm825_vm0, %v12344_v7, 0.0  ;;  %v12315_v1 = vmul.f32 %v26169_v5, %v26169_v5 }
 0x988   : > { %v12385_v6 = vadd.f32 %v12384_v21, %v12383_v30  ;;  %v12347_v30 = vmul.f32 %v12311_v44, %v28888_v46  ;;  %v12390_v21 = vsel %vm825_vm0, %v12345_v59, 0.0  ;;  %v12316_v44 = vmul.f32 %v26172_v61, %v26172_v61 }
 0x98a   : > { %v12387_v9 = vadd.f32 %v12386_v11, %v12385_v6  ;;  %v28889_v6 = vld [vmem:[#allocation18_spill] sm:$0xff]  ;;  %v12392_v11 = vsel %vm825_vm0, %v12346_v60, 0.0 }
 0x98b   : > { %v12348_v29 = vmul.f32 %v12312_v48, %v28889_v6  ;;  %v12317_v48 = vmul.f32 %v26175_v45, %v26175_v45 }
 0x98c   : > { %v12389_v56 = vadd.f32 %v12388_v32, %v12387_v9  ;;  %v28890_v9 = vld [vmem:[#allocation19_spill] sm:$0xff]  ;;  %v12394_v32 = vsel %vm825_vm0, %v12347_v30, 0.0 }
 0x98d   : > { %v12349_v7 = vmul.f32 %v12313_v39, %v28890_v9  ;;  %v12318_v39 = vmul.f32 %v26178_v20, %v26178_v20 }
 0x98e   : > { %v12391_v51 = vadd.f32 %v12390_v21, %v12389_v56  ;;  %v28891_v56 = vld [vmem:[#allocation20_spill] sm:$0xff]  ;;  %v12396_v21 = vsel %vm825_vm0, %v12348_v29, 0.0 }
 0x98f   : > { %v12350_v59 = vmul.f32 %v12314_v14, %v28891_v56  ;;  %v12319_v14 = vmul.f32 %v26181_v16, %v26181_v16 }
 0x990   : > { %v12393_v37 = vadd.f32 %v12392_v11, %v12391_v51  ;;  %v28892_v51 = vld [vmem:[#allocation21_spill] sm:$0xff]  ;;  %v12398_v11 = vsel %vm825_vm0, %v12349_v7, 0.0 }
 0x991   : > { %v12351_v60 = vmul.f32 %v12315_v1, %v28892_v51  ;;  %v12320_v1 = vmul.f32 %v26184_v24, %v26184_v24 }
 0x992   : > { %v12395_v57 = vadd.f32 %v12394_v32, %v12393_v37  ;;  %v28893_v37 = vld [vmem:[#allocation22_spill] sm:$0xff]  ;;  %v12400_v32 = vsel %vm825_vm0, %v12350_v59, 0.0 }
 0x993   : > { %v12352_v30 = vmul.f32 %v12316_v44, %v28893_v37  ;;  %v12321_v44 = vmul.f32 %v26187_v42, %v26187_v42 }
 0x994   : > { %v12397_v46 = vadd.f32 %v12396_v21, %v12395_v57  ;;  %v28894_v57 = vld [vmem:[#allocation23_spill] sm:$0xff]  ;;  %v12402_v21 = vsel %vm825_vm0, %v12351_v60, 0.0 }
 0x995   : > { %v12353_v29 = vmul.f32 %v12317_v48, %v28894_v57  ;;  %v12322_v48 = vmul.f32 %v26190_v23, %v26190_v23 }
 0x996   : > { %v12399_v6 = vadd.f32 %v12398_v11, %v12397_v46  ;;  %v28895_v46 = vld [vmem:[#allocation24_spill] sm:$0xff]  ;;  %v12404_v11 = vsel %vm825_vm0, %v12352_v30, 0.0 }
 0x997   : > { %v12354_v7 = vmul.f32 %v12318_v39, %v28895_v46  ;;  %v12323_v39 = vmul.f32 %v26193_v40, %v26193_v40 }
 0x998   : > { %v12401_v9 = vadd.f32 %v12400_v32, %v12399_v6  ;;  %v28896_v6 = vld [vmem:[#allocation25_spill] sm:$0xff]  ;;  %v12406_v32 = vsel %vm825_vm0, %v12353_v29, 0.0 }
 0x999   : > { %v12355_v59 = vmul.f32 %v12319_v14, %v28896_v6  ;;  %v12324_v14 = vmul.f32 %v26196_v18, %v26196_v18 }
 0x99a   : > { %v12403_v56 = vadd.f32 %v12402_v21, %v12401_v9  ;;  %v28897_v9 = vld [vmem:[#allocation26_spill] sm:$0xff]  ;;  %v12408_v21 = vsel %vm825_vm0, %v12354_v7, 0.0 }
 0x99b   : > { %v12356_v60 = vmul.f32 %v12320_v1, %v28897_v9  ;;  %v12325_v1 = vmul.f32 %v26199_v28, %v26199_v28 }
 0x99c   : > { %v12405_v51 = vadd.f32 %v12404_v11, %v12403_v56  ;;  %v28898_v56 = vld [vmem:[#allocation27_spill] sm:$0xff]  ;;  %v12410_v11 = vsel %vm825_vm0, %v12355_v59, 0.0 }
 0x99d   : > { %v12357_v30 = vmul.f32 %v12321_v44, %v28898_v56  ;;  %v12326_v44 = vmul.f32 %v26202_v31, %v26202_v31 }
 0x99e   : > { %v12407_v37 = vadd.f32 %v12406_v32, %v12405_v51  ;;  %v28899_v51 = vld [vmem:[#allocation28_spill] sm:$0xff]  ;;  %v12412_v32 = vsel %vm825_vm0, %v12356_v60, 0.0 }
 0x99f   : > { %v12358_v29 = vmul.f32 %v12322_v48, %v28899_v51  ;;  %v12327_v48 = vmul.f32 %v26205_v62, %v26205_v62 }
 0x9a0   : > { %v12409_v57 = vadd.f32 %v12408_v21, %v12407_v37  ;;  %v28900_v37 = vld [vmem:[#allocation29_spill] sm:$0xff]  ;;  %v12414_v21 = vsel %vm825_vm0, %v12357_v30, 0.0 }
 0x9a1   : > { %v12359_v7 = vmul.f32 %v12323_v39, %v28900_v37  ;;  %v12328_v39 = vmul.f32 %v26208_v26, %v26208_v26 }
 0x9a2   : > { %v12411_v46 = vadd.f32 %v12410_v11, %v12409_v57  ;;  %v28901_v57 = vld [vmem:[#allocation30_spill] sm:$0xff]  ;;  %v12416_v11 = vsel %vm825_vm0, %v12358_v29, 0.0 }
 0x9a3   : > { %v12360_v59 = vmul.f32 %v12324_v14, %v28901_v57  ;;  %v12329_v14 = vmul.f32 %v26211_v3, %v26211_v3 }
 0x9a4   : > { %v12413_v6 = vadd.f32 %v12412_v32, %v12411_v46  ;;  %v28902_v46 = vld [vmem:[#allocation31_spill] sm:$0xff]  ;;  %v12418_v32 = vsel %vm825_vm0, %v12359_v7, 0.0 }
 0x9a5   : > { %v12361_v60 = vmul.f32 %v12325_v1, %v28902_v46  ;;  %v12330_v1 = vmul.f32 %v26214_v53, %v26214_v53 }
 0x9a6   : > { %v12415_v9 = vadd.f32 %v12414_v21, %v12413_v6  ;;  %v28903_v6 = vld [vmem:[#allocation32_spill] sm:$0xff]  ;;  %v12420_v21 = vsel %vm825_vm0, %v12360_v59, 0.0 }
 0x9a7   : > { %v12362_v30 = vmul.f32 %v12326_v44, %v28903_v6  ;;  %v12331_v44 = vmul.f32 %v26216_v58, %v26216_v58 }
 0x9a8   : > { %v12417_v56 = vadd.f32 %v12416_v11, %v12415_v9  ;;  %v28904_v9 = vld [vmem:[#allocation33_spill] sm:$0xff]  ;;  %v12422_v11 = vsel %vm825_vm0, %v12361_v60, 0.0 }
 0x9a9   : > { %v12363_v29 = vmul.f32 %v12327_v48, %v28904_v9  ;;  %v12332_v48 = vmul.f32 %v26218_v15, %v26218_v15 }
 0x9aa   : > { %v12419_v51 = vadd.f32 %v12418_v32, %v12417_v56  ;;  %v28905_v56 = vld [vmem:[#allocation34_spill] sm:$0xff]  ;;  %v12424_v32 = vsel %vm825_vm0, %v12362_v30, 0.0 }
 0x9ab   : > { %v12364_v7 = vmul.f32 %v12328_v39, %v28905_v56  ;;  %v12333_v39 = vmul.f32 %v26220_v22, %v26220_v22 }
 0x9ac   : > { %v12421_v37 = vadd.f32 %v12420_v21, %v12419_v51  ;;  %v28906_v51 = vld [vmem:[#allocation35_spill] sm:$0xff]  ;;  %v12426_v21 = vsel %vm825_vm0, %v12363_v29, 0.0 }
 0x9ad   : > { %v12365_v59 = vmul.f32 %v12329_v14, %v28906_v51  ;;  %v12334_v14 = vmul.f32 %v26222_v8, %v26222_v8 }
 0x9ae   : > { %v12423_v57 = vadd.f32 %v12422_v11, %v12421_v37  ;;  %v28907_v37 = vld [vmem:[#allocation36_spill] sm:$0xff]  ;;  %v12428_v11 = vsel %vm825_vm0, %v12364_v7, 0.0 }
 0x9af   : > { %v12366_v60 = vmul.f32 %v12330_v1, %v28907_v37  ;;  %v28909_v1 = vld [vmem:[#allocation39_spill] sm:$0xff] }
 0x9b0   : > { %v12425_v46 = vadd.f32 %v12424_v32, %v12423_v57  ;;  %v28908_v57 = vld [vmem:[#allocation37_spill] sm:$0xff]  ;;  %v12430_v32 = vsel %vm825_vm0, %v12365_v59, 0.0  ;;  %v12369_v37 = vmul.f32 %v12333_v39, %v28909_v1 }
 0x9b1   : > { %v12367_v30 = vmul.f32 %v12331_v44, %v28908_v57  ;;  %v12432_v29 = vsel %vm825_vm0, %v12366_v60, 0.0 }
 0x9b2   : > { %v12427_v6 = vadd.f32 %v12426_v21, %v12425_v46  ;;  %v12368_v46 = vmul.f32 %v12332_v48, %v28881_v2 }
 0x9b4   : > { %v12429_v9 = vadd.f32 %v12428_v11, %v12427_v6  ;;  %v12434_v6 = vsel %vm825_vm0, %v12367_v30, 0.0  ;;  %v12370_v11 = vmul.f32 %v12334_v14, %v28882_v4  ;;  %v12436_v44 = vsel %vm825_vm0, %v12368_v46, 0.0  ;;  %v22511_v14 = vld [vmem:[%s28554_s6 + $0x20] sm:$0xff]  }
 0x9b5   : > { %20658 = vmatprep.subr.bf16.mxu0 %v22511_v14 }
 0x9b6   : > { %v12431_v56 = vadd.f32 %v12430_v32, %v12429_v9  ;;  %v12438_v9 = vsel %vm825_vm0, %v12369_v37, 0.0  ;;  %v12440_v32 = vsel %vm825_vm0, %v12370_v11, 0.0  ;;  %20659 = vmatpush3.bf16.msra.mxu0 %v22511_v14  ;;  %v13193_v37 = vld [vmem:[#allocation3 + $0x4] sm:$0xf] }
 0x9b8   : > { %v12433_v21 = vadd.f32 %v12432_v29, %v12431_v56 }
 0x9ba   : > { %v12435_v7 = vadd.f32 %v12434_v6, %v12433_v21 }
 0x9bc   : > { %v12437_v51 = vadd.f32 %v12436_v44, %v12435_v7  ;;  %v26395_v44 = vld [vmem:[%s28556_s8] ss:$0 sm:$0xff] }
 0x9be   : > { %v12439_v59 = vadd.f32 %v12438_v9, %v12437_v51  ;;  %v22512_v51 = vld [vmem:[%s28554_s6 + $0x28] sm:$0xff]  }
 0x9bf   : > { %20660 = vmatprep.subr.bf16.mxu0 %v22512_v51 }
 0x9c0   : > { %v12441_v33 = vadd.f32 %v12440_v32, %v12439_v59  ;;  %20661 = vmatpush3.bf16.msra.mxu0 %v22512_v51  ;;  %v22514_v59 = vld [vmem:[%s28554_s6 + $0x38] sm:$0xff]  }
 0x9c2   : > { %v12442_v48 = vrot.slane %v12441_v33, 4 }
 0x9c4   : > { %v12443_v49 = vadd.f32 %v12442_v48, %v12441_v33  ;;  %v13192_v33 = vld [vmem:[#allocation3] sm:$0xf] }
 0x9c5   : > { %v26390_v11 = vcombine.low %v13192_v33, %v13193_v37 }
 0x9c6   : > { %v12444_v60 = vrot.slane %v12443_v49, 2 }
 0x9c8   : > { %v12445_v56 = vadd.f32 %v12444_v60, %v12443_v49  ;;  %v22513_v49 = vld [vmem:[%s28554_s6 + $0x30] sm:$0xff]  }
 0x9c9   : > { %20662 = vmatprep.subr.bf16.mxu0 %v22513_v49 }
 0x9ca   : > { %v12446_v29 = vrot.slane %v12445_v56, 1  ;;  %20663 = vmatpush3.bf16.msra.mxu0 %v22513_v49 }
 0x9cb   : > { %20664 = vmatprep.subr.bf16.mxu0 %v22514_v59 }
 0x9cc   : > { %v12447_v39 = vadd.f32 %v12446_v29, %v12445_v56 }
 0x9ce   : > { %v12448_v12 = vmul.f32 0.00390625, %v12447_v39  ;;  %20665 = vmatpush3.bf16.msra.mxu0 %v22514_v59 }
 0x9d0   : > { %v12449_v30 = vadd.f32 1e-05, %v12448_v12  ;;  %v26382_v12 = vld [vmem:[%s28555_s7] ss:$0 sm:$0xff] }
 0x9d2   : > { %22608 = vrsqrt.f32 %v12449_v30 }
 0x9dc   : > { %v26377_v46 = vpop.eup %22608 }
 0x9dd   : > { %v12483_v21 = vmul.f32 %v26377_v46, %v26216_v58  ;;  %v12484_v6 = vmul.f32 %v26377_v46, %v26218_v15  ;;  %v12485_v7 = vmul.f32 %v26377_v46, %v26220_v22  ;;  %v26399_v9 = vmul.f32 %v26377_v46, %v26121_v25 }
 0x9de   : > { %v26403_v58 = vmul.f32 %v26377_v46, %v26124_v17  ;;  %v26407_v15 = vmul.f32 %v26377_v46, %v26127_v13  ;;  %v26411_v22 = vmul.f32 %v26377_v46, %v26130_v19  ;;  %v26421_v48 = vmul.f32 %v26377_v46, %v26133_v41 }
 0x9df   : > { %v12525_v25 = vmul.f32 %v26382_v12, %v12483_v21  ;;  %v12526_v32 = vmul.f32 %v26382_v12, %v12484_v6  ;;  %v12527_v17 = vmul.f32 %v26382_v12, %v12485_v7  ;;  %v26425_v13 = vmul.f32 %v26377_v46, %v26136_v35 }
 0x9e0   : > { %v26429_v19 = vmul.f32 %v26377_v46, %v26139_v50  ;;  %v26433_v60 = vmul.f32 %v26377_v46, %v26142_v43  ;;  %v26437_v56 = vmul.f32 %v26377_v46, %v26145_v10  ;;  %v26444_v35 = vmul.f32 %v26377_v46, %v26148_v47  ;;  %v22518_v47 = vld [vmem:[%s28554_s6] sm:$0xff]  }
 0x9e1   : > { %v12567_v29 = vadd.f32 %v26395_v44, %v12525_v25  ;;  %v12568_v41 = vadd.f32 %v26395_v44, %v12526_v32  ;;  %v12569_v39 = vadd.f32 %v26395_v44, %v12527_v17  ;;  %v26448_v50 = vmul.f32 %v26377_v46, %v26151_v63  ;;  %20702 = vmatprep.subr.bf16.mxu0 %v22518_v47 }
 0x9e2   : > { %v26452_v43 = vmul.f32 %v26377_v46, %v26154_v55  ;;  %v26456_v10 = vmul.f32 %v26377_v46, %v26157_v34  ;;  %v26460_v30 = vmul.f32 %v26377_v46, %v26160_v27  ;;  %v12465_v55 = vmul.f32 %v26377_v46, %v26163_v54 }
 0x9e3   : > { %v12603_v14 = vmax.f32 %v12567_v29, 0.0  ;;  %v12604_v63 = vmax.f32 %v12568_v41, 0.0  ;;  %v12605_v51 = vmax.f32 %v12569_v39, 0.0  ;;  %v12466_v49 = vmul.f32 %v26377_v46, %v26166_v36 }
 0x9e4   : > { %v12467_v34 = vmul.f32 %v26377_v46, %v26169_v5  ;;  %v12468_v27 = vmul.f32 %v26377_v46, %v26172_v61  ;;  %v12469_v33 = vmul.f32 %v26377_v46, %v26175_v45  ;;  %v12470_v54 = vmul.f32 %v26377_v46, %v26178_v20 }
 0x9e5   : > { %v12639_v37 = vmul.f32 %v12603_v14, %v28908_v57  ;;  %v12640_v21 = vmul.f32 %v12604_v63, %v28881_v2  ;;  %v12641_v6 = vmul.f32 %v12605_v51, %v28909_v1  ;;  %v12471_v36 = vmul.f32 %v26377_v46, %v26181_v16  ;;  %v28921_v2 = vld [vmem:[#allocation18_spill] sm:$0xff]  ;;  %v28922_v1 = vld [vmem:[#allocation19_spill] sm:$0xff]  ;;  %v28923_v57 = vld [vmem:[#allocation20_spill] sm:$0xff] }
 0x9e6   : > { %v12472_v5 = vmul.f32 %v26377_v46, %v26184_v24  ;;  %v12473_v61 = vmul.f32 %v26377_v46, %v26187_v42  ;;  %v12474_v45 = vmul.f32 %v26377_v46, %v26190_v23  ;;  %v12475_v20 = vmul.f32 %v26377_v46, %v26193_v40 }
 0x9e7   : > { %v18782_v7 = vpack.c.bf16 %v12639_v37, %v12639_v37  ;;  %v18783_v25 = vpack.c.bf16 %v12640_v21, %v12640_v21  ;;  %v18784_v32 = vpack.c.bf16 %v12641_v6, %v12641_v6  ;;  %v12476_v59 = vmul.f32 %v26377_v46, %v26196_v18 }
 0x9e8   : > { %v12477_v16 = vmul.f32 %v26377_v46, %v26199_v28  ;;  %v12478_v24 = vmul.f32 %v26377_v46, %v26202_v31  ;;  %v12479_v42 = vmul.f32 %v26377_v46, %v26205_v62  ;;  %v12480_v40 = vmul.f32 %v26377_v46, %v26208_v26 }
 0x9e9   : > { %v13071_v23 = vshrl.u32 %v18782_v7, 16  ;;  %v13074_v17 = vshll.u32 %v18782_v7, 16  ;;  %v13081_v29 = vshrl.u32 %v18783_v25, 16  ;;  %v13084_v41 = vshll.u32 %v18783_v25, 16 }
 0x9ea   : > { %v13091_v39 = vshrl.u32 %v18784_v32, 16  ;;  %v13094_v47 = vshll.u32 %v18784_v32, 16  ;;  %v12481_v18 = vmul.f32 %v26377_v46, %v26211_v3  ;;  %v12482_v62 = vmul.f32 %v26377_v46, %v26214_v53 }
 0x9eb   : > { %v13073_v14 = vrot.slane %v13071_v23, 6  ;;  %v13076_v28 = vrot.slane %v13074_v17, 7  ;;  %v13083_v63 = vrot.slane %v13081_v29, 6  ;;  %v13086_v51 = vrot.slane %v13084_v41, 7 }
 0x9ec   : > { %v13093_v31 = vrot.slane %v13091_v39, 6  ;;  %v13096_v37 = vrot.slane %v13094_v47, 7  ;;  %v12486_v21 = vmul.f32 %v26377_v46, %v26222_v8  ;;  %v12493_v26 = vmul.f32 %v26382_v12, %v26399_v9 }
 0x9ed   : > { %v26506_v6 = vor.u32 %v13076_v28, %v13073_v14  ;;  %v13087_v7 = vor.u32 %v13086_v51, %v13083_v63  ;;  %v12494_v3 = vmul.f32 %v26382_v12, %v26403_v58  ;;  %v12495_v32 = vmul.f32 %v26382_v12, %v26407_v15 }
 0x9ee   : > { %v26512_v25 = vor.u32 %v13096_v37, %v13093_v31  ;;  %v12496_v53 = vmul.f32 %v26382_v12, %v26411_v22  ;;  %v12497_v8 = vmul.f32 %v26382_v12, %v26421_v48  ;;  %v12498_v9 = vmul.f32 %v26382_v12, %v26425_v13 }
 0x9ef   : > { %v13079_v46 = vrot.slane %v26506_v6, 4  ;;  %v13089_v23 = vrot.slane %v13087_v7, 4  ;;  %v12499_v58 = vmul.f32 %v26382_v12, %v26429_v19  ;;  %v12500_v17 = vmul.f32 %v26382_v12, %v26433_v60 }
 0x9f0   : > { %v12501_v15 = vmul.f32 %v26382_v12, %v26437_v56  ;;  %v12502_v22 = vmul.f32 %v26382_v12, %v26444_v35  ;;  %v12503_v48 = vmul.f32 %v26382_v12, %v26448_v50  ;;  %v12504_v19 = vmul.f32 %v26382_v12, %v26452_v43 }
 0x9f1   : > { %v13088_v41 = vsel %vm23816_vm13, %v13079_v46, %v13087_v7  ;;  %v13098_v13 = vsel %vm23816_vm13, %v13089_v23, %v26512_v25  ;;  %v12505_v60 = vmul.f32 %v26382_v12, %v26456_v10  ;;  %v12506_v56 = vmul.f32 %v26382_v12, %v26460_v30 }
 0x9f2   : > { %13184 = vst.msk [vmem:[#allocation3 + $0x8c] sm:$0xf] %vm462_vm11, %v13088_v41  ;;  %13185 = vst.msk [vmem:[#allocation3 + $0x90] sm:$0xf] %vm462_vm11, %v13098_v13  ;;  %v12507_v35 = vmul.f32 %v26382_v12, %v12465_v55  ;;  %v12508_v50 = vmul.f32 %v26382_v12, %v12466_v49  ;;  %v12509_v39 = vmul.f32 %v26382_v12, %v12467_v34 }
 0x9f3   : > { %v12510_v47 = vmul.f32 %v26382_v12, %v12468_v27  ;;  %v12511_v43 = vmul.f32 %v26382_v12, %v12469_v33  ;;  %v12512_v14 = vmul.f32 %v26382_v12, %v12470_v54  ;;  %v12513_v10 = vmul.f32 %v26382_v12, %v12471_v36 }
 0x9f4   : > { %v12514_v28 = vmul.f32 %v26382_v12, %v12472_v5  ;;  %v12515_v63 = vmul.f32 %v26382_v12, %v12473_v61  ;;  %v12516_v30 = vmul.f32 %v26382_v12, %v12474_v45  ;;  %v12517_v55 = vmul.f32 %v26382_v12, %v12475_v20 }
 0x9f5   : > { %v12518_v49 = vmul.f32 %v26382_v12, %v12476_v59  ;;  %v12519_v34 = vmul.f32 %v26382_v12, %v12477_v16  ;;  %v12520_v27 = vmul.f32 %v26382_v12, %v12478_v24  ;;  %v12521_v33 = vmul.f32 %v26382_v12, %v12479_v42 }
 0x9f6   : > { %v12522_v54 = vmul.f32 %v26382_v12, %v12480_v40  ;;  %v12523_v36 = vmul.f32 %v26382_v12, %v12481_v18  ;;  %v12524_v5 = vmul.f32 %v26382_v12, %v12482_v62  ;;  %v12528_v61 = vmul.f32 %v26382_v12, %v12486_v21 }
 0x9f7   : > { %v26566_v45 = vadd.f32 %v26395_v44, %v12493_v26  ;;  %v26569_v20 = vadd.f32 %v26395_v44, %v12494_v3  ;;  %v26572_v59 = vadd.f32 %v26395_v44, %v12495_v32  ;;  %v26575_v16 = vadd.f32 %v26395_v44, %v12496_v53 }
 0x9f8   : > { %v26578_v24 = vadd.f32 %v26395_v44, %v12497_v8  ;;  %v26581_v42 = vadd.f32 %v26395_v44, %v12498_v9  ;;  %v26584_v12 = vadd.f32 %v26395_v44, %v12499_v58  ;;  %v26587_v40 = vadd.f32 %v26395_v44, %v12500_v17 }
 0x9f9   : > { %v26590_v18 = vadd.f32 %v26395_v44, %v12501_v15  ;;  %v26593_v51 = vadd.f32 %v26395_v44, %v12502_v22  ;;  %v26596_v31 = vadd.f32 %v26395_v44, %v12503_v48  ;;  %v26599_v37 = vadd.f32 %v26395_v44, %v12504_v19 }
 0x9fa   : > { %v26602_v62 = vadd.f32 %v26395_v44, %v12505_v60  ;;  %v26605_v21 = vadd.f32 %v26395_v44, %v12506_v56  ;;  %v26608_v7 = vadd.f32 %v26395_v44, %v12507_v35  ;;  %v26611_v26 = vadd.f32 %v26395_v44, %v12508_v50 }
 0x9fb   : > { %v26614_v3 = vadd.f32 %v26395_v44, %v12509_v39  ;;  %v26617_v32 = vadd.f32 %v26395_v44, %v12510_v47  ;;  %v26620_v53 = vadd.f32 %v26395_v44, %v12511_v43  ;;  %v26623_v8 = vadd.f32 %v26395_v44, %v12512_v14 }
 0x9fc   : > { %v26626_v46 = vadd.f32 %v26395_v44, %v12513_v10  ;;  %v26629_v23 = vadd.f32 %v26395_v44, %v12514_v28  ;;  %v26632_v9 = vadd.f32 %v26395_v44, %v12515_v63  ;;  %v26635_v58 = vadd.f32 %v26395_v44, %v12516_v30 }
 0x9fd   : > { %v26638_v17 = vadd.f32 %v26395_v44, %v12517_v55  ;;  %v26641_v15 = vadd.f32 %v26395_v44, %v12518_v49  ;;  %v26644_v22 = vadd.f32 %v26395_v44, %v12519_v34  ;;  %v26647_v48 = vadd.f32 %v26395_v44, %v12520_v27 }
 0x9fe   : > { %v26650_v41 = vadd.f32 %v26395_v44, %v12521_v33  ;;  %v26653_v13 = vadd.f32 %v26395_v44, %v12522_v54  ;;  %v26656_v19 = vadd.f32 %v26395_v44, %v12523_v36  ;;  %v26659_v60 = vadd.f32 %v26395_v44, %v12524_v5 }
 0x9ff   : > { %v26662_v56 = vadd.f32 %v26395_v44, %v12528_v61  ;;  %v12571_v35 = vmax.f32 %v26566_v45, 0.0  ;;  %v12572_v50 = vmax.f32 %v26569_v20, 0.0  ;;  %v12573_v39 = vmax.f32 %v26572_v59, 0.0 }
 0xa00   : > { %v12574_v47 = vmax.f32 %v26575_v16, 0.0  ;;  %v12575_v43 = vmax.f32 %v26578_v24, 0.0  ;;  %v12576_v14 = vmax.f32 %v26581_v42, 0.0  ;;  %v12577_v10 = vmax.f32 %v26584_v12, 0.0 }
 0xa01   : > { %v12578_v28 = vmax.f32 %v26587_v40, 0.0  ;;  %v12579_v63 = vmax.f32 %v26590_v18, 0.0  ;;  %v12580_v44 = vmax.f32 %v26593_v51, 0.0  ;;  %v12581_v30 = vmax.f32 %v26596_v31, 0.0 }
 0xa02   : > { %v12582_v55 = vmax.f32 %v26599_v37, 0.0  ;;  %v12583_v49 = vmax.f32 %v26602_v62, 0.0  ;;  %v12584_v34 = vmax.f32 %v26605_v21, 0.0  ;;  %v12585_v27 = vmax.f32 %v26608_v7, 0.0 }
 0xa03   : > { %v12586_v33 = vmax.f32 %v26611_v26, 0.0  ;;  %v12587_v54 = vmax.f32 %v26614_v3, 0.0  ;;  %v12588_v36 = vmax.f32 %v26617_v32, 0.0  ;;  %v12589_v5 = vmax.f32 %v26620_v53, 0.0  ;;  %v28911_v3 = vld [vmem:[#allocation7_spill] sm:$0xff]  ;;  %v28912_v53 = vld [vmem:[#allocation8_spill] sm:$0xff] }
 0xa04   : > { %v12590_v61 = vmax.f32 %v26623_v8, 0.0  ;;  %v12591_v45 = vmax.f32 %v26626_v46, 0.0  ;;  %v12592_v20 = vmax.f32 %v26629_v23, 0.0  ;;  %v12593_v59 = vmax.f32 %v26632_v9, 0.0  ;;  %v28913_v46 = vld [vmem:[#allocation9_spill] sm:$0xff]  ;;  %v28914_v9 = vld [vmem:[#allocation10_spill] sm:$0xff] }
 0xa05   : > { %v12594_v16 = vmax.f32 %v26635_v58, 0.0  ;;  %v12595_v24 = vmax.f32 %v26638_v17, 0.0  ;;  %v12596_v42 = vmax.f32 %v26641_v15, 0.0  ;;  %v12597_v12 = vmax.f32 %v26644_v22, 0.0  ;;  %v28915_v17 = vld [vmem:[#allocation11_spill] sm:$0xff]  ;;  %v28916_v22 = vld [vmem:[#allocation12_spill] sm:$0xff] }
 0xa06   : > { %v12598_v40 = vmax.f32 %v26647_v48, 0.0  ;;  %v12599_v18 = vmax.f32 %v26650_v41, 0.0  ;;  %v12600_v51 = vmax.f32 %v26653_v13, 0.0  ;;  %v12601_v31 = vmax.f32 %v26656_v19, 0.0  ;;  %v28917_v41 = vld [vmem:[#allocation14_spill] sm:$0xff]  ;;  %v28918_v19 = vld [vmem:[#allocation15_spill] sm:$0xff] }
 0xa07   : > { %v12602_v37 = vmax.f32 %v26659_v60, 0.0  ;;  %v12606_v62 = vmax.f32 %v26662_v56, 0.0  ;;  %v12607_v21 = vmul.f32 %v12571_v35, %v28847_v38  ;;  %v12608_v7 = vmul.f32 %v12572_v50, %v28849_v0  ;;  %v28919_v56 = vld [vmem:[#allocation16_spill] sm:$0xff]  ;;  %v28920_v50 = vld [vmem:[#allocation17_spill] sm:$0xff] }
 0xa08   : > { %v12609_v26 = vmul.f32 %v12573_v39, %v28848_v52  ;;  %v12610_v32 = vmul.f32 %v12574_v47, %v28911_v3  ;;  %v12611_v8 = vmul.f32 %v12575_v43, %v28912_v53  ;;  %v12612_v23 = vmul.f32 %v12576_v14, %v28913_v46  ;;  %v28924_v46 = vld [vmem:[#allocation21_spill] sm:$0xff] }
 0xa09   : > { %v12613_v58 = vmul.f32 %v12577_v10, %v28914_v9  ;;  %v12614_v15 = vmul.f32 %v12578_v28, %v28915_v17  ;;  %v12615_v48 = vmul.f32 %v12579_v63, %v28916_v22  ;;  %v12616_v13 = vmul.f32 %v12580_v44, %v28917_v41  ;;  %v28925_v9 = vld [vmem:[#allocation22_spill] sm:$0xff]  ;;  %v28926_v17 = vld [vmem:[#allocation23_spill] sm:$0xff]  ;;  %v28927_v22 = vld [vmem:[#allocation24_spill] sm:$0xff] }
 0xa0a   : > { %v12617_v60 = vmul.f32 %v12581_v30, %v28918_v19  ;;  %v12618_v35 = vmul.f32 %v12582_v55, %v28919_v56  ;;  %v12619_v39 = vmul.f32 %v12583_v49, %v28920_v50  ;;  %v12620_v47 = vmul.f32 %v12584_v34, %v28921_v2  ;;  %v28928_v41 = vld [vmem:[#allocation25_spill] sm:$0xff]  ;;  %v28929_v19 = vld [vmem:[#allocation26_spill] sm:$0xff]  ;;  %v28930_v56 = vld [vmem:[#allocation27_spill] sm:$0xff] }
 0xa0b   : > { %v12621_v43 = vmul.f32 %v12585_v27, %v28922_v1  ;;  %v12622_v14 = vmul.f32 %v12586_v33, %v28923_v57  ;;  %v12623_v10 = vmul.f32 %v12587_v54, %v28924_v46  ;;  %v12624_v28 = vmul.f32 %v12588_v36, %v28925_v9  ;;  %v28931_v50 = vld [vmem:[#allocation28_spill] sm:$0xff]  ;;  %v28932_v2 = vld [vmem:[#allocation29_spill] sm:$0xff]  ;;  %v28933_v1 = vld [vmem:[#allocation30_spill] sm:$0xff] }
 0xa0c   : > { %v12625_v63 = vmul.f32 %v12589_v5, %v28926_v17  ;;  %v12626_v44 = vmul.f32 %v12590_v61, %v28927_v22  ;;  %v12627_v30 = vmul.f32 %v12591_v45, %v28928_v41  ;;  %v12628_v55 = vmul.f32 %v12592_v20, %v28929_v19  ;;  %v28934_v57 = vld [vmem:[#allocation31_spill] sm:$0xff]  ;;  %v28935_v46 = vld [vmem:[#allocation32_spill] sm:$0xff]  ;;  %v28936_v9 = vld [vmem:[#allocation33_spill] sm:$0xff] }
 0xa0d   : > { %v12629_v49 = vmul.f32 %v12593_v59, %v28930_v56  ;;  %v12630_v34 = vmul.f32 %v12594_v16, %v28931_v50  ;;  %v12631_v27 = vmul.f32 %v12595_v24, %v28932_v2  ;;  %v12632_v33 = vmul.f32 %v12596_v42, %v28933_v1  ;;  %v28937_v17 = vld [vmem:[#allocation34_spill] sm:$0xff]  ;;  %v28938_v22 = vld [vmem:[#allocation35_spill] sm:$0xff]  ;;  %v28939_v41 = vld [vmem:[#allocation36_spill] sm:$0xff] }
 0xa0e   : > { %v12633_v54 = vmul.f32 %v12597_v12, %v28934_v57  ;;  %v12634_v36 = vmul.f32 %v12598_v40, %v28935_v46  ;;  %v12635_v5 = vmul.f32 %v12599_v18, %v28936_v9  ;;  %v12636_v61 = vmul.f32 %v12600_v51, %v28937_v17 }
 0xa0f   : > { %v12637_v45 = vmul.f32 %v12601_v31, %v28938_v22  ;;  %v12638_v20 = vmul.f32 %v12602_v37, %v28939_v41  ;;  %v12642_v59 = vmul.f32 %v12606_v62, %v28882_v4  ;;  %v18750_v19 = vpack.c.bf16 %v12607_v21, %v12607_v21 }
 0xa10   : > { %v18751_v16 = vpack.c.bf16 %v12608_v7, %v12608_v7  ;;  %v18752_v50 = vpack.c.bf16 %v12609_v26, %v12609_v26  ;;  %v18753_v24 = vpack.c.bf16 %v12610_v32, %v12610_v32  ;;  %v18754_v2 = vpack.c.bf16 %v12611_v8, %v12611_v8 }
 0xa11   : > { %v18755_v42 = vpack.c.bf16 %v12612_v23, %v12612_v23  ;;  %v26730_v1 = vpack.c.bf16 %v12613_v58, %v12613_v58  ;;  %v26732_v12 = vpack.c.bf16 %v12614_v15, %v12614_v15  ;;  %v26734_v40 = vpack.c.bf16 %v12615_v48, %v12615_v48 }
 0xa12   : > { %v26736_v18 = vpack.c.bf16 %v12616_v13, %v12616_v13  ;;  %v26738_v51 = vpack.c.bf16 %v12617_v60, %v12617_v60  ;;  %v26740_v31 = vpack.c.bf16 %v12618_v35, %v12618_v35  ;;  %v26742_v37 = vpack.c.bf16 %v12619_v39, %v12619_v39 }
 0xa13   : > { %v26744_v62 = vpack.c.bf16 %v12620_v47, %v12620_v47  ;;  %v26746_v21 = vpack.c.bf16 %v12621_v43, %v12621_v43  ;;  %v26748_v7 = vpack.c.bf16 %v12622_v14, %v12622_v14  ;;  %v26750_v26 = vpack.c.bf16 %v12623_v10, %v12623_v10 }
 0xa14   : > { %v26752_v32 = vpack.c.bf16 %v12624_v28, %v12624_v28  ;;  %v26754_v8 = vpack.c.bf16 %v12625_v63, %v12625_v63  ;;  %v26756_v23 = vpack.c.bf16 %v12626_v44, %v12626_v44  ;;  %v26758_v58 = vpack.c.bf16 %v12627_v30, %v12627_v30 }
 0xa15   : > { %v26760_v15 = vpack.c.bf16 %v12628_v55, %v12628_v55  ;;  %v26762_v48 = vpack.c.bf16 %v12629_v49, %v12629_v49  ;;  %v26764_v13 = vpack.c.bf16 %v12630_v34, %v12630_v34  ;;  %v26766_v60 = vpack.c.bf16 %v12631_v27, %v12631_v27 }
 0xa16   : > { %v26768_v35 = vpack.c.bf16 %v12632_v33, %v12632_v33  ;;  %v26770_v39 = vpack.c.bf16 %v12633_v54, %v12633_v54  ;;  %v26772_v47 = vpack.c.bf16 %v12634_v36, %v12634_v36  ;;  %v26774_v43 = vpack.c.bf16 %v12635_v5, %v12635_v5 }
 0xa17   : > { %v26776_v14 = vpack.c.bf16 %v12636_v61, %v12636_v61  ;;  %v26778_v10 = vpack.c.bf16 %v12637_v45, %v12637_v45  ;;  %v26780_v28 = vpack.c.bf16 %v12638_v20, %v12638_v20  ;;  %v26782_v63 = vpack.c.bf16 %v12642_v59, %v12642_v59 }
 0xa18   : > { %v12752_v44 = vshrl.u32 %v18750_v19, 16  ;;  %v12755_v30 = vshll.u32 %v18750_v19, 16  ;;  %v12761_v55 = vshrl.u32 %v18751_v16, 16  ;;  %v12764_v49 = vshll.u32 %v18751_v16, 16 }
 0xa19   : > { %v12771_v34 = vshrl.u32 %v18752_v50, 16  ;;  %v12774_v27 = vshll.u32 %v18752_v50, 16  ;;  %v12781_v33 = vshrl.u32 %v18753_v24, 16  ;;  %v12784_v54 = vshll.u32 %v18753_v24, 16 }
 0xa1a   : > { %v12754_v36 = vrot.slane %v12752_v44, 6  ;;  %v12757_v4 = vrot.slane %v12755_v30, 7  ;;  %v12763_v5 = vrot.slane %v12761_v55, 6  ;;  %v12766_v41 = vrot.slane %v12764_v49, 7 }
 0xa1b   : > { %v12773_v61 = vrot.slane %v12771_v34, 6  ;;  %v12776_v17 = vrot.slane %v12774_v27, 7  ;;  %v12783_v45 = vrot.slane %v12781_v33, 6  ;;  %v12786_v22 = vrot.slane %v12784_v54, 7 }
 0xa1c   : > { %v26784_v20 = vor.u32 %v12757_v4, %v12754_v36  ;;  %v12767_v59 = vor.u32 %v12766_v41, %v12763_v5  ;;  %v12791_v9 = vshrl.u32 %v18754_v2, 16  ;;  %v12794_v46 = vshll.u32 %v18754_v2, 16 }
 0xa1d   : > { %v12777_v19 = vor.u32 %v12776_v17, %v12773_v61  ;;  %v12787_v57 = vor.u32 %v12786_v22, %v12783_v45  ;;  %v12801_v16 = vshrl.u32 %v18755_v42, 16  ;;  %v12804_v56 = vshll.u32 %v18755_v42, 16 }
 0xa1e   : > { %v12759_v50 = vrot.slane %v26784_v20, 4  ;;  %v12769_v24 = vrot.slane %v12767_v59, 4  ;;  %v12793_v44 = vrot.slane %v12791_v9, 6  ;;  %v12796_v30 = vrot.slane %v12794_v46, 7 }
 0xa1f   : > { %v12779_v55 = vrot.slane %v12777_v19, 4  ;;  %v12789_v49 = vrot.slane %v12787_v57, 4  ;;  %v12803_v34 = vrot.slane %v12801_v16, 6  ;;  %v12806_v27 = vrot.slane %v12804_v56, 7 }
 0xa20   : > { %v12768_v4 = vsel %vm23816_vm13, %v12759_v50, %v12767_v59  ;;  %v12778_v41 = vsel %vm23816_vm13, %v12769_v24, %v12777_v19  ;;  %v12797_v2 = vor.u32 %v12796_v30, %v12793_v44  ;;  %v12811_v17 = vshrl.u32 %v26730_v1, 16 }
 0xa21   : > { %v12788_v22 = vsel %vm23816_vm13, %v12779_v55, %v12787_v57  ;;  %v12807_v42 = vor.u32 %v12806_v27, %v12803_v34  ;;  %v12814_v9 = vshll.u32 %v26730_v1, 16  ;;  %v12821_v46 = vshrl.u32 %v26732_v12, 16  ;;  %13152 = vst.msk [vmem:[#allocation3 + $0xc] sm:$0xf] %vm462_vm11, %v12768_v4  ;;  %13153 = vst.msk [vmem:[#allocation3 + $0x10] sm:$0xf] %vm462_vm11, %v12778_v41 }
 0xa22   : > { %v12798_v56 = vsel %vm23816_vm13, %v12789_v49, %v12797_v2  ;;  %v12799_v33 = vrot.slane %v12797_v2, 4  ;;  %v12813_v54 = vrot.slane %v12811_v17, 6  ;;  %v12824_v36 = vshll.u32 %v26732_v12, 16  ;;  %13154 = vst.msk [vmem:[#allocation3 + $0x14] sm:$0xf] %vm462_vm11, %v12788_v22 }
 0xa23   : > { %v12809_v5 = vrot.slane %v12807_v42, 4  ;;  %v12816_v57 = vrot.slane %v12814_v9, 7  ;;  %v12823_v61 = vrot.slane %v12821_v46, 6  ;;  %v12831_v1 = vshrl.u32 %v26734_v40, 16  ;;  %13155 = vst.msk [vmem:[#allocation3 + $0x18] sm:$0xf] %vm462_vm11, %v12798_v56 }
 0xa24   : > { %v12808_v45 = vsel %vm23816_vm13, %v12799_v33, %v12807_v42  ;;  %v12826_v59 = vrot.slane %v12824_v36, 7  ;;  %v12834_v19 = vshll.u32 %v26734_v40, 16  ;;  %v12841_v16 = vshrl.u32 %v26736_v18, 16 }
 0xa25   : > { %v12817_v50 = vor.u32 %v12816_v57, %v12813_v54  ;;  %v12833_v24 = vrot.slane %v12831_v1, 6  ;;  %v12844_v12 = vshll.u32 %v26736_v18, 16  ;;  %v12851_v44 = vshrl.u32 %v26738_v51, 16  ;;  %13156 = vst.msk [vmem:[#allocation3 + $0x1c] sm:$0xf] %vm462_vm11, %v12808_v45 }
 0xa26   : > { %v12827_v30 = vor.u32 %v12826_v59, %v12823_v61  ;;  %v12836_v55 = vrot.slane %v12834_v19, 7  ;;  %v12843_v49 = vrot.slane %v12841_v16, 6  ;;  %v12854_v34 = vshll.u32 %v26738_v51, 16 }
 0xa27   : > { %v12818_v27 = vsel %vm23816_vm13, %v12809_v5, %v12817_v50  ;;  %v12819_v4 = vrot.slane %v12817_v50, 4  ;;  %v12846_v40 = vrot.slane %v12844_v12, 7  ;;  %v12853_v41 = vrot.slane %v12851_v44, 6 }
 0xa28   : > { %v12829_v2 = vrot.slane %v12827_v30, 4  ;;  %v12837_v17 = vor.u32 %v12836_v55, %v12833_v24  ;;  %v12856_v22 = vrot.slane %v12854_v34, 7  ;;  %v12861_v18 = vshrl.u32 %v26740_v31, 16  ;;  %13157 = vst.msk [vmem:[#allocation3 + $0x20] sm:$0xf] %vm462_vm11, %v12818_v27 }
 0xa29   : > { %v12828_v42 = vsel %vm23816_vm13, %v12819_v4, %v12827_v30  ;;  %v12847_v9 = vor.u32 %v12846_v40, %v12843_v49  ;;  %v12864_v46 = vshll.u32 %v26740_v31, 16  ;;  %v12871_v51 = vshrl.u32 %v26742_v37, 16 }
 0xa2a   : > { %v12838_v56 = vsel %vm23816_vm13, %v12829_v2, %v12837_v17  ;;  %v12839_v33 = vrot.slane %v12837_v17, 4  ;;  %v12857_v54 = vor.u32 %v12856_v22, %v12853_v41  ;;  %v12863_v36 = vrot.slane %v12861_v18, 6  ;;  %13158 = vst.msk [vmem:[#allocation3 + $0x24] sm:$0xf] %vm462_vm11, %v12828_v42 }
 0xa2b   : > { %v12849_v5 = vrot.slane %v12847_v9, 4  ;;  %v12866_v57 = vrot.slane %v12864_v46, 7  ;;  %v12873_v61 = vrot.slane %v12871_v51, 6  ;;  %v12874_v1 = vshll.u32 %v26742_v37, 16  ;;  %13159 = vst.msk [vmem:[#allocation3 + $0x28] sm:$0xf] %vm462_vm11, %v12838_v56 }
 0xa2c   : > { %v12848_v31 = vsel %vm23816_vm13, %v12839_v33, %v12847_v9  ;;  %v12859_v45 = vrot.slane %v12857_v54, 4  ;;  %v12881_v59 = vshrl.u32 %v26744_v62, 16  ;;  %v12884_v19 = vshll.u32 %v26744_v62, 16 }
 0xa2d   : > { %v12858_v16 = vsel %vm23816_vm13, %v12849_v5, %v12857_v54  ;;  %v12867_v50 = vor.u32 %v12866_v57, %v12863_v36  ;;  %v12876_v24 = vrot.slane %v12874_v1, 7  ;;  %v12891_v12 = vshrl.u32 %v26746_v21, 16  ;;  %13160 = vst.msk [vmem:[#allocation3 + $0x2c] sm:$0xf] %vm462_vm11, %v12848_v31 }
 0xa2e   : > { %v12883_v37 = vrot.slane %v12881_v59, 6  ;;  %v12886_v44 = vrot.slane %v12884_v19, 7  ;;  %v12894_v30 = vshll.u32 %v26746_v21, 16  ;;  %v12901_v55 = vshrl.u32 %v26748_v7, 16  ;;  %13161 = vst.msk [vmem:[#allocation3 + $0x30] sm:$0xf] %vm462_vm11, %v12858_v16 }
 0xa2f   : > { %v12868_v62 = vsel %vm23816_vm13, %v12859_v45, %v12867_v50  ;;  %v12869_v49 = vrot.slane %v12867_v50, 4  ;;  %v12877_v34 = vor.u32 %v12876_v24, %v12873_v61  ;;  %v12893_v27 = vrot.slane %v12891_v12, 6 }
 0xa30   : > { %v12887_v4 = vor.u32 %v12886_v44, %v12883_v37  ;;  %v12896_v40 = vrot.slane %v12894_v30, 7  ;;  %v12903_v41 = vrot.slane %v12901_v55, 6  ;;  %v12904_v2 = vshll.u32 %v26748_v7, 16  ;;  %13162 = vst.msk [vmem:[#allocation3 + $0x34] sm:$0xf] %vm462_vm11, %v12868_v62 }
 0xa31   : > { %v12878_v21 = vsel %vm23816_vm13, %v12869_v49, %v12877_v34  ;;  %v12879_v17 = vrot.slane %v12877_v34, 4  ;;  %v12911_v22 = vshrl.u32 %v26750_v26, 16  ;;  %v12914_v18 = vshll.u32 %v26750_v26, 16  ;;  %v26964_v29 = vld [vmem:[#allocation3 + $0x20] sm:$0xff]  }
 0xa32   : > { %v12889_v42 = vrot.slane %v12887_v4, 4  ;;  %v12897_v9 = vor.u32 %v12896_v40, %v12893_v27  ;;  %v12906_v46 = vrot.slane %v12904_v2, 7  ;;  %v12921_v51 = vshrl.u32 %v26752_v32, 16  ;;  %13163 = vst.msk [vmem:[#allocation3 + $0x38] sm:$0xf] %vm462_vm11, %v12878_v21 }
 0xa33   : > { %v12888_v7 = vsel %vm23816_vm13, %v12879_v17, %v12887_v4  ;;  %v12913_v56 = vrot.slane %v12911_v22, 6  ;;  %v12916_v33 = vrot.slane %v12914_v18, 7  ;;  %v12924_v54 = vshll.u32 %v26752_v32, 16 }
 0xa34   : > { %v12898_v36 = vsel %vm23816_vm13, %v12889_v42, %v12897_v9  ;;  %v12899_v5 = vrot.slane %v12897_v9, 4  ;;  %v12907_v57 = vor.u32 %v12906_v46, %v12903_v41  ;;  %v12923_v26 = vrot.slane %v12921_v51, 6  ;;  %13164 = vst.msk [vmem:[#allocation3 + $0x3c] sm:$0xf] %vm462_vm11, %v12888_v7 }
 0xa35   : > { %v12917_v61 = vor.u32 %v12916_v33, %v12913_v56  ;;  %v12926_v1 = vrot.slane %v12924_v54, 7  ;;  %v12931_v31 = vshrl.u32 %v26754_v8, 16  ;;  %v12934_v45 = vshll.u32 %v26754_v8, 16  ;;  %13165 = vst.msk [vmem:[#allocation3 + $0x40] sm:$0xf] %vm462_vm11, %v12898_v36 }
 0xa36   : > { %v12908_v59 = vsel %vm23816_vm13, %v12899_v5, %v12907_v57  ;;  %v12909_v32 = vrot.slane %v12907_v57, 4  ;;  %v12941_v19 = vshrl.u32 %v26756_v23, 16  ;;  %v12944_v16 = vshll.u32 %v26756_v23, 16 }
 0xa37   : > { %v12919_v50 = vrot.slane %v12917_v61, 4  ;;  %v12927_v24 = vor.u32 %v12926_v1, %v12923_v26  ;;  %v12933_v12 = vrot.slane %v12931_v31, 6  ;;  %v12936_v37 = vrot.slane %v12934_v45, 7  ;;  %13166 = vst.msk [vmem:[#allocation3 + $0x44] sm:$0xf] %vm462_vm11, %v12908_v59 }
 0xa38   : > { %v12918_v44 = vsel %vm23816_vm13, %v12909_v32, %v12917_v61  ;;  %v12943_v8 = vrot.slane %v12941_v19, 6  ;;  %v12946_v30 = vrot.slane %v12944_v16, 7  ;;  %v12951_v55 = vshrl.u32 %v26758_v58, 16 }
 0xa39   : > { %v12928_v62 = vsel %vm23816_vm13, %v12919_v50, %v12927_v24  ;;  %v12929_v49 = vrot.slane %v12927_v24, 4  ;;  %v12937_v34 = vor.u32 %v12936_v37, %v12933_v12  ;;  %v12954_v23 = vshll.u32 %v26758_v58, 16  ;;  %13167 = vst.msk [vmem:[#allocation3 + $0x48] sm:$0xf] %vm462_vm11, %v12918_v44 }
 0xa3a   : > { %v12947_v27 = vor.u32 %v12946_v30, %v12943_v8  ;;  %v12953_v4 = vrot.slane %v12951_v55, 6  ;;  %v12961_v40 = vshrl.u32 %v26760_v15, 16  ;;  %v12964_v41 = vshll.u32 %v26760_v15, 16  ;;  %13168 = vst.msk [vmem:[#allocation3 + $0x4c] sm:$0xf] %vm462_vm11, %v12928_v62 }
 0xa3b   : > { %v12938_v2 = vsel %vm23816_vm13, %v12929_v49, %v12937_v34  ;;  %v12939_v21 = vrot.slane %v12937_v34, 4  ;;  %v12956_v17 = vrot.slane %v12954_v23, 7  ;;  %v12971_v22 = vshrl.u32 %v26762_v48, 16 }
 0xa3c   : > { %v12949_v18 = vrot.slane %v12947_v27, 4  ;;  %v12963_v42 = vrot.slane %v12961_v40, 6  ;;  %v12966_v58 = vrot.slane %v12964_v41, 7  ;;  %v12974_v9 = vshll.u32 %v26762_v48, 16  ;;  %13169 = vst.msk [vmem:[#allocation3 + $0x50] sm:$0xf] %vm462_vm11, %v12938_v2 }
 0xa3d   : > { %v12948_v46 = vsel %vm23816_vm13, %v12939_v21, %v12947_v27  ;;  %v12957_v15 = vor.u32 %v12956_v17, %v12953_v4  ;;  %v12973_v51 = vrot.slane %v12971_v22, 6  ;;  %v12981_v7 = vshrl.u32 %v26764_v13, 16 }
 0xa3e   : > { %v12967_v56 = vor.u32 %v12966_v58, %v12963_v42  ;;  %v12976_v33 = vrot.slane %v12974_v9, 7  ;;  %v12984_v54 = vshll.u32 %v26764_v13, 16  ;;  %v12991_v36 = vshrl.u32 %v26766_v60, 16  ;;  %13170 = vst.msk [vmem:[#allocation3 + $0x54] sm:$0xf] %vm462_vm11, %v12948_v46 }
 0xa3f   : > { %v12958_v48 = vsel %vm23816_vm13, %v12949_v18, %v12957_v15  ;;  %v12959_v5 = vrot.slane %v12957_v15, 4  ;;  %v12983_v57 = vrot.slane %v12981_v7, 6  ;;  %v12994_v26 = vshll.u32 %v26766_v60, 16 }
 0xa40   : > { %v12969_v61 = vrot.slane %v12967_v56, 4  ;;  %v12977_v1 = vor.u32 %v12976_v33, %v12973_v51  ;;  %v12986_v31 = vrot.slane %v12984_v54, 7  ;;  %v12993_v45 = vrot.slane %v12991_v36, 6  ;;  %13171 = vst.msk [vmem:[#allocation3 + $0x58] sm:$0xf] %vm462_vm11, %v12958_v48 }
 0xa41   : > { %v12968_v13 = vsel %vm23816_vm13, %v12959_v5, %v12967_v56  ;;  %v12996_v59 = vrot.slane %v12994_v26, 7  ;;  %v13001_v32 = vshrl.u32 %v26768_v35, 16  ;;  %v13004_v19 = vshll.u32 %v26768_v35, 16  ;;  %v13149_v51 = vld [vmem:[#allocation3 + $0x8] sm:$0xe] }
 0xa42   : > { %v12978_v16 = vsel %vm23816_vm13, %v12969_v61, %v12977_v1  ;;  %v12979_v50 = vrot.slane %v12977_v1, 4  ;;  %v12987_v60 = vor.u32 %v12986_v31, %v12983_v57  ;;  %v13011_v24 = vshrl.u32 %v26770_v39, 16  ;;  %13172 = vst.msk [vmem:[#allocation3 + $0x5c] sm:$0xf] %vm462_vm11, %v12968_v13  ;;  %v26988_v57 = vld [vmem:[#allocation3 + $0x38] sm:$0xff]  }
 0xa43   : > { %v12997_v12 = vor.u32 %v12996_v59, %v12993_v45  ;;  %v13003_v37 = vrot.slane %v13001_v32, 6  ;;  %v13006_v44 = vrot.slane %v13004_v19, 7  ;;  %v13014_v8 = vshll.u32 %v26770_v39, 16  ;;  %13173 = vst.msk [vmem:[#allocation3 + $0x60] sm:$0xf] %vm462_vm11, %v12978_v16  ;;  %v26930_v32 = vld [vmem:[#allocation3 + $0x10] sm:$0xff]  }
 0xa44   : > { %v12988_v30 = vsel %vm23816_vm13, %v12979_v50, %v12987_v60  ;;  %v12989_v35 = vrot.slane %v12987_v60, 4  ;;  %v13013_v55 = vrot.slane %v13011_v24, 6  ;;  %v13021_v62 = vshrl.u32 %v26772_v47, 16 }
 0xa45   : > { %v12999_v49 = vrot.slane %v12997_v12, 4  ;;  %v13007_v34 = vor.u32 %v13006_v44, %v13003_v37  ;;  %v13016_v23 = vrot.slane %v13014_v8, 7  ;;  %v13024_v27 = vshll.u32 %v26772_v47, 16  ;;  %13174 = vst.msk [vmem:[#allocation3 + $0x64] sm:$0xf] %vm462_vm11, %v12988_v30 }
 0xa46   : > { %v12998_v4 = vsel %vm23816_vm13, %v12989_v35, %v12997_v12  ;;  %v13023_v39 = vrot.slane %v13021_v62, 6  ;;  %v13031_v40 = vshrl.u32 %v26774_v43, 16  ;;  %v13034_v41 = vshll.u32 %v26774_v43, 16 }
 0xa47   : > { %v13008_v2 = vsel %vm23816_vm13, %v12999_v49, %v13007_v34  ;;  %v13009_v21 = vrot.slane %v13007_v34, 4  ;;  %v13017_v17 = vor.u32 %v13016_v23, %v13013_v55  ;;  %v13026_v22 = vrot.slane %v13024_v27, 7  ;;  %13175 = vst.msk [vmem:[#allocation3 + $0x68] sm:$0xf] %vm462_vm11, %v12998_v4  ;;  %v26956_v27 = vld [vmem:[#allocation3 + $0x18] sm:$0xff]  }
 0xa48   : > { %v13033_v47 = vrot.slane %v13031_v40, 6  ;;  %v13036_v18 = vrot.slane %v13034_v41, 7  ;;  %v13041_v42 = vshrl.u32 %v26776_v14, 16  ;;  %v13044_v58 = vshll.u32 %v26776_v14, 16  ;;  %13176 = vst.msk [vmem:[#allocation3 + $0x6c] sm:$0xf] %vm462_vm11, %v13008_v2 }
 0xa49   : > { %v13018_v43 = vsel %vm23816_vm13, %v13009_v21, %v13017_v17  ;;  %v13019_v9 = vrot.slane %v13017_v17, 4  ;;  %v13027_v46 = vor.u32 %v13026_v22, %v13023_v39  ;;  %v13051_v15 = vshrl.u32 %v26778_v10, 16 }
 0xa4a   : > { %v13037_v7 = vor.u32 %v13036_v18, %v13033_v47  ;;  %v13043_v56 = vrot.slane %v13041_v42, 6  ;;  %v13046_v33 = vrot.slane %v13044_v58, 7  ;;  %v13054_v54 = vshll.u32 %v26778_v10, 16  ;;  %13177 = vst.msk [vmem:[#allocation3 + $0x70] sm:$0xf] %vm462_vm11, %v13018_v43 }
 0xa4b   : > { %v13028_v14 = vsel %vm23816_vm13, %v13019_v9, %v13027_v46  ;;  %v13029_v36 = vrot.slane %v13027_v46, 4  ;;  %v13053_v48 = vrot.slane %v13051_v15, 6  ;;  %v13061_v5 = vshrl.u32 %v26780_v28, 16 }
 0xa4c   : > { %v13039_v26 = vrot.slane %v13037_v7, 4  ;;  %v13047_v61 = vor.u32 %v13046_v33, %v13043_v56  ;;  %v13056_v1 = vrot.slane %v13054_v54, 7  ;;  %v13064_v10 = vshll.u32 %v26780_v28, 16  ;;  %13178 = vst.msk [vmem:[#allocation3 + $0x74] sm:$0xf] %vm462_vm11, %v13028_v14  ;;  %v26979_v54 = vld [vmem:[#allocation3 + $0x30] sm:$0xff]  }
 0xa4d   : > { %v13038_v31 = vsel %vm23816_vm13, %v13029_v36, %v13037_v7  ;;  %v13063_v45 = vrot.slane %v13061_v5, 6  ;;  %v13101_v13 = vshrl.u32 %v26782_v63, 16  ;;  %v13104_v59 = vshll.u32 %v26782_v63, 16  ;;  %v22524_v7 = vld [vmem:[%s28554_s6 + $0x8] sm:$0xff]   ;;  %v22626_v14 = vld [vmem:[%s28554_s6] sm:$0xff]  }
 0xa4e   : > { %v13048_v19 = vsel %vm23816_vm13, %v13039_v26, %v13047_v61  ;;  %v13049_v16 = vrot.slane %v13047_v61, 4  ;;  %v13057_v50 = vor.u32 %v13056_v1, %v13053_v48  ;;  %v13066_v60 = vrot.slane %v13064_v10, 7  ;;  %13179 = vst.msk [vmem:[#allocation3 + $0x78] sm:$0xf] %vm462_vm11, %v13038_v31  ;;  %v22529_v26 = vld [vmem:[%s28554_s6 + $0x10] sm:$0xff]   ;;  %v26994_v31 = vld [vmem:[#allocation3 + $0x40] sm:$0xff]  }
 0xa4f   : > { %v13099_v28 = vrot.slane %v26512_v25, 4  ;;  %v13103_v24 = vrot.slane %v13101_v13, 6  ;;  %v13106_v12 = vrot.slane %v13104_v59, 7  ;;  %v13150_v37 = vsel %vm26920_vm15, %v26784_v20, %v13149_v51  ;;  %13180 = vst.msk [vmem:[#allocation3 + $0x7c] sm:$0xf] %vm462_vm11, %v13048_v19  ;;  %v26972_v51 = vld [vmem:[#allocation3 + $0x28] sm:$0xff]  }
 0xa50   : > { %v13058_v63 = vsel %vm23816_vm13, %v13049_v16, %v13057_v50  ;;  %v13059_v44 = vrot.slane %v13057_v50, 4  ;;  %v13067_v8 = vor.u32 %v13066_v60, %v13063_v45  ;;  %13151 = vst [vmem:[#allocation3 + $0x8] sm:$0xe] %v13150_v37  ;;  %v13342_v35 = vshll.u32 %v26390_v11, 16  ;;  %v13189_v25 = vld [vmem:[#allocation3 + $0x98] sm:$0x3] }
 0xa51   : > { %v13107_v30 = vor.u32 %v13106_v12, %v13103_v24  ;;  %13181 = vst.msk [vmem:[#allocation3 + $0x80] sm:$0xf] %vm462_vm11, %v13058_v63  ;;  %v13355_v62 = vshll.u32 %v26930_v32, 16  ;;  %v13340_v39 = vshrl.u32 %v26390_v11, 16  ;;  %v13359_v21 = vshrl.u32 %v26930_v32, 16  ;;  %v22534_v45 = vld [vmem:[%s28554_s6 + $0x18] sm:$0xff]  }
 0xa52   : > { %v13068_v20 = vsel %vm23816_vm13, %v13059_v44, %v13067_v8  ;;  %v13069_v55 = vrot.slane %v13067_v8, 4  ;;  %v13344_v40 = vrot.slane %v13342_v35, 1  ;;  %v13363_v17 = vshll.u32 %v26956_v27, 16  ;;  %v27000_v19 = vld [vmem:[#allocation3 + $0x48] sm:$0xff]   ;;  %v27003_v50 = vld [vmem:[#allocation3 + $0x50] sm:$0xff]   ;;  %v27005_v60 = vld [vmem:[#allocation3 + $0x58] sm:$0xff]  }
 0xa53   : > { %v13108_v49 = vsel %vm23816_vm13, %v13099_v28, %v13107_v30  ;;  %v13109_v34 = vrot.slane %v13107_v30, 4  ;;  %13182 = vst.msk [vmem:[#allocation3 + $0x84] sm:$0xf] %vm462_vm11, %v13068_v20  ;;  %v13357_v41 = vrot.slane %v13355_v62, 1  ;;  %v13371_v43 = vshll.u32 %v26964_v29, 16  ;;  %v27007_v28 = vld [vmem:[#allocation3 + $0x60] sm:$0xff]  }
 0xa54   : > { %v13078_v23 = vsel %vm23816_vm13, %v13069_v55, %v26506_v6  ;;  %13186 = vst.msk [vmem:[#allocation3 + $0x94] sm:$0xf] %vm462_vm11, %v13108_v49  ;;  %v13345_v6 = vor.u32 %v13344_v40, %v13340_v39  ;;  %v13365_v58 = vrot.slane %v13363_v17, 1  ;;  %v13367_v36 = vshrl.u32 %v26956_v27, 16  ;;  %v27015_v63 = vld [vmem:[%s28554_s6 + $0x40] sm:$0xff]   ;;  %v27021_v35 = vld [vmem:[#allocation3 + $0x68] sm:$0xff]  }
 0xa55   : > { %13183 = vst.msk [vmem:[#allocation3 + $0x88] sm:$0xf] %vm462_vm11, %v13078_v23  ;;  %v13190_v4 = vsel %vm13188_vm9, %v13109_v34, %v13189_v25  ;;  %v13361_v47 = vor.u32 %v13359_v21, %v13357_v41  ;;  %v13373_v33 = vrot.slane %v13371_v43, 1  ;;  %v13375_v48 = vshrl.u32 %v26964_v29, 16  ;;  %v27024_v55 = vld [vmem:[#allocation3 + $0x70] sm:$0xff]  }
 0xa56   : > { %13191 = vst [vmem:[#allocation3 + $0x98] sm:$0x3] %v13190_v4  ;;  %v13379_v5 = vshll.u32 %v26972_v51, 16  ;;  %v13369_v61 = vor.u32 %v13367_v36, %v13365_v58  ;;  %v13387_v10 = vshll.u32 %v26979_v54, 16  ;;  %v13395_v59 = vshll.u32 %v26988_v57, 16  ;;  %v27027_v4 = vld [vmem:[#allocation3 + $0x78] sm:$0xff]  }
 0xa57   : > { %v26960_v2 = vld [vmem:[#allocation3 + $0x8] sm:$0xff]   ;;  %v13366_v15 = vsel %vm652_vm1, %v13361_v47, %v13365_v58  ;;  %v13377_v1 = vor.u32 %v13375_v48, %v13373_v33  ;;  %v13403_v37 = vshll.u32 %v26994_v31, 16  ;;  %v13383_v44 = vshrl.u32 %v26972_v51, 16 }
 0xa58   : > { %v13347_v22 = vshll.u32 %v26960_v2, 16  ;;  %v13351_v42 = vshrl.u32 %v26960_v2, 16  ;;  %v13381_v13 = vrot.slane %v13379_v5, 1  ;;  %v13374_v16 = vsel %vm652_vm1, %v13369_v61, %v13373_v33 }
 0xa59   : > { %v13389_v12 = vrot.slane %v13387_v10, 1  ;;  %v13391_v8 = vshrl.u32 %v26979_v54, 16  ;;  %v13399_v30 = vshrl.u32 %v26988_v57, 16  ;;  %v13397_v25 = vrot.slane %v13395_v59, 1 }
 0xa5a   : > { %v13349_v18 = vrot.slane %v13347_v22, 1  ;;  %v13382_v24 = vsel %vm652_vm1, %v13377_v1, %v13381_v13  ;;  %v13407_v20 = vshrl.u32 %v26994_v31, 16  ;;  %v13385_v62 = vor.u32 %v13383_v44, %v13381_v13 }
 0xa5b   : > { %v13393_v49 = vor.u32 %v13391_v8, %v13389_v12  ;;  %v13405_v34 = vrot.slane %v13403_v37, 1  ;;  %v13411_v23 = vshll.u32 %v27000_v19, 16  ;;  %v13415_v39 = vshrl.u32 %v27000_v19, 16 }
 0xa5c   : > { %v13350_v9 = vsel %vm652_vm1, %v13345_v6, %v13349_v18  ;;  %v13353_v46 = vor.u32 %v13351_v42, %v13349_v18  ;;  %v13419_v40 = vshll.u32 %v27003_v50, 16  ;;  %v13435_v21 = vshll.u32 %v27007_v28, 16  ;;  %v27034_v6 = vld [vmem:[#allocation3 + $0x80] sm:$0xff]  }
 0xa5d   : > { %20666 = vmatprep.mubr.msk.bf16.mxu0 %vm825_vm0, %v13350_v9  ;;  %v13443_v17 = vshll.u32 %v27021_v35, 16  ;;  %v13390_v22 = vsel %vm652_vm1, %v13385_v62, %v13389_v12  ;;  %v13398_v47 = vsel %vm652_vm1, %v13393_v49, %v13397_v25  ;;  %v13413_v18 = vrot.slane %v13411_v23, 1 }
 0xa5e   : > { %v13358_v56 = vsel %vm652_vm1, %v13353_v46, %v13357_v41  ;;  %v13427_v41 = vshll.u32 %v27005_v60, 16  ;;  %v13423_v42 = vshrl.u32 %v27003_v50, 16  ;;  %v13451_v58 = vshll.u32 %v27024_v55, 16 }
 0xa5f   : > { %20667 = vmatmul.mubr.msk.bf16.vlgmr.msra.gmra.mrb[36].mxu0 %vm825_vm0, %v13358_v56  ;;  %v13421_v43 = vrot.slane %v13419_v40, 1  ;;  %v13431_v46 = vshrl.u32 %v27005_v60, 16  ;;  %v27046_v56 = vld [vmem:[#allocation3 + $0xc] sm:$0xf]  ;;  %v13445_v33 = vrot.slane %v13443_v17, 1  ;;  %v13401_v36 = vor.u32 %v13399_v30, %v13397_v25  ;;  %v27066_v40 = vld [vmem:[#allocation3 + $0x18] sm:$0xff]  }
 0xa60   : > { %20670 = vmatprep.mubr.msk.bf16.mxu0 %vm825_vm0, %v13366_v15  ;;  %20703 = vmatpush3.bf16.msra.mxu0 %v22626_v14  ;;  %v13429_v9 = vrot.slane %v13427_v41, 1  ;;  %v13437_v15 = vrot.slane %v13435_v21, 1  ;;  %v13459_v14 = vshll.u32 %v27027_v4, 16  ;;  %v13439_v48 = vshrl.u32 %v27007_v28, 16 }
 0xa61   : > { %20704 = vmatprep.subr.bf16.mxu0 %v22524_v7  ;;  %v13467_v5 = vshll.u32 %v27034_v6, 16  ;;  %v13417_v61 = vor.u32 %v13415_v39, %v13413_v18  ;;  %v13447_v1 = vshrl.u32 %v27021_v35, 16  ;;  %v13453_v10 = vrot.slane %v13451_v58, 1  ;;  %v27085_v58 = vld [vmem:[#allocation3 + $0x28] sm:$0xff]  }
 0xa62   : > { %v13433_v13 = vor.u32 %v13431_v46, %v13429_v9  ;;  %v13441_v59 = vor.u32 %v13439_v48, %v13437_v15  ;;  %v13455_v12 = vshrl.u32 %v27024_v55, 16  ;;  %v13461_v37 = vrot.slane %v13459_v14, 1 }
 0xa63   : > { %v13406_v8 = vsel %vm652_vm1, %v13401_v36, %v13405_v34  ;;  %v27057_v30 = vrot.slane %v13467_v5, 1  ;;  %v13422_v49 = vsel %vm652_vm1, %v13417_v61, %v13421_v43  ;;  %v13463_v39 = vshrl.u32 %v27027_v4, 16  ;;  %v27098_v36 = vld [vmem:[#allocation3 + $0x30] sm:$0xff]   ;;  %v27102_v61 = vld [vmem:[#allocation3 + $0x38] sm:$0xff]  }
 0xa64   : > { %20705 = vmatpush3.bf16.msra.mxu0 %v22524_v7  ;;  %v27044_v7 = vld [vmem:[#allocation3 + $0x88] sm:$0xff]   ;;  %v13457_v23 = vor.u32 %v13455_v12, %v13453_v10  ;;  %v27071_v41 = vsel %vm652_vm1, %v13433_v13, %v13437_v15  ;;  %v27074_v21 = vsel %vm652_vm1, %v13441_v59, %v13445_v33  ;;  %v13471_v17 = vshrl.u32 %v27034_v6, 16 }
 0xa65   : > { %20706 = vmatprep.subr.bf16.mxu0 %v22529_v26  ;;  %v13475_v25 = vshll.u32 %v27044_v7, 16  ;;  %v14836_v12 = vshrl.u32 %v27085_v58, 16 }
 0xa66   : > { %v27096_v14 = vsel %vm652_vm1, %v13457_v23, %v13461_v37  ;;  %v27110_v23 = vld [vmem:[#allocation3 + $0x40] sm:$0xff]  }
 0xa67   : > { %20671 = vmatmul.mubr.msk.bf16.gmra.mrb[40].mxu0 %vm825_vm0, %v13374_v16  ;;  %v14320_v16 = vld [vmem:[#allocation3 + $0x8] sm:$0xe]  ;;  %v27091_v46 = vrot.slane %v13475_v25, 1  ;;  %v14863_v53 = vshrl.u32 %v27110_v23, 16 }
 0xa68   : > { %20674 = vmatprep.mubr.msk.bf16.mxu0 %vm825_vm0, %v13382_v24  ;;  %20707 = vmatpush3.bf16.msra.mxu0 %v22529_v26  ;;  %v13409_v26 = vor.u32 %v13407_v20, %v13405_v34  ;;  %v13449_v24 = vor.u32 %v13447_v1, %v13445_v33  ;;  %v27054_v44 = vcombine.low %v14320_v16, %v27046_v56  ;;  %v27060_v20 = vld [vmem:[#allocation3 + $0x10] sm:$0xff]  }
 0xa69   : > { %20708 = vmatprep.subr.bf16.mxu0 %v22534_v45  ;;  %v14809_v33 = vshrl.u32 %v27060_v20, 16  ;;  %v14812_v5 = vshll.u32 %v27060_v20, 16 }
 0xa6a   : > { %v13414_v62 = vsel %vm652_vm1, %v13409_v26, %v13413_v18  ;;  %v27082_v18 = vor.u32 %v13463_v39, %v13461_v37  ;;  %v14804_v15 = vshll.u32 %v27054_v44, 16  ;;  %v14818_v26 = vshrl.u32 %v27066_v40, 16 }
 0xa6b   : > { %v14814_v59 = vrot.slane %v14812_v5, 2 }
 0xa6c   : > { %20709 = vmatpush3.bf16.msra.mxu0 %v22534_v45  ;;  %v13425_v45 = vor.u32 %v13423_v42, %v13421_v43  ;;  %v14801_v43 = vshrl.u32 %v27054_v44, 16  ;;  %v14806_v1 = vrot.slane %v14804_v15, 2  ;;  %v14820_v16 = vrot.slane %v14818_v26, 1 }
 0xa6d   : > { %20746 = vmatprep.subr.bf16.mxu0 %v27015_v63  ;;  %v14845_v15 = vshrl.u32 %v27098_v36, 16 }
 0xa6e   : > { %v13430_v34 = vsel %vm652_vm1, %v13425_v45, %v13429_v9  ;;  %v27089_v9 = vor.u32 %v13471_v17, %v27057_v30  ;;  %v14803_v48 = vrot.slane %v14801_v43, 1  ;;  %v14821_v45 = vshll.u32 %v27066_v40, 16 }
 0xa6f   : > { %20675 = vmatmul.mubr.msk.bf16.gmra.mrb[44].mxu0 %vm825_vm0, %v13390_v22  ;;  %v27077_v22 = vld [vmem:[#allocation3 + $0x20] sm:$0xff]   ;;  %v14838_v43 = vrot.slane %v14836_v12, 1 }
 0xa70   : > { %20678 = vmatprep.mubr.msk.bf16.mxu0 %vm825_vm0, %v13398_v47  ;;  %v27080_v47 = vsel %vm652_vm1, %v13449_v24, %v13453_v10  ;;  %v14811_v10 = vrot.slane %v14809_v33, 1  ;;  %v14827_v13 = vshrl.u32 %v27077_v22, 16  ;;  %v14830_v24 = vshll.u32 %v27077_v22, 16  ;;  %v27114_v33 = vld [vmem:[#allocation3 + $0x48] sm:$0xff]  }
 0xa71   : > { %v14807_v37 = vor.u32 %v14806_v1, %v14803_v48  ;;  %v14848_v48 = vshll.u32 %v27098_v36, 16  ;;  %v14854_v1 = vshrl.u32 %v27102_v61, 16 }
 0xa72   : > { %v14829_v25 = vrot.slane %v14827_v13, 1  ;;  %v14815_v39 = vor.u32 %v14814_v59, %v14811_v10  ;;  %v14832_v17 = vrot.slane %v14830_v24, 2  ;;  %v14847_v13 = vrot.slane %v14845_v15, 1 }
 0xa73   : > { %v14857_v59 = vshll.u32 %v27102_v61, 16  ;;  %v14850_v12 = vrot.slane %v14848_v48, 2  ;;  %v14875_v15 = vshll.u32 %v27114_v33, 16 }
 0xa74   : > { %v14833_v10 = vor.u32 %v14832_v17, %v14829_v25  ;;  %v27134_v25 = vld [vmem:[#allocation3 + $0x60] sm:$0xff]  }
 0xa75   : > { %v14859_v42 = vrot.slane %v14857_v59, 2  ;;  %v14877_v52 = vrot.slane %v14875_v15, 2 }
 0xa77   : > { %20679 = vmatmul.mubr.msk.bf16.gmra.mrb[48].mxu0 %vm825_vm0, %v13406_v8  ;;  %v14823_v8 = vrot.slane %v14821_v45, 2  ;;  %v27118_v45 = vld [vmem:[#allocation3 + $0x50] sm:$0xff]  }
 0xa78   : > { %20682 = vmatprep.mubr.msk.bf16.mxu0 %vm825_vm0, %v13414_v62  ;;  %v14839_v62 = vshll.u32 %v27085_v58, 16  ;;  %v14881_v59 = vshrl.u32 %v27118_v45, 16 }
 0xa79   : > { %v14824_v5 = vor.u32 %v14823_v8, %v14820_v16  ;;  %v14856_v16 = vrot.slane %v14854_v1, 1  ;;  %v27127_v8 = vld [vmem:[#allocation3 + $0x58] sm:$0xff]  }
 0xa7a   : > { %v14841_v26 = vrot.slane %v14839_v62, 2  ;;  %v14893_v15 = vshll.u32 %v27127_v8, 16 }
 0xa7b   : > { %v27125_v24 = vsel %vm2116_vm3, %v14815_v39, %v14824_v5  ;;  %v27130_v62 = vsel %vm2116_vm3, %v14824_v5, %v14833_v10  ;;  %v14860_v48 = vor.u32 %v14859_v42, %v14856_v16  ;;  %v14865_v5 = vrot.slane %v14863_v53, 1 }
 0xa7c   : > { %28943 = vst [vmem:[#allocation48_spill] sm:$0xff] %v27125_v24  ;;  %28944 = vst [vmem:[#allocation50_spill] sm:$0xff] %v27130_v62  ;;  %v14883_v53 = vrot.slane %v14881_v59, 1  ;;  %v14890_v16 = vshrl.u32 %v27127_v8, 16  ;;  %v27167_v59 = vld [vmem:[#allocation3 + $0x80] sm:$0xff]  }
 0xa7d   : > { %28951 = vst [vmem:[#allocation45_spill] sm:$0xff] %v27167_v59 }
 0xa7f   : > { %20683 = vmatmul.mubr.msk.bf16.gmra.mrb[52].mxu0 %vm825_vm0, %v13422_v49  ;;  %v27121_v49 = vsel %vm2116_vm3, %v14807_v37, %v14815_v39  ;;  %v14866_v37 = vshll.u32 %v27110_v23, 16  ;;  %v14851_v39 = vor.u32 %v14850_v12, %v14847_v13  ;;  %v27150_v13 = vld [vmem:[#allocation3 + $0x70] sm:$0xff]  }
 0xa80   : > { %20686 = vmatprep.mubr.msk.bf16.mxu0 %vm825_vm0, %v13430_v34  ;;  %28942 = vst [vmem:[#allocation46_spill] sm:$0xff] %v27121_v49  ;;  %v14842_v34 = vor.u32 %v14841_v26, %v14838_v43  ;;  %v14872_v43 = vshrl.u32 %v27114_v33, 16  ;;  %v27141_v26 = vld [vmem:[#allocation3 + $0x68] sm:$0xff]   ;;  %28947 = vst [vmem:[#allocation41_spill] sm:$0xff] %v27150_v13  ;;  %v14920_v24 = vshll.u32 %v27150_v13, 16 }
 0xa81   : > { %v14868_v1 = vrot.slane %v14866_v37, 2  ;;  %v27153_v12 = vsel %vm2116_vm3, %v14851_v39, %v14860_v48 }
 0xa82   : > { %v27137_v17 = vsel %vm2116_vm3, %v14833_v10, %v14842_v34  ;;  %v27145_v3 = vsel %vm2116_vm3, %v14842_v34, %v14851_v39  ;;  %v14874_v0 = vrot.slane %v14872_v43, 1  ;;  %v14884_v10 = vshll.u32 %v27118_v45, 16  ;;  %28948 = vst [vmem:[#allocation42_spill] sm:$0xff] %v27153_v12  ;;  %v27158_v34 = vld [vmem:[#allocation3 + $0x78] sm:$0xff]  }
 0xa83   : > { %28945 = vst [vmem:[#allocation52_spill] sm:$0xff] %v27137_v17  ;;  %28946 = vst [vmem:[#allocation54_spill] sm:$0xff] %v27145_v3  ;;  %v14869_v42 = vor.u32 %v14868_v1, %v14865_v5  ;;  %v14892_v39 = vrot.slane %v14890_v16, 1  ;;  %v14902_v5 = vshll.u32 %v27134_v25, 16  ;;  %v14908_v1 = vshrl.u32 %v27141_v26, 16 }
 0xa84   : > { %28949 = vst [vmem:[#allocation43_spill] sm:$0xff] %v27158_v34  ;;  %v14878_v37 = vor.u32 %v14877_v52, %v14874_v0  ;;  %v14886_v43 = vrot.slane %v14884_v10, 2  ;;  %v14895_v52 = vrot.slane %v14893_v15, 2  ;;  %v14911_v17 = vshll.u32 %v27141_v26, 16 }
 0xa85   : > { %v27163_v38 = vsel %vm2116_vm3, %v14860_v48, %v14869_v42  ;;  %v14904_v10 = vrot.slane %v14902_v5, 2  ;;  %v14910_v3 = vrot.slane %v14908_v1, 1  ;;  %v14917_v48 = vshrl.u32 %v27150_v13, 16 }
 0xa86   : > { %28950 = vst [vmem:[#allocation44_spill] sm:$0xff] %v27163_v38  ;;  %v14887_v12 = vor.u32 %v14886_v43, %v14883_v53  ;;  %v27174_v38 = vld [vmem:[#allocation3 + $0x88] sm:$0xff]   ;;  %v14896_v62 = vor.u32 %v14895_v52, %v14892_v39  ;;  %v14913_v43 = vrot.slane %v14911_v17, 2  ;;  %v14922_v1 = vrot.slane %v14920_v24, 2 }
 0xa87   : > { %20687 = vmatmul.mubr.msk.bf16.gmra.mrb[56].mxu0 %vm825_vm0, %v27071_v41  ;;  %v14899_v41 = vshrl.u32 %v27134_v25, 16  ;;  %28953 = vst [vmem:[#allocation49_spill] sm:$0xff] %v27174_v38  ;;  %v14919_v15 = vrot.slane %v14917_v48, 1  ;;  %v27190_v39 = vld [vmem:[#allocation3 + $0x90] ss:$0 sps:$4 sm:$0x11]  }
 0xa88   : > { %20690 = vmatprep.mubr.msk.bf16.mxu0 %vm825_vm0, %v27074_v21  ;;  %v27170_v21 = vsel %vm2116_vm3, %v14869_v42, %v14878_v37  ;;  %v27177_v16 = vsel %vm2116_vm3, %v14878_v37, %v14887_v12  ;;  %v14926_v42 = vshrl.u32 %v27158_v34, 16  ;;  %v27185_v5 = vsel %vm2116_vm3, %v14887_v12, %v14896_v62 }
 0xa89   : > { %28952 = vst [vmem:[#allocation47_spill] sm:$0xff] %v27170_v21  ;;  %v14901_v0 = vrot.slane %v14899_v41, 1  ;;  %28954 = vst [vmem:[#allocation51_spill] sm:$0xff] %v27177_v16  ;;  %v27181_v21 = vld [vmem:[#allocation3 + $0x90] sm:$0xff]   ;;  %v14929_v41 = vshll.u32 %v27158_v34, 16  ;;  %v14935_v37 = vshrl.u32 %v27167_v59, 16  ;;  %v14923_v12 = vor.u32 %v14922_v1, %v14919_v15 }
 0xa8a   : > { %28955 = vst [vmem:[#allocation53_spill] sm:$0xff] %v27181_v21  ;;  %28956 = vst [vmem:[#allocation55_spill] sm:$0xff] %v27185_v5  ;;  %v14928_v49 = vrot.slane %v14926_v42, 1  ;;  %v14944_v48 = vshrl.u32 %v27174_v38, 16  ;;  %v14947_v42 = vshll.u32 %v27174_v38, 16  ;;  %v13483_v15 = vshll.u32 %v27190_v39, 16 }
 0xa8b   : > { %v14905_v53 = vor.u32 %v14904_v10, %v14901_v0  ;;  %v14914_v0 = vor.u32 %v14913_v43, %v14910_v3  ;;  %v14931_v17 = vrot.slane %v14929_v41, 2  ;;  %v14938_v10 = vshll.u32 %v27167_v59, 16 }
 0xa8c   : > { %v14937_v24 = vrot.slane %v14935_v37, 1  ;;  %v14946_v43 = vrot.slane %v14944_v48, 1  ;;  %v14949_v41 = vrot.slane %v14947_v42, 2  ;;  %v13478_v48 = vsel %vm652_vm1, %v27089_v9, %v27091_v46 }
 0xa8d   : > { %v27193_v52 = vsel %vm2116_vm3, %v14896_v62, %v14905_v53  ;;  %v14932_v5 = vor.u32 %v14931_v17, %v14928_v49  ;;  %v14940_v16 = vrot.slane %v14938_v10, 2  ;;  %v14953_v62 = vshrl.u32 %v27181_v21, 16 }
 0xa8e   : > { %28957 = vst [vmem:[#allocation56_spill] sm:$0xff] %v27193_v52  ;;  %v27205_v3 = vsel %vm2116_vm3, %v14914_v0, %v14923_v12  ;;  %v13470_v49 = vsel %vm652_vm1, %v27082_v18, %v27057_v30  ;;  %v14950_v17 = vor.u32 %v14949_v41, %v14946_v43  ;;  %v15281_v43 = vrot.slane %v27085_v58, 2 }
 0xa8f   : > { %20691 = vmatmul.mubr.msk.bf16.gmra.mrb[60].mxu0 %vm825_vm0, %v27080_v47  ;;  %v27201_v47 = vsel %vm2116_vm3, %v14905_v53, %v14914_v0  ;;  %28959 = vst [vmem:[#allocation58_spill] sm:$0xff] %v27205_v3  ;;  %v27210_v1 = vsel %vm2116_vm3, %v14923_v12, %v14932_v5  ;;  %v14941_v37 = vor.u32 %v14940_v16, %v14937_v24  ;;  %v14955_v52 = vrot.slane %v14953_v62, 1  ;;  %v15261_v53 = vld [vmem:[#allocation3 + $0x8] sm:$0xc] }
 0xa90   : > { %20694 = vmatprep.mubr.msk.bf16.mxu0 %vm825_vm0, %v27096_v14  ;;  %28958 = vst [vmem:[#allocation57_spill] sm:$0xff] %v27201_v47  ;;  %v14956_v14 = vshll.u32 %v27181_v21, 16  ;;  %28960 = vst [vmem:[#allocation59_spill] sm:$0xff] %v27210_v1  ;;  %v18578_v0 = vcombine.low %v15261_v53, %v27046_v56  ;;  %v15275_v12 = vrot.slane %v27060_v20, 2  ;;  %v15277_v16 = vrot.slane %v27066_v40, 2 }
 0xa91   : > { %v27220_v42 = vsel %vm2116_vm3, %v14932_v5, %v14941_v37  ;;  %v28962_v24 = vshrl.u32 %v27044_v7, 16  ;;  %v27228_v30 = vsel %vm2116_vm3, %v14941_v37, %v14950_v17  ;;  %v15279_v5 = vrot.slane %v27077_v22, 2 }
 0xa92   : > { %v14958_v10 = vrot.slane %v14956_v14, 2  ;;  %28961 = vst [vmem:[#allocation60_spill] sm:$0xff] %v27220_v42  ;;  %28963 = vst [vmem:[#allocation69_spill] sm:$0xff] %v27228_v30  ;;  %v15274_v56 = vrot.slane %v18578_v0, 2  ;;  %v27234_v9 = vsel %vm2591_vm4, %v15275_v12, %v15277_v16  ;;  %v15283_v41 = vrot.slane %v27098_v36, 2 }
 0xa93   : > { %v13481_v62 = vor.u32 %v28962_v24, %v27091_v46  ;;  %28965 = vst [vmem:[#allocation63_spill] sm:$0xff] %v27234_v9  ;;  %v13485_v46 = vrot.slane %v13483_v15, 1  ;;  %v15285_v37 = vrot.slane %v27102_v61, 2  ;;  %v27249_v53 = vsel %vm2591_vm4, %v15277_v16, %v15279_v5  ;;  %v27264_v24 = vld [vmem:[#allocation3 + $0x98] ss:$0 sps:$4 sm:$0x33]  }
 0xa94   : > { %v27230_v18 = vor.u32 %v14958_v10, %v14955_v52  ;;  %v27245_v52 = vsel %vm2591_vm4, %v15274_v56, %v15275_v12  ;;  %28968 = vst [vmem:[#allocation65_spill] sm:$0xff] %v27249_v53  ;;  %v27255_v10 = vsel %vm2591_vm4, %v15281_v43, %v15283_v41  ;;  %v15287_v15 = vrot.slane %v27110_v23, 2  ;;  %28972 = vst [vmem:[#allocation70_spill] sm:$0xff] %v27264_v24 }
 0xa95   : > { %28967 = vst [vmem:[#allocation64_spill] sm:$0xff] %v27245_v52  ;;  %28970 = vst [vmem:[#allocation67_spill] sm:$0xff] %v27255_v10  ;;  %v13486_v0 = vsel %vm652_vm1, %v13481_v62, %v13485_v46  ;;  %v15291_v12 = vrot.slane %v27118_v45, 2  ;;  %v15293_v56 = vrot.slane %v27127_v8, 2  ;;  %v15299_v46 = vrot.slane %v27150_v13, 2 }
 0xa96   : > { %28964 = vst [vmem:[#allocation62_spill] sm:$0xff] %v27230_v18  ;;  %v27242_v14 = vsel %vm2116_vm3, %v14950_v17, %v27230_v18  ;;  %v27260_v17 = vsel %vm2591_vm4, %v15283_v41, %v15285_v37  ;;  %v27267_v16 = vsel %vm2591_vm4, %v15285_v37, %v15287_v15  ;;  %vm503_vm1 = vcmask 518144  }
 0xa97   : > { %20695 = vmatmul.mubr.msk.bf16.gmra.mrb[64].mxu0 %vm825_vm0, %v13470_v49  ;;  %28966 = vst [vmem:[#allocation61_spill] sm:$0xff] %v27242_v14  ;;  %v27252_v49 = vsel %vm2591_vm4, %v15279_v5, %v15281_v43  ;;  %28971 = vst [vmem:[#allocation68_spill] sm:$0xff] %v27260_v17  ;;  %v15295_v5 = vrot.slane %v27134_v25, 2  ;;  %v15297_v43 = vrot.slane %v27141_v26, 2  ;;  %v15301_v17 = vrot.slane %v27158_v34, 2  ;;  %v22541_v14 = vld [vmem:[%s28554_s6 + $0x58] sm:$0xff]  }
 0xa98   : > { %20698 = vmatprep.mubr.msk.bf16.mxu0 %vm825_vm0, %v13478_v48  ;;  %28969 = vst [vmem:[#allocation66_spill] sm:$0xff] %v27252_v49  ;;  %v15289_v48 = vrot.slane %v27114_v33, 2  ;;  %28973 = vst [vmem:[#allocation71_spill] sm:$0xff] %v27267_v16  ;;  %v27281_v10 = vsel %vm2591_vm4, %v15291_v12, %v15293_v56  ;;  %v15303_v49 = vrot.slane %v27167_v59, 2 }
 0xa99   : > { %28976 = vst [vmem:[#allocation74_spill] sm:$0xff] %v27281_v10  ;;  %v27284_v37 = vsel %vm2591_vm4, %v15293_v56, %v15295_v5  ;;  %v27287_v16 = vsel %vm2591_vm4, %v15295_v5, %v15297_v43  ;;  %v15309_v56 = vrot.slane %v27264_v24, 2 }
 0xa9a   : > { %v27273_v62 = vsel %vm2591_vm4, %v15287_v15, %v15289_v48  ;;  %v27276_v41 = vsel %vm2591_vm4, %v15289_v48, %v15291_v12  ;;  %28977 = vst [vmem:[#allocation75_spill] sm:$0xff] %v27284_v37  ;;  %28978 = vst [vmem:[#allocation76_spill] sm:$0xff] %v27287_v16  ;;  %v27291_v15 = vsel %vm2591_vm4, %v15297_v43, %v15299_v46  ;;  %v27347_v16 = vld [vmem:[#allocation3 + $0x40] sm:$0xff]  }
 0xa9b   : > { %28974 = vst [vmem:[#allocation72_spill] sm:$0xff] %v27273_v62  ;;  %28975 = vst [vmem:[#allocation73_spill] sm:$0xff] %v27276_v41  ;;  %v27294_v48 = vsel %vm2591_vm4, %v15299_v46, %v15301_v17  ;;  %v15305_v41 = vrot.slane %v27174_v38, 2  ;;  %v15307_v62 = vrot.slane %v27181_v21, 2  ;;  %v27300_v12 = vsel %vm2591_vm4, %v15301_v17, %v15303_v49 }
 0xa9c   : > { %28979 = vst [vmem:[#allocation77_spill] sm:$0xff] %v27291_v15  ;;  %28980 = vst [vmem:[#allocation78_spill] sm:$0xff] %v27294_v48  ;;  %v15602_v48 = vld [vmem:[#allocation3 + $0x10] sm:$0xc]  ;;  %v27314_v15 = vld [vmem:[#allocation3 + $0x14] sm:$0xf] }
 0xa9d   : > { %28981 = vst [vmem:[#allocation79_spill] sm:$0xff] %v27300_v12  ;;  %v27306_v5 = vsel %vm2591_vm4, %v15303_v49, %v15305_v41  ;;  %v27309_v43 = vsel %vm2591_vm4, %v15305_v41, %v15307_v62  ;;  %v27312_v46 = vsel %vm2591_vm4, %v15307_v62, %v15309_v56  ;;  %v27320_v17 = vcombine.low %v15602_v48, %v27314_v15  ;;  %v27324_v49 = vld [vmem:[#allocation3 + $0x20] sm:$0xff]   ;;  %v27328_v41 = vld [vmem:[#allocation3 + $0x28] sm:$0xff]   ;;  %v27336_v48 = vld [vmem:[#allocation3 + $0x30] sm:$0xff]  }
 0xa9e   : > { %28982 = vst [vmem:[#allocation80_spill] sm:$0xff] %v27306_v5  ;;  %28983 = vst [vmem:[#allocation81_spill] sm:$0xff] %v27309_v43  ;;  %v22540_v62 = vld [vmem:[%s28554_s6 + $0x50] sm:$0xff]   ;;  %v28986_v56 = vmov 0   ;;  %v27342_v5 = vld [vmem:[#allocation3 + $0x38] sm:$0xff]   ;;  %v16103_v12 = vshll.u32 %v27324_v49, 16 }
 0xa9f   : > { %20699 = vmatmul.mubr.msk.bf16.gmra.mrb[68].mxu0 %vm825_vm0, %v13486_v0  ;;  %28984 = vst [vmem:[#allocation83_spill] sm:$0xff] %v27312_v46  ;;  %v22539_v0 = vld [vmem:[%s28554_s6 + $0x48] sm:$0xff]   ;;  %28985 = vst [vmem:[#allocation82_spill] sm:$0xff] %v27320_v17  ;;  %v16083_v46 = vshrl.u32 %v27320_v17, 16  ;;  %v16112_v18 = vshll.u32 %v27328_v41, 16  ;;  %v16118_v42 = vshrl.u32 %v27336_v48, 16 }
 0xaa0   : > { %20710 = vmatprep.mubr.msk.bf16.mxu0 %vm825_vm0, %v26390_v11  ;;  %v27322_v11 = vld [vmem:[#allocation3 + $0x18] sm:$0xff]   ;;  %504 = vst.msk [vmem:[#allocation3 + $0xa0] sm:$0x7] %vm503_vm1, %v28986_v56  ;;  %v16109_v56 = vshrl.u32 %v27328_v41, 16  ;;  %v16105_v52 = vrot.slane %v16103_v12, 3  ;;  %v16127_v12 = vshrl.u32 %v27342_v5, 16 }
 0xaa1   : > { %v16091_v43 = vshrl.u32 %v27322_v11, 16  ;;  %v16085_v37 = vrot.slane %v16083_v46, 2  ;;  %v16121_v46 = vshll.u32 %v27336_v48, 16  ;;  %v16120_v1 = vrot.slane %v16118_v42, 2  ;;  %v27378_v42 = vld [vmem:[%s28554_s6 + $0x60] sm:$0xff]  }
 0xaa2   : > { %v16111_v24 = vrot.slane %v16109_v56, 2 }
 0xaa3   : > { %v16093_v53 = vrot.slane %v16091_v43, 2  ;;  %v27356_v43 = vld [vmem:[#allocation3 + $0x48] sm:$0xff]   ;;  %v16123_v3 = vrot.slane %v16121_v46, 3  ;;  %v27381_v46 = vld [vmem:[#allocation3 + $0x60] sm:$0xff]  }
 0xaa7   : > { %20711 = vmatmul.mubr.msk.bf16.vlgmr.msra.gmra.mrb[36].mxu0 %vm825_vm0, %v26960_v2  ;;  %v16086_v2 = vshll.u32 %v27320_v17, 16 }
 0xaa8   : > { %20714 = vmatprep.mubr.msk.bf16.mxu0 %vm825_vm0, %v26930_v32  ;;  %20747 = vmatpush3.bf16.msra.mxu0 %v27015_v63  ;;  %v16094_v32 = vshll.u32 %v27322_v11, 16  ;;  %v16100_v63 = vshrl.u32 %v27324_v49, 16 }
 0xaa9   : > { %20748 = vmatprep.subr.bf16.mxu0 %v22539_v0  ;;  %v16088_v10 = vrot.slane %v16086_v2, 3 }
 0xaaa   : > { %v16096_v9 = vrot.slane %v16094_v32, 3  ;;  %v16102_v17 = vrot.slane %v16100_v63, 2  ;;  %v16114_v32 = vrot.slane %v16112_v18, 3  ;;  %v27361_v63 = vld [vmem:[#allocation3 + $0x50] sm:$0xff]  }
 0xaab   : > { %v16089_v30 = vor.u32 %v16088_v10, %v16085_v37  ;;  %v16130_v10 = vshll.u32 %v27342_v5, 16  ;;  %v16136_v37 = vshrl.u32 %v27347_v16, 16 }
 0xaac   : > { %20749 = vmatpush3.bf16.msra.mxu0 %v22539_v0  ;;  %v16097_v2 = vor.u32 %v16096_v9, %v16093_v53  ;;  %v16106_v0 = vor.u32 %v16105_v52, %v16102_v17  ;;  %v27367_v9 = vld [vmem:[#allocation3 + $0x58] sm:$0xff]   ;;  %v16129_v53 = vrot.slane %v16127_v12, 2  ;;  %v16124_v17 = vor.u32 %v16123_v3, %v16120_v1 }
 0xaad   : > { %20750 = vmatprep.subr.bf16.mxu0 %v22540_v62  ;;  %v16132_v56 = vrot.slane %v16130_v10, 3  ;;  %v16154_v1 = vshrl.u32 %v27361_v63, 16 }
 0xaae   : > { %v27370_v18 = vsel %vm3400_vm5, %v16089_v30, %v16097_v2  ;;  %v27373_v52 = vsel %vm3400_vm5, %v16097_v2, %v16106_v0  ;;  %v16145_v2 = vshrl.u32 %v27356_v43, 16 }
 0xaaf   : > { %20715 = vmatmul.mubr.msk.bf16.gmra.mrb[40].mxu0 %vm825_vm0, %v26956_v27  ;;  %28987 = vst [vmem:[#allocation84_spill] sm:$0xff] %v27370_v18  ;;  %28988 = vst [vmem:[#allocation85_spill] sm:$0xff] %v27373_v52  ;;  %v16115_v27 = vor.u32 %v16114_v32, %v16111_v24  ;;  %v16148_v24 = vshll.u32 %v27356_v43, 16  ;;  %v27388_v32 = vld [vmem:[#allocation3 + $0x68] sm:$0xff]   ;;  %v16133_v52 = vor.u32 %v16132_v56, %v16129_v53  ;;  %v16157_v18 = vshll.u32 %v27361_v63, 16  ;;  %v27402_v53 = vld [vmem:[#allocation3 + $0x78] sm:$0xff]  }
 0xab0   : > { %20718 = vmatprep.mubr.msk.bf16.mxu0 %vm825_vm0, %v26964_v29  ;;  %20751 = vmatpush3.bf16.msra.mxu0 %v22540_v62  ;;  %v16138_v29 = vrot.slane %v16136_v37, 2  ;;  %v16139_v62 = vshll.u32 %v27347_v16, 16  ;;  %v16147_v10 = vrot.slane %v16145_v2, 2  ;;  %v16156_v21 = vrot.slane %v16154_v1, 2  ;;  %v27415_v1 = vld [vmem:[#allocation3 + $0x80] sm:$0xff]  }
 0xab1   : > { %20752 = vmatprep.subr.bf16.mxu0 %v22541_v14  ;;  %v27384_v30 = vsel %vm3400_vm5, %v16106_v0, %v16115_v27  ;;  %v27391_v12 = vsel %vm3400_vm5, %v16115_v27, %v16124_v17  ;;  %v16150_v37 = vrot.slane %v16148_v24, 3  ;;  %v27396_v0 = vld [vmem:[#allocation3 + $0x70] sm:$0xff]   ;;  %v16163_v27 = vshrl.u32 %v27367_v9, 16 }
 0xab2   : > { %28989 = vst [vmem:[#allocation86_spill] sm:$0xff] %v27384_v30  ;;  %28990 = vst [vmem:[#allocation87_spill] sm:$0xff] %v27391_v12  ;;  %v16141_v3 = vrot.slane %v16139_v62, 3  ;;  %v27399_v30 = vsel %vm3400_vm5, %v16124_v17, %v16133_v52  ;;  %v16159_v62 = vrot.slane %v16157_v18, 3  ;;  %v16172_v2 = vshrl.u32 %v27381_v46, 16 }
 0xab3   : > { %28991 = vst [vmem:[#allocation88_spill] sm:$0xff] %v27399_v30  ;;  %v16151_v56 = vor.u32 %v16150_v37, %v16147_v10  ;;  %v16165_v17 = vrot.slane %v16163_v27, 2  ;;  %v16190_v27 = vshrl.u32 %v27396_v0, 16  ;;  %v16193_v59 = vshll.u32 %v27396_v0, 16 }
 0xab4   : > { %20753 = vmatpush3.bf16.msra.mxu0 %v22541_v14  ;;  %v16142_v47 = vor.u32 %v16141_v3, %v16138_v29  ;;  %v16166_v14 = vshll.u32 %v27367_v9, 16  ;;  %v16175_v29 = vshll.u32 %v27381_v46, 16  ;;  %v16181_v3 = vshrl.u32 %v27388_v32, 16 }
 0xab5   : > { %20790 = vmatprep.subr.bf16.mxu0 %v27378_v42  ;;  %v16160_v10 = vor.u32 %v16159_v62, %v16156_v21  ;;  %v16174_v30 = vrot.slane %v16172_v2, 2  ;;  %v16202_v2 = vshll.u32 %v27402_v53, 16 }
 0xab6   : > { %v27409_v24 = vsel %vm3400_vm5, %v16133_v52, %v16142_v47  ;;  %v27418_v18 = vsel %vm3400_vm5, %v16142_v47, %v16151_v56  ;;  %v16168_v37 = vrot.slane %v16166_v14, 3  ;;  %v16183_v12 = vrot.slane %v16181_v3, 2 }
 0xab7   : > { %20719 = vmatmul.mubr.msk.bf16.gmra.mrb[44].mxu0 %vm825_vm0, %v26972_v51  ;;  %28992 = vst [vmem:[#allocation89_spill] sm:$0xff] %v27409_v24  ;;  %28993 = vst [vmem:[#allocation90_spill] sm:$0xff] %v27418_v18  ;;  %v16177_v51 = vrot.slane %v16175_v29, 3  ;;  %v16184_v52 = vshll.u32 %v27388_v32, 16  ;;  %v27422_v24 = vld [vmem:[#allocation3 + $0x88] sm:$0xff]   ;;  %v27425_v38 = vsel %vm3400_vm5, %v16151_v56, %v16160_v10  ;;  %v16199_v47 = vshrl.u32 %v27402_v53, 16 }
 0xab8   : > { %20722 = vmatprep.mubr.msk.bf16.mxu0 %vm825_vm0, %v26979_v54  ;;  %28994 = vst [vmem:[#allocation91_spill] sm:$0xff] %v27425_v38  ;;  %v16169_v54 = vor.u32 %v16168_v37, %v16165_v17  ;;  %v27429_v18 = vld [vmem:[#allocation3 + $0x90] sm:$0xff]   ;;  %v16192_v14 = vrot.slane %v16190_v27, 2  ;;  %v16195_v3 = vrot.slane %v16193_v59, 3  ;;  %v16208_v56 = vshrl.u32 %v27415_v1, 16  ;;  %v27436_v38 = vld [vmem:[#allocation3 + $0x98] sm:$0xff]  }
 0xab9   : > { %v16178_v21 = vor.u32 %v16177_v51, %v16174_v30  ;;  %v16186_v62 = vrot.slane %v16184_v52, 3  ;;  %v16201_v34 = vrot.slane %v16199_v47, 2  ;;  %v16204_v13 = vrot.slane %v16202_v2, 3 }
 0xaba   : > { %v27433_v29 = vsel %vm3400_vm5, %v16160_v10, %v16169_v54  ;;  %v16211_v30 = vshll.u32 %v27415_v1, 16  ;;  %v16196_v51 = vor.u32 %v16195_v3, %v16192_v14  ;;  %v16210_v52 = vrot.slane %v16208_v56, 2  ;;  %v16543_v3 = vld [vmem:[#allocation3 + $0x10] sm:$0x8] }
 0xabb   : > { %28995 = vst [vmem:[#allocation92_spill] sm:$0xff] %v27433_v29  ;;  %v27439_v17 = vsel %vm3400_vm5, %v16169_v54, %v16178_v21  ;;  %v16187_v37 = vor.u32 %v16186_v62, %v16183_v12  ;;  %v16217_v27 = vshrl.u32 %v27422_v24, 16  ;;  %v16220_v10 = vshll.u32 %v27422_v24, 16 }
 0xabc   : > { %v16205_v47 = vor.u32 %v16204_v13, %v16201_v34  ;;  %v16213_v29 = vrot.slane %v16211_v30, 3  ;;  %v16226_v54 = vshrl.u32 %v27429_v18, 16  ;;  %v16229_v2 = vshll.u32 %v27429_v18, 16 }
 0xabd   : > { %v27447_v59 = vsel %vm3400_vm5, %v16178_v21, %v16187_v37  ;;  %v27453_v12 = vsel %vm3400_vm5, %v16187_v37, %v16196_v51  ;;  %v16219_v62 = vrot.slane %v16217_v27, 2  ;;  %v16222_v14 = vrot.slane %v16220_v10, 3 }
 0xabe   : > { %28996 = vst [vmem:[#allocation93_spill] sm:$0xff] %v27447_v59  ;;  %28997 = vst [vmem:[#allocation94_spill] sm:$0xff] %v27453_v12  ;;  %v16214_v21 = vor.u32 %v16213_v29, %v16210_v52  ;;  %v16228_v56 = vrot.slane %v16226_v54, 2  ;;  %v16235_v13 = vshrl.u32 %v27436_v38, 16  ;;  %v16231_v30 = vrot.slane %v16229_v2, 3 }
 0xabf   : > { %20723 = vmatmul.mubr.msk.bf16.gmra.mrb[48].mxu0 %vm825_vm0, %v26988_v57  ;;  %v27457_v57 = vsel %vm3400_vm5, %v16196_v51, %v16205_v47  ;;  %v16223_v34 = vor.u32 %v16222_v14, %v16219_v62  ;;  %v16238_v59 = vshll.u32 %v27436_v38, 16  ;;  %v18689_v27 = vcombine.low %v16543_v3, %v27314_v15 }
 0xac0   : > { %20726 = vmatprep.mubr.msk.bf16.mxu0 %vm825_vm0, %v26994_v31  ;;  %28998 = vst [vmem:[#allocation95_spill] sm:$0xff] %v27457_v57  ;;  %v27462_v31 = vsel %vm3400_vm5, %v16205_v47, %v16214_v21  ;;  %v16237_v37 = vrot.slane %v16235_v13, 2  ;;  %v16232_v12 = vor.u32 %v16231_v30, %v16228_v56  ;;  %v16557_v29 = vrot.slane %v27322_v11, 3 }
 0xac1   : > { %v27466_v10 = vsel %vm3400_vm5, %v16214_v21, %v16223_v34  ;;  %v16240_v51 = vrot.slane %v16238_v59, 3  ;;  %v16556_v57 = vrot.slane %v18689_v27, 3  ;;  %v16559_v52 = vrot.slane %v27324_v49, 3 }
 0xac2   : > { %v27471_v54 = vsel %vm3400_vm5, %v16223_v34, %v16232_v12  ;;  %v16561_v47 = vrot.slane %v27328_v41, 3  ;;  %v16563_v14 = vrot.slane %v27336_v48, 3  ;;  %v16565_v2 = vrot.slane %v27342_v5, 3 }
 0xac3   : > { %v27473_v62 = vor.u32 %v16240_v51, %v16237_v37  ;;  %v27480_v15 = vsel %vm3875_vm6, %v16556_v57, %v16557_v29  ;;  %v27483_v59 = vsel %vm3875_vm6, %v16557_v29, %v16559_v52  ;;  %v16567_v57 = vrot.slane %v27347_v16, 3 }
 0xac4   : > { %v27493_v21 = vsel %vm3875_vm6, %v16559_v52, %v16561_v47  ;;  %v27500_v56 = vsel %vm3875_vm6, %v16563_v14, %v16565_v2  ;;  %v16569_v13 = vrot.slane %v27356_v43, 3  ;;  %v16571_v34 = vrot.slane %v27361_v63, 3 }
 0xac5   : > { %v27490_v3 = vsel %vm3400_vm5, %v16232_v12, %v27473_v62  ;;  %28999 = vst [vmem:[#allocation96_spill] sm:$0xff] %v27500_v56  ;;  %v27507_v12 = vsel %vm3875_vm6, %v16565_v2, %v16567_v57  ;;  %v16573_v30 = vrot.slane %v27367_v9, 3  ;;  %v16575_v37 = vrot.slane %v27381_v46, 3 }
 0xac6   : > { %29000 = vst [vmem:[#allocation97_spill] sm:$0xff] %v27507_v12  ;;  %v16577_v27 = vrot.slane %v27388_v32, 3  ;;  %v27513_v51 = vsel %vm3875_vm6, %v16567_v57, %v16569_v13  ;;  %v27516_v29 = vsel %vm3875_vm6, %v16569_v13, %v16571_v34  ;;  %v16579_v52 = vrot.slane %v27396_v0, 3 }
 0xac7   : > { %20727 = vmatmul.mubr.msk.bf16.gmra.mrb[52].mxu0 %vm825_vm0, %v27000_v19  ;;  %v27496_v19 = vsel %vm3875_vm6, %v16561_v47, %v16563_v14  ;;  %29001 = vst [vmem:[#allocation98_spill] sm:$0xff] %v27513_v51  ;;  %29002 = vst [vmem:[#allocation99_spill] sm:$0xff] %v27516_v29  ;;  %v16581_v47 = vrot.slane %v27402_v53, 3  ;;  %v27521_v14 = vsel %vm3875_vm6, %v16571_v34, %v16573_v30  ;;  %v16583_v56 = vrot.slane %v27415_v1, 3 }
 0xac8   : > { %20730 = vmatprep.mubr.msk.bf16.mxu0 %vm825_vm0, %v27003_v50  ;;  %v27504_v50 = vld [vmem:[#allocation3 + $0xa0] ss:$0 sps:$4 sm:$0x77]   ;;  %v27524_v2 = vsel %vm3875_vm6, %v16573_v30, %v16575_v37  ;;  %v27527_v12 = vsel %vm3875_vm6, %v16575_v37, %v16577_v27  ;;  %v27531_v57 = vsel %vm3875_vm6, %v16577_v27, %v16579_v52  ;;  %v16585_v29 = vrot.slane %v27422_v24, 3 }
 0xac9   : > { %v27534_v13 = vsel %vm3875_vm6, %v16579_v52, %v16581_v47  ;;  %v16587_v51 = vrot.slane %v27429_v18, 3  ;;  %v27539_v34 = vsel %vm3875_vm6, %v16581_v47, %v16583_v56  ;;  %v16589_v30 = vrot.slane %v27436_v38, 3 }
 0xaca   : > { %29003 = vst [vmem:[#allocation100_spill] sm:$0xff] %v27534_v13  ;;  %v16591_v37 = vrot.slane %v27504_v50, 3  ;;  %v27546_v27 = vsel %vm3875_vm6, %v16583_v56, %v16585_v29  ;;  %v22627_v56 = vld [vmem:[#allocation3 + $0x4] sm:$0xf] }
 0xacb   : > { %29004 = vst [vmem:[#allocation101_spill] sm:$0xff] %v27546_v27  ;;  %v27549_v52 = vsel %vm3875_vm6, %v16585_v29, %v16587_v51  ;;  %v27554_v13 = vsel %vm3875_vm6, %v16587_v51, %v16589_v30  ;;  %v22628_v51 = vld [vmem:[#allocation3 + $0x8] sm:$0xff]  }
 0xacc   : > { %29005 = vst [vmem:[#allocation102_spill] sm:$0xff] %v27549_v52  ;;  %29006 = vst [vmem:[#allocation103_spill] sm:$0xff] %v27554_v13  ;;  %v27557_v47 = vsel %vm3875_vm6, %v16589_v30, %v16591_v37  ;;  %v13993_v13 = vrot.slane %v22628_v51, 1  ;;  %v22630_v37 = vld [vmem:[#allocation3 + $0x18] sm:$0xff]   ;;  %v22631_v51 = vld [vmem:[#allocation3 + $0x20] sm:$0xff]  }
 0xacd   : > { %29007 = vst [vmem:[#allocation104_spill] sm:$0xff] %v27557_v47  ;;  %v13997_v47 = vrot.slane %v22630_v37, 1 }
 0xacf   : > { %20731 = vmatmul.mubr.msk.bf16.gmra.mrb[56].mxu0 %vm825_vm0, %v27005_v60  ;;  %v13979_v60 = vld [vmem:[#allocation3] sm:$0xe] }
 0xad0   : > { %20734 = vmatprep.mubr.msk.bf16.mxu0 %vm825_vm0, %v27007_v28  ;;  %v18467_v29 = vcombine.low %v13979_v60, %v22627_v56  ;;  %v22544_v60 = vld [vmem:[%s28554_s6 + $0x68] sm:$0xff]  }
 0xad2   : > { %v13992_v28 = vrot.slane %v18467_v29, 1 }
 0xad7   : > { %20735 = vmatmul.mubr.msk.bf16.gmra.mrb[60].mxu0 %vm825_vm0, %v27021_v35  ;;  %v13994_v35 = vsel %vm1307_vm2, %v13992_v28, %v13993_v13  ;;  %v22545_v28 = vld [vmem:[%s28554_s6 + $0x70] sm:$0xff]  }
 0xad8   : > { %20738 = vmatprep.mubr.msk.bf16.mxu0 %vm825_vm0, %v27024_v55  ;;  %v22629_v55 = vld [vmem:[#allocation3 + $0x10] sm:$0xff]  }
 0xad9   : > { %v13995_v30 = vrot.slane %v22629_v55, 1  ;;  %v22632_v55 = vld [vmem:[#allocation3 + $0x28] sm:$0xff]  }
 0xada   : > { %v14001_v37 = vrot.slane %v22632_v55, 1 }
 0xadb   : > { %v13996_v56 = vsel %vm1307_vm2, %v13993_v13, %v13995_v30  ;;  %v13998_v29 = vsel %vm1307_vm2, %v13995_v30, %v13997_v47  ;;  %v22546_v13 = vld [vmem:[%s28554_s6 + $0x78] sm:$0xff]  }
 0xadf   : > { %20739 = vmatmul.mubr.msk.bf16.gmra.mrb[64].mxu0 %vm825_vm0, %v27027_v4 }
 0xae0   : > { %20742 = vmatprep.mubr.msk.bf16.mxu0 %vm825_vm0, %v27034_v6 }
 0xae7   : > { %20743 = vmatmul.mubr.msk.bf16.gmra.mrb[68].mxu0 %vm825_vm0, %v27044_v7 }
 0xae8   : > { %20754 = vmatprep.mubr.msk.bf16.mxu0 %vm825_vm0, %v13994_v35  ;;  %v13999_v35 = vrot.slane %v22631_v51, 1  ;;  %v22634_v51 = vld [vmem:[#allocation3 + $0x38] sm:$0xff]  }
 0xae9   : > { %v14005_v55 = vrot.slane %v22634_v51, 1  ;;  %v22638_v51 = vld [vmem:[#allocation3 + $0x58] sm:$0xff]  }
 0xaea   : > { %v14000_v30 = vsel %vm1307_vm2, %v13997_v47, %v13999_v35 }
 0xaef   : > { %20755 = vmatmul.mubr.msk.bf16.vlgmr.msra.gmra.mrb[36].mxu0 %vm825_vm0, %v13996_v56  ;;  %v22550_v56 = vld [vmem:[%s28554_s6 + $0x80] sm:$0xff]  }
 0xaf0   : > { %20758 = vmatprep.mubr.msk.bf16.mxu0 %vm825_vm0, %v13998_v29  ;;  %20791 = vmatpush3.bf16.msra.mxu0 %v27378_v42  ;;  %v14002_v42 = vsel %vm1307_vm2, %v13999_v35, %v14001_v37 }
 0xaf1   : > { %20792 = vmatprep.subr.bf16.mxu0 %v22544_v60 }
 0xaf4   : > { %20793 = vmatpush3.bf16.msra.mxu0 %v22544_v60  ;;  %v22633_v60 = vld [vmem:[#allocation3 + $0x30] sm:$0xff]  }
 0xaf5   : > { %20794 = vmatprep.subr.bf16.mxu0 %v22545_v28  ;;  %v14003_v29 = vrot.slane %v22633_v60, 1 }
 0xaf7   : > { %20759 = vmatmul.mubr.msk.bf16.gmra.mrb[40].mxu0 %vm825_vm0, %v14000_v30  ;;  %v14004_v47 = vsel %vm1307_vm2, %v14001_v37, %v14003_v29  ;;  %v14006_v35 = vsel %vm1307_vm2, %v14003_v29, %v14005_v55 }
 0xaf8   : > { %20762 = vmatprep.mubr.msk.bf16.mxu0 %vm825_vm0, %v14002_v42  ;;  %20795 = vmatpush3.bf16.msra.mxu0 %v22545_v28  ;;  %v22635_v28 = vld [vmem:[#allocation3 + $0x40] sm:$0xff]   ;;  %v22636_v42 = vld [vmem:[#allocation3 + $0x48] sm:$0xff]  }
 0xaf9   : > { %20796 = vmatprep.subr.bf16.mxu0 %v22546_v13  ;;  %v14007_v30 = vrot.slane %v22635_v28, 1  ;;  %v14009_v52 = vrot.slane %v22636_v42, 1  ;;  %v22639_v28 = vld [vmem:[#allocation3 + $0x60] sm:$0xff]   ;;  %v22640_v42 = vld [vmem:[#allocation3 + $0x68] sm:$0xff]  }
 0xafb   : > { %v14008_v27 = vsel %vm1307_vm2, %v14005_v55, %v14007_v30  ;;  %v14010_v60 = vsel %vm1307_vm2, %v14007_v30, %v14009_v52  ;;  %v14015_v55 = vrot.slane %v22639_v28, 1 }
 0xafc   : > { %20797 = vmatpush3.bf16.msra.mxu0 %v22546_v13  ;;  %v22637_v13 = vld [vmem:[#allocation3 + $0x50] sm:$0xff]  }
 0xafd   : > { %20834 = vmatprep.subr.bf16.mxu0 %v22550_v56  ;;  %v14011_v37 = vrot.slane %v22637_v13, 1  ;;  %v22641_v13 = vld [vmem:[#allocation3 + $0x70] sm:$0xff]  }
 0xaff   : > { %20763 = vmatmul.mubr.msk.bf16.gmra.mrb[44].mxu0 %vm825_vm0, %v14004_v47  ;;  %v14013_v47 = vrot.slane %v22638_v51, 1  ;;  %v14012_v29 = vsel %vm1307_vm2, %v14009_v52, %v14011_v37  ;;  %v14019_v52 = vrot.slane %v22641_v13, 1  ;;  %v14021_v51 = vrot.slane %v27027_v4, 1 }
 0xb00   : > { %20766 = vmatprep.mubr.msk.bf16.mxu0 %vm825_vm0, %v14006_v35  ;;  %v14027_v4 = vrot.slane %v27190_v39, 1  ;;  %v22556_v39 = vld [vmem:[%s28554_s6 + $0x88] sm:$0xff]   ;;  %v14468_v13 = vrot.slane %v27098_v36, 1  ;;  %v14470_v36 = vrot.slane %v27102_v61, 1 }
 0xb01   : > { %v14014_v35 = vsel %vm1307_vm2, %v14011_v37, %v14013_v47  ;;  %v14016_v30 = vsel %vm1307_vm2, %v14013_v47, %v14015_v55  ;;  %v14023_v47 = vrot.slane %v27034_v6, 1 }
 0xb03   : > { %v14024_v28 = vsel %vm1307_vm2, %v14021_v51, %v14023_v47 }
 0xb07   : > { %20767 = vmatmul.mubr.msk.bf16.gmra.mrb[48].mxu0 %vm825_vm0, %v14008_v27  ;;  %v14017_v27 = vrot.slane %v22640_v42, 1  ;;  %v14459_v42 = vrot.slane %v27054_v44, 1 }
 0xb08   : > { %20770 = vmatprep.mubr.msk.bf16.mxu0 %vm825_vm0, %v14010_v60 }
 0xb09   : > { %v14018_v60 = vsel %vm1307_vm2, %v14015_v55, %v14017_v27  ;;  %v14020_v37 = vsel %vm1307_vm2, %v14017_v27, %v14019_v52  ;;  %v14460_v27 = vrot.slane %v27060_v20, 1 }
 0xb0b   : > { %v14461_v6 = vsel %vm1307_vm2, %v14459_v42, %v14460_v27 }
 0xb0f   : > { %20771 = vmatmul.mubr.msk.bf16.gmra.mrb[52].mxu0 %vm825_vm0, %v14012_v29  ;;  %v14022_v29 = vsel %vm1307_vm2, %v14019_v52, %v14021_v51  ;;  %v22566_v52 = vld [vmem:[%s28554_s6 + $0x98] sm:$0xff]  }
 0xb10   : > { %20774 = vmatprep.mubr.msk.bf16.mxu0 %vm825_vm0, %v14014_v35  ;;  %v14025_v35 = vrot.slane %v27044_v7, 1  ;;  %v14462_v7 = vrot.slane %v27066_v40, 1  ;;  %v22561_v40 = vld [vmem:[%s28554_s6 + $0x90] sm:$0xff]  }
 0xb12   : > { %v14026_v55 = vsel %vm1307_vm2, %v14023_v47, %v14025_v35  ;;  %v14463_v44 = vsel %vm1307_vm2, %v14460_v27, %v14462_v7  ;;  %v29008_v27 = vld [vmem:[#allocation41_spill] sm:$0xff] }
 0xb17   : > { %20775 = vmatmul.mubr.msk.bf16.gmra.mrb[56].mxu0 %vm825_vm0, %v14016_v30  ;;  %v14028_v30 = vsel %vm1307_vm2, %v14025_v35, %v14027_v4  ;;  %v14474_v35 = vrot.slane %v27114_v33, 1  ;;  %v14480_v4 = vrot.slane %v27134_v25, 1  ;;  %v29009_v25 = vld [vmem:[#allocation43_spill] sm:$0xff] }
 0xb18   : > { %20778 = vmatprep.mubr.msk.bf16.mxu0 %vm825_vm0, %v14018_v60  ;;  %v14464_v60 = vrot.slane %v27077_v22, 1  ;;  %v14466_v22 = vrot.slane %v27085_v58, 1  ;;  %v22570_v58 = vld [vmem:[%s28554_s6 + $0xa0] sm:$0xff]  }
 0xb1a   : > { %v14465_v20 = vsel %vm1307_vm2, %v14462_v7, %v14464_v60  ;;  %v14467_v51 = vsel %vm1307_vm2, %v14464_v60, %v14466_v22  ;;  %v14486_v7 = vrot.slane %v29009_v25, 1  ;;  %v29010_v60 = vld [vmem:[#allocation45_spill] sm:$0xff]  ;;  %v29025_v25 = vld [vmem:[#allocation58_spill] sm:$0xff] }
 0xb1f   : > { %20779 = vmatmul.mubr.msk.bf16.gmra.mrb[60].mxu0 %vm825_vm0, %v14020_v37  ;;  %v14472_v37 = vrot.slane %v27110_v23, 1  ;;  %v14478_v23 = vrot.slane %v27127_v8, 1 }
 0xb20   : > { %20782 = vmatprep.mubr.msk.bf16.mxu0 %vm825_vm0, %v14022_v29  ;;  %v14471_v29 = vsel %vm1307_vm2, %v14468_v13, %v14470_v36 }
 0xb21   : > { %v14473_v47 = vsel %vm1307_vm2, %v14470_v36, %v14472_v37  ;;  %v14481_v33 = vsel %vm1307_vm2, %v14478_v23, %v14480_v4 }
 0xb27   : > { %20783 = vmatmul.mubr.msk.bf16.gmra.mrb[64].mxu0 %vm825_vm0, %v14024_v28  ;;  %v14476_v28 = vrot.slane %v27118_v45, 1  ;;  %v14482_v45 = vrot.slane %v27141_v26, 1 }
 0xb28   : > { %20786 = vmatprep.mubr.msk.bf16.mxu0 %vm825_vm0, %v14026_v55  ;;  %v14475_v55 = vsel %vm1307_vm2, %v14472_v37, %v14474_v35 }
 0xb29   : > { %v14477_v61 = vsel %vm1307_vm2, %v14474_v35, %v14476_v28  ;;  %v14479_v42 = vsel %vm1307_vm2, %v14476_v28, %v14478_v23  ;;  %v29014_v35 = vld [vmem:[#allocation48_spill] sm:$0xff]  ;;  %v29015_v28 = vld [vmem:[#allocation50_spill] sm:$0xff] }
 0xb2a   : > { %v29016_v23 = vld [vmem:[#allocation52_spill] sm:$0xff] }
 0xb2f   : > { %20787 = vmatmul.mubr.msk.bf16.gmra.mrb[68].mxu0 %vm825_vm0, %v14028_v30  ;;  %v14484_v30 = vrot.slane %v29008_v27, 1  ;;  %v29021_v27 = vld [vmem:[#allocation51_spill] sm:$0xff] }
 0xb30   : > { %20798 = vmatprep.mubr.msk.bf16.mxu0 %vm825_vm0, %v14461_v6  ;;  %v14483_v6 = vsel %vm1307_vm2, %v14480_v4, %v14482_v45  ;;  %v29017_v4 = vld [vmem:[#allocation54_spill] sm:$0xff] }
 0xb31   : > { %v14485_v8 = vsel %vm1307_vm2, %v14482_v45, %v14484_v30  ;;  %v29020_v45 = vld [vmem:[#allocation47_spill] sm:$0xff] }
 0xb37   : > { %20799 = vmatmul.mubr.msk.bf16.vlgmr.msra.gmra.mrb[36].mxu0 %vm825_vm0, %v14463_v44  ;;  %v14487_v44 = vsel %vm1307_vm2, %v14484_v30, %v14486_v7  ;;  %v29022_v30 = vld [vmem:[#allocation55_spill] sm:$0xff] }
 0xb38   : > { %20802 = vmatprep.mubr.msk.bf16.mxu0 %vm825_vm0, %v14465_v20  ;;  %20835 = vmatpush3.bf16.msra.mxu0 %v22550_v56  ;;  %v14469_v56 = vsel %vm1307_vm2, %v14466_v22, %v14468_v13  ;;  %v29011_v20 = vld [vmem:[#allocation49_spill] sm:$0xff] }
 0xb39   : > { %20836 = vmatprep.subr.bf16.mxu0 %v22556_v39  ;;  %v29012_v22 = vld [vmem:[#allocation53_spill] sm:$0xff] }
 0xb3a   : > { %v14492_v13 = vrot.slane %v29012_v22, 1  ;;  %v29029_v22 = vld [vmem:[#allocation69_spill] sm:$0xff] }
 0xb3c   : > { %20837 = vmatpush3.bf16.msra.mxu0 %v22556_v39  ;;  %v14488_v39 = vrot.slane %v29010_v60, 1  ;;  %v29027_v60 = vld [vmem:[#allocation60_spill] sm:$0xff] }
 0xb3d   : > { %20838 = vmatprep.subr.bf16.mxu0 %v22561_v40 }
 0xb3e   : > { %v14489_v26 = vsel %vm1307_vm2, %v14486_v7, %v14488_v39  ;;  %v29026_v7 = vld [vmem:[#allocation59_spill] sm:$0xff] }
 0xb3f   : > { %20803 = vmatmul.mubr.msk.bf16.gmra.mrb[40].mxu0 %vm825_vm0, %v14467_v51  ;;  %v22569_v51 = vld [vmem:[#allocation3 + $0x98] ss:$0 sps:$4 sm:$0x11]  }
 0xb40   : > { %20806 = vmatprep.mubr.msk.bf16.mxu0 %vm825_vm0, %v14469_v56  ;;  %20839 = vmatpush3.bf16.msra.mxu0 %v22561_v40  ;;  %v14490_v40 = vrot.slane %v29011_v20, 1  ;;  %v14494_v36 = vrot.slane %v22569_v51, 1  ;;  %v29031_v51 = vld [vmem:[#allocation62_spill] sm:$0xff] }
 0xb41   : > { %20840 = vmatprep.subr.bf16.mxu0 %v22566_v52 }
 0xb42   : > { %v14493_v56 = vsel %vm1307_vm2, %v14490_v40, %v14492_v13  ;;  %v14495_v37 = vsel %vm1307_vm2, %v14492_v13, %v14494_v36  ;;  %v29030_v13 = vld [vmem:[#allocation61_spill] sm:$0xff]  ;;  %v29032_v36 = vld [vmem:[#allocation64_spill] sm:$0xff] }
 0xb44   : > { %20841 = vmatpush3.bf16.msra.mxu0 %v22566_v52  ;;  %v14491_v52 = vsel %vm1307_vm2, %v14488_v39, %v14490_v40  ;;  %v29028_v39 = vld [vmem:[#allocation70_spill] sm:$0xff] }
 0xb45   : > { %20878 = vmatprep.subr.bf16.mxu0 %v22570_v58 }
 0xb47   : > { %20807 = vmatmul.mubr.msk.bf16.gmra.mrb[44].mxu0 %vm825_vm0, %v14471_v29  ;;  %v29013_v29 = vld [vmem:[#allocation46_spill] sm:$0xff] }
 0xb48   : > { %20810 = vmatprep.mubr.msk.bf16.mxu0 %vm825_vm0, %v14473_v47  ;;  %v22571_v47 = vld [vmem:[%s28554_s6 + $0xa8] sm:$0xff]  }
 0xb4f   : > { %20811 = vmatmul.mubr.msk.bf16.gmra.mrb[48].mxu0 %vm825_vm0, %v14475_v55  ;;  %v22572_v55 = vld [vmem:[%s28554_s6 + $0xb0] sm:$0xff]  }
 0xb50   : > { %20814 = vmatprep.mubr.msk.bf16.mxu0 %vm825_vm0, %v14477_v61  ;;  %v22573_v61 = vld [vmem:[%s28554_s6 + $0xb8] sm:$0xff]  }
 0xb57   : > { %20815 = vmatmul.mubr.msk.bf16.gmra.mrb[52].mxu0 %vm825_vm0, %v14479_v42  ;;  %v29018_v42 = vld [vmem:[#allocation42_spill] sm:$0xff] }
 0xb58   : > { %20818 = vmatprep.mubr.msk.bf16.mxu0 %vm825_vm0, %v14481_v33  ;;  %v29019_v33 = vld [vmem:[#allocation44_spill] sm:$0xff] }
 0xb5f   : > { %20819 = vmatmul.mubr.msk.bf16.gmra.mrb[56].mxu0 %vm825_vm0, %v14483_v6  ;;  %v29023_v6 = vld [vmem:[#allocation56_spill] sm:$0xff] }
 0xb60   : > { %20822 = vmatprep.mubr.msk.bf16.mxu0 %vm825_vm0, %v14485_v8  ;;  %v29024_v8 = vld [vmem:[#allocation57_spill] sm:$0xff] }
 0xb67   : > { %20823 = vmatmul.mubr.msk.bf16.gmra.mrb[60].mxu0 %vm825_vm0, %v14487_v44  ;;  %v14962_v44 = vshrl.u32 %v29028_v39, 16 }
 0xb68   : > { %20826 = vmatprep.mubr.msk.bf16.mxu0 %vm825_vm0, %v14489_v26  ;;  %v14965_v26 = vshll.u32 %v29028_v39, 16  ;;  %v29049_v39 = vld [vmem:[#allocation82_spill] sm:$0xff] }
 0xb69   : > { %v14964_v20 = vrot.slane %v14962_v44, 1  ;;  %v15741_v44 = vrot.slane %v29049_v39, 2  ;;  %v22605_v39 = vld [vmem:[%s28554_s6 + $0x110] sm:$0xff]  }
 0xb6a   : > { %v14967_v40 = vrot.slane %v14965_v26, 2  ;;  %v15742_v26 = vrot.slane %v27322_v11, 2 }
 0xb6f   : > { %20827 = vmatmul.mubr.msk.bf16.gmra.mrb[64].mxu0 %vm825_vm0, %v14491_v52  ;;  %v14968_v52 = vor.u32 %v14967_v40, %v14964_v20  ;;  %v29050_v20 = vld [vmem:[#allocation83_spill] sm:$0xff]  ;;  %v15743_v40 = vsel %vm2591_vm4, %v15741_v44, %v15742_v26  ;;  %v22606_v44 = vld [vmem:[%s28554_s6 + $0x118] sm:$0xff]  }
 0xb70   : > { %20830 = vmatprep.mubr.msk.bf16.mxu0 %vm825_vm0, %v14493_v56 }
 0xb71   : > { %v14969_v56 = vsel %vm2116_vm3, %v29031_v51, %v14968_v52  ;;  %v22589_v52 = vld [vmem:[%s28554_s6 + $0xe8] sm:$0xff]  }
 0xb77   : > { %20831 = vmatmul.mubr.msk.bf16.gmra.mrb[68].mxu0 %vm825_vm0, %v14495_v37  ;;  %v22577_v37 = vld [vmem:[%s28554_s6 + $0xc8] sm:$0xff]  }
 0xb78   : > { %20842 = vmatprep.mubr.msk.bf16.mxu0 %vm825_vm0, %v29013_v29  ;;  %v29033_v29 = vld [vmem:[#allocation63_spill] sm:$0xff] }
 0xb7f   : > { %20843 = vmatmul.mubr.msk.bf16.vlgmr.msra.gmra.mrb[36].mxu0 %vm825_vm0, %v29014_v35  ;;  %v22578_v35 = vld [vmem:[%s28554_s6 + $0xd0] sm:$0xff]  }
 0xb80   : > { %20846 = vmatprep.mubr.msk.bf16.mxu0 %vm825_vm0, %v29015_v28  ;;  %20879 = vmatpush3.bf16.msra.mxu0 %v22570_v58  ;;  %v22576_v58 = vld [vmem:[%s28554_s6 + $0xc0] sm:$0xff]   ;;  %v22579_v28 = vld [vmem:[%s28554_s6 + $0xd8] sm:$0xff]  }
 0xb81   : > { %20880 = vmatprep.subr.bf16.mxu0 %v22571_v47 }
 0xb84   : > { %20881 = vmatpush3.bf16.msra.mxu0 %v22571_v47  ;;  %v29034_v47 = vld [vmem:[#allocation65_spill] sm:$0xff] }
 0xb85   : > { %20882 = vmatprep.subr.bf16.mxu0 %v22572_v55 }
 0xb87   : > { %20847 = vmatmul.mubr.msk.bf16.gmra.mrb[40].mxu0 %vm825_vm0, %v29016_v23  ;;  %v22583_v23 = vld [vmem:[%s28554_s6 + $0xe0] sm:$0xff]  }
 0xb88   : > { %20850 = vmatprep.mubr.msk.bf16.mxu0 %vm825_vm0, %v29017_v4  ;;  %20883 = vmatpush3.bf16.msra.mxu0 %v22572_v55  ;;  %v29035_v55 = vld [vmem:[#allocation66_spill] sm:$0xff]  ;;  %v29037_v4 = vld [vmem:[#allocation68_spill] sm:$0xff] }
 0xb89   : > { %20884 = vmatprep.subr.bf16.mxu0 %v22573_v61 }
 0xb8c   : > { %20885 = vmatpush3.bf16.msra.mxu0 %v22573_v61  ;;  %v29036_v61 = vld [vmem:[#allocation67_spill] sm:$0xff] }
 0xb8d   : > { %20922 = vmatprep.subr.bf16.mxu0 %v22576_v58 }
 0xb8f   : > { %20851 = vmatmul.mubr.msk.bf16.gmra.mrb[44].mxu0 %vm825_vm0, %v29018_v42  ;;  %v29039_v42 = vld [vmem:[#allocation72_spill] sm:$0xff] }
 0xb90   : > { %20854 = vmatprep.mubr.msk.bf16.mxu0 %vm825_vm0, %v29019_v33  ;;  %v29040_v33 = vld [vmem:[#allocation73_spill] sm:$0xff] }
 0xb97   : > { %20855 = vmatmul.mubr.msk.bf16.gmra.mrb[48].mxu0 %vm825_vm0, %v29020_v45  ;;  %v29041_v45 = vld [vmem:[#allocation74_spill] sm:$0xff] }
 0xb98   : > { %20858 = vmatprep.mubr.msk.bf16.mxu0 %vm825_vm0, %v29021_v27  ;;  %v29042_v27 = vld [vmem:[#allocation75_spill] sm:$0xff] }
 0xb9f   : > { %20859 = vmatmul.mubr.msk.bf16.gmra.mrb[52].mxu0 %vm825_vm0, %v29022_v30  ;;  %v29043_v30 = vld [vmem:[#allocation76_spill] sm:$0xff] }
 0xba0   : > { %20862 = vmatprep.mubr.msk.bf16.mxu0 %vm825_vm0, %v29023_v6  ;;  %v29044_v6 = vld [vmem:[#allocation77_spill] sm:$0xff] }
 0xba7   : > { %20863 = vmatmul.mubr.msk.bf16.gmra.mrb[56].mxu0 %vm825_vm0, %v29024_v8  ;;  %v29045_v8 = vld [vmem:[#allocation78_spill] sm:$0xff] }
 0xba8   : > { %20866 = vmatprep.mubr.msk.bf16.mxu0 %vm825_vm0, %v29025_v25  ;;  %v29046_v25 = vld [vmem:[#allocation79_spill] sm:$0xff] }
 0xbaf   : > { %20867 = vmatmul.mubr.msk.bf16.gmra.mrb[60].mxu0 %vm825_vm0, %v29026_v7  ;;  %v29047_v7 = vld [vmem:[#allocation80_spill] sm:$0xff] }
 0xbb0   : > { %20870 = vmatprep.mubr.msk.bf16.mxu0 %vm825_vm0, %v29027_v60  ;;  %v29048_v60 = vld [vmem:[#allocation81_spill] sm:$0xff] }
 0xbb7   : > { %20871 = vmatmul.mubr.msk.bf16.gmra.mrb[64].mxu0 %vm825_vm0, %v29029_v22  ;;  %v15744_v22 = vrot.slane %v27324_v49, 2  ;;  %v22594_v49 = vld [vmem:[%s28554_s6 + $0xf0] sm:$0xff]  }
 0xbb8   : > { %20874 = vmatprep.mubr.msk.bf16.mxu0 %vm825_vm0, %v29030_v13  ;;  %v15746_v13 = vrot.slane %v27328_v41, 2  ;;  %v15748_v41 = vrot.slane %v27336_v48, 2  ;;  %v15752_v48 = vrot.slane %v27347_v16, 2 }
 0xbb9   : > { %v15745_v51 = vsel %vm2591_vm4, %v15742_v26, %v15744_v22  ;;  %v29054_v26 = vld [vmem:[#allocation87_spill] sm:$0xff] }
 0xbba   : > { %v15747_v11 = vsel %vm2591_vm4, %v15744_v22, %v15746_v13  ;;  %v29057_v22 = vld [vmem:[#allocation90_spill] sm:$0xff] }
 0xbbf   : > { %20875 = vmatmul.mubr.msk.bf16.gmra.mrb[68].mxu0 %vm825_vm0, %v14969_v56  ;;  %v15750_v56 = vrot.slane %v27342_v5, 2  ;;  %v22603_v5 = vld [vmem:[%s28554_s6 + $0x100] sm:$0xff]  }
 0xbc0   : > { %20886 = vmatprep.mubr.msk.bf16.mxu0 %vm825_vm0, %v29032_v36  ;;  %v22599_v36 = vld [vmem:[%s28554_s6 + $0xf8] sm:$0xff]  }
 0xbc7   : > { %20887 = vmatmul.mubr.msk.bf16.vlgmr.msra.gmra.mrb[36].mxu0 %vm825_vm0, %v29033_v29  ;;  %v15751_v29 = vsel %vm2591_vm4, %v15748_v41, %v15750_v56 }
 0xbc8   : > { %20890 = vmatprep.mubr.msk.bf16.mxu0 %vm825_vm0, %v29034_v47  ;;  %20923 = vmatpush3.bf16.msra.mxu0 %v22576_v58  ;;  %v29038_v58 = vld [vmem:[#allocation71_spill] sm:$0xff]  ;;  %v15754_v47 = vrot.slane %v27356_v43, 2  ;;  %v15760_v43 = vrot.slane %v27381_v46, 2 }
 0xbc9   : > { %20924 = vmatprep.subr.bf16.mxu0 %v22577_v37 }
 0xbcc   : > { %20925 = vmatpush3.bf16.msra.mxu0 %v22577_v37  ;;  %v15749_v37 = vsel %vm2591_vm4, %v15746_v13, %v15748_v41  ;;  %v29058_v13 = vld [vmem:[#allocation91_spill] sm:$0xff]  ;;  %v16244_v41 = vshrl.u32 %v27504_v50, 16 }
 0xbcd   : > { %20926 = vmatprep.subr.bf16.mxu0 %v22578_v35 }
 0xbcf   : > { %20891 = vmatmul.mubr.msk.bf16.gmra.mrb[40].mxu0 %vm825_vm0, %v29035_v55  ;;  %v15756_v55 = vrot.slane %v27361_v63, 2 }
 0xbd0   : > { %20894 = vmatprep.mubr.msk.bf16.mxu0 %vm825_vm0, %v29036_v61  ;;  %20927 = vmatpush3.bf16.msra.mxu0 %v22578_v35  ;;  %v15753_v35 = vsel %vm2591_vm4, %v15750_v56, %v15752_v48  ;;  %v15758_v61 = vrot.slane %v27367_v9, 2  ;;  %v15764_v9 = vrot.slane %v27396_v0, 2  ;;  %v16247_v56 = vshll.u32 %v27504_v50, 16 }
 0xbd1   : > { %20928 = vmatprep.subr.bf16.mxu0 %v22579_v28 }
 0xbd2   : > { %v15759_v16 = vsel %vm2591_vm4, %v15756_v55, %v15758_v61 }
 0xbd4   : > { %20929 = vmatpush3.bf16.msra.mxu0 %v22579_v28  ;;  %v15755_v28 = vsel %vm2591_vm4, %v15752_v48, %v15754_v47 }
 0xbd5   : > { %20966 = vmatprep.subr.bf16.mxu0 %v22583_v23 }
 0xbd7   : > { %20895 = vmatmul.mubr.msk.bf16.gmra.mrb[44].mxu0 %vm825_vm0, %v29037_v4  ;;  %v15762_v4 = vrot.slane %v27388_v32, 2  ;;  %v15768_v32 = vrot.slane %v27415_v1, 2 }
 0xbd8   : > { %20898 = vmatprep.mubr.msk.bf16.mxu0 %vm825_vm0, %v29038_v58  ;;  %v15761_v58 = vsel %vm2591_vm4, %v15758_v61, %v15760_v43 }
 0xbd9   : > { %v15763_v63 = vsel %vm2591_vm4, %v15760_v43, %v15762_v4 }
 0xbdf   : > { %20899 = vmatmul.mubr.msk.bf16.gmra.mrb[48].mxu0 %vm825_vm0, %v29039_v42  ;;  %v15766_v42 = vrot.slane %v27402_v53, 2  ;;  %v15772_v53 = vrot.slane %v27429_v18, 2  ;;  %v29052_v18 = vld [vmem:[#allocation85_spill] sm:$0xff] }
 0xbe0   : > { %20902 = vmatprep.mubr.msk.bf16.mxu0 %vm825_vm0, %v29040_v33  ;;  %v15765_v33 = vsel %vm2591_vm4, %v15762_v4, %v15764_v9 }
 0xbe1   : > { %v15767_v46 = vsel %vm2591_vm4, %v15764_v9, %v15766_v42 }
 0xbe7   : > { %20903 = vmatmul.mubr.msk.bf16.gmra.mrb[52].mxu0 %vm825_vm0, %v29041_v45  ;;  %v15770_v45 = vrot.slane %v27422_v24, 2 }
 0xbe8   : > { %20906 = vmatprep.mubr.msk.bf16.mxu0 %vm825_vm0, %v29042_v27  ;;  %v15769_v27 = vsel %vm2591_vm4, %v15766_v42, %v15768_v32  ;;  %v29076_v42 = vld [vmem:[#allocation8_spill] sm:$0xff] }
 0xbe9   : > { %v15771_v0 = vsel %vm2591_vm4, %v15768_v32, %v15770_v45 }
 0xbef   : > { %20907 = vmatmul.mubr.msk.bf16.gmra.mrb[56].mxu0 %vm825_vm0, %v29043_v30  ;;  %v15774_v30 = vrot.slane %v27436_v38, 2  ;;  %v22604_v38 = vld [vmem:[%s28554_s6 + $0x108] sm:$0xff]  }
 0xbf0   : > { %20910 = vmatprep.mubr.msk.bf16.mxu0 %vm825_vm0, %v29044_v6  ;;  %v15773_v6 = vsel %vm2591_vm4, %v15770_v45, %v15772_v53 }
 0xbf1   : > { %v15775_v1 = vsel %vm2591_vm4, %v15772_v53, %v15774_v30 }
 0xbf7   : > { %20911 = vmatmul.mubr.msk.bf16.gmra.mrb[60].mxu0 %vm825_vm0, %v29045_v8  ;;  %v22602_v8 = vld [vmem:[#allocation3 + $0xa0] ss:$0 sps:$4 sm:$0x33]  }
 0xbf8   : > { %20914 = vmatprep.mubr.msk.bf16.mxu0 %vm825_vm0, %v29046_v25  ;;  %v15776_v24 = vrot.slane %v22602_v8, 2 }
 0xbfa   : > { %v15777_v25 = vsel %vm2591_vm4, %v15774_v30, %v15776_v24  ;;  %v29078_v30 = vld [vmem:[#allocation9_spill] sm:$0xff] }
 0xbff   : > { %20915 = vmatmul.mubr.msk.bf16.gmra.mrb[64].mxu0 %vm825_vm0, %v29047_v7  ;;  %v29051_v7 = vld [vmem:[#allocation84_spill] sm:$0xff] }
 0xc00   : > { %20918 = vmatprep.mubr.msk.bf16.mxu0 %vm825_vm0, %v29048_v60  ;;  %v29053_v60 = vld [vmem:[#allocation86_spill] sm:$0xff] }
 0xc07   : > { %20919 = vmatmul.mubr.msk.bf16.gmra.mrb[68].mxu0 %vm825_vm0, %v29050_v20  ;;  %v29055_v20 = vld [vmem:[#allocation88_spill] sm:$0xff] }
 0xc08   : > { %20930 = vmatprep.mubr.msk.bf16.mxu0 %vm825_vm0, %v15743_v40  ;;  %v29056_v40 = vld [vmem:[#allocation89_spill] sm:$0xff] }
 0xc0f   : > { %20931 = vmatmul.mubr.msk.bf16.vlgmr.msra.gmra.mrb[36].mxu0 %vm825_vm0, %v15745_v51  ;;  %v29060_v51 = vld [vmem:[#allocation93_spill] sm:$0xff] }
 0xc10   : > { %20934 = vmatprep.mubr.msk.bf16.mxu0 %vm825_vm0, %v15747_v11  ;;  %20967 = vmatpush3.bf16.msra.mxu0 %v22583_v23  ;;  %v15757_v23 = vsel %vm2591_vm4, %v15754_v47, %v15756_v55  ;;  %v29061_v11 = vld [vmem:[#allocation94_spill] sm:$0xff]  ;;  %v29075_v55 = vld [vmem:[#allocation7_spill] sm:$0xff] }
 0xc11   : > { %20968 = vmatprep.subr.bf16.mxu0 %v22589_v52  ;;  %v29074_v47 = vld [vmem:[#allocation6_spill] sm:$0xff] }
 0xc14   : > { %20969 = vmatpush3.bf16.msra.mxu0 %v22589_v52  ;;  %v29059_v52 = vld [vmem:[#allocation92_spill] sm:$0xff] }
 0xc15   : > { %20970 = vmatprep.subr.bf16.mxu0 %v22594_v49 }
 0xc17   : > { %20935 = vmatmul.mubr.msk.bf16.gmra.mrb[40].mxu0 %vm825_vm0, %v15749_v37 }
 0xc18   : > { %20938 = vmatprep.mubr.msk.bf16.mxu0 %vm825_vm0, %v15751_v29  ;;  %20971 = vmatpush3.bf16.msra.mxu0 %v22594_v49  ;;  %v29062_v49 = vld [vmem:[#allocation95_spill] sm:$0xff] }
 0xc19   : > { %20972 = vmatprep.subr.bf16.mxu0 %v22599_v36 }
 0xc1c   : > { %20973 = vmatpush3.bf16.msra.mxu0 %v22599_v36  ;;  %v16249_v36 = vrot.slane %v16247_v56, 3 }
 0xc1d   : > { %21010 = vmatprep.subr.bf16.mxu0 %v22603_v5 }
 0xc1f   : > { %20939 = vmatmul.mubr.msk.bf16.gmra.mrb[44].mxu0 %vm825_vm0, %v15753_v35 }
 0xc20   : > { %20942 = vmatprep.mubr.msk.bf16.mxu0 %vm825_vm0, %v15755_v28 }
 0xc27   : > { %20943 = vmatmul.mubr.msk.bf16.gmra.mrb[48].mxu0 %vm825_vm0, %v15757_v23 }
 0xc28   : > { %20946 = vmatprep.mubr.msk.bf16.mxu0 %vm825_vm0, %v15759_v16 }
 0xc2f   : > { %20947 = vmatmul.mubr.msk.bf16.gmra.mrb[52].mxu0 %vm825_vm0, %v15761_v58 }
 0xc30   : > { %20950 = vmatprep.mubr.msk.bf16.mxu0 %vm825_vm0, %v15763_v63 }
 0xc37   : > { %20951 = vmatmul.mubr.msk.bf16.gmra.mrb[56].mxu0 %vm825_vm0, %v15765_v33 }
 0xc38   : > { %20954 = vmatprep.mubr.msk.bf16.mxu0 %vm825_vm0, %v15767_v46 }
 0xc3f   : > { %20955 = vmatmul.mubr.msk.bf16.gmra.mrb[60].mxu0 %vm825_vm0, %v15769_v27  ;;  %v29077_v27 = vld [vmem:[#allocation10_spill] sm:$0xff] }
 0xc40   : > { %20958 = vmatprep.mubr.msk.bf16.mxu0 %vm825_vm0, %v15771_v0 }
 0xc47   : > { %20959 = vmatmul.mubr.msk.bf16.gmra.mrb[64].mxu0 %vm825_vm0, %v15773_v6 }
 0xc48   : > { %20962 = vmatprep.mubr.msk.bf16.mxu0 %vm825_vm0, %v15775_v1  ;;  %v29079_v1 = vld [vmem:[#allocation11_spill] sm:$0xff] }
 0xc4f   : > { %20963 = vmatmul.mubr.msk.bf16.gmra.mrb[68].mxu0 %vm825_vm0, %v15777_v25 }
 0xc50   : > { %20974 = vmatprep.mubr.msk.bf16.mxu0 %vm825_vm0, %v29051_v7 }
 0xc57   : > { %20975 = vmatmul.mubr.msk.bf16.vlgmr.msra.gmra.mrb[36].mxu0 %vm825_vm0, %v29052_v18 }
 0xc58   : > { %20978 = vmatprep.mubr.msk.bf16.mxu0 %vm825_vm0, %v29053_v60  ;;  %21011 = vmatpush3.bf16.msra.mxu0 %v22603_v5  ;;  %v29073_v5 = vld [vmem:[#allocation5_spill] sm:$0xff] }
 0xc59   : > { %21012 = vmatprep.subr.bf16.mxu0 %v22604_v38 }
 0xc5c   : > { %21013 = vmatpush3.bf16.msra.mxu0 %v22604_v38 }
 0xc5d   : > { %21014 = vmatprep.subr.bf16.mxu0 %v22605_v39 }
 0xc5f   : > { %20979 = vmatmul.mubr.msk.bf16.gmra.mrb[40].mxu0 %vm825_vm0, %v29054_v26  ;;  %v29080_v26 = vld [vmem:[#allocation12_spill] sm:$0xff] }
 0xc60   : > { %20982 = vmatprep.mubr.msk.bf16.mxu0 %vm825_vm0, %v29055_v20  ;;  %21015 = vmatpush3.bf16.msra.mxu0 %v22605_v39 }
 0xc61   : > { %21016 = vmatprep.subr.bf16.mxu0 %v22606_v44 }
 0xc64   : > { %21017 = vmatpush3.bf16.msra.mxu0 %v22606_v44 }
 0xc67   : > { %20983 = vmatmul.mubr.msk.bf16.gmra.mrb[44].mxu0 %vm825_vm0, %v29056_v40 }
 0xc68   : > { %20986 = vmatprep.mubr.msk.bf16.mxu0 %vm825_vm0, %v29057_v22 }
 0xc6f   : > { %20987 = vmatmul.mubr.msk.bf16.gmra.mrb[48].mxu0 %vm825_vm0, %v29058_v13 }
 0xc70   : > { %20990 = vmatprep.mubr.msk.bf16.mxu0 %vm825_vm0, %v29059_v52  ;;  %v29081_v52 = vld [vmem:[#allocation15_spill] sm:$0xff] }
 0xc77   : > { %20991 = vmatmul.mubr.msk.bf16.gmra.mrb[52].mxu0 %vm825_vm0, %v27439_v17  ;;  %v16246_v17 = vrot.slane %v16244_v41, 2 }
 0xc78   : > { %20994 = vmatprep.mubr.msk.bf16.mxu0 %vm825_vm0, %v29060_v51 }
 0xc79   : > { %v16250_v37 = vor.u32 %v16249_v36, %v16246_v17  ;;  %v29083_v17 = vld [vmem:[#allocation16_spill] sm:$0xff] }
 0xc7b   : > { %v16251_v29 = vsel %vm3400_vm5, %v27473_v62, %v16250_v37  ;;  %v29066_v62 = vld [vmem:[#allocation99_spill] sm:$0xff] }
 0xc7f   : > { %20995 = vmatmul.mubr.msk.bf16.gmra.mrb[56].mxu0 %vm825_vm0, %v29061_v11 }
 0xc80   : > { %20998 = vmatprep.mubr.msk.bf16.mxu0 %vm825_vm0, %v29062_v49  ;;  %v29082_v49 = vld [vmem:[#allocation14_spill] sm:$0xff] }
 0xc87   : > { %20999 = vmatmul.mubr.msk.bf16.gmra.mrb[60].mxu0 %vm825_vm0, %v27462_v31  ;;  %v29063_v31 = vld [vmem:[#allocation96_spill] sm:$0xff] }
 0xc88   : > { %21002 = vmatprep.mubr.msk.bf16.mxu0 %vm825_vm0, %v27466_v10  ;;  %v29064_v10 = vld [vmem:[#allocation97_spill] sm:$0xff] }
 0xc8f   : > { %21003 = vmatmul.mubr.msk.bf16.gmra.mrb[64].mxu0 %vm825_vm0, %v27471_v54  ;;  %v29065_v54 = vld [vmem:[#allocation98_spill] sm:$0xff] }
 0xc90   : > { %21006 = vmatprep.mubr.msk.bf16.mxu0 %vm825_vm0, %v27490_v3  ;;  %v29069_v3 = vld [vmem:[#allocation102_spill] sm:$0xff] }
 0xc97   : > { %21007 = vmatmul.mubr.msk.bf16.gmra.mrb[68].mxu0 %vm825_vm0, %v16251_v29 }
 0xc98   : > { %21018 = vmatprep.mubr.msk.bf16.mxu0 %vm825_vm0, %v27480_v15  ;;  %v29067_v15 = vld [vmem:[#allocation100_spill] sm:$0xff] }
 0xc9f   : > { %21019 = vmatmul.mubr.msk.bf16.vlgmr.msra.gmra.mrb[36].mxu0 %vm825_vm0, %v27483_v59  ;;  %v29068_v59 = vld [vmem:[#allocation101_spill] sm:$0xff] }
 0xca0   : > { %21022 = vmatprep.mubr.msk.bf16.mxu0 %vm825_vm0, %v27493_v21  ;;  %v29070_v21 = vld [vmem:[#allocation103_spill] sm:$0xff] }
 0xca7   : > { %21023 = vmatmul.mubr.msk.bf16.gmra.mrb[40].mxu0 %vm825_vm0, %v27496_v19  ;;  %v29071_v19 = vld [vmem:[#allocation104_spill] sm:$0xff] }
 0xca8   : > { %21026 = vmatprep.mubr.msk.bf16.mxu0 %vm825_vm0, %v29063_v31 }
 0xcaf   : > { %21027 = vmatmul.mubr.msk.bf16.gmra.mrb[44].mxu0 %vm825_vm0, %v29064_v10 }
 0xcb0   : > { %21030 = vmatprep.mubr.msk.bf16.mxu0 %vm825_vm0, %v29065_v54 }
 0xcb7   : > { %21031 = vmatmul.mubr.msk.bf16.gmra.mrb[48].mxu0 %vm825_vm0, %v29066_v62 }
 0xcb8   : > { %21034 = vmatprep.mubr.msk.bf16.mxu0 %vm825_vm0, %v27521_v14  ;;  %v29072_v14 = vld [vmem:[#allocation4_spill] sm:$0xff] }
 0xcbf   : > { %21035 = vmatmul.mubr.msk.bf16.gmra.mrb[52].mxu0 %vm825_vm0, %v27524_v2 }
 0xcc0   : > { %21038 = vmatprep.mubr.msk.bf16.mxu0 %vm825_vm0, %v27527_v12 }
 0xcc7   : > { %21039 = vmatmul.mubr.msk.bf16.gmra.mrb[56].mxu0 %vm825_vm0, %v27531_v57 }
 0xcc8   : > { %21042 = vmatprep.mubr.msk.bf16.mxu0 %vm825_vm0, %v29067_v15 }
 0xccf   : > { %21043 = vmatmul.mubr.msk.bf16.gmra.mrb[60].mxu0 %vm825_vm0, %v27539_v34 }
 0xcd0   : > { %21046 = vmatprep.mubr.msk.bf16.mxu0 %vm825_vm0, %v29068_v59  ;;  %v29084_v59 = vld [vmem:[#allocation17_spill] sm:$0xff] }
 0xcd7   : > { %21047 = vmatmul.mubr.msk.bf16.gmra.mrb[64].mxu0 %vm825_vm0, %v29069_v3 }
 0xcd8   : > { %21050 = vmatprep.mubr.msk.bf16.mxu0 %vm825_vm0, %v29070_v21 }
 0xcdf   : > { %21051 = vmatmul.mubr.msk.bf16.gmra.mrb[68].mxu0 %vm825_vm0, %v29071_v19 }
 0xd72   : > { %v27937_v50 = vpop.f32.mrb[36].mxu0 }
 0xd73   : > { %v27939_v12 = vpop.f32.mrb[37].mxu0  ;;  %v16886_v48 = vmul.f32 %v27937_v50, %v29073_v5 }
 0xd74   : > { %v16884_v2 = vmul.f32 %v27939_v12, %v29072_v14  ;;  %v27943_v57 = vpop.f32.mrb[38].mxu0 }
 0xd75   : > { %v27945_v34 = vpop.f32.mrb[39].mxu0  ;;  %v16887_v61 = vmul.f32 %v27943_v57, %v29075_v55  ;;  %v16923_v43 = vsel %vm825_vm0, %v16886_v48, 0.0  ;;  %v29085_v48 = vld [vmem:[#allocation19_spill] sm:$0xff] }
 0xd76   : > { %v16885_v35 = vmul.f32 %v27945_v34, %v29074_v47  ;;  %v16920_v28 = vsel %vm825_vm0, %v16884_v2, 0.0 }
 0xd77   : > { %v16925_v9 = vsel %vm825_vm0, %v16887_v61, 0.0  ;;  %v29086_v61 = vld [vmem:[#allocation18_spill] sm:$0xff] }
 0xd78   : > { %v16921_v23 = vsel %vm825_vm0, %v16885_v35, 0.0 }
 0xd79   : > { %v16922_v16 = vadd.f32 %v16921_v23, %v16920_v28 }
 0xd7a   : > { %v27956_v4 = vpop.f32.mrb[40].mxu0 }
 0xd7b   : > { %v16924_v58 = vadd.f32 %v16923_v43, %v16922_v16  ;;  %v27958_v63 = vpop.f32.mrb[41].mxu0  ;;  %v16890_v0 = vmul.f32 %v27956_v4, %v29077_v27  ;;  %v29087_v43 = vld [vmem:[#allocation20_spill] sm:$0xff] }
 0xd7c   : > { %v16888_v33 = vmul.f32 %v27958_v63, %v29076_v42  ;;  %v27963_v46 = vpop.f32.mrb[42].mxu0 }
 0xd7d   : > { %v16926_v32 = vadd.f32 %v16925_v9, %v16924_v58  ;;  %v27965_v45 = vpop.f32.mrb[43].mxu0  ;;  %v16891_v24 = vmul.f32 %v27963_v46, %v29079_v1  ;;  %v16931_v38 = vsel %vm825_vm0, %v16890_v0, 0.0 }
 0xd7e   : > { %v16927_v53 = vsel %vm825_vm0, %v16888_v33, 0.0  ;;  %v16889_v6 = vmul.f32 %v27965_v45, %v29078_v30 }
 0xd7f   : > { %v16928_v8 = vadd.f32 %v16927_v53, %v16926_v32  ;;  %v16933_v44 = vsel %vm825_vm0, %v16891_v24, 0.0  ;;  %v29088_v24 = vld [vmem:[#allocation21_spill] sm:$0xff] }
 0xd80   : > { %v16929_v25 = vsel %vm825_vm0, %v16889_v6, 0.0 }
 0xd81   : > { %v16930_v7 = vadd.f32 %v16929_v25, %v16928_v8 }
 0xd82   : > { %v27976_v18 = vpop.f32.mrb[44].mxu0 }
 0xd83   : > { %v16932_v60 = vadd.f32 %v16931_v38, %v16930_v7  ;;  %v27978_v39 = vpop.f32.mrb[45].mxu0  ;;  %v16894_v51 = vmul.f32 %v27976_v18, %v29081_v52 }
 0xd84   : > { %v16892_v20 = vmul.f32 %v27978_v39, %v29080_v26  ;;  %v27983_v40 = vpop.f32.mrb[46].mxu0 }
 0xd85   : > { %v16934_v22 = vadd.f32 %v16933_v44, %v16932_v60  ;;  %v27985_v13 = vpop.f32.mrb[47].mxu0  ;;  %v16895_v36 = vmul.f32 %v27983_v40, %v29083_v17  ;;  %v16939_v31 = vsel %vm825_vm0, %v16894_v51, 0.0  ;;  %v29089_v44 = vld [vmem:[#allocation23_spill] sm:$0xff]  ;;  %v29090_v51 = vld [vmem:[#allocation22_spill] sm:$0xff] }
 0xd86   : > { %v16935_v11 = vsel %vm825_vm0, %v16892_v20, 0.0  ;;  %v16893_v41 = vmul.f32 %v27985_v13, %v29082_v49 }
 0xd87   : > { %v16936_v56 = vadd.f32 %v16935_v11, %v16934_v22  ;;  %v16941_v15 = vsel %vm825_vm0, %v16895_v36, 0.0 }
 0xd88   : > { %v16937_v37 = vsel %vm825_vm0, %v16893_v41, 0.0 }
 0xd89   : > { %v16938_v29 = vadd.f32 %v16937_v37, %v16936_v56  ;;  %v29091_v56 = vld [vmem:[#allocation24_spill] sm:$0xff] }
 0xd8a   : > { %v27996_v10 = vpop.f32.mrb[48].mxu0 }
 0xd8b   : > { %v16940_v54 = vadd.f32 %v16939_v31, %v16938_v29  ;;  %v27998_v62 = vpop.f32.mrb[49].mxu0  ;;  %v16898_v35 = vmul.f32 %v27996_v10, %v29085_v48 }
 0xd8c   : > { %v16896_v3 = vmul.f32 %v27998_v62, %v29084_v59  ;;  %v28003_v21 = vpop.f32.mrb[50].mxu0 }
 0xd8d   : > { %v16942_v19 = vadd.f32 %v16941_v15, %v16940_v54  ;;  %v28005_v2 = vpop.f32.mrb[51].mxu0  ;;  %v16899_v58 = vmul.f32 %v28003_v21, %v29087_v43  ;;  %v16947_v32 = vsel %vm825_vm0, %v16898_v35, 0.0  ;;  %v29092_v35 = vld [vmem:[#allocation25_spill] sm:$0xff] }
 0xd8e   : > { %v16943_v28 = vsel %vm825_vm0, %v16896_v3, 0.0  ;;  %v16897_v23 = vmul.f32 %v28005_v2, %v29086_v61 }
 0xd8f   : > { %v16944_v16 = vadd.f32 %v16943_v28, %v16942_v19  ;;  %v16949_v8 = vsel %vm825_vm0, %v16899_v58, 0.0 }
 0xd90   : > { %v16945_v9 = vsel %vm825_vm0, %v16897_v23, 0.0 }
 0xd91   : > { %v16946_v33 = vadd.f32 %v16945_v9, %v16944_v16  ;;  %v29093_v9 = vld [vmem:[#allocation27_spill] sm:$0xff] }
 0xd92   : > { %v28016_v0 = vpop.f32.mrb[52].mxu0 }
 0xd93   : > { %v16948_v53 = vadd.f32 %v16947_v32, %v16946_v33  ;;  %v28018_v6 = vpop.f32.mrb[53].mxu0  ;;  %v16902_v20 = vmul.f32 %v28016_v0, %v29089_v44 }
 0xd94   : > { %v16900_v25 = vmul.f32 %v28018_v6, %v29088_v24  ;;  %v28023_v7 = vpop.f32.mrb[54].mxu0 }
 0xd95   : > { %v16950_v38 = vadd.f32 %v16949_v8, %v16948_v53  ;;  %v28025_v60 = vpop.f32.mrb[55].mxu0  ;;  %v16903_v36 = vmul.f32 %v28023_v7, %v29091_v56  ;;  %v16955_v31 = vsel %vm825_vm0, %v16902_v20, 0.0  ;;  %v29094_v53 = vld [vmem:[#allocation26_spill] sm:$0xff] }
 0xd96   : > { %v16951_v22 = vsel %vm825_vm0, %v16900_v25, 0.0  ;;  %v16901_v11 = vmul.f32 %v28025_v60, %v29090_v51 }
 0xd97   : > { %v16952_v41 = vadd.f32 %v16951_v22, %v16950_v38  ;;  %v16957_v19 = vsel %vm825_vm0, %v16903_v36, 0.0  ;;  %v29095_v38 = vld [vmem:[#allocation28_spill] sm:$0xff] }
 0xd98   : > { %v16953_v37 = vsel %vm825_vm0, %v16901_v11, 0.0 }
 0xd99   : > { %v16954_v29 = vadd.f32 %v16953_v37, %v16952_v41 }
 0xd9a   : > { %v28036_v54 = vpop.f32.mrb[56].mxu0 }
 0xd9b   : > { %v16956_v15 = vadd.f32 %v16955_v31, %v16954_v29  ;;  %v28038_v3 = vpop.f32.mrb[57].mxu0  ;;  %v16906_v33 = vmul.f32 %v28036_v54, %v29093_v9 }
 0xd9c   : > { %v16904_v28 = vmul.f32 %v28038_v3, %v29092_v35  ;;  %v28043_v23 = vpop.f32.mrb[58].mxu0 }
 0xd9d   : > { %v16958_v16 = vadd.f32 %v16957_v19, %v16956_v15  ;;  %v28045_v58 = vpop.f32.mrb[59].mxu0  ;;  %v16907_v20 = vmul.f32 %v28043_v23, %v29095_v38  ;;  %v16963_v41 = vsel %vm825_vm0, %v16906_v33, 0.0  ;;  %v29096_v15 = vld [vmem:[#allocation29_spill] sm:$0xff]  ;;  %v29097_v38 = vld [vmem:[#allocation31_spill] sm:$0xff] }
 0xd9e   : > { %v16959_v32 = vsel %vm825_vm0, %v16904_v28, 0.0  ;;  %v16905_v8 = vmul.f32 %v28045_v58, %v29094_v53 }
 0xd9f   : > { %v16960_v25 = vadd.f32 %v16959_v32, %v16958_v16  ;;  %v16965_v31 = vsel %vm825_vm0, %v16907_v20, 0.0 }
 0xda0   : > { %v16961_v22 = vsel %vm825_vm0, %v16905_v8, 0.0 }
 0xda1   : > { %v16962_v11 = vadd.f32 %v16961_v22, %v16960_v25  ;;  %v29098_v25 = vld [vmem:[#allocation30_spill] sm:$0xff] }
 0xda2   : > { %v28056_v36 = vpop.f32.mrb[60].mxu0 }
 0xda3   : > { %v16964_v37 = vadd.f32 %v16963_v41, %v16962_v11  ;;  %v28058_v29 = vpop.f32.mrb[61].mxu0  ;;  %v16910_v8 = vmul.f32 %v28056_v36, %v29097_v38  ;;  %v29099_v41 = vld [vmem:[#allocation32_spill] sm:$0xff] }
 0xda4   : > { %v16908_v19 = vmul.f32 %v28058_v29, %v29096_v15  ;;  %v28063_v28 = vpop.f32.mrb[62].mxu0 }
 0xda5   : > { %v16966_v16 = vadd.f32 %v16965_v31, %v16964_v37  ;;  %v28065_v32 = vpop.f32.mrb[63].mxu0  ;;  %v16911_v20 = vmul.f32 %v28063_v28, %v29099_v41  ;;  %v16971_v53 = vsel %vm825_vm0, %v16910_v8, 0.0  ;;  %v29101_v41 = vld [vmem:[#allocation35_spill] sm:$0xff] }
 0xda6   : > { %v16967_v33 = vsel %vm825_vm0, %v16908_v19, 0.0  ;;  %v16909_v22 = vmul.f32 %v28065_v32, %v29098_v25  ;;  %v29100_v19 = vld [vmem:[#allocation33_spill] sm:$0xff] }
 0xda7   : > { %v16968_v11 = vadd.f32 %v16967_v33, %v16966_v16  ;;  %v16973_v38 = vsel %vm825_vm0, %v16911_v20, 0.0 }
 0xda8   : > { %v16969_v9 = vsel %vm825_vm0, %v16909_v22, 0.0  ;;  %v29102_v22 = vld [vmem:[#allocation34_spill] sm:$0xff] }
 0xda9   : > { %v16970_v15 = vadd.f32 %v16969_v9, %v16968_v11  ;;  %v29103_v11 = vld [vmem:[#allocation36_spill] sm:$0xff] }
 0xdaa   : > { %v28076_v37 = vpop.f32.mrb[64].mxu0 }
 0xdab   : > { %v16972_v31 = vadd.f32 %v16971_v53, %v16970_v15  ;;  %v28078_v35 = vpop.f32.mrb[65].mxu0  ;;  %v16914_v9 = vmul.f32 %v28076_v37, %v29101_v41  ;;  %v29104_v41 = vld [vmem:[#allocation37_spill] sm:$0xff] }
 0xdac   : > { %v16912_v56 = vmul.f32 %v28078_v35, %v29100_v19  ;;  %v28083_v25 = vpop.f32.mrb[66].mxu0 }
 0xdad   : > { %v16974_v16 = vadd.f32 %v16973_v38, %v16972_v31  ;;  %v28085_v33 = vpop.f32.mrb[67].mxu0  ;;  %v16915_v20 = vmul.f32 %v28083_v25, %v29103_v11  ;;  %v16979_v51 = vsel %vm825_vm0, %v16914_v9, 0.0  ;;  %v29106_v11 = vld [vmem:[#allocation38_spill] sm:$0xff] }
 0xdae   : > { %v16975_v8 = vsel %vm825_vm0, %v16912_v56, 0.0  ;;  %v16913_v53 = vmul.f32 %v28085_v33, %v29102_v22  ;;  %v29105_v22 = vld [vmem:[#allocation39_spill] sm:$0xff] }
 0xdaf   : > { %v16976_v15 = vadd.f32 %v16975_v8, %v16974_v16  ;;  %v16981_v43 = vsel %vm825_vm0, %v16915_v20, 0.0 }
 0xdb0   : > { %v16977_v44 = vsel %vm825_vm0, %v16913_v53, 0.0 }
 0xdb1   : > { %v16978_v19 = vadd.f32 %v16977_v44, %v16976_v15  ;;  %v29107_v44 = vld [vmem:[#allocation40_spill] sm:$0xff] }
 0xdb2   : > { %v21052_v38 = vpop.f32.mrb[68].mxu0 }
 0xdb3   : > { %v16980_v31 = vadd.f32 %v16979_v51, %v16978_v19  ;;  %v16833_v24 = vpop.f32.mrb[69].mxu0  ;;  %v16918_v16 = vmul.f32 %v21052_v38, %v29105_v22 }
 0xdb4   : > { %v16916_v48 = vmul.f32 %v16833_v24, %v29104_v41  ;;  %v21053_v56 = vpop.f32.mrb[70].mxu0 }
 0xdb5   : > { %v16982_v61 = vadd.f32 %v16981_v43, %v16980_v31  ;;  %v16836_v59 = vpop.f32.mrb[71].mxu0  ;;  %v16919_v15 = vmul.f32 %v21053_v56, %v29107_v44  ;;  %v16987_v19 = vsel %vm825_vm0, %v16918_v16, 0.0 }
 0xdb6   : > { %v16983_v8 = vsel %vm825_vm0, %v16916_v48, 0.0  ;;  %v16917_v17 = vmul.f32 %v16836_v59, %v29106_v11 }
 0xdb7   : > { %v16984_v53 = vadd.f32 %v16983_v8, %v16982_v61  ;;  %v16989_v41 = vsel %vm825_vm0, %v16919_v15, 0.0 }
 0xdb8   : > { %v16985_v9 = vsel %vm825_vm0, %v16917_v17, 0.0 }
 0xdb9   : > { %v16986_v51 = vadd.f32 %v16985_v9, %v16984_v53 }
 0xdbb   : > { %v16988_v20 = vadd.f32 %v16987_v19, %v16986_v51 }
 0xdbd   : > { %v16990_v52 = vadd.f32 %v16989_v41, %v16988_v20 }
 0xdbf   : > { %v16991_v43 = vrot.slane %v16990_v52, 4 }
 0xdc1   : > { %v16992_v31 = vadd.f32 %v16991_v43, %v16990_v52 }
 0xdc3   : > { %v16993_v49 = vrot.slane %v16992_v31, 2 }
 0xdc5   : > { %v16994_v22 = vadd.f32 %v16993_v49, %v16992_v31 }
 0xdc7   : > { %v16995_v26 = vrot.slane %v16994_v22, 1 }
 0xdc9   : > { %v16996_v48 = vadd.f32 %v16995_v26, %v16994_v22 }
 0xdcb   : > { %v16997_v1 = vmul.f32 0.00390625, %v16996_v48 }
 0xdcd   : > { %v28106_v61 = vsub.f32 %v27939_v12, %v16997_v1  ;;  %v28109_v8 = vsub.f32 %v27945_v34, %v16997_v1  ;;  %v28112_v17 = vsub.f32 %v27937_v50, %v16997_v1  ;;  %v28115_v16 = vsub.f32 %v27943_v57, %v16997_v1 }
 0xdce   : > { %v28118_v41 = vsub.f32 %v27958_v63, %v16997_v1  ;;  %v28121_v52 = vsub.f32 %v27965_v45, %v16997_v1  ;;  %v28124_v26 = vsub.f32 %v27956_v4, %v16997_v1  ;;  %v28127_v12 = vsub.f32 %v27963_v46, %v16997_v1 }
 0xdcf   : > { %v28130_v34 = vsub.f32 %v27978_v39, %v16997_v1  ;;  %v28133_v50 = vsub.f32 %v27985_v13, %v16997_v1  ;;  %v28136_v57 = vsub.f32 %v27976_v18, %v16997_v1  ;;  %v28139_v63 = vsub.f32 %v27983_v40, %v16997_v1 }
 0xdd0   : > { %v28142_v45 = vsub.f32 %v27998_v62, %v16997_v1  ;;  %v28145_v4 = vsub.f32 %v28005_v2, %v16997_v1  ;;  %v28148_v46 = vsub.f32 %v27996_v10, %v16997_v1  ;;  %v28151_v39 = vsub.f32 %v28003_v21, %v16997_v1 }
 0xdd1   : > { %v28154_v13 = vsub.f32 %v28018_v6, %v16997_v1  ;;  %v28157_v18 = vsub.f32 %v28025_v60, %v16997_v1  ;;  %v28160_v40 = vsub.f32 %v28016_v0, %v16997_v1  ;;  %v28163_v49 = vsub.f32 %v28023_v7, %v16997_v1 }
 0xdd2   : > { %v28166_v62 = vsub.f32 %v28038_v3, %v16997_v1  ;;  %v28169_v10 = vsub.f32 %v28045_v58, %v16997_v1  ;;  %v28172_v21 = vsub.f32 %v28036_v54, %v16997_v1  ;;  %v28175_v2 = vsub.f32 %v28043_v23, %v16997_v1 }
 0xdd3   : > { %v28178_v6 = vsub.f32 %v28058_v29, %v16997_v1  ;;  %v28181_v0 = vsub.f32 %v28065_v32, %v16997_v1  ;;  %v28184_v7 = vsub.f32 %v28056_v36, %v16997_v1  ;;  %v28187_v60 = vsub.f32 %v28063_v28, %v16997_v1 }
 0xdd4   : > { %v28190_v3 = vsub.f32 %v28078_v35, %v16997_v1  ;;  %v28193_v54 = vsub.f32 %v28085_v33, %v16997_v1  ;;  %v28196_v23 = vsub.f32 %v28076_v37, %v16997_v1  ;;  %v28199_v58 = vsub.f32 %v28083_v25, %v16997_v1 }
 0xdd5   : > { %v28201_v29 = vsub.f32 %v16833_v24, %v16997_v1  ;;  %v28203_v32 = vsub.f32 %v16836_v59, %v16997_v1  ;;  %v28205_v36 = vsub.f32 %v21052_v38, %v16997_v1  ;;  %v28207_v28 = vsub.f32 %v21053_v56, %v16997_v1 }
 0xdd6   : > { %v17034_v35 = vmul.f32 %v28106_v61, %v28106_v61  ;;  %v17035_v33 = vmul.f32 %v28109_v8, %v28109_v8  ;;  %v17036_v37 = vmul.f32 %v28112_v17, %v28112_v17  ;;  %v17037_v25 = vmul.f32 %v28115_v16, %v28115_v16 }
 0xdd7   : > { %v17038_v1 = vmul.f32 %v28118_v41, %v28118_v41  ;;  %v17039_v38 = vmul.f32 %v28121_v52, %v28121_v52  ;;  %v17042_v31 = vmul.f32 %v28130_v34, %v28130_v34 }
 0xdd8   : > { %v17070_v24 = vmul.f32 %v17034_v35, %v29072_v14  ;;  %v17071_v59 = vmul.f32 %v17035_v33, %v29074_v47  ;;  %v17072_v22 = vmul.f32 %v17036_v37, %v29073_v5  ;;  %v17073_v56 = vmul.f32 %v17037_v25, %v29075_v55  ;;  %v29108_v37 = vld [vmem:[#allocation11_spill] sm:$0xff] }
 0xdd9   : > { %v17040_v14 = vmul.f32 %v28124_v26, %v28124_v26  ;;  %v17074_v47 = vmul.f32 %v17038_v1, %v29076_v42  ;;  %v17041_v5 = vmul.f32 %v28127_v12, %v28127_v12  ;;  %v17075_v20 = vmul.f32 %v17039_v38, %v29078_v30  ;;  %v29109_v1 = vld [vmem:[#allocation12_spill] sm:$0xff] }
 0xdda   : > { %v17106_v53 = vsel %vm825_vm0, %v17070_v24, 0.0  ;;  %v17107_v15 = vsel %vm825_vm0, %v17071_v59, 0.0  ;;  %v17109_v51 = vsel %vm825_vm0, %v17072_v22, 0.0  ;;  %v17111_v55 = vsel %vm825_vm0, %v17073_v56, 0.0 }
 0xddb   : > { %v17108_v9 = vadd.f32 %v17107_v15, %v17106_v53  ;;  %v17076_v48 = vmul.f32 %v17040_v14, %v29077_v27  ;;  %v17113_v35 = vsel %vm825_vm0, %v17074_v47, 0.0  ;;  %v17043_v42 = vmul.f32 %v28133_v50, %v28133_v50  ;;  %v29110_v53 = vld [vmem:[#allocation14_spill] sm:$0xff] }
 0xddc   : > { %v17077_v25 = vmul.f32 %v17041_v5, %v29108_v37  ;;  %v17115_v24 = vsel %vm825_vm0, %v17075_v20, 0.0  ;;  %v17044_v30 = vmul.f32 %v28136_v57, %v28136_v57  ;;  %v17078_v22 = vmul.f32 %v17042_v31, %v29109_v1 }
 0xddd   : > { %v17110_v19 = vadd.f32 %v17109_v51, %v17108_v9  ;;  %v17117_v38 = vsel %vm825_vm0, %v17076_v48, 0.0  ;;  %v17045_v27 = vmul.f32 %v28139_v63, %v28139_v63  ;;  %v17079_v15 = vmul.f32 %v17043_v42, %v29110_v53  ;;  %v29111_v51 = vld [vmem:[#allocation15_spill] sm:$0xff]  ;;  %v29113_v42 = vld [vmem:[#allocation17_spill] sm:$0xff] }
 0xdde   : > { %v17119_v9 = vsel %vm825_vm0, %v17077_v25, 0.0  ;;  %v17046_v47 = vmul.f32 %v28142_v45, %v28142_v45  ;;  %v17121_v5 = vsel %vm825_vm0, %v17078_v22, 0.0 }
 0xddf   : > { %v17112_v43 = vadd.f32 %v17111_v55, %v17110_v19  ;;  %v17080_v19 = vmul.f32 %v17044_v30, %v29111_v51  ;;  %v17047_v55 = vmul.f32 %v28145_v4, %v28145_v4  ;;  %v17123_v48 = vsel %vm825_vm0, %v17079_v15, 0.0  ;;  %v29114_v30 = vld [vmem:[#allocation18_spill] sm:$0xff] }
 0xde0   : > { %v17082_v37 = vmul.f32 %v17046_v47, %v29113_v42  ;;  %v29116_v47 = vld [vmem:[#allocation20_spill] sm:$0xff] }
 0xde1   : > { %v17114_v33 = vadd.f32 %v17113_v35, %v17112_v43  ;;  %v29112_v43 = vld [vmem:[#allocation16_spill] sm:$0xff]  ;;  %v17125_v25 = vsel %vm825_vm0, %v17080_v19, 0.0  ;;  %v17083_v1 = vmul.f32 %v17047_v55, %v29114_v30  ;;  %v29117_v55 = vld [vmem:[#allocation21_spill] sm:$0xff] }
 0xde2   : > { %v17081_v31 = vmul.f32 %v17045_v27, %v29112_v43  ;;  %v29115_v27 = vld [vmem:[#allocation19_spill] sm:$0xff]  ;;  %v17129_v15 = vsel %vm825_vm0, %v17082_v37, 0.0 }
 0xde3   : > { %v17116_v59 = vadd.f32 %v17115_v24, %v17114_v33  ;;  %v17048_v33 = vmul.f32 %v28148_v46, %v28148_v46  ;;  %v17131_v19 = vsel %vm825_vm0, %v17083_v1, 0.0 }
 0xde4   : > { %v17127_v22 = vsel %vm825_vm0, %v17081_v31, 0.0 }
 0xde5   : > { %v17118_v56 = vadd.f32 %v17117_v38, %v17116_v59  ;;  %v17049_v59 = vmul.f32 %v28151_v39, %v28151_v39  ;;  %v17084_v53 = vmul.f32 %v17048_v33, %v29115_v27  ;;  %v29118_v33 = vld [vmem:[#allocation22_spill] sm:$0xff] }
 0xde7   : > { %v17120_v14 = vadd.f32 %v17119_v9, %v17118_v56  ;;  %v17050_v56 = vmul.f32 %v28154_v13, %v28154_v13  ;;  %v17085_v51 = vmul.f32 %v17049_v59, %v29116_v47  ;;  %v17133_v31 = vsel %vm825_vm0, %v17084_v53, 0.0  ;;  %v29119_v59 = vld [vmem:[#allocation23_spill] sm:$0xff] }
 0xde9   : > { %v17122_v20 = vadd.f32 %v17121_v5, %v17120_v14  ;;  %v17051_v14 = vmul.f32 %v28157_v18, %v28157_v18  ;;  %v17086_v43 = vmul.f32 %v17050_v56, %v29117_v55  ;;  %v17135_v37 = vsel %vm825_vm0, %v17085_v51, 0.0  ;;  %v29120_v56 = vld [vmem:[#allocation24_spill] sm:$0xff] }
 0xdeb   : > { %v17124_v35 = vadd.f32 %v17123_v48, %v17122_v20  ;;  %v17052_v20 = vmul.f32 %v28160_v40, %v28160_v40  ;;  %v17087_v42 = vmul.f32 %v17051_v14, %v29118_v33  ;;  %v17137_v1 = vsel %vm825_vm0, %v17086_v43, 0.0  ;;  %v29121_v14 = vld [vmem:[#allocation25_spill] sm:$0xff] }
 0xded   : > { %v17126_v24 = vadd.f32 %v17125_v25, %v17124_v35  ;;  %v17053_v35 = vmul.f32 %v28163_v49, %v28163_v49  ;;  %v17088_v30 = vmul.f32 %v17052_v20, %v29119_v59  ;;  %v17139_v53 = vsel %vm825_vm0, %v17087_v42, 0.0  ;;  %v29122_v20 = vld [vmem:[#allocation26_spill] sm:$0xff] }
 0xdef   : > { %v17128_v38 = vadd.f32 %v17127_v22, %v17126_v24  ;;  %v17054_v24 = vmul.f32 %v28166_v62, %v28166_v62  ;;  %v17089_v27 = vmul.f32 %v17053_v35, %v29120_v56  ;;  %v17141_v51 = vsel %vm825_vm0, %v17088_v30, 0.0  ;;  %v29123_v35 = vld [vmem:[#allocation27_spill] sm:$0xff] }
 0xdf1   : > { %v17130_v9 = vadd.f32 %v17129_v15, %v17128_v38  ;;  %v17055_v38 = vmul.f32 %v28169_v10, %v28169_v10  ;;  %v17090_v47 = vmul.f32 %v17054_v24, %v29121_v14  ;;  %v17143_v43 = vsel %vm825_vm0, %v17089_v27, 0.0  ;;  %v29124_v24 = vld [vmem:[#allocation28_spill] sm:$0xff] }
 0xdf3   : > { %v17132_v5 = vadd.f32 %v17131_v19, %v17130_v9  ;;  %v17056_v9 = vmul.f32 %v28172_v21, %v28172_v21  ;;  %v17091_v55 = vmul.f32 %v17055_v38, %v29122_v20  ;;  %v17145_v42 = vsel %vm825_vm0, %v17090_v47, 0.0  ;;  %v29125_v38 = vld [vmem:[#allocation29_spill] sm:$0xff] }
 0xdf5   : > { %v17134_v48 = vadd.f32 %v17133_v31, %v17132_v5  ;;  %v17057_v5 = vmul.f32 %v28175_v2, %v28175_v2  ;;  %v17092_v33 = vmul.f32 %v17056_v9, %v29123_v35  ;;  %v17147_v30 = vsel %vm825_vm0, %v17091_v55, 0.0  ;;  %v29126_v9 = vld [vmem:[#allocation30_spill] sm:$0xff] }
 0xdf7   : > { %v17136_v25 = vadd.f32 %v17135_v37, %v17134_v48  ;;  %v17058_v48 = vmul.f32 %v28178_v6, %v28178_v6  ;;  %v17093_v59 = vmul.f32 %v17057_v5, %v29124_v24  ;;  %v17149_v27 = vsel %vm825_vm0, %v17092_v33, 0.0  ;;  %v29127_v5 = vld [vmem:[#allocation31_spill] sm:$0xff] }
 0xdf9   : > { %v17138_v22 = vadd.f32 %v17137_v1, %v17136_v25  ;;  %v17059_v25 = vmul.f32 %v28181_v0, %v28181_v0  ;;  %v17094_v56 = vmul.f32 %v17058_v48, %v29125_v38  ;;  %v17151_v47 = vsel %vm825_vm0, %v17093_v59, 0.0  ;;  %v29128_v48 = vld [vmem:[#allocation32_spill] sm:$0xff] }
 0xdfb   : > { %v17140_v15 = vadd.f32 %v17139_v53, %v17138_v22  ;;  %v17060_v22 = vmul.f32 %v28184_v7, %v28184_v7  ;;  %v17095_v14 = vmul.f32 %v17059_v25, %v29126_v9  ;;  %v17153_v55 = vsel %vm825_vm0, %v17094_v56, 0.0  ;;  %v29129_v25 = vld [vmem:[#allocation33_spill] sm:$0xff] }
 0xdfd   : > { %v17142_v19 = vadd.f32 %v17141_v51, %v17140_v15  ;;  %v17061_v15 = vmul.f32 %v28187_v60, %v28187_v60  ;;  %v17096_v20 = vmul.f32 %v17060_v22, %v29127_v5  ;;  %v17155_v33 = vsel %vm825_vm0, %v17095_v14, 0.0  ;;  %v29130_v22 = vld [vmem:[#allocation34_spill] sm:$0xff] }
 0xdff   : > { %v17144_v31 = vadd.f32 %v17143_v43, %v17142_v19  ;;  %v17062_v19 = vmul.f32 %v28190_v3, %v28190_v3  ;;  %v17097_v35 = vmul.f32 %v17061_v15, %v29128_v48  ;;  %v17157_v59 = vsel %vm825_vm0, %v17096_v20, 0.0  ;;  %v29131_v15 = vld [vmem:[#allocation35_spill] sm:$0xff] }
 0xe01   : > { %v17146_v37 = vadd.f32 %v17145_v42, %v17144_v31  ;;  %v17063_v31 = vmul.f32 %v28193_v54, %v28193_v54  ;;  %v17098_v24 = vmul.f32 %v17062_v19, %v29129_v25  ;;  %v17159_v56 = vsel %vm825_vm0, %v17097_v35, 0.0  ;;  %v29132_v19 = vld [vmem:[#allocation36_spill] sm:$0xff] }
 0xe03   : > { %v17148_v1 = vadd.f32 %v17147_v30, %v17146_v37  ;;  %v17064_v37 = vmul.f32 %v28196_v23, %v28196_v23  ;;  %v17099_v38 = vmul.f32 %v17063_v31, %v29130_v22  ;;  %v17161_v14 = vsel %vm825_vm0, %v17098_v24, 0.0  ;;  %v29133_v31 = vld [vmem:[#allocation37_spill] sm:$0xff] }
 0xe05   : > { %v17150_v53 = vadd.f32 %v17149_v27, %v17148_v1  ;;  %v17065_v1 = vmul.f32 %v28199_v58, %v28199_v58  ;;  %v17100_v9 = vmul.f32 %v17064_v37, %v29131_v15  ;;  %v17163_v20 = vsel %vm825_vm0, %v17099_v38, 0.0 }
 0xe07   : > { %v17152_v51 = vadd.f32 %v17151_v47, %v17150_v53  ;;  %v17066_v53 = vmul.f32 %v28201_v29, %v28201_v29  ;;  %v17101_v5 = vmul.f32 %v17065_v1, %v29132_v19  ;;  %v17165_v35 = vsel %vm825_vm0, %v17100_v9, 0.0 }
 0xe09   : > { %v17154_v43 = vadd.f32 %v17153_v55, %v17152_v51  ;;  %v17067_v51 = vmul.f32 %v28203_v32, %v28203_v32  ;;  %v17102_v48 = vmul.f32 %v17066_v53, %v29133_v31  ;;  %v17167_v25 = vsel %vm825_vm0, %v17101_v5, 0.0 }
 0xe0b   : > { %v17156_v42 = vadd.f32 %v17155_v33, %v17154_v43  ;;  %v17068_v43 = vmul.f32 %v28205_v36, %v28205_v36  ;;  %v17103_v37 = vmul.f32 %v17067_v51, %v29106_v11  ;;  %v17169_v1 = vsel %vm825_vm0, %v17102_v48, 0.0 }
 0xe0d   : > { %v17158_v30 = vadd.f32 %v17157_v59, %v17156_v42  ;;  %v17069_v42 = vmul.f32 %v28207_v28, %v28207_v28  ;;  %v29134_v59 = vld [vmem:[#allocation39_spill] sm:$0xff] }
 0xe0f   : > { %v17160_v27 = vadd.f32 %v17159_v56, %v17158_v30  ;;  %v17104_v30 = vmul.f32 %v17068_v43, %v29134_v59  ;;  %v17105_v38 = vmul.f32 %v17069_v42, %v29107_v44  ;;  %v17171_v56 = vsel %vm825_vm0, %v17103_v37, 0.0 }
 0xe11   : > { %v17162_v47 = vadd.f32 %v17161_v14, %v17160_v27  ;;  %v17173_v53 = vsel %vm825_vm0, %v17104_v30, 0.0  ;;  %v17175_v9 = vsel %vm825_vm0, %v17105_v38, 0.0 }
 0xe13   : > { %v17164_v55 = vadd.f32 %v17163_v20, %v17162_v47 }
 0xe15   : > { %v17166_v33 = vadd.f32 %v17165_v35, %v17164_v55 }
 0xe17   : > { %v17168_v24 = vadd.f32 %v17167_v25, %v17166_v33 }
 0xe19   : > { %v17170_v22 = vadd.f32 %v17169_v1, %v17168_v24 }
 0xe1b   : > { %v17172_v27 = vadd.f32 %v17171_v56, %v17170_v22 }
 0xe1d   : > { %v17174_v15 = vadd.f32 %v17173_v53, %v17172_v27 }
 0xe1f   : > { %v17176_v14 = vadd.f32 %v17175_v9, %v17174_v15 }
 0xe21   : > { %v17177_v11 = vrot.slane %v17176_v14, 4 }
 0xe23   : > { %v17178_v47 = vadd.f32 %v17177_v11, %v17176_v14 }
 0xe25   : > { %v17179_v51 = vrot.slane %v17178_v47, 2 }
 0xe27   : > { %v17180_v19 = vadd.f32 %v17179_v51, %v17178_v47 }
 0xe29   : > { %v17181_v5 = vrot.slane %v17180_v19, 1 }
 0xe2b   : > { %v17182_v20 = vadd.f32 %v17181_v5, %v17180_v19 }
 0xe2d   : > { %v17183_v55 = vmul.f32 0.00390625, %v17182_v20 }
 0xe2f   : > { %v17184_v43 = vadd.f32 1e-05, %v17183_v55 }
 0xe31   : > { %22610 = vrsqrt.f32 %v17184_v43 }
 0xe3b   : > { %v22611_v31 = vpop.eup %22610 }
 0xe3c   : > { %v17186_v44 = vmul.f32 %v22611_v31, %v28106_v61  ;;  %v17187_v48 = vmul.f32 %v22611_v31, %v28109_v8  ;;  %v17188_v35 = vmul.f32 %v22611_v31, %v28112_v17  ;;  %v17189_v33 = vmul.f32 %v22611_v31, %v28115_v16 }
 0xe3d   : > { %v17190_v42 = vmul.f32 %v22611_v31, %v28118_v41  ;;  %v17191_v37 = vmul.f32 %v22611_v31, %v28121_v52  ;;  %v17192_v25 = vmul.f32 %v22611_v31, %v28124_v26  ;;  %v17193_v24 = vmul.f32 %v22611_v31, %v28127_v12 }
 0xe3e   : > { %v17194_v59 = vmul.f32 %v22611_v31, %v28130_v34  ;;  %v17195_v30 = vmul.f32 %v22611_v31, %v28133_v50  ;;  %v17196_v61 = vmul.f32 %v22611_v31, %v28136_v57  ;;  %v17197_v8 = vmul.f32 %v22611_v31, %v28139_v63 }
 0xe3f   : > { %v17198_v17 = vmul.f32 %v22611_v31, %v28142_v45  ;;  %v17199_v16 = vmul.f32 %v22611_v31, %v28145_v4  ;;  %v17200_v41 = vmul.f32 %v22611_v31, %v28148_v46  ;;  %v17201_v52 = vmul.f32 %v22611_v31, %v28151_v39 }
 0xe40   : > { %v17202_v26 = vmul.f32 %v22611_v31, %v28154_v13  ;;  %v17203_v12 = vmul.f32 %v22611_v31, %v28157_v18  ;;  %v17204_v34 = vmul.f32 %v22611_v31, %v28160_v40  ;;  %v17205_v50 = vmul.f32 %v22611_v31, %v28163_v49 }
 0xe41   : > { %v17206_v57 = vmul.f32 %v22611_v31, %v28166_v62  ;;  %v17207_v63 = vmul.f32 %v22611_v31, %v28169_v10  ;;  %v17208_v45 = vmul.f32 %v22611_v31, %v28172_v21  ;;  %v17209_v4 = vmul.f32 %v22611_v31, %v28175_v2 }
 0xe42   : > { %v17210_v46 = vmul.f32 %v22611_v31, %v28178_v6  ;;  %v17211_v39 = vmul.f32 %v22611_v31, %v28181_v0  ;;  %v17212_v13 = vmul.f32 %v22611_v31, %v28184_v7  ;;  %v17213_v18 = vmul.f32 %v22611_v31, %v28187_v60  ;;  %v22642_v7 = vld [vmem:[%s28555_s7] ss:$0 sm:$0xff] }
 0xe43   : > { %v17214_v40 = vmul.f32 %v22611_v31, %v28190_v3  ;;  %v17215_v49 = vmul.f32 %v22611_v31, %v28193_v54  ;;  %v17216_v62 = vmul.f32 %v22611_v31, %v28196_v23  ;;  %v17217_v10 = vmul.f32 %v22611_v31, %v28199_v58 }
 0xe44   : > { %v17218_v21 = vmul.f32 %v22611_v31, %v28201_v29  ;;  %v17219_v2 = vmul.f32 %v22611_v31, %v28203_v32  ;;  %v17220_v6 = vmul.f32 %v22611_v31, %v28205_v36  ;;  %v17221_v0 = vmul.f32 %v22611_v31, %v28207_v28 }
 0xe45   : > { %v17222_v60 = vmul.f32 %v22642_v7, %v17186_v44  ;;  %v17223_v3 = vmul.f32 %v22642_v7, %v17187_v48  ;;  %v17224_v1 = vmul.f32 %v22642_v7, %v17188_v35  ;;  %v17225_v54 = vmul.f32 %v22642_v7, %v17189_v33 }
 0xe46   : > { %v17226_v22 = vmul.f32 %v22642_v7, %v17190_v42  ;;  %v17227_v23 = vmul.f32 %v22642_v7, %v17191_v37  ;;  %v17228_v38 = vmul.f32 %v22642_v7, %v17192_v25  ;;  %v17229_v58 = vmul.f32 %v22642_v7, %v17193_v24 }
 0xe47   : > { %v17230_v56 = vmul.f32 %v22642_v7, %v17194_v59  ;;  %v17231_v29 = vmul.f32 %v22642_v7, %v17195_v30  ;;  %v17232_v27 = vmul.f32 %v22642_v7, %v17196_v61  ;;  %v17233_v32 = vmul.f32 %v22642_v7, %v17197_v8  ;;  %v22643_v30 = vld [vmem:[%s28556_s8] ss:$0 sm:$0xff] }
 0xe48   : > { %v17234_v53 = vmul.f32 %v22642_v7, %v17198_v17  ;;  %v17235_v36 = vmul.f32 %v22642_v7, %v17199_v16  ;;  %v17236_v15 = vmul.f32 %v22642_v7, %v17200_v41  ;;  %v17237_v28 = vmul.f32 %v22642_v7, %v17201_v52 }
 0xe49   : > { %v17238_v9 = vmul.f32 %v22642_v7, %v17202_v26  ;;  %v17239_v14 = vmul.f32 %v22642_v7, %v17203_v12  ;;  %v17240_v11 = vmul.f32 %v22642_v7, %v17204_v34  ;;  %v17241_v47 = vmul.f32 %v22642_v7, %v17205_v50 }
 0xe4a   : > { %v17242_v51 = vmul.f32 %v22642_v7, %v17206_v57  ;;  %v17243_v19 = vmul.f32 %v22642_v7, %v17207_v63  ;;  %v17244_v5 = vmul.f32 %v22642_v7, %v17208_v45  ;;  %v17245_v20 = vmul.f32 %v22642_v7, %v17209_v4 }
 0xe4b   : > { %v17246_v55 = vmul.f32 %v22642_v7, %v17210_v46  ;;  %v17247_v43 = vmul.f32 %v22642_v7, %v17211_v39  ;;  %v17248_v31 = vmul.f32 %v22642_v7, %v17212_v13  ;;  %v17249_v44 = vmul.f32 %v22642_v7, %v17213_v18 }
 0xe4c   : > { %v17250_v48 = vmul.f32 %v22642_v7, %v17214_v40  ;;  %v17251_v35 = vmul.f32 %v22642_v7, %v17215_v49  ;;  %v17252_v33 = vmul.f32 %v22642_v7, %v17216_v62  ;;  %v17253_v42 = vmul.f32 %v22642_v7, %v17217_v10 }
 0xe4d   : > { %v17254_v37 = vmul.f32 %v22642_v7, %v17218_v21  ;;  %v17255_v25 = vmul.f32 %v22642_v7, %v17219_v2  ;;  %v17256_v24 = vmul.f32 %v22642_v7, %v17220_v6  ;;  %v17257_v59 = vmul.f32 %v22642_v7, %v17221_v0 }
 0xe4e   : > { %v17258_v61 = vadd.f32 %v22643_v30, %v17222_v60  ;;  %v17259_v8 = vadd.f32 %v22643_v30, %v17223_v3  ;;  %v17260_v17 = vadd.f32 %v22643_v30, %v17224_v1  ;;  %v17261_v16 = vadd.f32 %v22643_v30, %v17225_v54 }
 0xe4f   : > { %v17262_v41 = vadd.f32 %v22643_v30, %v17226_v22  ;;  %v17263_v52 = vadd.f32 %v22643_v30, %v17227_v23  ;;  %v17264_v26 = vadd.f32 %v22643_v30, %v17228_v38  ;;  %v17265_v12 = vadd.f32 %v22643_v30, %v17229_v58 }
 0xe50   : > { %v17266_v34 = vadd.f32 %v22643_v30, %v17230_v56  ;;  %v17267_v50 = vadd.f32 %v22643_v30, %v17231_v29  ;;  %v17268_v57 = vadd.f32 %v22643_v30, %v17232_v27  ;;  %v17269_v63 = vadd.f32 %v22643_v30, %v17233_v32 }
 0xe51   : > { %v28395_v45 = vadd.f32 %v22643_v30, %v17234_v53  ;;  %v28397_v4 = vadd.f32 %v22643_v30, %v17235_v36  ;;  %v28399_v46 = vadd.f32 %v22643_v30, %v17236_v15  ;;  %v28401_v39 = vadd.f32 %v22643_v30, %v17237_v28 }
 0xe52   : > { %v28404_v13 = vadd.f32 %v22643_v30, %v17238_v9  ;;  %v28406_v18 = vadd.f32 %v22643_v30, %v17239_v14  ;;  %v28408_v40 = vadd.f32 %v22643_v30, %v17240_v11  ;;  %v28410_v49 = vadd.f32 %v22643_v30, %v17241_v47 }
 0xe53   : > { %v28412_v62 = vadd.f32 %v22643_v30, %v17242_v51  ;;  %v28414_v10 = vadd.f32 %v22643_v30, %v17243_v19  ;;  %v28416_v21 = vadd.f32 %v22643_v30, %v17244_v5  ;;  %v28418_v2 = vadd.f32 %v22643_v30, %v17245_v20 }
 0xe54   : > { %v28420_v6 = vadd.f32 %v22643_v30, %v17246_v55  ;;  %v28422_v0 = vadd.f32 %v22643_v30, %v17247_v43  ;;  %v28424_v7 = vadd.f32 %v22643_v30, %v17248_v31  ;;  %v28426_v60 = vadd.f32 %v22643_v30, %v17249_v44 }
 0xe55   : > { %v28428_v3 = vadd.f32 %v22643_v30, %v17250_v48  ;;  %v28430_v1 = vadd.f32 %v22643_v30, %v17251_v35  ;;  %v28432_v54 = vadd.f32 %v22643_v30, %v17252_v33  ;;  %v28434_v22 = vadd.f32 %v22643_v30, %v17253_v42 }
 0xe56   : > { %v28441_v23 = vadd.f32 %v22643_v30, %v17254_v37  ;;  %v28443_v38 = vadd.f32 %v22643_v30, %v17255_v25  ;;  %v28445_v58 = vadd.f32 %v22643_v30, %v17256_v24  ;;  %v28447_v56 = vadd.f32 %v22643_v30, %v17257_v59 }
 0xe57   : > { %v17294_v29 = vmax.f32 %v17258_v61, 0.0  ;;  %v17295_v27 = vmax.f32 %v17259_v8, 0.0  ;;  %v17296_v32 = vmax.f32 %v17260_v17, 0.0  ;;  %v17297_v53 = vmax.f32 %v17261_v16, 0.0 }
 0xe58   : > { %v17298_v36 = vmax.f32 %v17262_v41, 0.0  ;;  %v17299_v15 = vmax.f32 %v17263_v52, 0.0  ;;  %v17300_v28 = vmax.f32 %v17264_v26, 0.0  ;;  %v17301_v9 = vmax.f32 %v17265_v12, 0.0 }
 0xe59   : > { %v17302_v14 = vmax.f32 %v17266_v34, 0.0  ;;  %v17303_v11 = vmax.f32 %v17267_v50, 0.0  ;;  %v17304_v47 = vmax.f32 %v17268_v57, 0.0  ;;  %v17305_v51 = vmax.f32 %v17269_v63, 0.0  ;;  %17330 = vst.msk [vmem:[%s28439_s20] sm:$0xff] %vm825_vm0, %v17294_v29  ;;  %17331 = vst.msk [vmem:[%s28439_s20 + $0x8] sm:$0xff] %vm825_vm0, %v17295_v27 }
 0xe5a   : > { %17332 = vst.msk [vmem:[%s28439_s20 + $0x10] sm:$0xff] %vm825_vm0, %v17296_v32  ;;  %17333 = vst.msk [vmem:[%s28439_s20 + $0x18] sm:$0xff] %vm825_vm0, %v17297_v53  ;;  %v17306_v19 = vmax.f32 %v28395_v45, 0.0  ;;  %v17307_v5 = vmax.f32 %v28397_v4, 0.0  ;;  %v17308_v20 = vmax.f32 %v28399_v46, 0.0  ;;  %v17309_v55 = vmax.f32 %v28401_v39, 0.0 }
 0xe5b   : > { %17334 = vst.msk [vmem:[%s28439_s20 + $0x20] sm:$0xff] %vm825_vm0, %v17298_v36  ;;  %17335 = vst.msk [vmem:[%s28439_s20 + $0x28] sm:$0xff] %vm825_vm0, %v17299_v15  ;;  %v17310_v43 = vmax.f32 %v28404_v13, 0.0  ;;  %v17311_v31 = vmax.f32 %v28406_v18, 0.0  ;;  %v17312_v44 = vmax.f32 %v28408_v40, 0.0  ;;  %v17313_v48 = vmax.f32 %v28410_v49, 0.0 }
 0xe5c   : > { %17336 = vst.msk [vmem:[%s28439_s20 + $0x30] sm:$0xff] %vm825_vm0, %v17300_v28  ;;  %17337 = vst.msk [vmem:[%s28439_s20 + $0x38] sm:$0xff] %vm825_vm0, %v17301_v9  ;;  %v17314_v35 = vmax.f32 %v28412_v62, 0.0  ;;  %v17315_v33 = vmax.f32 %v28414_v10, 0.0  ;;  %v17316_v42 = vmax.f32 %v28416_v21, 0.0  ;;  %v17317_v37 = vmax.f32 %v28418_v2, 0.0 }
 0xe5d   : > { %17338 = vst.msk [vmem:[%s28439_s20 + $0x40] sm:$0xff] %vm825_vm0, %v17302_v14  ;;  %17339 = vst.msk [vmem:[%s28439_s20 + $0x48] sm:$0xff] %vm825_vm0, %v17303_v11  ;;  %v17318_v25 = vmax.f32 %v28420_v6, 0.0  ;;  %v17319_v24 = vmax.f32 %v28422_v0, 0.0  ;;  %v17320_v59 = vmax.f32 %v28424_v7, 0.0  ;;  %v17321_v30 = vmax.f32 %v28426_v60, 0.0 }
 0xe5e   : > { %17340 = vst.msk [vmem:[%s28439_s20 + $0x50] sm:$0xff] %vm825_vm0, %v17304_v47  ;;  %17341 = vst.msk [vmem:[%s28439_s20 + $0x58] sm:$0xff] %vm825_vm0, %v17305_v51  ;;  %v17322_v61 = vmax.f32 %v28428_v3, 0.0  ;;  %v17323_v8 = vmax.f32 %v28430_v1, 0.0  ;;  %v17324_v17 = vmax.f32 %v28432_v54, 0.0  ;;  %v17325_v16 = vmax.f32 %v28434_v22, 0.0 }
 0xe5f   : > { %17342 = vst.msk [vmem:[%s28439_s20 + $0x60] sm:$0xff] %vm825_vm0, %v17306_v19  ;;  %17343 = vst.msk [vmem:[%s28439_s20 + $0x68] sm:$0xff] %vm825_vm0, %v17307_v5  ;;  %v17326_v41 = vmax.f32 %v28441_v23, 0.0  ;;  %v17327_v52 = vmax.f32 %v28443_v38, 0.0  ;;  %v17328_v26 = vmax.f32 %v28445_v58, 0.0  ;;  %v17329_v12 = vmax.f32 %v28447_v56, 0.0 }
 0xe60   : > { %17344 = vst.msk [vmem:[%s28439_s20 + $0x70] sm:$0xff] %vm825_vm0, %v17308_v20  ;;  %17345 = vst.msk [vmem:[%s28439_s20 + $0x78] sm:$0xff] %vm825_vm0, %v17309_v55 }
 0xe61   : > { %17346 = vst.msk [vmem:[%s28439_s20 + $0x80] sm:$0xff] %vm825_vm0, %v17310_v43  ;;  %17347 = vst.msk [vmem:[%s28439_s20 + $0x88] sm:$0xff] %vm825_vm0, %v17311_v31 }
 0xe62   : > { %17348 = vst.msk [vmem:[%s28439_s20 + $0x90] sm:$0xff] %vm825_vm0, %v17312_v44  ;;  %17349 = vst.msk [vmem:[%s28439_s20 + $0x98] sm:$0xff] %vm825_vm0, %v17313_v48 }
 0xe63   : > { %17350 = vst.msk [vmem:[%s28439_s20 + $0xa0] sm:$0xff] %vm825_vm0, %v17314_v35  ;;  %17351 = vst.msk [vmem:[%s28439_s20 + $0xa8] sm:$0xff] %vm825_vm0, %v17315_v33 }
 0xe64   : > { %17352 = vst.msk [vmem:[%s28439_s20 + $0xb0] sm:$0xff] %vm825_vm0, %v17316_v42  ;;  %17353 = vst.msk [vmem:[%s28439_s20 + $0xb8] sm:$0xff] %vm825_vm0, %v17317_v37 }
 0xe65   : > { %17354 = vst.msk [vmem:[%s28439_s20 + $0xc0] sm:$0xff] %vm825_vm0, %v17318_v25  ;;  %17355 = vst.msk [vmem:[%s28439_s20 + $0xc8] sm:$0xff] %vm825_vm0, %v17319_v24 }
 0xe66   : > { %17356 = vst.msk [vmem:[%s28439_s20 + $0xd0] sm:$0xff] %vm825_vm0, %v17320_v59  ;;  %17357 = vst.msk [vmem:[%s28439_s20 + $0xd8] sm:$0xff] %vm825_vm0, %v17321_v30 }
 0xe67   : > { %17358 = vst.msk [vmem:[%s28439_s20 + $0xe0] sm:$0xff] %vm825_vm0, %v17322_v61  ;;  %17359 = vst.msk [vmem:[%s28439_s20 + $0xe8] sm:$0xff] %vm825_vm0, %v17323_v8 }
 0xe68   : > { %17360 = vst.msk [vmem:[%s28439_s20 + $0xf0] sm:$0xff] %vm825_vm0, %v17324_v17  ;;  %17361 = vst.msk [vmem:[%s28439_s20 + $0xf8] sm:$0xff] %vm825_vm0, %v17325_v16 }
 0xe69   : > { %17362 = vst.msk [vmem:[%s28439_s20 + $0x100] sm:$0xff] %vm825_vm0, %v17326_v41  ;;  %17363 = vst.msk [vmem:[%s28439_s20 + $0x108] sm:$0xff] %vm825_vm0, %v17327_v52 }
 0xe6a   : > { %17364 = vst.msk [vmem:[%s28439_s20 + $0x110] sm:$0xff] %vm825_vm0, %v17328_v26  ;;  %17365 = vst.msk [vmem:[%s28439_s20 + $0x118] sm:$0xff] %vm825_vm0, %v17329_v12 }
 0xe6b PF: > { %s20_s13 = sadd.s32 1, %s22650_s13  }
 0xe6c   : > { %p17_p4 = scmp.ge.s32.totalorder %s20_s13, 4  }
 0xe6e   :  { %19 = sbr.rel (!%p17_p4) target bundleno = 1 (0x1), region = 125 }

</bundles_post_ra>
